<compile_context>
chip_gen: v7x
topology: tpu7x:2x2x1
jax: 0.10.0
libtpu: 0.0.40
codegen_flags: <defaults>
</compile_context>

<pallas_src>
import jax
import jax.numpy as jnp
from jax import lax
from jax.experimental import pallas as pl
from jax.experimental.pallas import tpu as pltpu

# ----------------------- small synthetic config (Human) ----------------------
B = 2                               # batch
BONE_DIM = 2
INPUT_SIZE = 16                     # config.input_size
HIDDEN_SIZE = 16                    # config.hidden_size
NBONES = INPUT_SIZE // BONE_DIM     # 8
H = NBONES * HIDDEN_SIZE            # int(input_size / bone_dim * hidden_size) = 128
SEQ_OUT = 4                         # config.output_window_size
T_IN = 3                            # input_window_size - 1
CHAIN_LEN = [4, 3, 3, 3, 3]         # config.training_chain_length (sums to input_size)
CHAIN_OFF = [0, 4, 7, 10, 13]       # config.index[c] == [off, off+len) (contiguous)
ORDER = [2, 0, 1, 3, 4]             # Human ordering in the reference code
# NOTE: the PyTorch source has `elif i == (3 or 4 or 5)` which evaluates to
# `i == 3`; we reproduce that exact behaviour.
SRC = {1: 0, 2: 1, 3: 1, 4: 3, 5: 4}       # which h feeds layer i this frame
CELL_IDX = {1: 0, 2: 1, 3: 1, 4: 2, 5: 2}  # spine / arm(shared) / leg(shared)


# --------------------------------- kernel ------------------------------------
def kinematics_decoder_kernel(
        hs_ref, cs_ref, gts_ref, p_ref,
        w0_ref, b0_ref, wr_ref, br_ref, wc_ref, bc_ref,
        out_ref):
    """Single invocation (no grid): runs the full SEQ_OUT x 6-cell recurrence.

    All recurrent state lives in vregs (SSA carried through the unrolled loop):
      h*_bf  : [B, H]  bf16  per-layer hidden state (MXU-operand copy)
      c*     : [B, H]  f32   per-layer cell state
      x_prev : [B, H]  f32   previous frame's prediction, lanes INPUT_SIZE.. == 0
    """
    f32 = jnp.float32
    bf16 = jnp.bfloat16

    def lstm_cell(x_bf, h_prev_bf, c_prev, w_bf, b_bcast):
        # one fused [x | h_prev] @ [Wih ; Whh] gate matmul: bf16 in, f32 accumulate
        xc = jnp.concatenate([x_bf, h_prev_bf], axis=1)
        gates = jnp.dot(xc, w_bf, preferred_element_type=f32) + b_bcast
        # gate order (i, f, o, g): one contiguous sigmoid slice + one tanh slice
        sg = jax.nn.sigmoid(gates[:, :3 * H])
        g_g = jnp.tanh(gates[:, 3 * H:])
        c_new = sg[:, H:2 * H] * c_prev + sg[:, :H] * g_g
        h_new = sg[:, 2 * H:3 * H] * jnp.tanh(c_new)
        # single bf16 cast at production; every consumer reuses this copy
        return h_new.astype(bf16), c_new

    # ---- state initialization (mirrors the python pre-loop) ----
    hs_sum = jnp.sum(hs_ref[...], axis=1)                 # [B, H]
    cs_mean = jnp.mean(cs_ref[...], axis=1)               # [B, H]
    h0_bf = (hs_sum * (1.0 / T_IN)).astype(bf16)
    h1_bf = ((gts_ref[...] + hs_sum) * (1.0 / (T_IN + 1))).astype(bf16)
    c0 = cs_mean
    c1 = cs_mean
    h23_bf = jnp.zeros((2 * B, H), bf16)      # layers 2 & 3, batch-stacked
    c23 = jnp.zeros((2 * B, H), f32)
    h4_bf = jnp.zeros((B, H), bf16)
    h5_bf = jnp.zeros((B, H), bf16)
    c4 = jnp.zeros((B, H), f32)
    c5 = jnp.zeros((B, H), f32)
    x_prev = p_ref[...]                        # lane-padded; lanes 16.. are zero

    # biases: read + broadcast ONCE (broadcast_in_dim is not CSE'd per iteration)
    b0_b = jnp.broadcast_to(b0_ref[...], (B, 4 * H))
    b_sp_b = jnp.broadcast_to(br_ref[0], (B, 4 * H))
    b_arm_b = jnp.broadcast_to(br_ref[1], (2 * B, 4 * H))
    b_leg_b = jnp.broadcast_to(br_ref[2], (B, 4 * H))
    bc_b = jnp.broadcast_to(bc_ref[...], (B, H))

    # SEQ_OUT is small and static -> full unroll; all indices are static.
    for frame in range(SEQ_OUT):
        x_bf = x_prev.astype(bf16)                        # pads stay zero

        # layer 0 (driven by previous prediction / p)
        h0_bf, c0 = lstm_cell(x_bf, h0_bf, c0, w0_ref[...], b0_b)

        # layer 1 -- spine, fed by layer 0
        h1_bf, c1 = lstm_cell(h0_bf, h1_bf, c1, wr_ref[0], b_sp_b)

        # layers 2 & 3 -- same 'arm' cell AND same input (h1): batch-stack and
        # run one [2B, 2H] x [2H, 4H] matmul, then split.
        x23 = jnp.concatenate([h1_bf, h1_bf], axis=0)     # [2B, H]
        h23_bf, c23 = lstm_cell(x23, h23_bf, c23, wr_ref[1], b_arm_b)
        h2_bf = h23_bf[:B]
        h3_bf = h23_bf[B:]

        # layers 4 & 5 -- shared 'leg' cell; weight read once per frame and
        # reused by both dots (layer 4 input is h3: exact `i == (3 or 4 or 5)`
        # semantics).  Explicit MXU RHS staging skipped (v5e caveat).
        w_leg = wr_ref[2]
        h4_bf, c4 = lstm_cell(h3_bf, h4_bf, c4, w_leg, b_leg_b)
        h5_bf, c5 = lstm_cell(h4_bf, h5_bf, c5, w_leg, b_leg_b)

        # all 5 kinematic-chain projections in ONE lane-padded bf16 matmul;
        # wc zeroes the (layer, chain) pairs that don't interact and the padded
        # columns, so pre_new lanes 16.. stay exactly zero for the next frame.
        h_cat = jnp.concatenate([h1_bf, h2_bf, h3_bf, h4_bf, h5_bf], axis=1)
        pre_new = (jnp.dot(h_cat, wc_ref[...], preferred_element_type=f32)
                   + bc_b + x_prev)                       # [B, H] f32
        out_ref[frame] = pre_new                          # full-128-lane store
        x_prev = pre_new                                  # feeds next frame


# --------------------------------- wrapper -----------------------------------
def _reorder_gates(w):
    """(i, f, g, o) PyTorch gate order -> (i, f, o, g) along the last 4H axis."""
    return jnp.concatenate([w[..., :2 * H], w[..., 3 * H:], w[..., 2 * H:3 * H]],
                           axis=-1)


@jax.jit
def kinematics_lstm_decoder(hidden_states, cell_states, global_t_state, p2d,
                            wih0, whh0, b0, wih_r, whh_r, b_r, wchain, bchain):
    # ---- wrapper-side layout plumbing (fused by XLA, outside the kernel) ----
    # layer 0: pad Wih to H rows so [x_pad | h] is a 128-lane-aligned concat,
    # then fuse [Wih ; Whh] -> [2H, 4H]
    wih0_pad = jnp.zeros((H, 4 * H), jnp.float32).at[:INPUT_SIZE].set(wih0)
    w0 = jnp.concatenate([wih0_pad, whh0], axis=0)            # [2H, 4H]
    wr = jnp.concatenate([wih_r, whh_r], axis=1)              # [3, 2H, 4H]
    # gate reorder to (i, f, o, g) + bf16 MXU operands (f32 accumulation)
    w0 = _reorder_gates(w0).astype(jnp.bfloat16)
    wr = _reorder_gates(wr).astype(jnp.bfloat16)
    b0r = _reorder_gates(b0)                                  # [1, 4H]  f32
    brr = _reorder_gates(b_r)                                 # [3, 1, 4H] f32
    # pack the 5 chain projections into ONE block-structured, lane-padded
    # [5H, 128] bf16 matrix: row block l belongs to LSTM layer l+1 and is
    # nonzero only on the columns of chain ORDER[l]; columns 16.. are zero.
    wc = jnp.zeros((5 * H, H), jnp.float32)
    for l in range(5):
        ch = ORDER[l]
        off, ln = CHAIN_OFF[ch], CHAIN_LEN[ch]
        wc = wc.at[l * H:(l + 1) * H, off:off + ln].set(wchain[:, off:off + ln])
    wc = wc.astype(jnp.bfloat16)
    bc = jnp.zeros((1, H), jnp.float32).at[:, :INPUT_SIZE].set(bchain)
    # lane-pad the first decoder input to H
    p_pad = jnp.zeros((B, H), jnp.float32).at[:, :INPUT_SIZE].set(p2d)

    args = (hidden_states, cell_states, global_t_state, p_pad,
            w0, b0r, wr, brr, wc, bc)

    vmem_spec = pl.BlockSpec(memory_space=pltpu.MemorySpace.VMEM)
    # frame-major, lane-padded output: lane-dense leading-dim stores in the
    # kernel; transpose + slice back to (B, SEQ_OUT, INPUT_SIZE) here.
    out_shape = jax.ShapeDtypeStruct((SEQ_OUT, B, H), jnp.float32)
    # No grid: one invocation, whole arrays resident in VMEM (~0.8 MiB total),
    # no pipeline prologue/epilogue and no double-buffering of invariant weights.
    # (v7x note: for larger batches add a leading "parallel" batch grid axis so
    #  both TensorCores run independent batch shards; at B=2 one TC running the
    #  serial recurrence is the right shape.  Throughput scales nearly free with
    #  batch -- fold independent sequences into B at the call site when possible.)
    out = pl.pallas_call(
        kinematics_decoder_kernel,
        out_shape=out_shape,
        in_specs=[vmem_spec for _ in args],
        out_specs=vmem_spec,
    )(*args)
    return jnp.transpose(out, (1, 0, 2))[:, :, :INPUT_SIZE]


# ----------------------------- pure-JAX reference ----------------------------
def reference_forward(hidden_states, cell_states, global_t_state, p2d,
                      wih0, whh0, b0, wih_r, whh_r, b_r, wchain, bchain):
    prec = lax.Precision.HIGHEST

    def cell(x, h, c, wih, whh, b):
        g = (jnp.dot(x, wih, precision=prec)
             + jnp.dot(h, whh, precision=prec) + b)
        i = jax.nn.sigmoid(g[:, :H])
        f = jax.nn.sigmoid(g[:, H:2 * H])
        gg = jnp.tanh(g[:, 2 * H:3 * H])
        o = jax.nn.sigmoid(g[:, 3 * H:])
        c2 = f * c + i * gg
        return o * jnp.tanh(c2), c2

    h = [jnp.zeros((B, H), jnp.float32) for _ in range(6)]
    c = [jnp.zeros((B, H), jnp.float32) for _ in range(6)]
    h[0] = hidden_states.mean(axis=1)
    c[0] = cell_states.mean(axis=1)
    h[1] = jnp.concatenate([global_t_state[:, None, :], hidden_states],
                           axis=1).mean(axis=1)
    c[1] = cell_states.mean(axis=1)

    pre = jnp.zeros((B, SEQ_OUT, INPUT_SIZE), jnp.float32)
    for frame in range(SEQ_OUT):
        inp_first = p2d if frame == 0 else pre[:, frame - 1, :]
        h_frame = [None] * 6
        for i in range(6):
            if i == 0:
                hh, cc = cell(inp_first, h[0], c[0], wih0, whh0, b0)
            else:
                ci = CELL_IDX[i]
                hh, cc = cell(h_frame[SRC[i]], h[i], c[i],
                              wih_r[ci], whh_r[ci], b_r[ci])
            h[i], c[i] = hh, cc
            h_frame[i] = hh
            if i != 0:
                chain = ORDER[i - 1]
                off, ln = CHAIN_OFF[chain], CHAIN_LEN[chain]
                val = (jnp.dot(hh, wchain[:, off:off + ln], precision=prec)
                       + bchain[:, off:off + ln]
                       + inp_first[:, off:off + ln])
                pre = pre.at[:, frame, off:off + ln].set(val)
    return pre


# ----------------------------------- main ------------------------------------
if __name__ == "__main__":
    key = jax.random.PRNGKey(0)
    ks = jax.random.split(key, 16)

    def uni(k, shape, a):
        return jax.random.uniform(k, shape, jnp.float32, -a, a)

    # inputs (docstring says p is hidden-sized, but it must feed an
    # LSTMCell(input_size, H) and the residual over input_size dims, so it is
    # input_size-dim in practice)
    hidden_states = jax.random.normal(ks[0], (B, T_IN, H), jnp.float32) * 0.5
    cell_states = jax.random.normal(ks[1], (B, T_IN, H), jnp.float32) * 0.5
    global_t_state = jax.random.normal(ks[2], (B, H), jnp.float32) * 0.5
    p = jax.random.normal(ks[3], (B, 1, INPUT_SIZE), jnp.float32) * 0.5
    p2d = p[:, 0, :]

    # deterministic synthetic parameters (PyTorch gate order i,f,g,o, transposed)
    wih0 = uni(ks[4], (INPUT_SIZE, 4 * H), 0.08)      # lstm[0]
    whh0 = uni(ks[5], (H, 4 * H), 0.08)
    b0 = uni(ks[6], (1, 4 * H), 0.08)
    wih_r = uni(ks[7], (3, H, 4 * H), 0.08)           # [spine, arm, leg]
    whh_r = uni(ks[8], (3, H, 4 * H), 0.08)
    b_r = uni(ks[9], (3, 1, 4 * H), 0.08)
    wchain = uni(ks[10], (H, INPUT_SIZE), 0.04)       # para_list weights packed
    bchain = uni(ks[11], (1, INPUT_SIZE), 0.04)       # para_list biases packed

    pre = kinematics_lstm_decoder(hidden_states, cell_states, global_t_state,
                                  p2d, wih0, whh0, b0, wih_r, whh_r, b_r,
                                  wchain, bchain)
    pre = jax.block_until_ready(pre)

    ref = reference_forward(hidden_states, cell_states, global_t_state, p2d,
                            wih0, whh0, b0, wih_r, whh_r, b_r, wchain, bchain)
    assert pre.shape == (B, SEQ_OUT, INPUT_SIZE)
    assert bool(jnp.all(jnp.isfinite(pre)))
    assert bool(jnp.allclose(pre, ref, rtol=3e-2, atol=3e-2))

    print("KERNEL_OK")
</pallas_src>

<mosaic_0001>
module attributes {stable_mosaic.version = 11 : i64} {
  func.func @kinematics_decoder_kernel(%arg0: memref<2x3x128xf32, #tpu.memory_space<vmem>>, %arg1: memref<2x3x128xf32, #tpu.memory_space<vmem>>, %arg2: memref<2x128xf32, #tpu.memory_space<vmem>>, %arg3: memref<2x128xf32, #tpu.memory_space<vmem>>, %arg4: memref<256x512xbf16, #tpu.memory_space<vmem>>, %arg5: memref<1x512xf32, #tpu.memory_space<vmem>>, %arg6: memref<3x256x512xbf16, #tpu.memory_space<vmem>>, %arg7: memref<3x1x512xf32, #tpu.memory_space<vmem>>, %arg8: memref<640x128xbf16, #tpu.memory_space<vmem>>, %arg9: memref<1x128xf32, #tpu.memory_space<vmem>>, %arg10: memref<4x2x128xf32, #tpu.memory_space<vmem>>) attributes {dimension_semantics = [], scalar_prefetch = 0 : i64, scratch_operands = 0 : i64, tpu.core_type = #tpu.core_type<tc>} {
    %c0 = arith.constant 0 : index
    %c0_0 = arith.constant 0 : index
    %c0_1 = arith.constant 0 : index
    %0 = vector.load %arg0[%c0, %c0_0, %c0_1] : memref<2x3x128xf32, #tpu.memory_space<vmem>>, vector<2x3x128xf32>
    %cst = arith.constant dense<0.000000e+00> : vector<2x128xf32>
    %1 = vector.multi_reduction <add>, %0, %cst [1] : vector<2x3x128xf32> to vector<2x128xf32>
    %c0_2 = arith.constant 0 : index
    %c0_3 = arith.constant 0 : index
    %c0_4 = arith.constant 0 : index
    %2 = vector.load %arg1[%c0_2, %c0_3, %c0_4] : memref<2x3x128xf32, #tpu.memory_space<vmem>>, vector<2x3x128xf32>
    %cst_5 = arith.constant dense<0.000000e+00> : vector<2x128xf32>
    %3 = vector.multi_reduction <add>, %2, %cst_5 [1] : vector<2x3x128xf32> to vector<2x128xf32>
    %cst_6 = arith.constant 3.000000e+00 : f32
    %4 = vector.broadcast %cst_6 : f32 to vector<2x128xf32>
    %5 = arith.divf %3, %4 : vector<2x128xf32>
    %cst_7 = arith.constant 0.333333343 : f32
    %6 = vector.broadcast %cst_7 : f32 to vector<2x128xf32>
    %7 = arith.mulf %1, %6 : vector<2x128xf32>
    %8 = arith.truncf %7 : vector<2x128xf32> to vector<2x128xbf16>
    %c0_8 = arith.constant 0 : index
    %c0_9 = arith.constant 0 : index
    %9 = vector.load %arg2[%c0_8, %c0_9] : memref<2x128xf32, #tpu.memory_space<vmem>>, vector<2x128xf32>
    %10 = arith.addf %9, %1 : vector<2x128xf32>
    %cst_10 = arith.constant 2.500000e-01 : f32
    %11 = vector.broadcast %cst_10 : f32 to vector<2x128xf32>
    %12 = arith.mulf %10, %11 : vector<2x128xf32>
    %13 = arith.truncf %12 : vector<2x128xf32> to vector<2x128xbf16>
    %cst_11 = arith.constant 0.000000e+00 : bf16
    %14 = vector.broadcast %cst_11 : bf16 to vector<4x128xbf16>
    %cst_12 = arith.constant 0.000000e+00 : f32
    %15 = vector.broadcast %cst_12 : f32 to vector<4x128xf32>
    %cst_13 = arith.constant 0.000000e+00 : bf16
    %16 = vector.broadcast %cst_13 : bf16 to vector<2x128xbf16>
    %cst_14 = arith.constant 0.000000e+00 : bf16
    %17 = vector.broadcast %cst_14 : bf16 to vector<2x128xbf16>
    %cst_15 = arith.constant 0.000000e+00 : f32
    %18 = vector.broadcast %cst_15 : f32 to vector<2x128xf32>
    %cst_16 = arith.constant 0.000000e+00 : f32
    %19 = vector.broadcast %cst_16 : f32 to vector<2x128xf32>
    %c0_17 = arith.constant 0 : index
    %c0_18 = arith.constant 0 : index
    %20 = vector.load %arg3[%c0_17, %c0_18] : memref<2x128xf32, #tpu.memory_space<vmem>>, vector<2x128xf32>
    %c0_19 = arith.constant 0 : index
    %c0_20 = arith.constant 0 : index
    %21 = vector.load %arg5[%c0_19, %c0_20] : memref<1x512xf32, #tpu.memory_space<vmem>>, vector<1x512xf32>
    %22 = vector.shape_cast %21 : vector<1x512xf32> to vector<1x512xf32>
    %23 = vector.broadcast %22 : vector<1x512xf32> to vector<2x512xf32>
    %c0_21 = arith.constant 0 : index
    %c0_22 = arith.constant 0 : index
    %c0_23 = arith.constant 0 : index
    %24 = vector.load %arg7[%c0_21, %c0_22, %c0_23] : memref<3x1x512xf32, #tpu.memory_space<vmem>>, vector<1x1x512xf32>
    %25 = vector.shape_cast %24 : vector<1x1x512xf32> to vector<1x512xf32>
    %26 = vector.shape_cast %25 : vector<1x512xf32> to vector<1x512xf32>
    %27 = vector.broadcast %26 : vector<1x512xf32> to vector<2x512xf32>
    %c1 = arith.constant 1 : index
    %c0_24 = arith.constant 0 : index
    %c0_25 = arith.constant 0 : index
    %28 = vector.load %arg7[%c1, %c0_24, %c0_25] : memref<3x1x512xf32, #tpu.memory_space<vmem>>, vector<1x1x512xf32>
    %29 = vector.shape_cast %28 : vector<1x1x512xf32> to vector<1x512xf32>
    %30 = vector.shape_cast %29 : vector<1x512xf32> to vector<1x512xf32>
    %31 = vector.broadcast %30 : vector<1x512xf32> to vector<4x512xf32>
    %c2 = arith.constant 2 : index
    %c0_26 = arith.constant 0 : index
    %c0_27 = arith.constant 0 : index
    %32 = vector.load %arg7[%c2, %c0_26, %c0_27] : memref<3x1x512xf32, #tpu.memory_space<vmem>>, vector<1x1x512xf32>
    %33 = vector.shape_cast %32 : vector<1x1x512xf32> to vector<1x512xf32>
    %34 = vector.shape_cast %33 : vector<1x512xf32> to vector<1x512xf32>
    %35 = vector.broadcast %34 : vector<1x512xf32> to vector<2x512xf32>
    %c0_28 = arith.constant 0 : index
    %c0_29 = arith.constant 0 : index
    %36 = vector.load %arg9[%c0_28, %c0_29] : memref<1x128xf32, #tpu.memory_space<vmem>>, vector<1x128xf32>
    %37 = vector.shape_cast %36 : vector<1x128xf32> to vector<1x128xf32>
    %38 = vector.broadcast %37 : vector<1x128xf32> to vector<2x128xf32>
    %39 = arith.truncf %20 : vector<2x128xf32> to vector<2x128xbf16>
    %c0_30 = arith.constant 0 : index
    %c0_31 = arith.constant 0 : index
    %40 = vector.load %arg4[%c0_30, %c0_31] : memref<256x512xbf16, #tpu.memory_space<vmem>>, vector<256x512xbf16>
    %41 = tpu.concatenate %39, %8 in 1 : vector<2x128xbf16>, vector<2x128xbf16> -> vector<2x256xbf16>
    %cst_32 = arith.constant dense<0.000000e+00> : vector<2x512xf32>
    %42 = tpu.matmul %41, %40, %cst_32 {dimension_numbers = #tpu.dot_dimension_numbers<[1], [0], [0], [1], [0, 0, 1, 1], [], []>} : vector<2x256xbf16>, vector<256x512xbf16>, vector<2x512xf32> -> vector<2x512xf32>
    %43 = arith.addf %42, %23 : vector<2x512xf32>
    %44 = vector.extract_strided_slice %43 {offsets = [0, 0], sizes = [2, 384], strides = [1, 1]} : vector<2x512xf32> to vector<2x384xf32>
    %45 = arith.negf %44 : vector<2x384xf32>
    %46 = math.exp %45 : vector<2x384xf32>
    %cst_33 = arith.constant 1.000000e+00 : f32
    %47 = vector.broadcast %cst_33 : f32 to vector<2x384xf32>
    %48 = arith.addf %47, %46 : vector<2x384xf32>
    %49 = arith.divf %47, %48 : vector<2x384xf32>
    %50 = vector.extract_strided_slice %43 {offsets = [0, 384], sizes = [2, 128], strides = [1, 1]} : vector<2x512xf32> to vector<2x128xf32>
    %51 = math.tanh %50 : vector<2x128xf32>
    %52 = vector.extract_strided_slice %49 {offsets = [0, 128], sizes = [2, 128], strides = [1, 1]} : vector<2x384xf32> to vector<2x128xf32>
    %53 = arith.mulf %52, %5 : vector<2x128xf32>
    %54 = vector.extract_strided_slice %49 {offsets = [0, 0], sizes = [2, 128], strides = [1, 1]} : vector<2x384xf32> to vector<2x128xf32>
    %55 = arith.mulf %54, %51 : vector<2x128xf32>
    %56 = arith.addf %53, %55 : vector<2x128xf32>
    %57 = vector.extract_strided_slice %49 {offsets = [0, 256], sizes = [2, 128], strides = [1, 1]} : vector<2x384xf32> to vector<2x128xf32>
    %58 = math.tanh %56 : vector<2x128xf32>
    %59 = arith.mulf %57, %58 : vector<2x128xf32>
    %60 = arith.truncf %59 : vector<2x128xf32> to vector<2x128xbf16>
    %c0_34 = arith.constant 0 : index
    %c0_35 = arith.constant 0 : index
    %c0_36 = arith.constant 0 : index
    %61 = vector.load %arg6[%c0_34, %c0_35, %c0_36] : memref<3x256x512xbf16, #tpu.memory_space<vmem>>, vector<1x256x512xbf16>
    %62 = vector.shape_cast %61 : vector<1x256x512xbf16> to vector<256x512xbf16>
    %63 = tpu.concatenate %60, %13 in 1 : vector<2x128xbf16>, vector<2x128xbf16> -> vector<2x256xbf16>
    %cst_37 = arith.constant dense<0.000000e+00> : vector<2x512xf32>
    %64 = tpu.matmul %63, %62, %cst_37 {dimension_numbers = #tpu.dot_dimension_numbers<[1], [0], [0], [1], [0, 0, 1, 1], [], []>} : vector<2x256xbf16>, vector<256x512xbf16>, vector<2x512xf32> -> vector<2x512xf32>
    %65 = arith.addf %64, %27 : vector<2x512xf32>
    %66 = vector.extract_strided_slice %65 {offsets = [0, 0], sizes = [2, 384], strides = [1, 1]} : vector<2x512xf32> to vector<2x384xf32>
    %67 = arith.negf %66 : vector<2x384xf32>
    %68 = math.exp %67 : vector<2x384xf32>
    %cst_38 = arith.constant 1.000000e+00 : f32
    %69 = vector.broadcast %cst_38 : f32 to vector<2x384xf32>
    %70 = arith.addf %69, %68 : vector<2x384xf32>
    %71 = arith.divf %69, %70 : vector<2x384xf32>
    %72 = vector.extract_strided_slice %65 {offsets = [0, 384], sizes = [2, 128], strides = [1, 1]} : vector<2x512xf32> to vector<2x128xf32>
    %73 = math.tanh %72 : vector<2x128xf32>
    %74 = vector.extract_strided_slice %71 {offsets = [0, 128], sizes = [2, 128], strides = [1, 1]} : vector<2x384xf32> to vector<2x128xf32>
    %75 = arith.mulf %74, %5 : vector<2x128xf32>
    %76 = vector.extract_strided_slice %71 {offsets = [0, 0], sizes = [2, 128], strides = [1, 1]} : vector<2x384xf32> to vector<2x128xf32>
    %77 = arith.mulf %76, %73 : vector<2x128xf32>
    %78 = arith.addf %75, %77 : vector<2x128xf32>
    %79 = vector.extract_strided_slice %71 {offsets = [0, 256], sizes = [2, 128], strides = [1, 1]} : vector<2x384xf32> to vector<2x128xf32>
    %80 = math.tanh %78 : vector<2x128xf32>
    %81 = arith.mulf %79, %80 : vector<2x128xf32>
    %82 = arith.truncf %81 : vector<2x128xf32> to vector<2x128xbf16>
    %83 = tpu.concatenate %82, %82 in 0 : vector<2x128xbf16>, vector<2x128xbf16> -> vector<4x128xbf16>
    %c1_39 = arith.constant 1 : index
    %c0_40 = arith.constant 0 : index
    %c0_41 = arith.constant 0 : index
    %84 = vector.load %arg6[%c1_39, %c0_40, %c0_41] : memref<3x256x512xbf16, #tpu.memory_space<vmem>>, vector<1x256x512xbf16>
    %85 = vector.shape_cast %84 : vector<1x256x512xbf16> to vector<256x512xbf16>
    %86 = tpu.concatenate %83, %14 in 1 : vector<4x128xbf16>, vector<4x128xbf16> -> vector<4x256xbf16>
    %cst_42 = arith.constant dense<0.000000e+00> : vector<4x512xf32>
    %87 = tpu.matmul %86, %85, %cst_42 {dimension_numbers = #tpu.dot_dimension_numbers<[1], [0], [0], [1], [0, 0, 1, 1], [], []>} : vector<4x256xbf16>, vector<256x512xbf16>, vector<4x512xf32> -> vector<4x512xf32>
    %88 = arith.addf %87, %31 : vector<4x512xf32>
    %89 = vector.extract_strided_slice %88 {offsets = [0, 0], sizes = [4, 384], strides = [1, 1]} : vector<4x512xf32> to vector<4x384xf32>
    %90 = arith.negf %89 : vector<4x384xf32>
    %91 = math.exp %90 : vector<4x384xf32>
    %cst_43 = arith.constant 1.000000e+00 : f32
    %92 = vector.broadcast %cst_43 : f32 to vector<4x384xf32>
    %93 = arith.addf %92, %91 : vector<4x384xf32>
    %94 = arith.divf %92, %93 : vector<4x384xf32>
    %95 = vector.extract_strided_slice %88 {offsets = [0, 384], sizes = [4, 128], strides = [1, 1]} : vector<4x512xf32> to vector<4x128xf32>
    %96 = math.tanh %95 : vector<4x128xf32>
    %97 = vector.extract_strided_slice %94 {offsets = [0, 128], sizes = [4, 128], strides = [1, 1]} : vector<4x384xf32> to vector<4x128xf32>
    %98 = arith.mulf %97, %15 : vector<4x128xf32>
    %99 = vector.extract_strided_slice %94 {offsets = [0, 0], sizes = [4, 128], strides = [1, 1]} : vector<4x384xf32> to vector<4x128xf32>
    %100 = arith.mulf %99, %96 : vector<4x128xf32>
    %101 = arith.addf %98, %100 : vector<4x128xf32>
    %102 = vector.extract_strided_slice %94 {offsets = [0, 256], sizes = [4, 128], strides = [1, 1]} : vector<4x384xf32> to vector<4x128xf32>
    %103 = math.tanh %101 : vector<4x128xf32>
    %104 = arith.mulf %102, %103 : vector<4x128xf32>
    %105 = arith.truncf %104 : vector<4x128xf32> to vector<4x128xbf16>
    %106 = vector.extract_strided_slice %105 {offsets = [0, 0], sizes = [2, 128], strides = [1, 1]} : vector<4x128xbf16> to vector<2x128xbf16>
    %107 = vector.extract_strided_slice %105 {offsets = [2, 0], sizes = [2, 128], strides = [1, 1]} : vector<4x128xbf16> to vector<2x128xbf16>
    %c2_44 = arith.constant 2 : index
    %c0_45 = arith.constant 0 : index
    %c0_46 = arith.constant 0 : index
    %108 = vector.load %arg6[%c2_44, %c0_45, %c0_46] : memref<3x256x512xbf16, #tpu.memory_space<vmem>>, vector<1x256x512xbf16>
    %109 = vector.shape_cast %108 : vector<1x256x512xbf16> to vector<256x512xbf16>
    %110 = tpu.concatenate %107, %16 in 1 : vector<2x128xbf16>, vector<2x128xbf16> -> vector<2x256xbf16>
    %cst_47 = arith.constant dense<0.000000e+00> : vector<2x512xf32>
    %111 = tpu.matmul %110, %109, %cst_47 {dimension_numbers = #tpu.dot_dimension_numbers<[1], [0], [0], [1], [0, 0, 1, 1], [], []>} : vector<2x256xbf16>, vector<256x512xbf16>, vector<2x512xf32> -> vector<2x512xf32>
    %112 = arith.addf %111, %35 : vector<2x512xf32>
    %113 = vector.extract_strided_slice %112 {offsets = [0, 0], sizes = [2, 384], strides = [1, 1]} : vector<2x512xf32> to vector<2x384xf32>
    %114 = arith.negf %113 : vector<2x384xf32>
    %115 = math.exp %114 : vector<2x384xf32>
    %cst_48 = arith.constant 1.000000e+00 : f32
    %116 = vector.broadcast %cst_48 : f32 to vector<2x384xf32>
    %117 = arith.addf %116, %115 : vector<2x384xf32>
    %118 = arith.divf %116, %117 : vector<2x384xf32>
    %119 = vector.extract_strided_slice %112 {offsets = [0, 384], sizes = [2, 128], strides = [1, 1]} : vector<2x512xf32> to vector<2x128xf32>
    %120 = math.tanh %119 : vector<2x128xf32>
    %121 = vector.extract_strided_slice %118 {offsets = [0, 128], sizes = [2, 128], strides = [1, 1]} : vector<2x384xf32> to vector<2x128xf32>
    %122 = arith.mulf %121, %18 : vector<2x128xf32>
    %123 = vector.extract_strided_slice %118 {offsets = [0, 0], sizes = [2, 128], strides = [1, 1]} : vector<2x384xf32> to vector<2x128xf32>
    %124 = arith.mulf %123, %120 : vector<2x128xf32>
    %125 = arith.addf %122, %124 : vector<2x128xf32>
    %126 = vector.extract_strided_slice %118 {offsets = [0, 256], sizes = [2, 128], strides = [1, 1]} : vector<2x384xf32> to vector<2x128xf32>
    %127 = math.tanh %125 : vector<2x128xf32>
    %128 = arith.mulf %126, %127 : vector<2x128xf32>
    %129 = arith.truncf %128 : vector<2x128xf32> to vector<2x128xbf16>
    %130 = tpu.concatenate %129, %17 in 1 : vector<2x128xbf16>, vector<2x128xbf16> -> vector<2x256xbf16>
    %cst_49 = arith.constant dense<0.000000e+00> : vector<2x512xf32>
    %131 = tpu.matmul %130, %109, %cst_49 {dimension_numbers = #tpu.dot_dimension_numbers<[1], [0], [0], [1], [0, 0, 1, 1], [], []>} : vector<2x256xbf16>, vector<256x512xbf16>, vector<2x512xf32> -> vector<2x512xf32>
    %132 = arith.addf %131, %35 : vector<2x512xf32>
    %133 = vector.extract_strided_slice %132 {offsets = [0, 0], sizes = [2, 384], strides = [1, 1]} : vector<2x512xf32> to vector<2x384xf32>
    %134 = arith.negf %133 : vector<2x384xf32>
    %135 = math.exp %134 : vector<2x384xf32>
    %cst_50 = arith.constant 1.000000e+00 : f32
    %136 = vector.broadcast %cst_50 : f32 to vector<2x384xf32>
    %137 = arith.addf %136, %135 : vector<2x384xf32>
    %138 = arith.divf %136, %137 : vector<2x384xf32>
    %139 = vector.extract_strided_slice %132 {offsets = [0, 384], sizes = [2, 128], strides = [1, 1]} : vector<2x512xf32> to vector<2x128xf32>
    %140 = math.tanh %139 : vector<2x128xf32>
    %141 = vector.extract_strided_slice %138 {offsets = [0, 128], sizes = [2, 128], strides = [1, 1]} : vector<2x384xf32> to vector<2x128xf32>
    %142 = arith.mulf %141, %19 : vector<2x128xf32>
    %143 = vector.extract_strided_slice %138 {offsets = [0, 0], sizes = [2, 128], strides = [1, 1]} : vector<2x384xf32> to vector<2x128xf32>
    %144 = arith.mulf %143, %140 : vector<2x128xf32>
    %145 = arith.addf %142, %144 : vector<2x128xf32>
    %146 = vector.extract_strided_slice %138 {offsets = [0, 256], sizes = [2, 128], strides = [1, 1]} : vector<2x384xf32> to vector<2x128xf32>
    %147 = math.tanh %145 : vector<2x128xf32>
    %148 = arith.mulf %146, %147 : vector<2x128xf32>
    %149 = arith.truncf %148 : vector<2x128xf32> to vector<2x128xbf16>
    %150 = tpu.concatenate %82, %106, %107, %129, %149 in 1 : vector<2x128xbf16>, vector<2x128xbf16>, vector<2x128xbf16>, vector<2x128xbf16>, vector<2x128xbf16> -> vector<2x640xbf16>
    %c0_51 = arith.constant 0 : index
    %c0_52 = arith.constant 0 : index
    %151 = vector.load %arg8[%c0_51, %c0_52] : memref<640x128xbf16, #tpu.memory_space<vmem>>, vector<640x128xbf16>
    %cst_53 = arith.constant dense<0.000000e+00> : vector<2x128xf32>
    %152 = tpu.matmul %150, %151, %cst_53 {dimension_numbers = #tpu.dot_dimension_numbers<[1], [0], [0], [1], [0, 0, 1, 1], [], []>} : vector<2x640xbf16>, vector<640x128xbf16>, vector<2x128xf32> -> vector<2x128xf32>
    %153 = arith.addf %152, %38 : vector<2x128xf32>
    %154 = arith.addf %153, %20 : vector<2x128xf32>
    %c0_54 = arith.constant 0 : index
    %c0_55 = arith.constant 0 : index
    %c0_56 = arith.constant 0 : index
    %155 = vector.load %arg10[%c0_54, %c0_55, %c0_56] : memref<4x2x128xf32, #tpu.memory_space<vmem>>, vector<1x2x128xf32>
    %156 = vector.shape_cast %155 : vector<1x2x128xf32> to vector<2x128xf32>
    %157 = vector.shape_cast %154 : vector<2x128xf32> to vector<1x2x128xf32>
    tpu.vector_store %arg10[%c0_54, %c0_55, %c0_56], %157 {strides = array<i32>} : memref<4x2x128xf32, #tpu.memory_space<vmem>>, vector<1x2x128xf32>,
    %158 = arith.truncf %154 : vector<2x128xf32> to vector<2x128xbf16>
    %c0_57 = arith.constant 0 : index
    %c0_58 = arith.constant 0 : index
    %159 = vector.load %arg4[%c0_57, %c0_58] : memref<256x512xbf16, #tpu.memory_space<vmem>>, vector<256x512xbf16>
    %160 = tpu.concatenate %158, %60 in 1 : vector<2x128xbf16>, vector<2x128xbf16> -> vector<2x256xbf16>
    %cst_59 = arith.constant dense<0.000000e+00> : vector<2x512xf32>
    %161 = tpu.matmul %160, %159, %cst_59 {dimension_numbers = #tpu.dot_dimension_numbers<[1], [0], [0], [1], [0, 0, 1, 1], [], []>} : vector<2x256xbf16>, vector<256x512xbf16>, vector<2x512xf32> -> vector<2x512xf32>
    %162 = arith.addf %161, %23 : vector<2x512xf32>
    %163 = vector.extract_strided_slice %162 {offsets = [0, 0], sizes = [2, 384], strides = [1, 1]} : vector<2x512xf32> to vector<2x384xf32>
    %164 = arith.negf %163 : vector<2x384xf32>
    %165 = math.exp %164 : vector<2x384xf32>
    %cst_60 = arith.constant 1.000000e+00 : f32
    %166 = vector.broadcast %cst_60 : f32 to vector<2x384xf32>
    %167 = arith.addf %166, %165 : vector<2x384xf32>
    %168 = arith.divf %166, %167 : vector<2x384xf32>
    %169 = vector.extract_strided_slice %162 {offsets = [0, 384], sizes = [2, 128], strides = [1, 1]} : vector<2x512xf32> to vector<2x128xf32>
    %170 = math.tanh %169 : vector<2x128xf32>
    %171 = vector.extract_strided_slice %168 {offsets = [0, 128], sizes = [2, 128], strides = [1, 1]} : vector<2x384xf32> to vector<2x128xf32>
    %172 = arith.mulf %171, %56 : vector<2x128xf32>
    %173 = vector.extract_strided_slice %168 {offsets = [0, 0], sizes = [2, 128], strides = [1, 1]} : vector<2x384xf32> to vector<2x128xf32>
    %174 = arith.mulf %173, %170 : vector<2x128xf32>
    %175 = arith.addf %172, %174 : vector<2x128xf32>
    %176 = vector.extract_strided_slice %168 {offsets = [0, 256], sizes = [2, 128], strides = [1, 1]} : vector<2x384xf32> to vector<2x128xf32>
    %177 = math.tanh %175 : vector<2x128xf32>
    %178 = arith.mulf %176, %177 : vector<2x128xf32>
    %179 = arith.truncf %178 : vector<2x128xf32> to vector<2x128xbf16>
    %c0_61 = arith.constant 0 : index
    %c0_62 = arith.constant 0 : index
    %c0_63 = arith.constant 0 : index
    %180 = vector.load %arg6[%c0_61, %c0_62, %c0_63] : memref<3x256x512xbf16, #tpu.memory_space<vmem>>, vector<1x256x512xbf16>
    %181 = vector.shape_cast %180 : vector<1x256x512xbf16> to vector<256x512xbf16>
    %182 = tpu.concatenate %179, %82 in 1 : vector<2x128xbf16>, vector<2x128xbf16> -> vector<2x256xbf16>
    %cst_64 = arith.constant dense<0.000000e+00> : vector<2x512xf32>
    %183 = tpu.matmul %182, %181, %cst_64 {dimension_numbers = #tpu.dot_dimension_numbers<[1], [0], [0], [1], [0, 0, 1, 1], [], []>} : vector<2x256xbf16>, vector<256x512xbf16>, vector<2x512xf32> -> vector<2x512xf32>
    %184 = arith.addf %183, %27 : vector<2x512xf32>
    %185 = vector.extract_strided_slice %184 {offsets = [0, 0], sizes = [2, 384], strides = [1, 1]} : vector<2x512xf32> to vector<2x384xf32>
    %186 = arith.negf %185 : vector<2x384xf32>
    %187 = math.exp %186 : vector<2x384xf32>
    %cst_65 = arith.constant 1.000000e+00 : f32
    %188 = vector.broadcast %cst_65 : f32 to vector<2x384xf32>
    %189 = arith.addf %188, %187 : vector<2x384xf32>
    %190 = arith.divf %188, %189 : vector<2x384xf32>
    %191 = vector.extract_strided_slice %184 {offsets = [0, 384], sizes = [2, 128], strides = [1, 1]} : vector<2x512xf32> to vector<2x128xf32>
    %192 = math.tanh %191 : vector<2x128xf32>
    %193 = vector.extract_strided_slice %190 {offsets = [0, 128], sizes = [2, 128], strides = [1, 1]} : vector<2x384xf32> to vector<2x128xf32>
    %194 = arith.mulf %193, %78 : vector<2x128xf32>
    %195 = vector.extract_strided_slice %190 {offsets = [0, 0], sizes = [2, 128], strides = [1, 1]} : vector<2x384xf32> to vector<2x128xf32>
    %196 = arith.mulf %195, %192 : vector<2x128xf32>
    %197 = arith.addf %194, %196 : vector<2x128xf32>
    %198 = vector.extract_strided_slice %190 {offsets = [0, 256], sizes = [2, 128], strides = [1, 1]} : vector<2x384xf32> to vector<2x128xf32>
    %199 = math.tanh %197 : vector<2x128xf32>
    %200 = arith.mulf %198, %199 : vector<2x128xf32>
    %201 = arith.truncf %200 : vector<2x128xf32> to vector<2x128xbf16>
    %202 = tpu.concatenate %201, %201 in 0 : vector<2x128xbf16>, vector<2x128xbf16> -> vector<4x128xbf16>
    %c1_66 = arith.constant 1 : index
    %c0_67 = arith.constant 0 : index
    %c0_68 = arith.constant 0 : index
    %203 = vector.load %arg6[%c1_66, %c0_67, %c0_68] : memref<3x256x512xbf16, #tpu.memory_space<vmem>>, vector<1x256x512xbf16>
    %204 = vector.shape_cast %203 : vector<1x256x512xbf16> to vector<256x512xbf16>
    %205 = tpu.concatenate %202, %105 in 1 : vector<4x128xbf16>, vector<4x128xbf16> -> vector<4x256xbf16>
    %cst_69 = arith.constant dense<0.000000e+00> : vector<4x512xf32>
    %206 = tpu.matmul %205, %204, %cst_69 {dimension_numbers = #tpu.dot_dimension_numbers<[1], [0], [0], [1], [0, 0, 1, 1], [], []>} : vector<4x256xbf16>, vector<256x512xbf16>, vector<4x512xf32> -> vector<4x512xf32>
    %207 = arith.addf %206, %31 : vector<4x512xf32>
    %208 = vector.extract_strided_slice %207 {offsets = [0, 0], sizes = [4, 384], strides = [1, 1]} : vector<4x512xf32> to vector<4x384xf32>
    %209 = arith.negf %208 : vector<4x384xf32>
    %210 = math.exp %209 : vector<4x384xf32>
    %cst_70 = arith.constant 1.000000e+00 : f32
    %211 = vector.broadcast %cst_70 : f32 to vector<4x384xf32>
    %212 = arith.addf %211, %210 : vector<4x384xf32>
    %213 = arith.divf %211, %212 : vector<4x384xf32>
    %214 = vector.extract_strided_slice %207 {offsets = [0, 384], sizes = [4, 128], strides = [1, 1]} : vector<4x512xf32> to vector<4x128xf32>
    %215 = math.tanh %214 : vector<4x128xf32>
    %216 = vector.extract_strided_slice %213 {offsets = [0, 128], sizes = [4, 128], strides = [1, 1]} : vector<4x384xf32> to vector<4x128xf32>
    %217 = arith.mulf %216, %101 : vector<4x128xf32>
    %218 = vector.extract_strided_slice %213 {offsets = [0, 0], sizes = [4, 128], strides = [1, 1]} : vector<4x384xf32> to vector<4x128xf32>
    %219 = arith.mulf %218, %215 : vector<4x128xf32>
    %220 = arith.addf %217, %219 : vector<4x128xf32>
    %221 = vector.extract_strided_slice %213 {offsets = [0, 256], sizes = [4, 128], strides = [1, 1]} : vector<4x384xf32> to vector<4x128xf32>
    %222 = math.tanh %220 : vector<4x128xf32>
    %223 = arith.mulf %221, %222 : vector<4x128xf32>
    %224 = arith.truncf %223 : vector<4x128xf32> to vector<4x128xbf16>
    %225 = vector.extract_strided_slice %224 {offsets = [0, 0], sizes = [2, 128], strides = [1, 1]} : vector<4x128xbf16> to vector<2x128xbf16>
    %226 = vector.extract_strided_slice %224 {offsets = [2, 0], sizes = [2, 128], strides = [1, 1]} : vector<4x128xbf16> to vector<2x128xbf16>
    %c2_71 = arith.constant 2 : index
    %c0_72 = arith.constant 0 : index
    %c0_73 = arith.constant 0 : index
    %227 = vector.load %arg6[%c2_71, %c0_72, %c0_73] : memref<3x256x512xbf16, #tpu.memory_space<vmem>>, vector<1x256x512xbf16>
    %228 = vector.shape_cast %227 : vector<1x256x512xbf16> to vector<256x512xbf16>
    %229 = tpu.concatenate %226, %129 in 1 : vector<2x128xbf16>, vector<2x128xbf16> -> vector<2x256xbf16>
    %cst_74 = arith.constant dense<0.000000e+00> : vector<2x512xf32>
    %230 = tpu.matmul %229, %228, %cst_74 {dimension_numbers = #tpu.dot_dimension_numbers<[1], [0], [0], [1], [0, 0, 1, 1], [], []>} : vector<2x256xbf16>, vector<256x512xbf16>, vector<2x512xf32> -> vector<2x512xf32>
    %231 = arith.addf %230, %35 : vector<2x512xf32>
    %232 = vector.extract_strided_slice %231 {offsets = [0, 0], sizes = [2, 384], strides = [1, 1]} : vector<2x512xf32> to vector<2x384xf32>
    %233 = arith.negf %232 : vector<2x384xf32>
    %234 = math.exp %233 : vector<2x384xf32>
    %cst_75 = arith.constant 1.000000e+00 : f32
    %235 = vector.broadcast %cst_75 : f32 to vector<2x384xf32>
    %236 = arith.addf %235, %234 : vector<2x384xf32>
    %237 = arith.divf %235, %236 : vector<2x384xf32>
    %238 = vector.extract_strided_slice %231 {offsets = [0, 384], sizes = [2, 128], strides = [1, 1]} : vector<2x512xf32> to vector<2x128xf32>
    %239 = math.tanh %238 : vector<2x128xf32>
    %240 = vector.extract_strided_slice %237 {offsets = [0, 128], sizes = [2, 128], strides = [1, 1]} : vector<2x384xf32> to vector<2x128xf32>
    %241 = arith.mulf %240, %125 : vector<2x128xf32>
    %242 = vector.extract_strided_slice %237 {offsets = [0, 0], sizes = [2, 128], strides = [1, 1]} : vector<2x384xf32> to vector<2x128xf32>
    %243 = arith.mulf %242, %239 : vector<2x128xf32>
    %244 = arith.addf %241, %243 : vector<2x128xf32>
    %245 = vector.extract_strided_slice %237 {offsets = [0, 256], sizes = [2, 128], strides = [1, 1]} : vector<2x384xf32> to vector<2x128xf32>
    %246 = math.tanh %244 : vector<2x128xf32>
    %247 = arith.mulf %245, %246 : vector<2x128xf32>
    %248 = arith.truncf %247 : vector<2x128xf32> to vector<2x128xbf16>
    %249 = tpu.concatenate %248, %149 in 1 : vector<2x128xbf16>, vector<2x128xbf16> -> vector<2x256xbf16>
    %cst_76 = arith.constant dense<0.000000e+00> : vector<2x512xf32>
    %250 = tpu.matmul %249, %228, %cst_76 {dimension_numbers = #tpu.dot_dimension_numbers<[1], [0], [0], [1], [0, 0, 1, 1], [], []>} : vector<2x256xbf16>, vector<256x512xbf16>, vector<2x512xf32> -> vector<2x512xf32>
    %251 = arith.addf %250, %35 : vector<2x512xf32>
    %252 = vector.extract_strided_slice %251 {offsets = [0, 0], sizes = [2, 384], strides = [1, 1]} : vector<2x512xf32> to vector<2x384xf32>
    %253 = arith.negf %252 : vector<2x384xf32>
    %254 = math.exp %253 : vector<2x384xf32>
    %cst_77 = arith.constant 1.000000e+00 : f32
    %255 = vector.broadcast %cst_77 : f32 to vector<2x384xf32>
    %256 = arith.addf %255, %254 : vector<2x384xf32>
    %257 = arith.divf %255, %256 : vector<2x384xf32>
    %258 = vector.extract_strided_slice %251 {offsets = [0, 384], sizes = [2, 128], strides = [1, 1]} : vector<2x512xf32> to vector<2x128xf32>
    %259 = math.tanh %258 : vector<2x128xf32>
    %260 = vector.extract_strided_slice %257 {offsets = [0, 128], sizes = [2, 128], strides = [1, 1]} : vector<2x384xf32> to vector<2x128xf32>
    %261 = arith.mulf %260, %145 : vector<2x128xf32>
    %262 = vector.extract_strided_slice %257 {offsets = [0, 0], sizes = [2, 128], strides = [1, 1]} : vector<2x384xf32> to vector<2x128xf32>
    %263 = arith.mulf %262, %259 : vector<2x128xf32>
    %264 = arith.addf %261, %263 : vector<2x128xf32>
    %265 = vector.extract_strided_slice %257 {offsets = [0, 256], sizes = [2, 128], strides = [1, 1]} : vector<2x384xf32> to vector<2x128xf32>
    %266 = math.tanh %264 : vector<2x128xf32>
    %267 = arith.mulf %265, %266 : vector<2x128xf32>
    %268 = arith.truncf %267 : vector<2x128xf32> to vector<2x128xbf16>
    %269 = tpu.concatenate %201, %225, %226, %248, %268 in 1 : vector<2x128xbf16>, vector<2x128xbf16>, vector<2x128xbf16>, vector<2x128xbf16>, vector<2x128xbf16> -> vector<2x640xbf16>
    %c0_78 = arith.constant 0 : index
    %c0_79 = arith.constant 0 : index
    %270 = vector.load %arg8[%c0_78, %c0_79] : memref<640x128xbf16, #tpu.memory_space<vmem>>, vector<640x128xbf16>
    %cst_80 = arith.constant dense<0.000000e+00> : vector<2x128xf32>
    %271 = tpu.matmul %269, %270, %cst_80 {dimension_numbers = #tpu.dot_dimension_numbers<[1], [0], [0], [1], [0, 0, 1, 1], [], []>} : vector<2x640xbf16>, vector<640x128xbf16>, vector<2x128xf32> -> vector<2x128xf32>
    %272 = arith.addf %271, %38 : vector<2x128xf32>
    %273 = arith.addf %272, %154 : vector<2x128xf32>
    %c1_81 = arith.constant 1 : index
    %c0_82 = arith.constant 0 : index
    %c0_83 = arith.constant 0 : index
    %274 = vector.load %arg10[%c1_81, %c0_82, %c0_83] : memref<4x2x128xf32, #tpu.memory_space<vmem>>, vector<1x2x128xf32>
    %275 = vector.shape_cast %274 : vector<1x2x128xf32> to vector<2x128xf32>
    %276 = vector.shape_cast %273 : vector<2x128xf32> to vector<1x2x128xf32>
    tpu.vector_store %arg10[%c1_81, %c0_82, %c0_83], %276 {strides = array<i32>} : memref<4x2x128xf32, #tpu.memory_space<vmem>>, vector<1x2x128xf32>,
    %277 = arith.truncf %273 : vector<2x128xf32> to vector<2x128xbf16>
    %c0_84 = arith.constant 0 : index
    %c0_85 = arith.constant 0 : index
    %278 = vector.load %arg4[%c0_84, %c0_85] : memref<256x512xbf16, #tpu.memory_space<vmem>>, vector<256x512xbf16>
    %279 = tpu.concatenate %277, %179 in 1 : vector<2x128xbf16>, vector<2x128xbf16> -> vector<2x256xbf16>
    %cst_86 = arith.constant dense<0.000000e+00> : vector<2x512xf32>
    %280 = tpu.matmul %279, %278, %cst_86 {dimension_numbers = #tpu.dot_dimension_numbers<[1], [0], [0], [1], [0, 0, 1, 1], [], []>} : vector<2x256xbf16>, vector<256x512xbf16>, vector<2x512xf32> -> vector<2x512xf32>
    %281 = arith.addf %280, %23 : vector<2x512xf32>
    %282 = vector.extract_strided_slice %281 {offsets = [0, 0], sizes = [2, 384], strides = [1, 1]} : vector<2x512xf32> to vector<2x384xf32>
    %283 = arith.negf %282 : vector<2x384xf32>
    %284 = math.exp %283 : vector<2x384xf32>
    %cst_87 = arith.constant 1.000000e+00 : f32
    %285 = vector.broadcast %cst_87 : f32 to vector<2x384xf32>
    %286 = arith.addf %285, %284 : vector<2x384xf32>
    %287 = arith.divf %285, %286 : vector<2x384xf32>
    %288 = vector.extract_strided_slice %281 {offsets = [0, 384], sizes = [2, 128], strides = [1, 1]} : vector<2x512xf32> to vector<2x128xf32>
    %289 = math.tanh %288 : vector<2x128xf32>
    %290 = vector.extract_strided_slice %287 {offsets = [0, 128], sizes = [2, 128], strides = [1, 1]} : vector<2x384xf32> to vector<2x128xf32>
    %291 = arith.mulf %290, %175 : vector<2x128xf32>
    %292 = vector.extract_strided_slice %287 {offsets = [0, 0], sizes = [2, 128], strides = [1, 1]} : vector<2x384xf32> to vector<2x128xf32>
    %293 = arith.mulf %292, %289 : vector<2x128xf32>
    %294 = arith.addf %291, %293 : vector<2x128xf32>
    %295 = vector.extract_strided_slice %287 {offsets = [0, 256], sizes = [2, 128], strides = [1, 1]} : vector<2x384xf32> to vector<2x128xf32>
    %296 = math.tanh %294 : vector<2x128xf32>
    %297 = arith.mulf %295, %296 : vector<2x128xf32>
    %298 = arith.truncf %297 : vector<2x128xf32> to vector<2x128xbf16>
    %c0_88 = arith.constant 0 : index
    %c0_89 = arith.constant 0 : index
    %c0_90 = arith.constant 0 : index
    %299 = vector.load %arg6[%c0_88, %c0_89, %c0_90] : memref<3x256x512xbf16, #tpu.memory_space<vmem>>, vector<1x256x512xbf16>
    %300 = vector.shape_cast %299 : vector<1x256x512xbf16> to vector<256x512xbf16>
    %301 = tpu.concatenate %298, %201 in 1 : vector<2x128xbf16>, vector<2x128xbf16> -> vector<2x256xbf16>
    %cst_91 = arith.constant dense<0.000000e+00> : vector<2x512xf32>
    %302 = tpu.matmul %301, %300, %cst_91 {dimension_numbers = #tpu.dot_dimension_numbers<[1], [0], [0], [1], [0, 0, 1, 1], [], []>} : vector<2x256xbf16>, vector<256x512xbf16>, vector<2x512xf32> -> vector<2x512xf32>
    %303 = arith.addf %302, %27 : vector<2x512xf32>
    %304 = vector.extract_strided_slice %303 {offsets = [0, 0], sizes = [2, 384], strides = [1, 1]} : vector<2x512xf32> to vector<2x384xf32>
    %305 = arith.negf %304 : vector<2x384xf32>
    %306 = math.exp %305 : vector<2x384xf32>
    %cst_92 = arith.constant 1.000000e+00 : f32
    %307 = vector.broadcast %cst_92 : f32 to vector<2x384xf32>
    %308 = arith.addf %307, %306 : vector<2x384xf32>
    %309 = arith.divf %307, %308 : vector<2x384xf32>
    %310 = vector.extract_strided_slice %303 {offsets = [0, 384], sizes = [2, 128], strides = [1, 1]} : vector<2x512xf32> to vector<2x128xf32>
    %311 = math.tanh %310 : vector<2x128xf32>
    %312 = vector.extract_strided_slice %309 {offsets = [0, 128], sizes = [2, 128], strides = [1, 1]} : vector<2x384xf32> to vector<2x128xf32>
    %313 = arith.mulf %312, %197 : vector<2x128xf32>
    %314 = vector.extract_strided_slice %309 {offsets = [0, 0], sizes = [2, 128], strides = [1, 1]} : vector<2x384xf32> to vector<2x128xf32>
    %315 = arith.mulf %314, %311 : vector<2x128xf32>
    %316 = arith.addf %313, %315 : vector<2x128xf32>
    %317 = vector.extract_strided_slice %309 {offsets = [0, 256], sizes = [2, 128], strides = [1, 1]} : vector<2x384xf32> to vector<2x128xf32>
    %318 = math.tanh %316 : vector<2x128xf32>
    %319 = arith.mulf %317, %318 : vector<2x128xf32>
    %320 = arith.truncf %319 : vector<2x128xf32> to vector<2x128xbf16>
    %321 = tpu.concatenate %320, %320 in 0 : vector<2x128xbf16>, vector<2x128xbf16> -> vector<4x128xbf16>
    %c1_93 = arith.constant 1 : index
    %c0_94 = arith.constant 0 : index
    %c0_95 = arith.constant 0 : index
    %322 = vector.load %arg6[%c1_93, %c0_94, %c0_95] : memref<3x256x512xbf16, #tpu.memory_space<vmem>>, vector<1x256x512xbf16>
    %323 = vector.shape_cast %322 : vector<1x256x512xbf16> to vector<256x512xbf16>
    %324 = tpu.concatenate %321, %224 in 1 : vector<4x128xbf16>, vector<4x128xbf16> -> vector<4x256xbf16>
    %cst_96 = arith.constant dense<0.000000e+00> : vector<4x512xf32>
    %325 = tpu.matmul %324, %323, %cst_96 {dimension_numbers = #tpu.dot_dimension_numbers<[1], [0], [0], [1], [0, 0, 1, 1], [], []>} : vector<4x256xbf16>, vector<256x512xbf16>, vector<4x512xf32> -> vector<4x512xf32>
    %326 = arith.addf %325, %31 : vector<4x512xf32>
    %327 = vector.extract_strided_slice %326 {offsets = [0, 0], sizes = [4, 384], strides = [1, 1]} : vector<4x512xf32> to vector<4x384xf32>
    %328 = arith.negf %327 : vector<4x384xf32>
    %329 = math.exp %328 : vector<4x384xf32>
    %cst_97 = arith.constant 1.000000e+00 : f32
    %330 = vector.broadcast %cst_97 : f32 to vector<4x384xf32>
    %331 = arith.addf %330, %329 : vector<4x384xf32>
    %332 = arith.divf %330, %331 : vector<4x384xf32>
    %333 = vector.extract_strided_slice %326 {offsets = [0, 384], sizes = [4, 128], strides = [1, 1]} : vector<4x512xf32> to vector<4x128xf32>
    %334 = math.tanh %333 : vector<4x128xf32>
    %335 = vector.extract_strided_slice %332 {offsets = [0, 128], sizes = [4, 128], strides = [1, 1]} : vector<4x384xf32> to vector<4x128xf32>
    %336 = arith.mulf %335, %220 : vector<4x128xf32>
    %337 = vector.extract_strided_slice %332 {offsets = [0, 0], sizes = [4, 128], strides = [1, 1]} : vector<4x384xf32> to vector<4x128xf32>
    %338 = arith.mulf %337, %334 : vector<4x128xf32>
    %339 = arith.addf %336, %338 : vector<4x128xf32>
    %340 = vector.extract_strided_slice %332 {offsets = [0, 256], sizes = [4, 128], strides = [1, 1]} : vector<4x384xf32> to vector<4x128xf32>
    %341 = math.tanh %339 : vector<4x128xf32>
    %342 = arith.mulf %340, %341 : vector<4x128xf32>
    %343 = arith.truncf %342 : vector<4x128xf32> to vector<4x128xbf16>
    %344 = vector.extract_strided_slice %343 {offsets = [0, 0], sizes = [2, 128], strides = [1, 1]} : vector<4x128xbf16> to vector<2x128xbf16>
    %345 = vector.extract_strided_slice %343 {offsets = [2, 0], sizes = [2, 128], strides = [1, 1]} : vector<4x128xbf16> to vector<2x128xbf16>
    %c2_98 = arith.constant 2 : index
    %c0_99 = arith.constant 0 : index
    %c0_100 = arith.constant 0 : index
    %346 = vector.load %arg6[%c2_98, %c0_99, %c0_100] : memref<3x256x512xbf16, #tpu.memory_space<vmem>>, vector<1x256x512xbf16>
    %347 = vector.shape_cast %346 : vector<1x256x512xbf16> to vector<256x512xbf16>
    %348 = tpu.concatenate %345, %248 in 1 : vector<2x128xbf16>, vector<2x128xbf16> -> vector<2x256xbf16>
    %cst_101 = arith.constant dense<0.000000e+00> : vector<2x512xf32>
    %349 = tpu.matmul %348, %347, %cst_101 {dimension_numbers = #tpu.dot_dimension_numbers<[1], [0], [0], [1], [0, 0, 1, 1], [], []>} : vector<2x256xbf16>, vector<256x512xbf16>, vector<2x512xf32> -> vector<2x512xf32>
    %350 = arith.addf %349, %35 : vector<2x512xf32>
    %351 = vector.extract_strided_slice %350 {offsets = [0, 0], sizes = [2, 384], strides = [1, 1]} : vector<2x512xf32> to vector<2x384xf32>
    %352 = arith.negf %351 : vector<2x384xf32>
    %353 = math.exp %352 : vector<2x384xf32>
    %cst_102 = arith.constant 1.000000e+00 : f32
    %354 = vector.broadcast %cst_102 : f32 to vector<2x384xf32>
    %355 = arith.addf %354, %353 : vector<2x384xf32>
    %356 = arith.divf %354, %355 : vector<2x384xf32>
    %357 = vector.extract_strided_slice %350 {offsets = [0, 384], sizes = [2, 128], strides = [1, 1]} : vector<2x512xf32> to vector<2x128xf32>
    %358 = math.tanh %357 : vector<2x128xf32>
    %359 = vector.extract_strided_slice %356 {offsets = [0, 128], sizes = [2, 128], strides = [1, 1]} : vector<2x384xf32> to vector<2x128xf32>
    %360 = arith.mulf %359, %244 : vector<2x128xf32>
    %361 = vector.extract_strided_slice %356 {offsets = [0, 0], sizes = [2, 128], strides = [1, 1]} : vector<2x384xf32> to vector<2x128xf32>
    %362 = arith.mulf %361, %358 : vector<2x128xf32>
    %363 = arith.addf %360, %362 : vector<2x128xf32>
    %364 = vector.extract_strided_slice %356 {offsets = [0, 256], sizes = [2, 128], strides = [1, 1]} : vector<2x384xf32> to vector<2x128xf32>
    %365 = math.tanh %363 : vector<2x128xf32>
    %366 = arith.mulf %364, %365 : vector<2x128xf32>
    %367 = arith.truncf %366 : vector<2x128xf32> to vector<2x128xbf16>
    %368 = tpu.concatenate %367, %268 in 1 : vector<2x128xbf16>, vector<2x128xbf16> -> vector<2x256xbf16>
    %cst_103 = arith.constant dense<0.000000e+00> : vector<2x512xf32>
    %369 = tpu.matmul %368, %347, %cst_103 {dimension_numbers = #tpu.dot_dimension_numbers<[1], [0], [0], [1], [0, 0, 1, 1], [], []>} : vector<2x256xbf16>, vector<256x512xbf16>, vector<2x512xf32> -> vector<2x512xf32>
    %370 = arith.addf %369, %35 : vector<2x512xf32>
    %371 = vector.extract_strided_slice %370 {offsets = [0, 0], sizes = [2, 384], strides = [1, 1]} : vector<2x512xf32> to vector<2x384xf32>
    %372 = arith.negf %371 : vector<2x384xf32>
    %373 = math.exp %372 : vector<2x384xf32>
    %cst_104 = arith.constant 1.000000e+00 : f32
    %374 = vector.broadcast %cst_104 : f32 to vector<2x384xf32>
    %375 = arith.addf %374, %373 : vector<2x384xf32>
    %376 = arith.divf %374, %375 : vector<2x384xf32>
    %377 = vector.extract_strided_slice %370 {offsets = [0, 384], sizes = [2, 128], strides = [1, 1]} : vector<2x512xf32> to vector<2x128xf32>
    %378 = math.tanh %377 : vector<2x128xf32>
    %379 = vector.extract_strided_slice %376 {offsets = [0, 128], sizes = [2, 128], strides = [1, 1]} : vector<2x384xf32> to vector<2x128xf32>
    %380 = arith.mulf %379, %264 : vector<2x128xf32>
    %381 = vector.extract_strided_slice %376 {offsets = [0, 0], sizes = [2, 128], strides = [1, 1]} : vector<2x384xf32> to vector<2x128xf32>
    %382 = arith.mulf %381, %378 : vector<2x128xf32>
    %383 = arith.addf %380, %382 : vector<2x128xf32>
    %384 = vector.extract_strided_slice %376 {offsets = [0, 256], sizes = [2, 128], strides = [1, 1]} : vector<2x384xf32> to vector<2x128xf32>
    %385 = math.tanh %383 : vector<2x128xf32>
    %386 = arith.mulf %384, %385 : vector<2x128xf32>
    %387 = arith.truncf %386 : vector<2x128xf32> to vector<2x128xbf16>
    %388 = tpu.concatenate %320, %344, %345, %367, %387 in 1 : vector<2x128xbf16>, vector<2x128xbf16>, vector<2x128xbf16>, vector<2x128xbf16>, vector<2x128xbf16> -> vector<2x640xbf16>
    %c0_105 = arith.constant 0 : index
    %c0_106 = arith.constant 0 : index
    %389 = vector.load %arg8[%c0_105, %c0_106] : memref<640x128xbf16, #tpu.memory_space<vmem>>, vector<640x128xbf16>
    %cst_107 = arith.constant dense<0.000000e+00> : vector<2x128xf32>
    %390 = tpu.matmul %388, %389, %cst_107 {dimension_numbers = #tpu.dot_dimension_numbers<[1], [0], [0], [1], [0, 0, 1, 1], [], []>} : vector<2x640xbf16>, vector<640x128xbf16>, vector<2x128xf32> -> vector<2x128xf32>
    %391 = arith.addf %390, %38 : vector<2x128xf32>
    %392 = arith.addf %391, %273 : vector<2x128xf32>
    %c2_108 = arith.constant 2 : index
    %c0_109 = arith.constant 0 : index
    %c0_110 = arith.constant 0 : index
    %393 = vector.load %arg10[%c2_108, %c0_109, %c0_110] : memref<4x2x128xf32, #tpu.memory_space<vmem>>, vector<1x2x128xf32>
    %394 = vector.shape_cast %393 : vector<1x2x128xf32> to vector<2x128xf32>
    %395 = vector.shape_cast %392 : vector<2x128xf32> to vector<1x2x128xf32>
    tpu.vector_store %arg10[%c2_108, %c0_109, %c0_110], %395 {strides = array<i32>} : memref<4x2x128xf32, #tpu.memory_space<vmem>>, vector<1x2x128xf32>,
    %396 = arith.truncf %392 : vector<2x128xf32> to vector<2x128xbf16>
    %c0_111 = arith.constant 0 : index
    %c0_112 = arith.constant 0 : index
    %397 = vector.load %arg4[%c0_111, %c0_112] : memref<256x512xbf16, #tpu.memory_space<vmem>>, vector<256x512xbf16>
    %398 = tpu.concatenate %396, %298 in 1 : vector<2x128xbf16>, vector<2x128xbf16> -> vector<2x256xbf16>
    %cst_113 = arith.constant dense<0.000000e+00> : vector<2x512xf32>
    %399 = tpu.matmul %398, %397, %cst_113 {dimension_numbers = #tpu.dot_dimension_numbers<[1], [0], [0], [1], [0, 0, 1, 1], [], []>} : vector<2x256xbf16>, vector<256x512xbf16>, vector<2x512xf32> -> vector<2x512xf32>
    %400 = arith.addf %399, %23 : vector<2x512xf32>
    %401 = vector.extract_strided_slice %400 {offsets = [0, 0], sizes = [2, 384], strides = [1, 1]} : vector<2x512xf32> to vector<2x384xf32>
    %402 = arith.negf %401 : vector<2x384xf32>
    %403 = math.exp %402 : vector<2x384xf32>
    %cst_114 = arith.constant 1.000000e+00 : f32
    %404 = vector.broadcast %cst_114 : f32 to vector<2x384xf32>
    %405 = arith.addf %404, %403 : vector<2x384xf32>
    %406 = arith.divf %404, %405 : vector<2x384xf32>
    %407 = vector.extract_strided_slice %400 {offsets = [0, 384], sizes = [2, 128], strides = [1, 1]} : vector<2x512xf32> to vector<2x128xf32>
    %408 = math.tanh %407 : vector<2x128xf32>
    %409 = vector.extract_strided_slice %406 {offsets = [0, 128], sizes = [2, 128], strides = [1, 1]} : vector<2x384xf32> to vector<2x128xf32>
    %410 = arith.mulf %409, %294 : vector<2x128xf32>
    %411 = vector.extract_strided_slice %406 {offsets = [0, 0], sizes = [2, 128], strides = [1, 1]} : vector<2x384xf32> to vector<2x128xf32>
    %412 = arith.mulf %411, %408 : vector<2x128xf32>
    %413 = arith.addf %410, %412 : vector<2x128xf32>
    %414 = vector.extract_strided_slice %406 {offsets = [0, 256], sizes = [2, 128], strides = [1, 1]} : vector<2x384xf32> to vector<2x128xf32>
    %415 = math.tanh %413 : vector<2x128xf32>
    %416 = arith.mulf %414, %415 : vector<2x128xf32>
    %417 = arith.truncf %416 : vector<2x128xf32> to vector<2x128xbf16>
    %c0_115 = arith.constant 0 : index
    %c0_116 = arith.constant 0 : index
    %c0_117 = arith.constant 0 : index
    %418 = vector.load %arg6[%c0_115, %c0_116, %c0_117] : memref<3x256x512xbf16, #tpu.memory_space<vmem>>, vector<1x256x512xbf16>
    %419 = vector.shape_cast %418 : vector<1x256x512xbf16> to vector<256x512xbf16>
    %420 = tpu.concatenate %417, %320 in 1 : vector<2x128xbf16>, vector<2x128xbf16> -> vector<2x256xbf16>
    %cst_118 = arith.constant dense<0.000000e+00> : vector<2x512xf32>
    %421 = tpu.matmul %420, %419, %cst_118 {dimension_numbers = #tpu.dot_dimension_numbers<[1], [0], [0], [1], [0, 0, 1, 1], [], []>} : vector<2x256xbf16>, vector<256x512xbf16>, vector<2x512xf32> -> vector<2x512xf32>
    %422 = arith.addf %421, %27 : vector<2x512xf32>
    %423 = vector.extract_strided_slice %422 {offsets = [0, 0], sizes = [2, 384], strides = [1, 1]} : vector<2x512xf32> to vector<2x384xf32>
    %424 = arith.negf %423 : vector<2x384xf32>
    %425 = math.exp %424 : vector<2x384xf32>
    %cst_119 = arith.constant 1.000000e+00 : f32
    %426 = vector.broadcast %cst_119 : f32 to vector<2x384xf32>
    %427 = arith.addf %426, %425 : vector<2x384xf32>
    %428 = arith.divf %426, %427 : vector<2x384xf32>
    %429 = vector.extract_strided_slice %422 {offsets = [0, 384], sizes = [2, 128], strides = [1, 1]} : vector<2x512xf32> to vector<2x128xf32>
    %430 = math.tanh %429 : vector<2x128xf32>
    %431 = vector.extract_strided_slice %428 {offsets = [0, 128], sizes = [2, 128], strides = [1, 1]} : vector<2x384xf32> to vector<2x128xf32>
    %432 = arith.mulf %431, %316 : vector<2x128xf32>
    %433 = vector.extract_strided_slice %428 {offsets = [0, 0], sizes = [2, 128], strides = [1, 1]} : vector<2x384xf32> to vector<2x128xf32>
    %434 = arith.mulf %433, %430 : vector<2x128xf32>
    %435 = arith.addf %432, %434 : vector<2x128xf32>
    %436 = vector.extract_strided_slice %428 {offsets = [0, 256], sizes = [2, 128], strides = [1, 1]} : vector<2x384xf32> to vector<2x128xf32>
    %437 = math.tanh %435 : vector<2x128xf32>
    %438 = arith.mulf %436, %437 : vector<2x128xf32>
    %439 = arith.truncf %438 : vector<2x128xf32> to vector<2x128xbf16>
    %440 = tpu.concatenate %439, %439 in 0 : vector<2x128xbf16>, vector<2x128xbf16> -> vector<4x128xbf16>
    %c1_120 = arith.constant 1 : index
    %c0_121 = arith.constant 0 : index
    %c0_122 = arith.constant 0 : index
    %441 = vector.load %arg6[%c1_120, %c0_121, %c0_122] : memref<3x256x512xbf16, #tpu.memory_space<vmem>>, vector<1x256x512xbf16>
    %442 = vector.shape_cast %441 : vector<1x256x512xbf16> to vector<256x512xbf16>
    %443 = tpu.concatenate %440, %343 in 1 : vector<4x128xbf16>, vector<4x128xbf16> -> vector<4x256xbf16>
    %cst_123 = arith.constant dense<0.000000e+00> : vector<4x512xf32>
    %444 = tpu.matmul %443, %442, %cst_123 {dimension_numbers = #tpu.dot_dimension_numbers<[1], [0], [0], [1], [0, 0, 1, 1], [], []>} : vector<4x256xbf16>, vector<256x512xbf16>, vector<4x512xf32> -> vector<4x512xf32>
    %445 = arith.addf %444, %31 : vector<4x512xf32>
    %446 = vector.extract_strided_slice %445 {offsets = [0, 0], sizes = [4, 384], strides = [1, 1]} : vector<4x512xf32> to vector<4x384xf32>
    %447 = arith.negf %446 : vector<4x384xf32>
    %448 = math.exp %447 : vector<4x384xf32>
    %cst_124 = arith.constant 1.000000e+00 : f32
    %449 = vector.broadcast %cst_124 : f32 to vector<4x384xf32>
    %450 = arith.addf %449, %448 : vector<4x384xf32>
    %451 = arith.divf %449, %450 : vector<4x384xf32>
    %452 = vector.extract_strided_slice %445 {offsets = [0, 384], sizes = [4, 128], strides = [1, 1]} : vector<4x512xf32> to vector<4x128xf32>
    %453 = math.tanh %452 : vector<4x128xf32>
    %454 = vector.extract_strided_slice %451 {offsets = [0, 128], sizes = [4, 128], strides = [1, 1]} : vector<4x384xf32> to vector<4x128xf32>
    %455 = arith.mulf %454, %339 : vector<4x128xf32>
    %456 = vector.extract_strided_slice %451 {offsets = [0, 0], sizes = [4, 128], strides = [1, 1]} : vector<4x384xf32> to vector<4x128xf32>
    %457 = arith.mulf %456, %453 : vector<4x128xf32>
    %458 = arith.addf %455, %457 : vector<4x128xf32>
    %459 = vector.extract_strided_slice %451 {offsets = [0, 256], sizes = [4, 128], strides = [1, 1]} : vector<4x384xf32> to vector<4x128xf32>
    %460 = math.tanh %458 : vector<4x128xf32>
    %461 = arith.mulf %459, %460 : vector<4x128xf32>
    %462 = arith.truncf %461 : vector<4x128xf32> to vector<4x128xbf16>
    %463 = vector.extract_strided_slice %462 {offsets = [0, 0], sizes = [2, 128], strides = [1, 1]} : vector<4x128xbf16> to vector<2x128xbf16>
    %464 = vector.extract_strided_slice %462 {offsets = [2, 0], sizes = [2, 128], strides = [1, 1]} : vector<4x128xbf16> to vector<2x128xbf16>
    %c2_125 = arith.constant 2 : index
    %c0_126 = arith.constant 0 : index
    %c0_127 = arith.constant 0 : index
    %465 = vector.load %arg6[%c2_125, %c0_126, %c0_127] : memref<3x256x512xbf16, #tpu.memory_space<vmem>>, vector<1x256x512xbf16>
    %466 = vector.shape_cast %465 : vector<1x256x512xbf16> to vector<256x512xbf16>
    %467 = tpu.concatenate %464, %367 in 1 : vector<2x128xbf16>, vector<2x128xbf16> -> vector<2x256xbf16>
    %cst_128 = arith.constant dense<0.000000e+00> : vector<2x512xf32>
    %468 = tpu.matmul %467, %466, %cst_128 {dimension_numbers = #tpu.dot_dimension_numbers<[1], [0], [0], [1], [0, 0, 1, 1], [], []>} : vector<2x256xbf16>, vector<256x512xbf16>, vector<2x512xf32> -> vector<2x512xf32>
    %469 = arith.addf %468, %35 : vector<2x512xf32>
    %470 = vector.extract_strided_slice %469 {offsets = [0, 0], sizes = [2, 384], strides = [1, 1]} : vector<2x512xf32> to vector<2x384xf32>
    %471 = arith.negf %470 : vector<2x384xf32>
    %472 = math.exp %471 : vector<2x384xf32>
    %cst_129 = arith.constant 1.000000e+00 : f32
    %473 = vector.broadcast %cst_129 : f32 to vector<2x384xf32>
    %474 = arith.addf %473, %472 : vector<2x384xf32>
    %475 = arith.divf %473, %474 : vector<2x384xf32>
    %476 = vector.extract_strided_slice %469 {offsets = [0, 384], sizes = [2, 128], strides = [1, 1]} : vector<2x512xf32> to vector<2x128xf32>
    %477 = math.tanh %476 : vector<2x128xf32>
    %478 = vector.extract_strided_slice %475 {offsets = [0, 128], sizes = [2, 128], strides = [1, 1]} : vector<2x384xf32> to vector<2x128xf32>
    %479 = arith.mulf %478, %363 : vector<2x128xf32>
    %480 = vector.extract_strided_slice %475 {offsets = [0, 0], sizes = [2, 128], strides = [1, 1]} : vector<2x384xf32> to vector<2x128xf32>
    %481 = arith.mulf %480, %477 : vector<2x128xf32>
    %482 = arith.addf %479, %481 : vector<2x128xf32>
    %483 = vector.extract_strided_slice %475 {offsets = [0, 256], sizes = [2, 128], strides = [1, 1]} : vector<2x384xf32> to vector<2x128xf32>
    %484 = math.tanh %482 : vector<2x128xf32>
    %485 = arith.mulf %483, %484 : vector<2x128xf32>
    %486 = arith.truncf %485 : vector<2x128xf32> to vector<2x128xbf16>
    %487 = tpu.concatenate %486, %387 in 1 : vector<2x128xbf16>, vector<2x128xbf16> -> vector<2x256xbf16>
    %cst_130 = arith.constant dense<0.000000e+00> : vector<2x512xf32>
    %488 = tpu.matmul %487, %466, %cst_130 {dimension_numbers = #tpu.dot_dimension_numbers<[1], [0], [0], [1], [0, 0, 1, 1], [], []>} : vector<2x256xbf16>, vector<256x512xbf16>, vector<2x512xf32> -> vector<2x512xf32>
    %489 = arith.addf %488, %35 : vector<2x512xf32>
    %490 = vector.extract_strided_slice %489 {offsets = [0, 0], sizes = [2, 384], strides = [1, 1]} : vector<2x512xf32> to vector<2x384xf32>
    %491 = arith.negf %490 : vector<2x384xf32>
    %492 = math.exp %491 : vector<2x384xf32>
    %cst_131 = arith.constant 1.000000e+00 : f32
    %493 = vector.broadcast %cst_131 : f32 to vector<2x384xf32>
    %494 = arith.addf %493, %492 : vector<2x384xf32>
    %495 = arith.divf %493, %494 : vector<2x384xf32>
    %496 = vector.extract_strided_slice %489 {offsets = [0, 384], sizes = [2, 128], strides = [1, 1]} : vector<2x512xf32> to vector<2x128xf32>
    %497 = math.tanh %496 : vector<2x128xf32>
    %498 = vector.extract_strided_slice %495 {offsets = [0, 128], sizes = [2, 128], strides = [1, 1]} : vector<2x384xf32> to vector<2x128xf32>
    %499 = arith.mulf %498, %383 : vector<2x128xf32>
    %500 = vector.extract_strided_slice %495 {offsets = [0, 0], sizes = [2, 128], strides = [1, 1]} : vector<2x384xf32> to vector<2x128xf32>
    %501 = arith.mulf %500, %497 : vector<2x128xf32>
    %502 = arith.addf %499, %501 : vector<2x128xf32>
    %503 = vector.extract_strided_slice %495 {offsets = [0, 256], sizes = [2, 128], strides = [1, 1]} : vector<2x384xf32> to vector<2x128xf32>
    %504 = math.tanh %502 : vector<2x128xf32>
    %505 = arith.mulf %503, %504 : vector<2x128xf32>
    %506 = arith.truncf %505 : vector<2x128xf32> to vector<2x128xbf16>
    %507 = tpu.concatenate %439, %463, %464, %486, %506 in 1 : vector<2x128xbf16>, vector<2x128xbf16>, vector<2x128xbf16>, vector<2x128xbf16>, vector<2x128xbf16> -> vector<2x640xbf16>
    %c0_132 = arith.constant 0 : index
    %c0_133 = arith.constant 0 : index
    %508 = vector.load %arg8[%c0_132, %c0_133] : memref<640x128xbf16, #tpu.memory_space<vmem>>, vector<640x128xbf16>
    %cst_134 = arith.constant dense<0.000000e+00> : vector<2x128xf32>
    %509 = tpu.matmul %507, %508, %cst_134 {dimension_numbers = #tpu.dot_dimension_numbers<[1], [0], [0], [1], [0, 0, 1, 1], [], []>} : vector<2x640xbf16>, vector<640x128xbf16>, vector<2x128xf32> -> vector<2x128xf32>
    %510 = arith.addf %509, %38 : vector<2x128xf32>
    %511 = arith.addf %510, %392 : vector<2x128xf32>
    %c3 = arith.constant 3 : index
    %c0_135 = arith.constant 0 : index
    %c0_136 = arith.constant 0 : index
    %512 = vector.load %arg10[%c3, %c0_135, %c0_136] : memref<4x2x128xf32, #tpu.memory_space<vmem>>, vector<1x2x128xf32>
    %513 = vector.shape_cast %512 : vector<1x2x128xf32> to vector<2x128xf32>
    %514 = vector.shape_cast %511 : vector<2x128xf32> to vector<1x2x128xf32>
    tpu.vector_store %arg10[%c3, %c0_135, %c0_136], %514 {strides = array<i32>} : memref<4x2x128xf32, #tpu.memory_space<vmem>>, vector<1x2x128xf32>,
    return
  }
}

</mosaic_0001>

<bundles_post_ra>
// kernel: kinematics_lstm_decoder.1
= control target key start
LH: loop header
LB: loop body
LE: loop exit
PB: predicated region body
PF: predicated region fallthrough
CT: control target
= control target key end

     0   :  { %vm38_vm0 = vcmask 1042432   ;;  %vm79_vm1 = vcmask 1041409   ;;  %vm1179_vm2 = vcmask 1040384   ;;  %vm14390_vm3 = vmmov 0   ;;  %s19489_s4 = inlined_call_operand.vmem [shape: bf16[256,512], index: 4, kind: input, shape index: {}]   ;;  %s19490_s0 = inlined_call_operand.vmem [shape: f32[2,3,128], index: 0, kind: input, shape index: {}]   ;;  %s19491_s6 = inlined_call_operand.vmem [shape: bf16[3,256,512], index: 6, kind: input, shape index: {}]   ;;  %s19492_s3 = inlined_call_operand.vmem [shape: f32[2,128], index: 3, kind: input, shape index: {}]   ;;  %s19493_s2 = inlined_call_operand.vmem [shape: f32[2,128], index: 2, kind: input, shape index: {}]   ;;  %s19494_s1 = inlined_call_operand.vmem [shape: f32[2,3,128], index: 1, kind: input, shape index: {}]   ;;  %s19495_s5 = inlined_call_operand.vmem [shape: f32[1,512], index: 5, kind: input, shape index: {}]   ;;  %s19496_s7 = inlined_call_operand.vmem [shape: f32[3,1,512], index: 7, kind: input, shape index: {}]   ;;  %s19497_s8 = inlined_call_operand.vmem [shape: bf16[640,128], index: 8, kind: input, shape index: {}]   ;;  %s19498_s9 = inlined_call_operand.vmem [shape: f32[1,128], index: 9, kind: input, shape index: {}]   ;;  %s19499_s10 = inlined_call_operand.vmem [shape: f32[4,2,128], index: 10, kind: output, shape index: {}]  }
   0x1   :  { %v12368_v0 = vld [vmem:[%s19489_s4 + $0x4] ss:$16 sps:$4 sm:$0xff]   ;;  %v12370_v1 = vld [vmem:[%s19489_s4] ss:$16 sps:$4 sm:$0xff]   ;;  %v12379_v5 = vld [vmem:[%s19489_s4 + $0xc] ss:$16 sps:$4 sm:$0xff]  }
   0x2   :  { %575 = vmatprep.subr.bf16.mxu0 %v12368_v0  ;;  %v12371_v2 = vld [vmem:[%s19489_s4 + $0x24] ss:$16 sps:$4 sm:$0xff]   ;;  %v12373_v3 = vld [vmem:[%s19489_s4 + $0x20] ss:$16 sps:$4 sm:$0xff]   ;;  %v12382_v6 = vld [vmem:[%s19489_s4 + $0x8] ss:$16 sps:$4 sm:$0xff]   ;;  %616 = vmatprep.subr.bf16.mxu1 %v12379_v5 }
   0x3   :  { %576 = vmatpush1.bf16.msra.mxu0 %v12370_v1  ;;  %v12374_v4 = vld [vmem:[%s19489_s4 + $0x44] ss:$16 sps:$4 sm:$0xff]   ;;  %v12376_v7 = vld [vmem:[%s19489_s4 + $0x40] ss:$16 sps:$4 sm:$0xff]   ;;  %617 = vmatpush1.bf16.msra.mxu1 %v12382_v6  ;;  %v12385_v9 = vld [vmem:[%s19489_s4 + $0x2c] ss:$16 sps:$4 sm:$0xff]  }
   0x4   :  { %577 = vmatprep.subr.bf16.mxu0 %v12371_v2  ;;  %v12377_v8 = vld [vmem:[%s19489_s4 + $0x64] ss:$16 sps:$4 sm:$0xff]   ;;  %v12388_v10 = vld [vmem:[%s19489_s4 + $0x28] ss:$16 sps:$4 sm:$0xff]   ;;  %618 = vmatprep.subr.bf16.mxu1 %v12385_v9  ;;  %v12381_v11 = vld [vmem:[%s19489_s4 + $0x60] ss:$16 sps:$4 sm:$0xff]  }
   0x5   :  { %v12383_v12 = vld [vmem:[%s19489_s4 + $0x84] ss:$16 sps:$4 sm:$0xff]   ;;  %v12391_v13 = vld [vmem:[%s19489_s4 + $0x4c] ss:$16 sps:$4 sm:$0xff]   ;;  %v12394_v14 = vld [vmem:[%s19489_s4 + $0x48] ss:$16 sps:$4 sm:$0xff]  }
   0x6   :  { %v12397_v15 = vld [vmem:[%s19489_s4 + $0x6c] ss:$16 sps:$4 sm:$0xff]   ;;  %v12387_v16 = vld [vmem:[%s19489_s4 + $0x80] ss:$16 sps:$4 sm:$0xff]   ;;  %v12389_v17 = vld [vmem:[%s19489_s4 + $0xa4] ss:$16 sps:$4 sm:$0xff]  }
   0x7   :  { %578 = vmatpush1.bf16.msra.mxu0 %v12373_v3  ;;  %619 = vmatpush1.bf16.msra.mxu1 %v12388_v10  ;;  %v12400_v18 = vld [vmem:[%s19489_s4 + $0x68] ss:$16 sps:$4 sm:$0xff]   ;;  %v12403_v19 = vld [vmem:[%s19489_s4 + $0x8c] ss:$16 sps:$4 sm:$0xff]   ;;  %v12393_v20 = vld [vmem:[%s19489_s4 + $0xa0] ss:$16 sps:$4 sm:$0xff]  }
   0x8   :  { %579 = vmatprep.subr.bf16.mxu0 %v12374_v4  ;;  %620 = vmatprep.subr.bf16.mxu1 %v12391_v13  ;;  %v12395_v21 = vld [vmem:[%s19489_s4 + $0xc4] ss:$16 sps:$4 sm:$0xff]   ;;  %v12406_v22 = vld [vmem:[%s19489_s4 + $0x88] ss:$16 sps:$4 sm:$0xff]   ;;  %v12409_v23 = vld [vmem:[%s19489_s4 + $0xac] ss:$16 sps:$4 sm:$0xff]  }
   0x9   :  { %v12399_v24 = vld [vmem:[%s19489_s4 + $0xc0] ss:$16 sps:$4 sm:$0xff]   ;;  %v12401_v25 = vld [vmem:[%s19489_s4 + $0xe4] ss:$16 sps:$4 sm:$0xff]   ;;  %v12412_v26 = vld [vmem:[%s19489_s4 + $0xa8] ss:$16 sps:$4 sm:$0xff]  }
   0xa   :  { %v12415_v27 = vld [vmem:[%s19489_s4 + $0xcc] ss:$16 sps:$4 sm:$0xff]   ;;  %v12405_v28 = vld [vmem:[%s19489_s4 + $0xe0] ss:$16 sps:$4 sm:$0xff]   ;;  %v12407_v29 = vld [vmem:[%s19489_s4 + $0x104] ss:$16 sps:$4 sm:$0xff]  }
   0xb   :  { %580 = vmatpush1.bf16.msra.mxu0 %v12376_v7  ;;  %621 = vmatpush1.bf16.msra.mxu1 %v12394_v14  ;;  %v12418_v30 = vld [vmem:[%s19489_s4 + $0xc8] ss:$16 sps:$4 sm:$0xff]   ;;  %v12421_v31 = vld [vmem:[%s19489_s4 + $0xec] ss:$16 sps:$4 sm:$0xff]   ;;  %v12411_v32 = vld [vmem:[%s19489_s4 + $0x100] ss:$16 sps:$4 sm:$0xff]  }
   0xc   :  { %581 = vmatprep.subr.bf16.mxu0 %v12377_v8  ;;  %622 = vmatprep.subr.bf16.mxu1 %v12397_v15  ;;  %v12413_v33 = vld [vmem:[%s19489_s4 + $0x124] ss:$16 sps:$4 sm:$0xff]   ;;  %v12424_v34 = vld [vmem:[%s19489_s4 + $0xe8] ss:$16 sps:$4 sm:$0xff]   ;;  %v12427_v35 = vld [vmem:[%s19489_s4 + $0x10c] ss:$16 sps:$4 sm:$0xff]  }
   0xd   :  { %v12417_v36 = vld [vmem:[%s19489_s4 + $0x120] ss:$16 sps:$4 sm:$0xff]   ;;  %v12419_v37 = vld [vmem:[%s19489_s4 + $0x144] ss:$16 sps:$4 sm:$0xff]   ;;  %v12430_v38 = vld [vmem:[%s19489_s4 + $0x108] ss:$16 sps:$4 sm:$0xff]  }
   0xe   :  { %v12433_v39 = vld [vmem:[%s19489_s4 + $0x12c] ss:$16 sps:$4 sm:$0xff]   ;;  %v12423_v40 = vld [vmem:[%s19489_s4 + $0x140] ss:$16 sps:$4 sm:$0xff]   ;;  %v12425_v42 = vld [vmem:[%s19489_s4 + $0x164] ss:$16 sps:$4 sm:$0xff]  }
   0xf   :  { %582 = vmatpush1.bf16.msra.mxu0 %v12381_v11  ;;  %623 = vmatpush1.bf16.msra.mxu1 %v12400_v18  ;;  %v36_v41 = vld [vmem:[%s19490_s0] sm:$0x7]  ;;  %v37_v43 = vld [vmem:[%s19490_s0 + $0x4] sm:$0x7]  ;;  %v12436_v45 = vld [vmem:[%s19489_s4 + $0x128] ss:$16 sps:$4 sm:$0xff]  }
  0x10   :  { %583 = vmatprep.subr.bf16.mxu0 %v12383_v12  ;;  %624 = vmatprep.subr.bf16.mxu1 %v12403_v19  ;;  %v39_v44 = vsel %vm38_vm0, %v36_v41, 0.0  ;;  %v46_v47 = vsel %vm38_vm0, %v37_v43, 0.0  ;;  %v12439_v48 = vld [vmem:[%s19489_s4 + $0x14c] ss:$16 sps:$4 sm:$0xff]   ;;  %v12429_v51 = vld [vmem:[%s19489_s4 + $0x160] ss:$16 sps:$4 sm:$0xff]  }
  0x11   :  { %v40_v46 = vrot.slane %v39_v44, 4  ;;  %v47_v49 = vrot.slane %v46_v47, 4  ;;  %v12431_v53 = vld [vmem:[%s19489_s4 + $0x184] ss:$16 sps:$4 sm:$0xff]   ;;  %v12442_v54 = vld [vmem:[%s19489_s4 + $0x148] ss:$16 sps:$4 sm:$0xff]  }
  0x12   :  { %v12445_v56 = vld [vmem:[%s19489_s4 + $0x16c] ss:$16 sps:$4 sm:$0xff]   ;;  %v12435_v59 = vld [vmem:[%s19489_s4 + $0x180] ss:$16 sps:$4 sm:$0xff]   ;;  %v12437_v61 = vld [vmem:[%s19489_s4 + $0x1a4] ss:$16 sps:$4 sm:$0xff]  }
  0x13   :  { %584 = vmatpush1.bf16.msra.mxu0 %v12387_v16  ;;  %625 = vmatpush1.bf16.msra.mxu1 %v12406_v22  ;;  %v41_v50 = vadd.f32 %v40_v46, %v39_v44  ;;  %v48_v52 = vadd.f32 %v47_v49, %v46_v47  ;;  %v12448_v62 = vld [vmem:[%s19489_s4 + $0x168] ss:$16 sps:$4 sm:$0xff]   ;;  %v12451_v0 = vld [vmem:[%s19489_s4 + $0x18c] ss:$16 sps:$4 sm:$0xff]   ;;  %v12441_v3 = vld [vmem:[%s19489_s4 + $0x1a0] ss:$16 sps:$4 sm:$0xff]  }
  0x14   :  { %585 = vmatprep.subr.bf16.mxu0 %v12389_v17  ;;  %626 = vmatprep.subr.bf16.mxu1 %v12409_v23  ;;  %v12443_v4 = vld [vmem:[%s19489_s4 + $0x1c4] ss:$16 sps:$4 sm:$0xff]   ;;  %v12454_v6 = vld [vmem:[%s19489_s4 + $0x188] ss:$16 sps:$4 sm:$0xff]   ;;  %v12455_v9 = vld [vmem:[%s19489_s4 + $0x1ac] ss:$16 sps:$4 sm:$0xff]  }
  0x15   :  { %v42_v55 = vrot.slane %v41_v50, 2  ;;  %v49_v57 = vrot.slane %v48_v52, 2  ;;  %v12447_v11 = vld [vmem:[%s19489_s4 + $0x1c0] ss:$16 sps:$4 sm:$0xff]   ;;  %v12449_v12 = vld [vmem:[%s19489_s4 + $0x1e4] ss:$16 sps:$4 sm:$0xff]  }
  0x16   :  { %v12457_v15 = vld [vmem:[%s19489_s4 + $0x1a8] ss:$16 sps:$4 sm:$0xff]   ;;  %v12458_v16 = vld [vmem:[%s19489_s4 + $0x1cc] ss:$16 sps:$4 sm:$0xff]   ;;  %v12453_v17 = vld [vmem:[%s19489_s4 + $0x1e0] ss:$16 sps:$4 sm:$0xff]  }
  0x17   :  { %586 = vmatpush1.bf16.msra.mxu0 %v12393_v20  ;;  %627 = vmatpush1.bf16.msra.mxu1 %v12412_v26  ;;  %v43_v58 = vadd.f32 %v42_v55, %v41_v50  ;;  %v50_v60 = vadd.f32 %v49_v57, %v48_v52  ;;  %v85_v19 = vld [vmem:[%s19492_s3] sm:$0x3]  ;;  %v12460_v20 = vld [vmem:[%s19489_s4 + $0x1c8] ss:$16 sps:$4 sm:$0xff]   ;;  %v12461_v23 = vld [vmem:[%s19489_s4 + $0x1ec] ss:$16 sps:$4 sm:$0xff]  }
  0x18   :  { %587 = vmatprep.subr.bf16.mxu0 %v12395_v21  ;;  %628 = vmatprep.subr.bf16.mxu1 %v12415_v27  ;;  %v12466_v21 = vld [vmem:[%s19491_s6 + $0x4] ss:$16 sps:$4 sm:$0xff]   ;;  %v183_v26 = vpack.c.bf16 %v85_v19, %v85_v19  ;;  %v12463_v27 = vld [vmem:[%s19489_s4 + $0x1e8] ss:$16 sps:$4 sm:$0xff]   ;;  %v12493_v43 = vld [vmem:[%s19491_s6 + $0x8c] ss:$16 sps:$4 sm:$0xff]  }
  0x19   :  { %v44_v63 = vrot.slane %v43_v58, 1  ;;  %v51_v1 = vrot.slane %v50_v60, 1  ;;  %v12485_v41 = vld [vmem:[%s19491_s6 + $0x68] ss:$16 sps:$4 sm:$0xff]   ;;  %v12488_v44 = vld [vmem:[%s19491_s6 + $0x80] ss:$16 sps:$4 sm:$0xff]  }
  0x1a   :  { %v12496_v46 = vld [vmem:[%s19491_s6 + $0xa4] ss:$16 sps:$4 sm:$0xff]   ;;  %v12499_v47 = vld [vmem:[%s19491_s6 + $0xac] ss:$16 sps:$4 sm:$0xff]   ;;  %v12497_v49 = vld [vmem:[%s19491_s6 + $0xa8] ss:$16 sps:$4 sm:$0xff]  }
  0x1b   :  { %588 = vmatpush1.bf16.msra.mxu0 %v12399_v24  ;;  %629 = vmatpush1.bf16.msra.mxu1 %v12418_v30  ;;  %v14610_v2 = vadd.f32 %v44_v63, %v43_v58  ;;  %v14618_v5 = vadd.f32 %v51_v1, %v50_v60  ;;  %v12470_v30 = vld [vmem:[%s19491_s6 + $0x20] ss:$16 sps:$4 sm:$0xff]   ;;  %v12502_v50 = vld [vmem:[%s19491_s6 + $0xc4] ss:$16 sps:$4 sm:$0xff]   ;;  %v12511_v55 = vld [vmem:[%s19491_s6 + $0xec] ss:$16 sps:$4 sm:$0xff]  }
  0x1c   :  { %589 = vmatprep.subr.bf16.mxu0 %v12401_v25  ;;  %630 = vmatprep.subr.bf16.mxu1 %v12421_v31  ;;  %v12464_v25 = vld [vmem:[%s19491_s6] ss:$16 sps:$4 sm:$0xff]   ;;  %v12467_v31 = vld [vmem:[%s19491_s6 + $0x8] ss:$16 sps:$4 sm:$0xff]   ;;  %v12514_v58 = vld [vmem:[%s19491_s6 + $0x104] ss:$16 sps:$4 sm:$0xff]  }
  0x1d   :  { %v72_v7 = vmul.f32 0.33333334, %v14610_v2  ;;  %v73_v8 = vmul.f32 0.33333334, %v14618_v5  ;;  %v12500_v52 = vld [vmem:[%s19491_s6 + $0xc0] ss:$16 sps:$4 sm:$0xff]  }
  0x1e   :  { %v12509_v57 = vld [vmem:[%s19491_s6 + $0xe8] ss:$16 sps:$4 sm:$0xff]   ;;  %v12512_v60 = vld [vmem:[%s19491_s6 + $0x100] ss:$16 sps:$4 sm:$0xff]   ;;  %v12523_v63 = vld [vmem:[%s19491_s6 + $0x12c] ss:$16 sps:$4 sm:$0xff]  }
  0x1f   :  { %590 = vmatpush1.bf16.msra.mxu0 %v12405_v28  ;;  %631 = vmatpush1.bf16.msra.mxu1 %v12424_v34  ;;  %v74_v10 = vpack.c.bf16 %v72_v7, %v72_v7  ;;  %v75_v13 = vpack.c.bf16 %v73_v8, %v73_v8  ;;  %v12472_v28 = vld [vmem:[%s19491_s6 + $0x24] ss:$16 sps:$4 sm:$0xff]   ;;  %v12476_v34 = vld [vmem:[%s19491_s6 + $0x40] ss:$16 sps:$4 sm:$0xff]   ;;  %v12521_v1 = vld [vmem:[%s19491_s6 + $0x128] ss:$16 sps:$4 sm:$0xff]  }
  0x20   :  { %591 = vmatprep.subr.bf16.mxu0 %v12407_v29  ;;  %632 = vmatprep.subr.bf16.mxu1 %v12427_v35  ;;  %v12469_v29 = vld [vmem:[%s19491_s6 + $0xc] ss:$16 sps:$4 sm:$0xff]   ;;  %v12473_v35 = vld [vmem:[%s19491_s6 + $0x28] ss:$16 sps:$4 sm:$0xff]   ;;  %v12532_v8 = vld [vmem:[%s19491_s6 + $0x164] ss:$16 sps:$4 sm:$0xff]  }
  0x21   :  { %v250_v14 = vunpack.c.l.b16 %v74_v10  ;;  %v251_v18 = vunpack.c.l.b16 %v75_v13  ;;  %v12527_v7 = vld [vmem:[%s19491_s6 + $0x148] ss:$16 sps:$4 sm:$0xff]   ;;  %v12530_v10 = vld [vmem:[%s19491_s6 + $0x160] ss:$16 sps:$4 sm:$0xff]   ;;  %v12541_v13 = vld [vmem:[%s19491_s6 + $0x18c] ss:$16 sps:$4 sm:$0xff]  }
  0x22   :  { %v12547_v19 = vld [vmem:[%s19491_s6 + $0x1ac] ss:$16 sps:$4 sm:$0xff]  }
  0x23   :  { %592 = vmatpush1.bf16.msra.mxu0 %v12411_v32  ;;  %633 = vmatpush1.bf16.msra.mxu1 %v12430_v38  ;;  %v252_v22 = vsel %vm79_vm1, %v251_v18, %v250_v14  ;;  %v12478_v32 = vld [vmem:[%s19491_s6 + $0x44] ss:$16 sps:$4 sm:$0xff]   ;;  %v12482_v38 = vld [vmem:[%s19491_s6 + $0x60] ss:$16 sps:$4 sm:$0xff]   ;;  %v12545_v18 = vld [vmem:[%s19491_s6 + $0x1a8] ss:$16 sps:$4 sm:$0xff]  }
  0x24   :  { %593 = vmatprep.subr.bf16.mxu0 %v12413_v33  ;;  %634 = vmatprep.subr.bf16.mxu1 %v12433_v39  ;;  %v253_v24 = vpack.c.b16 %v252_v22, %v252_v22  ;;  %v12475_v33 = vld [vmem:[%s19491_s6 + $0x2c] ss:$16 sps:$4 sm:$0xff]   ;;  %v12479_v39 = vld [vmem:[%s19491_s6 + $0x48] ss:$16 sps:$4 sm:$0xff]   ;;  %v12536_v14 = vld [vmem:[%s19491_s6 + $0x180] ss:$16 sps:$4 sm:$0xff]  }
  0x25   :  { %v12553_v22 = vld [vmem:[%s19491_s6 + $0x1cc] ss:$16 sps:$4 sm:$0xff]  }
  0x26   :  { %607 = vmatprep.mubr.bf16.mxu0 %v253_v24  ;;  %648 = vmatprep.mubr.bf16.mxu1 %v253_v24  ;;  %v12551_v24 = vld [vmem:[%s19491_s6 + $0x1c8] ss:$16 sps:$4 sm:$0xff]  }
  0x27   :  { %594 = vmatpush1.bf16.msra.mxu0 %v12417_v36  ;;  %635 = vmatpush1.bf16.msra.mxu1 %v12436_v45  ;;  %v12484_v36 = vld [vmem:[%s19491_s6 + $0x64] ss:$16 sps:$4 sm:$0xff]   ;;  %v12491_v45 = vld [vmem:[%s19491_s6 + $0x88] ss:$16 sps:$4 sm:$0xff]  }
  0x28   :  { %595 = vmatprep.subr.bf16.mxu0 %v12419_v37  ;;  %636 = vmatprep.subr.bf16.mxu1 %v12439_v48  ;;  %v12481_v37 = vld [vmem:[%s19491_s6 + $0x4c] ss:$16 sps:$4 sm:$0xff]   ;;  %v12494_v48 = vld [vmem:[%s19491_s6 + $0xa0] ss:$16 sps:$4 sm:$0xff]  }
  0x2b   :  { %596 = vmatpush1.bf16.msra.mxu0 %v12423_v40  ;;  %637 = vmatpush1.bf16.msra.mxu1 %v12442_v54  ;;  %v12487_v40 = vld [vmem:[%s19491_s6 + $0x6c] ss:$16 sps:$4 sm:$0xff]   ;;  %v12508_v54 = vld [vmem:[%s19491_s6 + $0xe4] ss:$16 sps:$4 sm:$0xff]  }
  0x2c   :  { %597 = vmatprep.subr.bf16.mxu0 %v12425_v42  ;;  %638 = vmatprep.subr.bf16.mxu1 %v12445_v56  ;;  %v12490_v42 = vld [vmem:[%s19491_s6 + $0x84] ss:$16 sps:$4 sm:$0xff]   ;;  %v12506_v56 = vld [vmem:[%s19491_s6 + $0xe0] ss:$16 sps:$4 sm:$0xff]  }
  0x2f   :  { %598 = vmatpush1.bf16.msra.mxu0 %v12429_v51  ;;  %639 = vmatpush1.bf16.msra.mxu1 %v12448_v62  ;;  %v12505_v51 = vld [vmem:[%s19491_s6 + $0xcc] ss:$16 sps:$4 sm:$0xff]   ;;  %v12520_v62 = vld [vmem:[%s19491_s6 + $0x124] ss:$16 sps:$4 sm:$0xff]  }
  0x30   :  { %599 = vmatprep.subr.bf16.mxu0 %v12431_v53  ;;  %640 = vmatprep.subr.bf16.mxu1 %v12451_v0  ;;  %v12503_v53 = vld [vmem:[%s19491_s6 + $0xc8] ss:$16 sps:$4 sm:$0xff]   ;;  %v12518_v0 = vld [vmem:[%s19491_s6 + $0x120] ss:$16 sps:$4 sm:$0xff]  }
  0x33   :  { %600 = vmatpush1.bf16.msra.mxu0 %v12435_v59  ;;  %641 = vmatpush1.bf16.msra.mxu1 %v12454_v6  ;;  %v12517_v59 = vld [vmem:[%s19491_s6 + $0x10c] ss:$16 sps:$4 sm:$0xff]   ;;  %v12524_v6 = vld [vmem:[%s19491_s6 + $0x140] ss:$16 sps:$4 sm:$0xff]  }
  0x34   :  { %601 = vmatprep.subr.bf16.mxu0 %v12437_v61  ;;  %642 = vmatprep.subr.bf16.mxu1 %v12455_v9  ;;  %v12515_v61 = vld [vmem:[%s19491_s6 + $0x108] ss:$16 sps:$4 sm:$0xff]   ;;  %v12535_v9 = vld [vmem:[%s19491_s6 + $0x16c] ss:$16 sps:$4 sm:$0xff]  }
  0x37   :  { %602 = vmatpush1.bf16.msra.mxu0 %v12441_v3  ;;  %643 = vmatpush1.bf16.msra.mxu1 %v12457_v15  ;;  %v12526_v3 = vld [vmem:[%s19491_s6 + $0x144] ss:$16 sps:$4 sm:$0xff]   ;;  %v12539_v15 = vld [vmem:[%s19491_s6 + $0x188] ss:$16 sps:$4 sm:$0xff]  }
  0x38   :  { %603 = vmatprep.subr.bf16.mxu0 %v12443_v4  ;;  %644 = vmatprep.subr.bf16.mxu1 %v12458_v16  ;;  %v12529_v4 = vld [vmem:[%s19491_s6 + $0x14c] ss:$16 sps:$4 sm:$0xff]   ;;  %v12542_v16 = vld [vmem:[%s19491_s6 + $0x1a0] ss:$16 sps:$4 sm:$0xff]  }
  0x3b   :  { %604 = vmatpush1.bf16.msra.mxu0 %v12447_v11  ;;  %645 = vmatpush1.bf16.msra.mxu1 %v12460_v20  ;;  %v12533_v11 = vld [vmem:[%s19491_s6 + $0x168] ss:$16 sps:$4 sm:$0xff]   ;;  %v12550_v20 = vld [vmem:[%s19491_s6 + $0x1c4] ss:$16 sps:$4 sm:$0xff]  }
  0x3c   :  { %605 = vmatprep.subr.bf16.mxu0 %v12449_v12  ;;  %646 = vmatprep.subr.bf16.mxu1 %v12461_v23  ;;  %v12538_v12 = vld [vmem:[%s19491_s6 + $0x184] ss:$16 sps:$4 sm:$0xff]   ;;  %v80_v23 = vsel %vm79_vm1, %v14618_v5, %v14610_v2  ;;  %v12554_v5 = vld [vmem:[%s19491_s6 + $0x1e0] ss:$16 sps:$4 sm:$0xff]  }
  0x3f   :  { %606 = vmatpush1.bf16.msra.mxu0 %v12453_v17  ;;  %647 = vmatpush1.bf16.msra.mxu1 %v12463_v27  ;;  %v12544_v17 = vld [vmem:[%s19491_s6 + $0x1a4] ss:$16 sps:$4 sm:$0xff]   ;;  %v76_v27 = vld [vmem:[%s19493_s2] sm:$0x3] }
  0x40   :  { %1070 = vmatprep.subr.bf16.mxu0 %v12466_v21  ;;  %1111 = vmatprep.subr.bf16.mxu1 %v12469_v29  ;;  %v12548_v21 = vld [vmem:[%s19491_s6 + $0x1c0] ss:$16 sps:$4 sm:$0xff]   ;;  %v82_v2 = vadd.f32 %v80_v23, %v76_v27 }
  0x42   :  { %608 = vmatmul.mubr.bf16.vlgmr.msra.gmra.mrb[0].mxu0 %v183_v26  ;;  %649 = vmatmul.mubr.bf16.vlgmr.msra.gmra.mrb[0].mxu1 %v183_v26  ;;  %v12559_v26 = vld [vmem:[%s19491_s6 + $0x1ec] ss:$16 sps:$4 sm:$0xff]   ;;  %v83_v29 = vmul.f32 0.25, %v82_v2 }
  0x43   :  { %1071 = vmatpush1.bf16.msra.mxu0 %v12464_v25  ;;  %1112 = vmatpush1.bf16.msra.mxu1 %v12467_v31  ;;  %v12556_v25 = vld [vmem:[%s19491_s6 + $0x1e4] ss:$16 sps:$4 sm:$0xff]  }
  0x44   :  { %1072 = vmatprep.subr.bf16.mxu0 %v12472_v28  ;;  %1113 = vmatprep.subr.bf16.mxu1 %v12475_v33  ;;  %v12557_v28 = vld [vmem:[%s19491_s6 + $0x1e8] ss:$16 sps:$4 sm:$0xff]   ;;  %v12562_v31 = vld [vmem:[%s19491_s6 + $0x204] ss:$16 sps:$4 sm:$0xff]   ;;  %v88_v33 = vlaneseq }
  0x47   :  { %1073 = vmatpush1.bf16.msra.mxu0 %v12470_v30  ;;  %1114 = vmatpush1.bf16.msra.mxu1 %v12473_v35  ;;  %v84_v30 = vpack.c.bf16 %v83_v29, %v83_v29  ;;  %v53_v35 = vld [vmem:[%s19494_s1] sm:$0x7]  ;;  %v12563_v29 = vld [vmem:[%s19491_s6 + $0x208] ss:$16 sps:$4 sm:$0xff]  }
  0x48   :  { %1074 = vmatprep.subr.bf16.mxu0 %v12478_v32  ;;  %1115 = vmatprep.subr.bf16.mxu1 %v12481_v37  ;;  %v12565_v32 = vld [vmem:[%s19491_s6 + $0x20c] ss:$16 sps:$4 sm:$0xff]   ;;  %v86_v37 = vld [vmem:[%s19495_s5] sm:$0xf] }
  0x49   :  { %1102 = vmatprep.mubr.bf16.mxu0 %v84_v30  ;;  %1143 = vmatprep.mubr.bf16.mxu1 %v84_v30 }
  0x4b   :  { %1075 = vmatpush1.bf16.msra.mxu0 %v12476_v34  ;;  %1116 = vmatpush1.bf16.msra.mxu1 %v12479_v39  ;;  %v89_v34 = vshrl.u32 %v88_v33, 7 }
  0x4c   :  { %1076 = vmatprep.subr.bf16.mxu0 %v12484_v36  ;;  %1117 = vmatprep.subr.bf16.mxu1 %v12487_v40  ;;  %v54_v36 = vld [vmem:[%s19494_s1 + $0x4] sm:$0x7]  ;;  %v55_v40 = vsel %vm38_vm0, %v53_v35, 0.0  ;;  %v12569_v35 = vld [vmem:[%s19491_s6 + $0x228] ss:$16 sps:$4 sm:$0xff]  }
  0x4d   :  { %v14871_v39 = vsub.s32 1, %v89_v34 }
  0x4f   :  { %1077 = vmatpush1.bf16.msra.mxu0 %v12482_v38  ;;  %1118 = vmatpush1.bf16.msra.mxu1 %v12485_v41  ;;  %v14869_v38 = vsub.s32 0, %v89_v34  ;;  %19656 = vst [vmem:[#allocation3_spill] sm:$0xff] %v14871_v39  ;;  %v62_v41 = vsel %vm38_vm0, %v54_v36, 0.0  ;;  %v12574_v36 = vld [vmem:[%s19491_s6 + $0x244] ss:$16 sps:$4 sm:$0xff]  }
  0x50   :  { %1078 = vmatprep.subr.bf16.mxu0 %v12490_v42  ;;  %1119 = vmatprep.subr.bf16.mxu1 %v12493_v43  ;;  %v56_v43 = vrot.slane %v55_v40, 4 }
  0x51   :  { %19655 = vst [vmem:[#allocation2_spill] sm:$0xff] %v14869_v38  ;;  %v14876_v42 = vrot.slane %v86_v37, %v14869_v38 }
  0x53   :  { %1079 = vmatpush1.bf16.msra.mxu0 %v12488_v44  ;;  %1120 = vmatpush1.bf16.msra.mxu1 %v12491_v45  ;;  %19657 = vst [vmem:[#allocation4_spill] sm:$0xff] %v14876_v42  ;;  %v14879_v44 = vrot.slane %v86_v37, %v14871_v39  ;;  %v63_v45 = vrot.slane %v62_v41, 4 }
  0x54   :  { %1080 = vmatprep.subr.bf16.mxu0 %v12496_v46  ;;  %1121 = vmatprep.subr.bf16.mxu1 %v12499_v47  ;;  %v14881_v46 = vsub.s32 2, %v89_v34 }
  0x55   :  { %19658 = vst [vmem:[#allocation5_spill] sm:$0xff] %v14879_v44 }
  0x57   :  { %1081 = vmatpush1.bf16.msra.mxu0 %v12494_v48  ;;  %1122 = vmatpush1.bf16.msra.mxu1 %v12497_v49 }
  0x58   :  { %1082 = vmatprep.subr.bf16.mxu0 %v12502_v50  ;;  %1123 = vmatprep.subr.bf16.mxu1 %v12505_v51  ;;  %v57_v50 = vadd.f32 %v56_v43, %v55_v40  ;;  %v12572_v40 = vld [vmem:[%s19491_s6 + $0x240] ss:$16 sps:$4 sm:$0xff]   ;;  %v12580_v43 = vld [vmem:[%s19491_s6 + $0x264] ss:$16 sps:$4 sm:$0xff]  }
  0x5b   :  { %1083 = vmatpush1.bf16.msra.mxu0 %v12500_v52  ;;  %1124 = vmatpush1.bf16.msra.mxu1 %v12503_v53  ;;  %v64_v53 = vadd.f32 %v63_v45, %v62_v41  ;;  %v12575_v41 = vld [vmem:[%s19491_s6 + $0x248] ss:$16 sps:$4 sm:$0xff]   ;;  %v12583_v45 = vld [vmem:[%s19491_s6 + $0x26c] ss:$16 sps:$4 sm:$0xff]  }
  0x5c   :  { %1084 = vmatprep.subr.bf16.mxu0 %v12508_v54  ;;  %1125 = vmatprep.subr.bf16.mxu1 %v12511_v55 }
  0x5f   :  { %1085 = vmatpush1.bf16.msra.mxu0 %v12506_v56  ;;  %1126 = vmatpush1.bf16.msra.mxu1 %v12509_v57  ;;  %v14886_v56 = vrot.slane %v86_v37, %v14881_v46 }
  0x60   :  { %1086 = vmatprep.subr.bf16.mxu0 %v12514_v58  ;;  %1127 = vmatprep.subr.bf16.mxu1 %v12517_v59  ;;  %v14888_v58 = vsub.s32 3, %v89_v34  ;;  %v12566_v34 = vld [vmem:[%s19491_s6 + $0x220] ss:$16 sps:$4 sm:$0xff]  }
  0x61   :  { %19659 = vst [vmem:[#allocation6_spill] sm:$0xff] %v14886_v56 }
  0x62   :  { %19660 = vst [vmem:[#allocation7_spill] sm:$0xff] %v14888_v58 }
  0x63   :  { %1087 = vmatpush1.bf16.msra.mxu0 %v12512_v60  ;;  %1128 = vmatpush1.bf16.msra.mxu1 %v12515_v61  ;;  %v58_v60 = vrot.slane %v57_v50, 2 }
  0x64   :  { %1088 = vmatprep.subr.bf16.mxu0 %v12520_v62  ;;  %1129 = vmatprep.subr.bf16.mxu1 %v12523_v63  ;;  %v65_v62 = vrot.slane %v64_v53, 2 }
  0x67   :  { %1089 = vmatpush1.bf16.msra.mxu0 %v12518_v0  ;;  %1130 = vmatpush1.bf16.msra.mxu1 %v12521_v1  ;;  %v14892_v1 = vrot.slane %v86_v37, %v14888_v58  ;;  %v12577_v37 = vld [vmem:[%s19491_s6 + $0x24c] ss:$16 sps:$4 sm:$0xff]  }
  0x68   :  { %1090 = vmatprep.subr.bf16.mxu0 %v12526_v3  ;;  %1131 = vmatprep.subr.bf16.mxu1 %v12529_v4  ;;  %v59_v4 = vadd.f32 %v58_v60, %v57_v50  ;;  %v12589_v50 = vld [vmem:[%s19491_s6 + $0x28c] ss:$16 sps:$4 sm:$0xff]  }
  0x69   :  { %19661 = vst [vmem:[#allocation8_spill] sm:$0xff] %v14892_v1  ;;  %v12601_v60 = vld [vmem:[%s19491_s6 + $0x2cc] ss:$16 sps:$4 sm:$0xff]  }
  0x6b   :  { %1091 = vmatpush1.bf16.msra.mxu0 %v12524_v6  ;;  %1132 = vmatpush1.bf16.msra.mxu1 %v12527_v7  ;;  %v66_v6 = vadd.f32 %v65_v62, %v64_v53  ;;  %v12592_v53 = vld [vmem:[%s19491_s6 + $0x2a4] ss:$16 sps:$4 sm:$0xff]   ;;  %v12599_v62 = vld [vmem:[%s19491_s6 + $0x2c8] ss:$16 sps:$4 sm:$0xff]  }
  0x6c   :  { %1092 = vmatprep.subr.bf16.mxu0 %v12532_v8  ;;  %1133 = vmatprep.subr.bf16.mxu1 %v12535_v9  ;;  %v60_v9 = vrot.slane %v59_v4, 1 }
  0x6f   :  { %1093 = vmatpush1.bf16.msra.mxu0 %v12530_v10  ;;  %1134 = vmatpush1.bf16.msra.mxu1 %v12533_v11  ;;  %v67_v11 = vrot.slane %v66_v6, 1 }
  0x70   :  { %1094 = vmatprep.subr.bf16.mxu0 %v12538_v12  ;;  %1135 = vmatprep.subr.bf16.mxu1 %v12541_v13 }
  0x73   :  { %1095 = vmatpush1.bf16.msra.mxu0 %v12536_v14  ;;  %1136 = vmatpush1.bf16.msra.mxu1 %v12539_v15  ;;  %v61_v15 = vadd.f32 %v60_v9, %v59_v4  ;;  %v12605_v4 = vld [vmem:[%s19491_s6 + $0x2e8] ss:$16 sps:$4 sm:$0xff]  }
  0x74   :  { %1096 = vmatprep.subr.bf16.mxu0 %v12544_v17  ;;  %1137 = vmatprep.subr.bf16.mxu1 %v12547_v19  ;;  %v12611_v9 = vld [vmem:[%s19491_s6 + $0x308] ss:$16 sps:$4 sm:$0xff]  }
  0x75   :  { %v70_v17 = vmul.f32 0.33333334, %v61_v15  ;;  %v12625_v15 = vld [vmem:[%s19491_s6 + $0x34c] ss:$16 sps:$4 sm:$0xff]  }
  0x77   :  { %1097 = vmatpush1.bf16.msra.mxu0 %v12542_v16  ;;  %1138 = vmatpush1.bf16.msra.mxu1 %v12545_v18  ;;  %v68_v16 = vadd.f32 %v67_v11, %v66_v6  ;;  %v12610_v6 = vld [vmem:[%s19491_s6 + $0x304] ss:$16 sps:$4 sm:$0xff]   ;;  %v12619_v11 = vld [vmem:[%s19491_s6 + $0x32c] ss:$16 sps:$4 sm:$0xff]  }
  0x78   :  { %1098 = vmatprep.subr.bf16.mxu0 %v12550_v20  ;;  %1139 = vmatprep.subr.bf16.mxu1 %v12553_v22 }
  0x79   :  { %v71_v18 = vmul.f32 0.33333334, %v68_v16  ;;  %v12620_v16 = vld [vmem:[%s19491_s6 + $0x340] ss:$16 sps:$4 sm:$0xff]  }
  0x7b   :  { %1099 = vmatpush1.bf16.msra.mxu0 %v12548_v21  ;;  %1140 = vmatpush1.bf16.msra.mxu1 %v12551_v24  ;;  %v14896_v21 = vsel %vm79_vm1, %v71_v18, %v70_v17  ;;  %v12623_v17 = vld [vmem:[%s19491_s6 + $0x348] ss:$16 sps:$4 sm:$0xff]   ;;  %v12628_v18 = vld [vmem:[%s19491_s6 + $0x364] ss:$16 sps:$4 sm:$0xff]  }
  0x7c   :  { %1100 = vmatprep.subr.bf16.mxu0 %v12556_v25  ;;  %1141 = vmatprep.subr.bf16.mxu1 %v12559_v26 }
  0x7f   :  { %1101 = vmatpush1.bf16.msra.mxu0 %v12554_v5  ;;  %1142 = vmatpush1.bf16.msra.mxu1 %v12557_v28  ;;  %v12560_v28 = vld [vmem:[%s19491_s6 + $0x200] ss:$16 sps:$4 sm:$0xff]  }
  0x80   :  { %1569 = vmatprep.subr.bf16.mxu0 %v12562_v31  ;;  %1610 = vmatprep.subr.bf16.mxu1 %v12565_v32  ;;  %v12568_v31 = vld [vmem:[%s19491_s6 + $0x224] ss:$16 sps:$4 sm:$0xff]   ;;  %v12571_v32 = vld [vmem:[%s19491_s6 + $0x22c] ss:$16 sps:$4 sm:$0xff]  }
 0x115   :  { %v609_v47 = vpop.f32.mrb[0].mxu0  ;;  %v650_v59 = vpop.f32.mrb[0].mxu1 }
 0x116   :  { %v610_v48 = vadd.f32 %v609_v47, %v14876_v42  ;;  %v611_v49 = vpop.f32.mrb[1].mxu0  ;;  %v652_v61 = vpop.f32.mrb[1].mxu1  ;;  %v651_v63 = vadd.f32 %v650_v59, %v14886_v56  ;;  %v12578_v47 = vld [vmem:[%s19491_s6 + $0x260] ss:$16 sps:$4 sm:$0xff]   ;;  %v12598_v59 = vld [vmem:[%s19491_s6 + $0x2c4] ss:$16 sps:$4 sm:$0xff]  }
 0x117   :  { %v612_v51 = vadd.f32 %v611_v49, %v14879_v44  ;;  %v613_v52 = vpop.f32.mrb[2].mxu0  ;;  %v654_v0 = vpop.f32.mrb[2].mxu1  ;;  %v653_v8 = vadd.f32 %v652_v61, %v14892_v1  ;;  %v12586_v49 = vld [vmem:[%s19491_s6 + $0x284] ss:$16 sps:$4 sm:$0xff]   ;;  %v12596_v61 = vld [vmem:[%s19491_s6 + $0x2c0] ss:$16 sps:$4 sm:$0xff]  }
 0x118   :  { %v10378_v54 = vmul.f32 -1.442695, %v610_v48  ;;  %v614_v55 = vpop.f32.mrb[3].mxu0  ;;  %v655_v3 = vpop.f32.mrb[3].mxu1  ;;  %v10380_v7 = vmul.f32 -1.442695, %v651_v63 }
 0x119   :  { %v10379_v57 = vmul.f32 -1.442695, %v612_v51  ;;  %v12581_v48 = vld [vmem:[%s19491_s6 + $0x268] ss:$16 sps:$4 sm:$0xff]   ;;  %v12584_v51 = vld [vmem:[%s19491_s6 + $0x280] ss:$16 sps:$4 sm:$0xff]  }
 0x11a   :  { %14064 = vpow2.f32 %v10378_v54  ;;  %v12587_v52 = vld [vmem:[%s19491_s6 + $0x288] ss:$16 sps:$4 sm:$0xff]   ;;  %v12595_v54 = vld [vmem:[%s19491_s6 + $0x2ac] ss:$16 sps:$4 sm:$0xff]   ;;  %v12590_v55 = vld [vmem:[%s19491_s6 + $0x2a0] ss:$16 sps:$4 sm:$0xff]  }
 0x11b   :  { %14066 = vpow2.f32 %v10379_v57  ;;  %v12593_v57 = vld [vmem:[%s19491_s6 + $0x2a8] ss:$16 sps:$4 sm:$0xff]   ;;  %v12604_v63 = vld [vmem:[%s19491_s6 + $0x2e4] ss:$16 sps:$4 sm:$0xff]   ;;  %v12607_v0 = vld [vmem:[%s19491_s6 + $0x2ec] ss:$16 sps:$4 sm:$0xff]  }
 0x11c   :  { %14068 = vpow2.f32 %v10380_v7  ;;  %v12602_v3 = vld [vmem:[%s19491_s6 + $0x2e0] ss:$16 sps:$4 sm:$0xff]   ;;  %v12613_v7 = vld [vmem:[%s19491_s6 + $0x30c] ss:$16 sps:$4 sm:$0xff]   ;;  %v15452_v56 = vld [vmem:[%s19491_s6 + $0x5a8] ss:$16 sps:$4 sm:$0xff]  }
 0x11d   :  { %14070 = vtanh.f32 %v653_v8  ;;  %v12608_v8 = vld [vmem:[%s19491_s6 + $0x300] ss:$16 sps:$4 sm:$0xff]   ;;  %19680 = vst [vmem:[#allocation27_spill] sm:$0xff] %v15452_v56  ;;  %v15459_v44 = vld [vmem:[%s19491_s6 + $0x5c4] ss:$16 sps:$4 sm:$0xff]  }
 0x11e   :  { %v15447_v1 = vld [vmem:[%s19491_s6 + $0x5a0] ss:$16 sps:$4 sm:$0xff]   ;;  %19681 = vst [vmem:[#allocation28_spill] sm:$0xff] %v15459_v44  ;;  %v15464_v42 = vld [vmem:[%s19491_s6 + $0x5cc] ss:$16 sps:$4 sm:$0xff]  }
 0x11f   :  { %19679 = vst [vmem:[#allocation26_spill] sm:$0xff] %v15447_v1  ;;  %19682 = vst [vmem:[#allocation29_spill] sm:$0xff] %v15464_v42 }
 0x124   :  { %v14065_v10 = vpop.eup %14064 }
 0x125   :  { %v14067_v12 = vpop.eup %14066  ;;  %v666_v13 = vadd.f32 1.0, %v14065_v10  ;;  %v12616_v10 = vld [vmem:[%s19491_s6 + $0x324] ss:$16 sps:$4 sm:$0xff]  }
 0x126   :  { %v667_v14 = vadd.f32 1.0, %v14067_v12  ;;  %v14069_v19 = vpop.eup %14068  ;;  %v12614_v12 = vld [vmem:[%s19491_s6 + $0x320] ss:$16 sps:$4 sm:$0xff]  }
 0x127   :  { %14072 = vrcp.f32 %v666_v13  ;;  %v14071_v20 = vpop.eup %14070  ;;  %v668_v23 = vadd.f32 1.0, %v14069_v19  ;;  %v12617_v13 = vld [vmem:[%s19491_s6 + $0x328] ss:$16 sps:$4 sm:$0xff]   ;;  %v12631_v19 = vld [vmem:[%s19491_s6 + $0x36c] ss:$16 sps:$4 sm:$0xff]  }
 0x128   :  { %14074 = vrcp.f32 %v667_v14  ;;  %v12622_v14 = vld [vmem:[%s19491_s6 + $0x344] ss:$16 sps:$4 sm:$0xff]  }
 0x129   :  { %14076 = vrcp.f32 %v668_v23  ;;  %v12632_v23 = vld [vmem:[%s19491_s6 + $0x380] ss:$16 sps:$4 sm:$0xff]  }
 0x131   :  { %v14073_v22 = vpop.eup %14072 }
 0x132   :  { %v14075_v24 = vpop.eup %14074  ;;  %v681_v25 = vmul.f32 %v14073_v22, %v14071_v20  ;;  %v12626_v20 = vld [vmem:[%s19491_s6 + $0x360] ss:$16 sps:$4 sm:$0xff]   ;;  %v12629_v22 = vld [vmem:[%s19491_s6 + $0x368] ss:$16 sps:$4 sm:$0xff]  }
 0x133   :  { %v680_v26 = vmul.f32 %v14075_v24, %v14896_v21  ;;  %v14077_v2 = vpop.eup %14076  ;;  %v12634_v24 = vld [vmem:[%s19491_s6 + $0x384] ss:$16 sps:$4 sm:$0xff]  }
 0x135   :  { %v14899_v27 = vadd.f32 %v681_v25, %v680_v26  ;;  %v12635_v25 = vld [vmem:[%s19491_s6 + $0x388] ss:$16 sps:$4 sm:$0xff]   ;;  %v12637_v26 = vld [vmem:[%s19491_s6 + $0x38c] ss:$16 sps:$4 sm:$0xff]  }
 0x137   :  { %19662 = vst [vmem:[#allocation9_spill] sm:$0xff] %v14899_v27  ;;  %14078 = vtanh.f32 %v14899_v27  ;;  %v15440_v27 = vld [vmem:[%s19491_s6 + $0x5ac] ss:$16 sps:$4 sm:$0xff]  }
 0x138   :  { %19678 = vst [vmem:[#allocation25_spill] sm:$0xff] %v15440_v27 }
 0x141   :  { %v14079_v5 = vpop.eup %14078 }
 0x142   :  { %v684_v30 = vmul.f32 %v14079_v5, %v14077_v2  ;;  %v12640_v2 = vld [vmem:[%s19491_s6 + $0x3a4] ss:$16 sps:$4 sm:$0xff]   ;;  %v12643_v5 = vld [vmem:[%s19491_s6 + $0x3ac] ss:$16 sps:$4 sm:$0xff]  }
 0x144   :  { %v14914_v33 = vpack.c.bf16 %v684_v30, %v684_v30  ;;  %v12646_v30 = vld [vmem:[%s19491_s6 + $0x3c4] ss:$16 sps:$4 sm:$0xff]  }
 0x146   :  { %19663 = vst [vmem:[#allocation10_spill] sm:$0xff] %v14914_v33  ;;  %1103 = vmatmul.mubr.bf16.vlgmr.msra.gmra.mrb[4].mxu0 %v14914_v33  ;;  %1144 = vmatmul.mubr.bf16.vlgmr.msra.gmra.mrb[4].mxu1 %v14914_v33  ;;  %v19683_v33 = vmov 0  }
 0x147   :  { %1570 = vmatpush1.bf16.msra.mxu0 %v12560_v28  ;;  %1611 = vmatpush1.bf16.msra.mxu1 %v12563_v29  ;;  %v12638_v28 = vld [vmem:[%s19491_s6 + $0x3a0] ss:$16 sps:$4 sm:$0xff]   ;;  %v12641_v29 = vld [vmem:[%s19491_s6 + $0x3a8] ss:$16 sps:$4 sm:$0xff]  }
 0x148   :  { %1571 = vmatprep.subr.bf16.mxu0 %v12568_v31  ;;  %1612 = vmatprep.subr.bf16.mxu1 %v12571_v32  ;;  %v12649_v31 = vld [vmem:[%s19491_s6 + $0x3cc] ss:$16 sps:$4 sm:$0xff]   ;;  %v19500_v32 = vmov 0  }
 0x149   :  { %1601 = vmatprep.mubr.bf16.mxu0 %v19500_v32  ;;  %1642 = vmatprep.mubr.bf16.mxu1 %v19500_v32  ;;  %v15404_v32 = vld [vmem:[%s19491_s6 + $0x568] ss:$16 sps:$4 sm:$0xff]  }
 0x14a   :  { %19672 = vst [vmem:[#allocation19_spill] sm:$0xff] %v15404_v32 }
 0x14b   :  { %1572 = vmatpush1.bf16.msra.mxu0 %v12566_v34  ;;  %1613 = vmatpush1.bf16.msra.mxu1 %v12569_v35  ;;  %v12644_v34 = vld [vmem:[%s19491_s6 + $0x3c0] ss:$16 sps:$4 sm:$0xff]   ;;  %v12647_v35 = vld [vmem:[%s19491_s6 + $0x3c8] ss:$16 sps:$4 sm:$0xff]  }
 0x14c   :  { %1573 = vmatprep.subr.bf16.mxu0 %v12574_v36  ;;  %1614 = vmatprep.subr.bf16.mxu1 %v12577_v37  ;;  %v12652_v36 = vld [vmem:[%s19491_s6 + $0x3e4] ss:$16 sps:$4 sm:$0xff]   ;;  %v12655_v37 = vld [vmem:[%s19491_s6 + $0x3ec] ss:$16 sps:$4 sm:$0xff]  }
 0x14f   :  { %1574 = vmatpush1.bf16.msra.mxu0 %v12572_v40  ;;  %1615 = vmatpush1.bf16.msra.mxu1 %v12575_v41  ;;  %v12650_v40 = vld [vmem:[%s19491_s6 + $0x3e0] ss:$16 sps:$4 sm:$0xff]   ;;  %v12653_v41 = vld [vmem:[%s19491_s6 + $0x3e8] ss:$16 sps:$4 sm:$0xff]  }
 0x150   :  { %1575 = vmatprep.subr.bf16.mxu0 %v12580_v43  ;;  %1616 = vmatprep.subr.bf16.mxu1 %v12583_v45  ;;  %v15097_v43 = vld [vmem:[%s19491_s6 + $0x404] ss:$16 sps:$4 sm:$0xff]   ;;  %v15102_v45 = vld [vmem:[%s19491_s6 + $0x40c] ss:$16 sps:$4 sm:$0xff]  }
 0x153   :  { %1576 = vmatpush1.bf16.msra.mxu0 %v12578_v47  ;;  %1617 = vmatpush1.bf16.msra.mxu1 %v12581_v48  ;;  %v108_v47 = vld [vmem:[%s19496_s7] sm:$0xf] }
 0x154   :  { %1577 = vmatprep.subr.bf16.mxu0 %v12586_v49  ;;  %1618 = vmatprep.subr.bf16.mxu1 %v12589_v50  ;;  %v15110_v48 = vrot.slane %v108_v47, %v14869_v38  ;;  %v15113_v49 = vrot.slane %v108_v47, %v14871_v39 }
 0x156   :  { %19664 = vst [vmem:[#allocation11_spill] sm:$0xff] %v15110_v48  ;;  %19665 = vst [vmem:[#allocation12_spill] sm:$0xff] %v15113_v49 }
 0x157   :  { %1578 = vmatpush1.bf16.msra.mxu0 %v12584_v51  ;;  %1619 = vmatpush1.bf16.msra.mxu1 %v12587_v52 }
 0x158   :  { %1579 = vmatprep.subr.bf16.mxu0 %v12592_v53  ;;  %1620 = vmatprep.subr.bf16.mxu1 %v12595_v54 }
 0x15b   :  { %1580 = vmatpush1.bf16.msra.mxu0 %v12590_v55  ;;  %1621 = vmatpush1.bf16.msra.mxu1 %v12593_v57 }
 0x15c   :  { %1581 = vmatprep.subr.bf16.mxu0 %v12598_v59  ;;  %1622 = vmatprep.subr.bf16.mxu1 %v12601_v60 }
 0x15f   :  { %1582 = vmatpush1.bf16.msra.mxu0 %v12596_v61  ;;  %1623 = vmatpush1.bf16.msra.mxu1 %v12599_v62 }
 0x160   :  { %1583 = vmatprep.subr.bf16.mxu0 %v12604_v63  ;;  %1624 = vmatprep.subr.bf16.mxu1 %v12607_v0  ;;  %v15118_v0 = vrot.slane %v108_v47, %v14881_v46 }
 0x162   :  { %19666 = vst [vmem:[#allocation13_spill] sm:$0xff] %v15118_v0 }
 0x163   :  { %1584 = vmatpush1.bf16.msra.mxu0 %v12602_v3  ;;  %1625 = vmatpush1.bf16.msra.mxu1 %v12605_v4  ;;  %v15121_v3 = vrot.slane %v108_v47, %v14888_v58  ;;  %v15212_v47 = vld [vmem:[%s19491_s6 + $0x468] ss:$16 sps:$4 sm:$0xff]  }
 0x164   :  { %1585 = vmatprep.subr.bf16.mxu0 %v12610_v6  ;;  %1626 = vmatprep.subr.bf16.mxu1 %v12613_v7 }
 0x165   :  { %19667 = vst [vmem:[#allocation14_spill] sm:$0xff] %v15121_v3 }
 0x167   :  { %1586 = vmatpush1.bf16.msra.mxu0 %v12608_v8  ;;  %1627 = vmatpush1.bf16.msra.mxu1 %v12611_v9 }
 0x168   :  { %1587 = vmatprep.subr.bf16.mxu0 %v12616_v10  ;;  %1628 = vmatprep.subr.bf16.mxu1 %v12619_v11 }
 0x16b   :  { %1588 = vmatpush1.bf16.msra.mxu0 %v12614_v12  ;;  %1629 = vmatpush1.bf16.msra.mxu1 %v12617_v13 }
 0x16c   :  { %1589 = vmatprep.subr.bf16.mxu0 %v12622_v14  ;;  %1630 = vmatprep.subr.bf16.mxu1 %v12625_v15 }
 0x16f   :  { %1590 = vmatpush1.bf16.msra.mxu0 %v12620_v16  ;;  %1631 = vmatpush1.bf16.msra.mxu1 %v12623_v17 }
 0x170   :  { %1591 = vmatprep.subr.bf16.mxu0 %v12628_v18  ;;  %1632 = vmatprep.subr.bf16.mxu1 %v12631_v19 }
 0x173   :  { %1592 = vmatpush1.bf16.msra.mxu0 %v12626_v20  ;;  %1633 = vmatpush1.bf16.msra.mxu1 %v12629_v22 }
 0x174   :  { %1593 = vmatprep.subr.bf16.mxu0 %v12634_v24  ;;  %1634 = vmatprep.subr.bf16.mxu1 %v12637_v26  ;;  %v15135_v26 = vld [vmem:[%s19491_s6 + $0x400] ss:$16 sps:$4 sm:$0xff]  }
 0x177   :  { %1594 = vmatpush1.bf16.msra.mxu0 %v12632_v23  ;;  %1635 = vmatpush1.bf16.msra.mxu1 %v12635_v25 }
 0x178   :  { %1595 = vmatprep.subr.bf16.mxu0 %v12640_v2  ;;  %1636 = vmatprep.subr.bf16.mxu1 %v12643_v5  ;;  %v15145_v2 = vld [vmem:[%s19491_s6 + $0x424] ss:$16 sps:$4 sm:$0xff]   ;;  %v15150_v5 = vld [vmem:[%s19491_s6 + $0x42c] ss:$16 sps:$4 sm:$0xff]  }
 0x17b   :  { %1596 = vmatpush1.bf16.msra.mxu0 %v12638_v28  ;;  %1637 = vmatpush1.bf16.msra.mxu1 %v12641_v29  ;;  %v15159_v29 = vld [vmem:[%s19491_s6 + $0x420] ss:$16 sps:$4 sm:$0xff]  }
 0x17c   :  { %1597 = vmatprep.subr.bf16.mxu0 %v12646_v30  ;;  %1638 = vmatprep.subr.bf16.mxu1 %v12649_v31  ;;  %v15164_v30 = vld [vmem:[%s19491_s6 + $0x428] ss:$16 sps:$4 sm:$0xff]   ;;  %v15171_v31 = vld [vmem:[%s19491_s6 + $0x444] ss:$16 sps:$4 sm:$0xff]  }
 0x17f   :  { %1598 = vmatpush1.bf16.msra.mxu0 %v12644_v34  ;;  %1639 = vmatpush1.bf16.msra.mxu1 %v12647_v35  ;;  %v15176_v34 = vld [vmem:[%s19491_s6 + $0x44c] ss:$16 sps:$4 sm:$0xff]   ;;  %v15183_v35 = vld [vmem:[%s19491_s6 + $0x440] ss:$16 sps:$4 sm:$0xff]  }
 0x180   :  { %1599 = vmatprep.subr.bf16.mxu0 %v12652_v36  ;;  %1640 = vmatprep.subr.bf16.mxu1 %v12655_v37  ;;  %v15188_v36 = vld [vmem:[%s19491_s6 + $0x448] ss:$16 sps:$4 sm:$0xff]   ;;  %v15195_v37 = vld [vmem:[%s19491_s6 + $0x464] ss:$16 sps:$4 sm:$0xff]  }
 0x183   :  { %1600 = vmatpush1.bf16.msra.mxu0 %v12650_v40  ;;  %1641 = vmatpush1.bf16.msra.mxu1 %v12653_v41  ;;  %v15200_v40 = vld [vmem:[%s19491_s6 + $0x46c] ss:$16 sps:$4 sm:$0xff]   ;;  %v15207_v41 = vld [vmem:[%s19491_s6 + $0x460] ss:$16 sps:$4 sm:$0xff]  }
 0x184   :  { %2067 = vmatprep.subr.bf16.mxu0 %v15097_v43  ;;  %2108 = vmatprep.subr.bf16.mxu1 %v15102_v45 }
 0x219   :  { %v1104_v50 = vpop.f32.mrb[4].mxu0  ;;  %v1145_v51 = vpop.f32.mrb[4].mxu1 }
 0x21a   :  { %v1105_v52 = vadd.f32 %v1104_v50, %v15110_v48  ;;  %v1106_v53 = vpop.f32.mrb[5].mxu0  ;;  %v1147_v54 = vpop.f32.mrb[5].mxu1  ;;  %v1146_v4 = vadd.f32 %v1145_v51, %v15118_v0  ;;  %v15221_v50 = vld [vmem:[%s19491_s6 + $0x484] ss:$16 sps:$4 sm:$0xff]   ;;  %v15226_v51 = vld [vmem:[%s19491_s6 + $0x48c] ss:$16 sps:$4 sm:$0xff]  }
 0x21b   :  { %v1107_v55 = vadd.f32 %v1106_v53, %v15113_v49  ;;  %v1108_v57 = vpop.f32.mrb[6].mxu0  ;;  %v1149_v59 = vpop.f32.mrb[6].mxu1  ;;  %v1148_v6 = vadd.f32 %v1147_v54, %v15121_v3  ;;  %v15236_v53 = vld [vmem:[%s19491_s6 + $0x488] ss:$16 sps:$4 sm:$0xff]   ;;  %v15245_v54 = vld [vmem:[%s19491_s6 + $0x4a4] ss:$16 sps:$4 sm:$0xff]  }
 0x21c   :  { %v10445_v60 = vmul.f32 -1.442695, %v1105_v52  ;;  %v1109_v61 = vpop.f32.mrb[7].mxu0  ;;  %v1150_v62 = vpop.f32.mrb[7].mxu1  ;;  %v10447_v7 = vmul.f32 -1.442695, %v1146_v4 }
 0x21d   :  { %v10446_v63 = vmul.f32 -1.442695, %v1107_v55  ;;  %v15231_v52 = vld [vmem:[%s19491_s6 + $0x480] ss:$16 sps:$4 sm:$0xff]   ;;  %v15250_v55 = vld [vmem:[%s19491_s6 + $0x4ac] ss:$16 sps:$4 sm:$0xff]  }
 0x21e   :  { %14080 = vpow2.f32 %v10445_v60  ;;  %v15255_v57 = vld [vmem:[%s19491_s6 + $0x4a0] ss:$16 sps:$4 sm:$0xff]   ;;  %v15260_v59 = vld [vmem:[%s19491_s6 + $0x4a8] ss:$16 sps:$4 sm:$0xff]   ;;  %v15269_v60 = vld [vmem:[%s19491_s6 + $0x4c4] ss:$16 sps:$4 sm:$0xff]  }
 0x21f   :  { %14082 = vpow2.f32 %v10446_v63  ;;  %v15274_v61 = vld [vmem:[%s19491_s6 + $0x4cc] ss:$16 sps:$4 sm:$0xff]   ;;  %v15279_v62 = vld [vmem:[%s19491_s6 + $0x4c0] ss:$16 sps:$4 sm:$0xff]   ;;  %v15284_v63 = vld [vmem:[%s19491_s6 + $0x4c8] ss:$16 sps:$4 sm:$0xff]  }
 0x220   :  { %14084 = vtanh.f32 %v1148_v6  ;;  %v15293_v4 = vld [vmem:[%s19491_s6 + $0x4e4] ss:$16 sps:$4 sm:$0xff]   ;;  %v15298_v6 = vld [vmem:[%s19491_s6 + $0x4ec] ss:$16 sps:$4 sm:$0xff]   ;;  %v15423_v0 = vld [vmem:[%s19491_s6 + $0x580] ss:$16 sps:$4 sm:$0xff]  }
 0x221   :  { %14086 = vpow2.f32 %v10447_v7  ;;  %v15303_v7 = vld [vmem:[%s19491_s6 + $0x4e0] ss:$16 sps:$4 sm:$0xff]   ;;  %v15418_v3 = vld [vmem:[%s19491_s6 + $0x58c] ss:$16 sps:$4 sm:$0xff]   ;;  %19675 = vst [vmem:[#allocation22_spill] sm:$0xff] %v15423_v0 }
 0x222   :  { %19674 = vst [vmem:[#allocation21_spill] sm:$0xff] %v15418_v3  ;;  %v15428_v49 = vld [vmem:[%s19491_s6 + $0x588] ss:$16 sps:$4 sm:$0xff]   ;;  %v15435_v48 = vld [vmem:[%s19491_s6 + $0x5a4] ss:$16 sps:$4 sm:$0xff]  }
 0x223   :  { %19676 = vst [vmem:[#allocation23_spill] sm:$0xff] %v15428_v49  ;;  %19677 = vst [vmem:[#allocation24_spill] sm:$0xff] %v15435_v48 }
 0x228   :  { %v14081_v8 = vpop.eup %14080 }
 0x229   :  { %v1161_v9 = vadd.f32 1.0, %v14081_v8  ;;  %v14083_v10 = vpop.eup %14082  ;;  %v15308_v8 = vld [vmem:[%s19491_s6 + $0x4e8] ss:$16 sps:$4 sm:$0xff]  }
 0x22a   :  { %v1162_v11 = vadd.f32 1.0, %v14083_v10  ;;  %v14085_v12 = vpop.eup %14084  ;;  %v15322_v10 = vld [vmem:[%s19491_s6 + $0x50c] ss:$16 sps:$4 sm:$0xff]  }
 0x22b   :  { %14088 = vrcp.f32 %v1161_v9  ;;  %v14087_v13 = vpop.eup %14086  ;;  %v15317_v9 = vld [vmem:[%s19491_s6 + $0x504] ss:$16 sps:$4 sm:$0xff]  }
 0x22c   :  { %14090 = vrcp.f32 %v1162_v11  ;;  %v1163_v17 = vadd.f32 1.0, %v14087_v13  ;;  %v15327_v11 = vld [vmem:[%s19491_s6 + $0x500] ss:$16 sps:$4 sm:$0xff]   ;;  %v15341_v13 = vld [vmem:[%s19491_s6 + $0x524] ss:$16 sps:$4 sm:$0xff]  }
 0x22e   :  { %14092 = vrcp.f32 %v1163_v17  ;;  %v15365_v17 = vld [vmem:[%s19491_s6 + $0x544] ss:$16 sps:$4 sm:$0xff]  }
 0x235   :  { %v14089_v14 = vpop.eup %14088 }
 0x236   :  { %v1172_v15 = vmul.f32 %v14089_v14, %v14085_v12  ;;  %v14091_v16 = vpop.eup %14090  ;;  %v15332_v12 = vld [vmem:[%s19491_s6 + $0x508] ss:$16 sps:$4 sm:$0xff]   ;;  %v15346_v14 = vld [vmem:[%s19491_s6 + $0x52c] ss:$16 sps:$4 sm:$0xff]  }
 0x237   :  { %v1171_v18 = vmul.f32 %v14091_v16, %v14896_v21  ;;  %v15140_v21 = vld [vmem:[%s19491_s6 + $0x408] ss:$16 sps:$4 sm:$0xff]  }
 0x238   :  { %v14093_v20 = vpop.eup %14092  ;;  %v15356_v16 = vld [vmem:[%s19491_s6 + $0x528] ss:$16 sps:$4 sm:$0xff]  }
 0x239   :  { %v15126_v19 = vadd.f32 %v1172_v15, %v1171_v18  ;;  %v15351_v15 = vld [vmem:[%s19491_s6 + $0x520] ss:$16 sps:$4 sm:$0xff]   ;;  %v15370_v18 = vld [vmem:[%s19491_s6 + $0x54c] ss:$16 sps:$4 sm:$0xff]  }
 0x23b   :  { %19668 = vst [vmem:[#allocation15_spill] sm:$0xff] %v15126_v19  ;;  %14094 = vtanh.f32 %v15126_v19  ;;  %v15413_v19 = vld [vmem:[%s19491_s6 + $0x584] ss:$16 sps:$4 sm:$0xff]  }
 0x23c   :  { %19673 = vst [vmem:[#allocation20_spill] sm:$0xff] %v15413_v19 }
 0x245   :  { %v14095_v22 = vpop.eup %14094 }
 0x246   :  { %v1175_v23 = vmul.f32 %v14095_v22, %v14093_v20  ;;  %v15375_v20 = vld [vmem:[%s19491_s6 + $0x540] ss:$16 sps:$4 sm:$0xff]   ;;  %v15380_v22 = vld [vmem:[%s19491_s6 + $0x548] ss:$16 sps:$4 sm:$0xff]  }
 0x248   :  { %v15129_v24 = vpack.c.bf16 %v1175_v23, %v1175_v23  ;;  %v15389_v23 = vld [vmem:[%s19491_s6 + $0x564] ss:$16 sps:$4 sm:$0xff]  }
 0x24a   :  { %19669 = vst [vmem:[#allocation16_spill] sm:$0xff] %v15129_v24  ;;  %v1178_v25 = vrot.slane %v15129_v24, 7 }
 0x24c   :  { %v1182_v28 = vsel %vm1179_vm2, %v15129_v24, %v1178_v25  ;;  %v15394_v25 = vld [vmem:[%s19491_s6 + $0x56c] ss:$16 sps:$4 sm:$0xff]   ;;  %v1744_v24 = vrot.slane %v19683_v33, 1 }
 0x24d   :  { %1602 = vmatmul.mubr.bf16.vlgmr.msra.gmra.mrb[8].mxu0 %v1182_v28  ;;  %1643 = vmatmul.mubr.bf16.vlgmr.msra.gmra.mrb[8].mxu1 %v1182_v28  ;;  %19670 = vst [vmem:[#allocation17_spill] sm:$0xff] %v15394_v25  ;;  %v15399_v28 = vld [vmem:[%s19491_s6 + $0x560] ss:$16 sps:$4 sm:$0xff]  }
 0x24e   :  { %2068 = vmatpush1.bf16.msra.mxu0 %v15135_v26  ;;  %2109 = vmatpush1.bf16.msra.mxu1 %v15140_v21  ;;  %19671 = vst [vmem:[#allocation18_spill] sm:$0xff] %v15399_v28 }
 0x24f   :  { %2069 = vmatprep.subr.bf16.mxu0 %v15145_v2  ;;  %2110 = vmatprep.subr.bf16.mxu1 %v15150_v5 }
 0x250   :  { %2099 = vmatprep.mubr.bf16.mxu0 %v1744_v24  ;;  %2140 = vmatprep.mubr.bf16.mxu1 %v1744_v24  ;;  %v10311_v24 = vld [vmem:[%s19496_s7 + $0x4] sm:$0xf] }
 0x252   :  { %2070 = vmatpush1.bf16.msra.mxu0 %v15159_v29  ;;  %2111 = vmatpush1.bf16.msra.mxu1 %v15164_v30 }
 0x253   :  { %2071 = vmatprep.subr.bf16.mxu0 %v15171_v31  ;;  %2112 = vmatprep.subr.bf16.mxu1 %v15176_v34 }
 0x256   :  { %2072 = vmatpush1.bf16.msra.mxu0 %v15183_v35  ;;  %2113 = vmatpush1.bf16.msra.mxu1 %v15188_v36 }
 0x257   :  { %2073 = vmatprep.subr.bf16.mxu0 %v15195_v37  ;;  %2114 = vmatprep.subr.bf16.mxu1 %v15200_v40 }
 0x25a   :  { %2074 = vmatpush1.bf16.msra.mxu0 %v15207_v41  ;;  %2115 = vmatpush1.bf16.msra.mxu1 %v15212_v47 }
 0x25b   :  { %2075 = vmatprep.subr.bf16.mxu0 %v15221_v50  ;;  %2116 = vmatprep.subr.bf16.mxu1 %v15226_v51 }
 0x25e   :  { %2076 = vmatpush1.bf16.msra.mxu0 %v15231_v52  ;;  %2117 = vmatpush1.bf16.msra.mxu1 %v15236_v53 }
 0x25f   :  { %2077 = vmatprep.subr.bf16.mxu0 %v15245_v54  ;;  %2118 = vmatprep.subr.bf16.mxu1 %v15250_v55 }
 0x262   :  { %2078 = vmatpush1.bf16.msra.mxu0 %v15255_v57  ;;  %2119 = vmatpush1.bf16.msra.mxu1 %v15260_v59 }
 0x263   :  { %2079 = vmatprep.subr.bf16.mxu0 %v15269_v60  ;;  %2120 = vmatprep.subr.bf16.mxu1 %v15274_v61 }
 0x266   :  { %2080 = vmatpush1.bf16.msra.mxu0 %v15279_v62  ;;  %2121 = vmatpush1.bf16.msra.mxu1 %v15284_v63 }
 0x267   :  { %2081 = vmatprep.subr.bf16.mxu0 %v15293_v4  ;;  %2122 = vmatprep.subr.bf16.mxu1 %v15298_v6 }
 0x26a   :  { %2082 = vmatpush1.bf16.msra.mxu0 %v15303_v7  ;;  %2123 = vmatpush1.bf16.msra.mxu1 %v15308_v8 }
 0x26b   :  { %2083 = vmatprep.subr.bf16.mxu0 %v15317_v9  ;;  %2124 = vmatprep.subr.bf16.mxu1 %v15322_v10 }
 0x26e   :  { %2084 = vmatpush1.bf16.msra.mxu0 %v15327_v11  ;;  %2125 = vmatpush1.bf16.msra.mxu1 %v15332_v12 }
 0x26f   :  { %2085 = vmatprep.subr.bf16.mxu0 %v15341_v13  ;;  %2126 = vmatprep.subr.bf16.mxu1 %v15346_v14 }
 0x272   :  { %2086 = vmatpush1.bf16.msra.mxu0 %v15351_v15  ;;  %2127 = vmatpush1.bf16.msra.mxu1 %v15356_v16 }
 0x273   :  { %2087 = vmatprep.subr.bf16.mxu0 %v15365_v17  ;;  %2128 = vmatprep.subr.bf16.mxu1 %v15370_v18 }
 0x276   :  { %2088 = vmatpush1.bf16.msra.mxu0 %v15375_v20  ;;  %2129 = vmatpush1.bf16.msra.mxu1 %v15380_v22 }
 0x277   :  { %2089 = vmatprep.subr.bf16.mxu0 %v15389_v23  ;;  %2130 = vmatprep.subr.bf16.mxu1 %v15394_v25 }
 0x27a   :  { %2090 = vmatpush1.bf16.msra.mxu0 %v15399_v28  ;;  %2131 = vmatpush1.bf16.msra.mxu1 %v15404_v32 }
 0x27b   :  { %2091 = vmatprep.subr.bf16.mxu0 %v15413_v19  ;;  %2132 = vmatprep.subr.bf16.mxu1 %v15418_v3 }
 0x27e   :  { %2092 = vmatpush1.bf16.msra.mxu0 %v15423_v0  ;;  %2133 = vmatpush1.bf16.msra.mxu1 %v15428_v49 }
 0x27f   :  { %2093 = vmatprep.subr.bf16.mxu0 %v15435_v48  ;;  %2134 = vmatprep.subr.bf16.mxu1 %v15440_v27  ;;  %v15472_v27 = vld [vmem:[%s19491_s6 + $0x5c0] ss:$16 sps:$4 sm:$0xff]   ;;  %v15477_v48 = vld [vmem:[%s19491_s6 + $0x5c8] ss:$16 sps:$4 sm:$0xff]  }
 0x280   :  { %19684 = vst [vmem:[#allocation30_spill] sm:$0xff] %v15472_v27  ;;  %19685 = vst [vmem:[#allocation31_spill] sm:$0xff] %v15477_v48 }
 0x282   :  { %2094 = vmatpush1.bf16.msra.mxu0 %v15447_v1  ;;  %2135 = vmatpush1.bf16.msra.mxu1 %v15452_v56  ;;  %v15484_v1 = vld [vmem:[%s19491_s6 + $0x5e4] ss:$16 sps:$4 sm:$0xff]   ;;  %v15489_v56 = vld [vmem:[%s19491_s6 + $0x5ec] ss:$16 sps:$4 sm:$0xff]  }
 0x283   :  { %2095 = vmatprep.subr.bf16.mxu0 %v15459_v44  ;;  %2136 = vmatprep.subr.bf16.mxu1 %v15464_v42  ;;  %19686 = vst [vmem:[#allocation32_spill] sm:$0xff] %v15484_v1  ;;  %19687 = vst [vmem:[#allocation33_spill] sm:$0xff] %v15489_v56  ;;  %v15496_v42 = vld [vmem:[%s19491_s6 + $0x5e0] ss:$16 sps:$4 sm:$0xff]   ;;  %v15501_v44 = vld [vmem:[%s19491_s6 + $0x5e8] ss:$16 sps:$4 sm:$0xff]  }
 0x284   :  { %19688 = vst [vmem:[#allocation34_spill] sm:$0xff] %v15496_v42  ;;  %19689 = vst [vmem:[#allocation35_spill] sm:$0xff] %v15501_v44 }
 0x286   :  { %2096 = vmatpush1.bf16.msra.mxu0 %v15472_v27  ;;  %2137 = vmatpush1.bf16.msra.mxu1 %v15477_v48  ;;  %v15513_v48 = vrot.slane %v10311_v24, %v14869_v38  ;;  %v15516_v27 = vrot.slane %v10311_v24, %v14871_v39  ;;  %v15521_v38 = vrot.slane %v10311_v24, %v14881_v46 }
 0x287   :  { %2097 = vmatprep.subr.bf16.mxu0 %v15484_v1  ;;  %2138 = vmatprep.subr.bf16.mxu1 %v15489_v56  ;;  %v15524_v39 = vrot.slane %v10311_v24, %v14888_v58 }
 0x288   :  { %19690 = vst [vmem:[#allocation36_spill] sm:$0xff] %v15513_v48  ;;  %19691 = vst [vmem:[#allocation37_spill] sm:$0xff] %v15516_v27 }
 0x28a   :  { %2098 = vmatpush1.bf16.msra.mxu0 %v15496_v42  ;;  %2139 = vmatpush1.bf16.msra.mxu1 %v15501_v44 }
 0x28b   :  { %2174 = vmatprep.subr.bf16.mxu0 %v15097_v43  ;;  %2215 = vmatprep.subr.bf16.mxu1 %v15102_v45 }
 0x320   :  { %v1603_v1 = vpop.f32.mrb[8].mxu0  ;;  %v1644_v56 = vpop.f32.mrb[8].mxu1 }
 0x321   :  { %v1604_v42 = vadd.f32 %v1603_v1, %v15513_v48  ;;  %v1605_v49 = vpop.f32.mrb[9].mxu0  ;;  %v1646_v44 = vpop.f32.mrb[9].mxu1  ;;  %v1645_v1 = vadd.f32 %v1644_v56, %v15521_v38 }
 0x322   :  { %v1606_v43 = vadd.f32 %v1605_v49, %v15516_v27  ;;  %v1607_v0 = vpop.f32.mrb[10].mxu0  ;;  %v1648_v45 = vpop.f32.mrb[10].mxu1  ;;  %v1647_v48 = vadd.f32 %v1646_v44, %v15524_v39 }
 0x323   :  { %v10576_v3 = vmul.f32 -1.442695, %v1604_v42  ;;  %v1608_v19 = vpop.f32.mrb[11].mxu0  ;;  %v1649_v32 = vpop.f32.mrb[11].mxu1  ;;  %v10578_v25 = vmul.f32 -1.442695, %v1645_v1 }
 0x324   :  { %v10577_v28 = vmul.f32 -1.442695, %v1606_v43 }
 0x325   :  { %14096 = vpow2.f32 %v10576_v3 }
 0x326   :  { %14098 = vpow2.f32 %v10577_v28 }
 0x327   :  { %14100 = vtanh.f32 %v1647_v48 }
 0x328   :  { %14102 = vpow2.f32 %v10578_v25 }
 0x32f   :  { %v14097_v49 = vpop.eup %14096 }
 0x330   :  { %v1660_v0 = vadd.f32 1.0, %v14097_v49  ;;  %v14099_v42 = vpop.eup %14098 }
 0x331   :  { %v1661_v32 = vadd.f32 1.0, %v14099_v42  ;;  %v14101_v3 = vpop.eup %14100 }
 0x332   :  { %14104 = vrcp.f32 %v1660_v0  ;;  %v14103_v19 = vpop.eup %14102 }
 0x333   :  { %14106 = vrcp.f32 %v1661_v32  ;;  %v1662_v24 = vadd.f32 1.0, %v14103_v19 }
 0x335   :  { %14108 = vrcp.f32 %v1662_v24 }
 0x33c   :  { %v14105_v43 = vpop.eup %14104 }
 0x33d   :  { %v1671_v28 = vmul.f32 %v14105_v43, %v14101_v3  ;;  %v14107_v45 = vpop.eup %14106 }
 0x33e   :  { %v1670_v27 = vmul.f32 0.0, %v14107_v45 }
 0x33f   :  { %v14109_v44 = vpop.eup %14108 }
 0x340   :  { %v15528_v58 = vadd.f32 %v1671_v28, %v1670_v27  ;;  %v19692_v27 = vld [vmem:[#allocation17_spill] sm:$0xff] }
 0x342   :  { %14110 = vtanh.f32 %v15528_v58 }
 0x34c   :  { %v14111_v56 = vpop.eup %14110 }
 0x34d   :  { %v1674_v48 = vmul.f32 %v14111_v56, %v14109_v44 }
 0x34f   :  { %v15531_v1 = vpack.c.bf16 %v1674_v48, %v1674_v48 }
 0x351   :  { %v15534_v25 = vrot.slane %v15531_v1, 1 }
 0x353   :  { %2100 = vmatmul.mubr.bf16.vlgmr.msra.gmra.mrb[12].mxu0 %v15534_v25  ;;  %2141 = vmatmul.mubr.bf16.vlgmr.msra.gmra.mrb[12].mxu1 %v15534_v25 }
 0x354   :  { %2175 = vmatpush1.bf16.msra.mxu0 %v15135_v26  ;;  %2216 = vmatpush1.bf16.msra.mxu1 %v15140_v21  ;;  %v19694_v26 = vld [vmem:[#allocation19_spill] sm:$0xff]  ;;  %v19695_v21 = vld [vmem:[#allocation20_spill] sm:$0xff] }
 0x355   :  { %2176 = vmatprep.subr.bf16.mxu0 %v15145_v2  ;;  %2217 = vmatprep.subr.bf16.mxu1 %v15150_v5  ;;  %v19696_v2 = vld [vmem:[#allocation21_spill] sm:$0xff]  ;;  %v19697_v5 = vld [vmem:[#allocation22_spill] sm:$0xff] }
 0x356   :  { %2206 = vmatprep.mubr.bf16.mxu0 %v19683_v33  ;;  %2247 = vmatprep.mubr.bf16.mxu1 %v19683_v33  ;;  %v19693_v33 = vld [vmem:[#allocation18_spill] sm:$0xff] }
 0x358   :  { %2177 = vmatpush1.bf16.msra.mxu0 %v15159_v29  ;;  %2218 = vmatpush1.bf16.msra.mxu1 %v15164_v30  ;;  %v19698_v29 = vld [vmem:[#allocation23_spill] sm:$0xff]  ;;  %v19699_v30 = vld [vmem:[#allocation24_spill] sm:$0xff] }
 0x359   :  { %2178 = vmatprep.subr.bf16.mxu0 %v15171_v31  ;;  %2219 = vmatprep.subr.bf16.mxu1 %v15176_v34  ;;  %v19700_v31 = vld [vmem:[#allocation25_spill] sm:$0xff]  ;;  %v19701_v34 = vld [vmem:[#allocation26_spill] sm:$0xff] }
 0x35c   :  { %2179 = vmatpush1.bf16.msra.mxu0 %v15183_v35  ;;  %2220 = vmatpush1.bf16.msra.mxu1 %v15188_v36  ;;  %v19702_v35 = vld [vmem:[#allocation27_spill] sm:$0xff]  ;;  %v19703_v36 = vld [vmem:[#allocation28_spill] sm:$0xff] }
 0x35d   :  { %2180 = vmatprep.subr.bf16.mxu0 %v15195_v37  ;;  %2221 = vmatprep.subr.bf16.mxu1 %v15200_v40  ;;  %v19704_v37 = vld [vmem:[#allocation29_spill] sm:$0xff]  ;;  %v19705_v40 = vld [vmem:[#allocation30_spill] sm:$0xff] }
 0x360   :  { %2181 = vmatpush1.bf16.msra.mxu0 %v15207_v41  ;;  %2222 = vmatpush1.bf16.msra.mxu1 %v15212_v47  ;;  %v19706_v41 = vld [vmem:[#allocation31_spill] sm:$0xff]  ;;  %v19707_v47 = vld [vmem:[#allocation32_spill] sm:$0xff] }
 0x361   :  { %2182 = vmatprep.subr.bf16.mxu0 %v15221_v50  ;;  %2223 = vmatprep.subr.bf16.mxu1 %v15226_v51  ;;  %v19708_v50 = vld [vmem:[#allocation33_spill] sm:$0xff]  ;;  %v19709_v51 = vld [vmem:[#allocation34_spill] sm:$0xff] }
 0x364   :  { %2183 = vmatpush1.bf16.msra.mxu0 %v15231_v52  ;;  %2224 = vmatpush1.bf16.msra.mxu1 %v15236_v53  ;;  %v19710_v52 = vld [vmem:[#allocation35_spill] sm:$0xff]  ;;  %v12752_v53 = vld [vmem:[%s19497_s8 + $0x40] sm:$0xff]  }
 0x365   :  { %2184 = vmatprep.subr.bf16.mxu0 %v15245_v54  ;;  %2225 = vmatprep.subr.bf16.mxu1 %v15250_v55  ;;  %v12753_v54 = vld [vmem:[%s19497_s8 + $0xc0] sm:$0xff]   ;;  %v10312_v55 = vld [vmem:[%s19496_s7 + $0x8] sm:$0xf] }
 0x368   :  { %2185 = vmatpush1.bf16.msra.mxu0 %v15255_v57  ;;  %2226 = vmatpush1.bf16.msra.mxu1 %v15260_v59  ;;  %v19711_v57 = vld [vmem:[#allocation2_spill] sm:$0xff] }
 0x369   :  { %2186 = vmatprep.subr.bf16.mxu0 %v15269_v60  ;;  %2227 = vmatprep.subr.bf16.mxu1 %v15274_v61  ;;  %v15612_v59 = vrot.slane %v10312_v55, %v19711_v57  ;;  %v15615_v60 = vrot.slane %v10312_v55, %v14881_v46  ;;  %v19714_v61 = vld [vmem:[#allocation3_spill] sm:$0xff] }
 0x36a   :  { %v12775_v57 = vld [vmem:[%s19497_s8 + $0xa8] sm:$0xff]  }
 0x36b   :  { %19712 = vst [vmem:[#allocation17_spill] sm:$0xff] %v15612_v59  ;;  %19713 = vst [vmem:[#allocation18_spill] sm:$0xff] %v15615_v60 }
 0x36c   :  { %2187 = vmatpush1.bf16.msra.mxu0 %v15279_v62  ;;  %2228 = vmatpush1.bf16.msra.mxu1 %v15284_v63  ;;  %v15618_v62 = vrot.slane %v10312_v55, %v19714_v61  ;;  %v12776_v61 = vld [vmem:[%s19497_s8 + $0x70] sm:$0xff]  }
 0x36d   :  { %2188 = vmatprep.subr.bf16.mxu0 %v15293_v4  ;;  %2229 = vmatprep.subr.bf16.mxu1 %v15298_v6 }
 0x36e   :  { %19715 = vst [vmem:[#allocation19_spill] sm:$0xff] %v15618_v62 }
 0x370   :  { %2189 = vmatpush1.bf16.msra.mxu0 %v15303_v7  ;;  %2230 = vmatpush1.bf16.msra.mxu1 %v15308_v8 }
 0x371   :  { %2190 = vmatprep.subr.bf16.mxu0 %v15317_v9  ;;  %2231 = vmatprep.subr.bf16.mxu1 %v15322_v10 }
 0x374   :  { %2191 = vmatpush1.bf16.msra.mxu0 %v15327_v11  ;;  %2232 = vmatpush1.bf16.msra.mxu1 %v15332_v12 }
 0x375   :  { %2192 = vmatprep.subr.bf16.mxu0 %v15341_v13  ;;  %2233 = vmatprep.subr.bf16.mxu1 %v15346_v14 }
 0x378   :  { %2193 = vmatpush1.bf16.msra.mxu0 %v15351_v15  ;;  %2234 = vmatpush1.bf16.msra.mxu1 %v15356_v16 }
 0x379   :  { %2194 = vmatprep.subr.bf16.mxu0 %v15365_v17  ;;  %2235 = vmatprep.subr.bf16.mxu1 %v15370_v18  ;;  %v19716_v17 = vld [vmem:[#allocation7_spill] sm:$0xff] }
 0x37a   :  { %v15624_v18 = vrot.slane %v10312_v55, %v19716_v17  ;;  %v12774_v55 = vld [vmem:[%s19497_s8 + $0x28] sm:$0xff]  }
 0x37b   :  { %v12789_v17 = vld [vmem:[%s19497_s8 + $0x128] sm:$0xff]  }
 0x37c   :  { %2195 = vmatpush1.bf16.msra.mxu0 %v15375_v20  ;;  %2236 = vmatpush1.bf16.msra.mxu1 %v15380_v22  ;;  %19717 = vst [vmem:[#allocation20_spill] sm:$0xff] %v15624_v18 }
 0x37d   :  { %2196 = vmatprep.subr.bf16.mxu0 %v15389_v23  ;;  %2237 = vmatprep.subr.bf16.mxu1 %v19692_v27  ;;  %v12754_v27 = vld [vmem:[%s19497_s8] sm:$0xff]  }
 0x380   :  { %2197 = vmatpush1.bf16.msra.mxu0 %v19693_v33  ;;  %2238 = vmatpush1.bf16.msra.mxu1 %v19694_v26  ;;  %v12755_v33 = vld [vmem:[%s19497_s8 + $0x80] sm:$0xff]  }
 0x381   :  { %2198 = vmatprep.subr.bf16.mxu0 %v19695_v21  ;;  %2239 = vmatprep.subr.bf16.mxu1 %v19696_v2  ;;  %v12756_v21 = vld [vmem:[%s19497_s8 + $0x48] sm:$0xff]  }
 0x382   :  { %v12757_v2 = vld [vmem:[%s19497_s8 + $0xc8] sm:$0xff]  }
 0x384   :  { %2199 = vmatpush1.bf16.msra.mxu0 %v19697_v5  ;;  %2240 = vmatpush1.bf16.msra.mxu1 %v19698_v29  ;;  %v12758_v5 = vld [vmem:[%s19497_s8 + $0x8] sm:$0xff]  }
 0x385   :  { %2200 = vmatprep.subr.bf16.mxu0 %v19699_v30  ;;  %2241 = vmatprep.subr.bf16.mxu1 %v19700_v31  ;;  %v12759_v29 = vld [vmem:[%s19497_s8 + $0x88] sm:$0xff]   ;;  %v12760_v30 = vld [vmem:[%s19497_s8 + $0x50] sm:$0xff]  }
 0x386   :  { %v12761_v31 = vld [vmem:[%s19497_s8 + $0xd0] sm:$0xff]  }
 0x388   :  { %2201 = vmatpush1.bf16.msra.mxu0 %v19701_v34  ;;  %2242 = vmatpush1.bf16.msra.mxu1 %v19702_v35  ;;  %v12762_v34 = vld [vmem:[%s19497_s8 + $0x10] sm:$0xff]  }
 0x389   :  { %2202 = vmatprep.subr.bf16.mxu0 %v19703_v36  ;;  %2243 = vmatprep.subr.bf16.mxu1 %v19704_v37  ;;  %v12763_v35 = vld [vmem:[%s19497_s8 + $0x90] sm:$0xff]   ;;  %v12764_v36 = vld [vmem:[%s19497_s8 + $0x58] sm:$0xff]  }
 0x38a   :  { %v12765_v37 = vld [vmem:[%s19497_s8 + $0xd8] sm:$0xff]  }
 0x38c   :  { %2203 = vmatpush1.bf16.msra.mxu0 %v19705_v40  ;;  %2244 = vmatpush1.bf16.msra.mxu1 %v19706_v41  ;;  %v12766_v40 = vld [vmem:[%s19497_s8 + $0x18] sm:$0xff]  }
 0x38d   :  { %2204 = vmatprep.subr.bf16.mxu0 %v19707_v47  ;;  %2245 = vmatprep.subr.bf16.mxu1 %v19708_v50  ;;  %v12767_v41 = vld [vmem:[%s19497_s8 + $0x98] sm:$0xff]   ;;  %v12768_v47 = vld [vmem:[%s19497_s8 + $0x60] sm:$0xff]  }
 0x38e   :  { %v12769_v50 = vld [vmem:[%s19497_s8 + $0xe0] sm:$0xff]  }
 0x390   :  { %2205 = vmatpush1.bf16.msra.mxu0 %v19709_v51  ;;  %2246 = vmatpush1.bf16.msra.mxu1 %v19710_v52  ;;  %v12770_v51 = vld [vmem:[%s19497_s8 + $0x20] sm:$0xff]  }
 0x391   :  { %12073 = vmatprep.subr.bf16.mxu0 %v12752_v53  ;;  %12095 = vmatprep.subr.bf16.mxu1 %v12753_v54  ;;  %v12771_v52 = vld [vmem:[%s19497_s8 + $0xa0] sm:$0xff]   ;;  %v12772_v53 = vld [vmem:[%s19497_s8 + $0x68] sm:$0xff]  }
 0x392   :  { %v12773_v54 = vld [vmem:[%s19497_s8 + $0xe8] sm:$0xff]  }
 0x426   :  { %v2101_v63 = vpop.f32.mrb[12].mxu0  ;;  %v2142_v4 = vpop.f32.mrb[12].mxu1 }
 0x427   :  { %v2102_v6 = vadd.f32 %v2101_v63, %v15612_v59  ;;  %v2143_v7 = vadd.f32 %v2142_v4, %v15615_v60  ;;  %v2103_v8 = vpop.f32.mrb[13].mxu0  ;;  %v2144_v9 = vpop.f32.mrb[13].mxu1  ;;  %v12777_v63 = vld [vmem:[%s19497_s8 + $0xf0] sm:$0xff]  }
 0x428   :  { %v2104_v10 = vadd.f32 %v2103_v8, %v15618_v62  ;;  %v2105_v11 = vpop.f32.mrb[14].mxu0  ;;  %v2146_v12 = vpop.f32.mrb[14].mxu1  ;;  %v2145_v20 = vadd.f32 %v2144_v9, %v15624_v18  ;;  %v12778_v4 = vld [vmem:[%s19497_s8 + $0x30] sm:$0xff]   ;;  %v12781_v8 = vld [vmem:[%s19497_s8 + $0xf8] sm:$0xff]  }
 0x429   :  { %v10707_v13 = vmul.f32 -1.442695, %v2102_v6  ;;  %v10709_v14 = vmul.f32 -1.442695, %v2143_v7  ;;  %v2106_v15 = vpop.f32.mrb[15].mxu0  ;;  %v2147_v46 = vpop.f32.mrb[15].mxu1 }
 0x42a   :  { %v10708_v16 = vmul.f32 -1.442695, %v2104_v10  ;;  %v12779_v6 = vld [vmem:[%s19497_s8 + $0xb0] sm:$0xff]   ;;  %v12780_v7 = vld [vmem:[%s19497_s8 + $0x78] sm:$0xff]   ;;  %v19720_v12 = vld [vmem:[#allocation10_spill] sm:$0xff] }
 0x42b   :  { %14112 = vpow2.f32 %v10707_v13  ;;  %v12782_v9 = vld [vmem:[%s19497_s8 + $0x38] sm:$0xff]   ;;  %v19719_v11 = vld [vmem:[#allocation16_spill] sm:$0xff]  ;;  %v12784_v13 = vld [vmem:[%s19497_s8 + $0x100] sm:$0xff]  }
 0x42c   :  { %14114 = vpow2.f32 %v10708_v16  ;;  %v12783_v10 = vld [vmem:[%s19497_s8 + $0xb8] sm:$0xff]   ;;  %v12785_v15 = vld [vmem:[%s19497_s8 + $0x108] sm:$0xff]   ;;  %v12788_v16 = vld [vmem:[%s19497_s8 + $0x120] sm:$0xff]  }
 0x42d   :  { %14116 = vtanh.f32 %v2145_v20  ;;  %v12787_v46 = vld [vmem:[%s19497_s8 + $0x118] sm:$0xff]   ;;  %v12790_v20 = vld [vmem:[%s19497_s8 + $0x130] sm:$0xff]  }
 0x42e   :  { %14118 = vpow2.f32 %v10709_v14  ;;  %v19550_v14 = vmov 0.0  }
 0x435   :  { %v14113_v22 = vpop.eup %14112 }
 0x436   :  { %v2158_v23 = vadd.f32 1.0, %v14113_v22  ;;  %v14115_v49 = vpop.eup %14114  ;;  %v12791_v22 = vld [vmem:[%s19497_s8 + $0x138] sm:$0xff]  }
 0x437   :  { %v2159_v0 = vadd.f32 1.0, %v14115_v49  ;;  %v14117_v42 = vpop.eup %14116  ;;  %v12794_v49 = vld [vmem:[%s19489_s4 + $0x4] ss:$16 sps:$4 sm:$0xff]  }
 0x438   :  { %14120 = vrcp.f32 %v2158_v23  ;;  %v14119_v32 = vpop.eup %14118  ;;  %v12792_v23 = vld [vmem:[%s19489_s4] ss:$16 sps:$4 sm:$0xff]  }
 0x439   :  { %14122 = vrcp.f32 %v2159_v0  ;;  %v2160_v28 = vadd.f32 1.0, %v14119_v32  ;;  %v12797_v0 = vld [vmem:[%s19489_s4 + $0xc] ss:$16 sps:$4 sm:$0xff]   ;;  %v12798_v32 = vld [vmem:[%s19489_s4 + $0x20] ss:$16 sps:$4 sm:$0xff]  }
 0x43b   :  { %14124 = vrcp.f32 %v2160_v28  ;;  %v12810_v28 = vld [vmem:[%s19489_s4 + $0x60] ss:$16 sps:$4 sm:$0xff]  }
 0x442   :  { %v14121_v3 = vpop.eup %14120 }
 0x443   :  { %v2169_v19 = vmul.f32 %v14121_v3, %v14117_v42  ;;  %v14123_v43 = vpop.eup %14122  ;;  %v12800_v42 = vld [vmem:[%s19489_s4 + $0x24] ss:$16 sps:$4 sm:$0xff]  }
 0x444   :  { %v2168_v45 = vmul.f32 0.0, %v14123_v43  ;;  %v12806_v3 = vld [vmem:[%s19489_s4 + $0x44] ss:$16 sps:$4 sm:$0xff]  }
 0x445   :  { %v14125_v44 = vpop.eup %14124  ;;  %v12812_v43 = vld [vmem:[%s19489_s4 + $0x64] ss:$16 sps:$4 sm:$0xff]  }
 0x446   :  { %v15627_v24 = vadd.f32 %v2169_v19, %v2168_v45  ;;  %v12804_v19 = vld [vmem:[%s19489_s4 + $0x40] ss:$16 sps:$4 sm:$0xff]   ;;  %v12818_v45 = vld [vmem:[%s19489_s4 + $0x84] ss:$16 sps:$4 sm:$0xff]  }
 0x448   :  { %19718 = vst [vmem:[#allocation21_spill] sm:$0xff] %v15627_v24  ;;  %14126 = vtanh.f32 %v15627_v24  ;;  %v16727_v24 = vld [vmem:[%s19491_s6 + $0x5a8] ss:$16 sps:$4 sm:$0xff]  }
 0x449   :  { %19749 = vst [vmem:[#allocation10_spill] sm:$0xff] %v16727_v24 }
 0x452   :  { %v14127_v56 = vpop.eup %14126 }
 0x453   :  { %v2172_v48 = vmul.f32 %v14127_v56, %v14125_v44  ;;  %v12816_v44 = vld [vmem:[%s19489_s4 + $0x80] ss:$16 sps:$4 sm:$0xff]   ;;  %v12824_v56 = vld [vmem:[%s19489_s4 + $0xa4] ss:$16 sps:$4 sm:$0xff]  }
 0x455   :  { %v15636_v26 = vpack.c.bf16 %v2172_v48, %v2172_v48  ;;  %v12822_v48 = vld [vmem:[%s19489_s4 + $0xa0] ss:$16 sps:$4 sm:$0xff]  }
 0x457   :  { %2207 = vmatmul.mubr.bf16.vlgmr.msra.gmra.mrb[16].mxu0 %v15636_v26  ;;  %2248 = vmatmul.mubr.bf16.vlgmr.msra.gmra.mrb[16].mxu1 %v15636_v26 }
 0x458   :  { %12074 = vmatpush3.bf16.msra.mxu0 %v12754_v27  ;;  %12096 = vmatpush3.bf16.msra.mxu1 %v12755_v33  ;;  %v12830_v27 = vld [vmem:[%s19489_s4 + $0xc4] ss:$16 sps:$4 sm:$0xff]   ;;  %v12828_v33 = vld [vmem:[%s19489_s4 + $0xc0] ss:$16 sps:$4 sm:$0xff]  }
 0x459   :  { %2633 = vmatprep.mubr.bf16.mxu0 %v15531_v1  ;;  %2673 = vmatprep.mubr.bf16.mxu1 %v15636_v26 }
 0x45a   :  { %12075 = vmatprep.subr.bf16.mxu0 %v12756_v21  ;;  %12097 = vmatprep.subr.bf16.mxu1 %v12757_v2  ;;  %v12836_v21 = vld [vmem:[%s19489_s4 + $0xe4] ss:$16 sps:$4 sm:$0xff]   ;;  %v12834_v2 = vld [vmem:[%s19489_s4 + $0xe0] ss:$16 sps:$4 sm:$0xff]  }
 0x45c   :  { %12076 = vmatpush3.bf16.msra.mxu0 %v12758_v5  ;;  %12098 = vmatpush3.bf16.msra.mxu1 %v12759_v29  ;;  %v12842_v5 = vld [vmem:[%s19489_s4 + $0x104] ss:$16 sps:$4 sm:$0xff]   ;;  %v12840_v29 = vld [vmem:[%s19489_s4 + $0x100] ss:$16 sps:$4 sm:$0xff]  }
 0x45d   :  { %12077 = vmatprep.subr.bf16.mxu0 %v12760_v30  ;;  %12099 = vmatprep.subr.bf16.mxu1 %v12761_v31  ;;  %v12848_v30 = vld [vmem:[%s19489_s4 + $0x124] ss:$16 sps:$4 sm:$0xff]   ;;  %v12846_v31 = vld [vmem:[%s19489_s4 + $0x120] ss:$16 sps:$4 sm:$0xff]  }
 0x460   :  { %12078 = vmatpush3.bf16.msra.mxu0 %v12762_v34  ;;  %12100 = vmatpush3.bf16.msra.mxu1 %v12763_v35  ;;  %v12854_v34 = vld [vmem:[%s19489_s4 + $0x144] ss:$16 sps:$4 sm:$0xff]   ;;  %v12852_v35 = vld [vmem:[%s19489_s4 + $0x140] ss:$16 sps:$4 sm:$0xff]  }
 0x461   :  { %12079 = vmatprep.subr.bf16.mxu0 %v12764_v36  ;;  %12101 = vmatprep.subr.bf16.mxu1 %v12765_v37  ;;  %v12860_v36 = vld [vmem:[%s19489_s4 + $0x164] ss:$16 sps:$4 sm:$0xff]   ;;  %v12858_v37 = vld [vmem:[%s19489_s4 + $0x160] ss:$16 sps:$4 sm:$0xff]  }
 0x464   :  { %12080 = vmatpush3.bf16.msra.mxu0 %v12766_v40  ;;  %12102 = vmatpush3.bf16.msra.mxu1 %v12767_v41  ;;  %v12866_v40 = vld [vmem:[%s19489_s4 + $0x184] ss:$16 sps:$4 sm:$0xff]   ;;  %v12864_v41 = vld [vmem:[%s19489_s4 + $0x180] ss:$16 sps:$4 sm:$0xff]  }
 0x465   :  { %12081 = vmatprep.subr.bf16.mxu0 %v12768_v47  ;;  %12103 = vmatprep.subr.bf16.mxu1 %v12769_v50  ;;  %v12872_v47 = vld [vmem:[%s19489_s4 + $0x1a4] ss:$16 sps:$4 sm:$0xff]   ;;  %v12870_v50 = vld [vmem:[%s19489_s4 + $0x1a0] ss:$16 sps:$4 sm:$0xff]  }
 0x468   :  { %12082 = vmatpush3.bf16.msra.mxu0 %v12770_v51  ;;  %12104 = vmatpush3.bf16.msra.mxu1 %v12771_v52  ;;  %v12878_v51 = vld [vmem:[%s19489_s4 + $0x1c4] ss:$16 sps:$4 sm:$0xff]   ;;  %v12876_v52 = vld [vmem:[%s19489_s4 + $0x1c0] ss:$16 sps:$4 sm:$0xff]  }
 0x469   :  { %12083 = vmatprep.subr.bf16.mxu0 %v12772_v53  ;;  %12105 = vmatprep.subr.bf16.mxu1 %v12773_v54 }
 0x46c   :  { %12084 = vmatpush3.bf16.msra.mxu0 %v12774_v55  ;;  %12106 = vmatpush3.bf16.msra.mxu1 %v12775_v57 }
 0x46d   :  { %12085 = vmatprep.subr.bf16.mxu0 %v12776_v61  ;;  %12107 = vmatprep.subr.bf16.mxu1 %v12777_v63 }
 0x470   :  { %12086 = vmatpush3.bf16.msra.mxu0 %v12778_v4  ;;  %12108 = vmatpush3.bf16.msra.mxu1 %v12779_v6 }
 0x471   :  { %12087 = vmatprep.subr.bf16.mxu0 %v12780_v7  ;;  %12109 = vmatprep.subr.bf16.mxu1 %v12781_v8 }
 0x474   :  { %12088 = vmatpush3.bf16.msra.mxu0 %v12782_v9  ;;  %12110 = vmatpush3.bf16.msra.mxu1 %v12783_v10 }
 0x475   :  { %12285 = vmatprep.subr.bf16.mxu0 %v19550_v14  ;;  %3108 = vmatprep.subr.bf16.mxu1 %v12794_v49 }
 0x477   :  { %2634 = vmatmul.mubr.bf16.vlgmr.msra.gmra.mrb[20].mxu0 %v19719_v11  ;;  %2674 = vmatmul.mubr.bf16.vlgmr.msra.gmra.mrb[20].mxu1 %v15534_v25  ;;  %v12786_v25 = vld [vmem:[%s19497_s8 + $0x110] sm:$0xff]  }
 0x478   :  { %3140 = vmatprep.mubr.bf16.mxu1 %v19720_v12  ;;  %12286 = vmatpush3.bf16.msra.mxu0 %v12784_v13 }
 0x479   :  { %12287 = vmatprep.subr.bf16.mxu0 %v19550_v14  ;;  %12301 = vmatprep.mubr.msk.bf16.mxu0 %vm14390_vm3, %v19550_v14 }
 0x47a   :  { %3109 = vmatpush1.bf16.msra.mxu1 %v12792_v23 }
 0x47b   :  { %3110 = vmatprep.subr.bf16.mxu1 %v12800_v42 }
 0x47c   :  { %12288 = vmatpush3.bf16.msra.mxu0 %v12785_v15 }
 0x47d   :  { %12289 = vmatprep.subr.bf16.mxu0 %v19550_v14 }
 0x47e   :  { %3111 = vmatpush1.bf16.msra.mxu1 %v12798_v32 }
 0x47f   :  { %3112 = vmatprep.subr.bf16.mxu1 %v12806_v3 }
 0x480   :  { %12290 = vmatpush3.bf16.msra.mxu0 %v12786_v25 }
 0x481   :  { %12291 = vmatprep.subr.bf16.mxu0 %v19550_v14 }
 0x482   :  { %3113 = vmatpush1.bf16.msra.mxu1 %v12804_v19 }
 0x483   :  { %3114 = vmatprep.subr.bf16.mxu1 %v12812_v43 }
 0x484   :  { %12292 = vmatpush3.bf16.msra.mxu0 %v12787_v46 }
 0x485   :  { %12293 = vmatprep.subr.bf16.mxu0 %v19550_v14 }
 0x486   :  { %3115 = vmatpush1.bf16.msra.mxu1 %v12810_v28 }
 0x487   :  { %3116 = vmatprep.subr.bf16.mxu1 %v12818_v45  ;;  %v10313_v45 = vld [vmem:[%s19498_s9] ss:$0 sm:$0xff] }
 0x488   :  { %12294 = vmatpush3.bf16.msra.mxu0 %v12788_v16 }
 0x489   :  { %12295 = vmatprep.subr.bf16.mxu0 %v19550_v14 }
 0x48a   :  { %3117 = vmatpush1.bf16.msra.mxu1 %v12816_v44 }
 0x48b   :  { %3118 = vmatprep.subr.bf16.mxu1 %v12824_v56 }
 0x48c   :  { %12296 = vmatpush3.bf16.msra.mxu0 %v12789_v17 }
 0x48d   :  { %12297 = vmatprep.subr.bf16.mxu0 %v19550_v14 }
 0x48e   :  { %3119 = vmatpush1.bf16.msra.mxu1 %v12822_v48 }
 0x48f   :  { %3120 = vmatprep.subr.bf16.mxu1 %v12830_v27 }
 0x490   :  { %12298 = vmatpush3.bf16.msra.mxu0 %v12790_v20 }
 0x491   :  { %12299 = vmatprep.subr.bf16.mxu0 %v19550_v14  ;;  %v16640_v14 = vld [vmem:[%s19491_s6 + $0x544] ss:$16 sps:$4 sm:$0xff]  }
 0x492   :  { %3121 = vmatpush1.bf16.msra.mxu1 %v12828_v33 }
 0x493   :  { %3122 = vmatprep.subr.bf16.mxu1 %v12836_v21 }
 0x494   :  { %12300 = vmatpush3.bf16.msra.mxu0 %v12791_v22 }
 0x495   :  { %3149 = vmatprep.subr.bf16.mxu0 %v12797_v0 }
 0x496   :  { %3123 = vmatpush1.bf16.msra.mxu1 %v12834_v2 }
 0x497   :  { %3124 = vmatprep.subr.bf16.mxu1 %v12842_v5 }
 0x49a   :  { %3125 = vmatpush1.bf16.msra.mxu1 %v12840_v29 }
 0x49b   :  { %3126 = vmatprep.subr.bf16.mxu1 %v12848_v30 }
 0x49e   :  { %3127 = vmatpush1.bf16.msra.mxu1 %v12846_v31 }
 0x49f   :  { %3128 = vmatprep.subr.bf16.mxu1 %v12854_v34 }
 0x4a2   :  { %3129 = vmatpush1.bf16.msra.mxu1 %v12852_v35 }
 0x4a3   :  { %3130 = vmatprep.subr.bf16.mxu1 %v12860_v36  ;;  %v12795_v36 = vld [vmem:[%s19489_s4 + $0x8] ss:$16 sps:$4 sm:$0xff]  }
 0x4a6   :  { %3131 = vmatpush1.bf16.msra.mxu1 %v12858_v37 }
 0x4a7   :  { %3132 = vmatprep.subr.bf16.mxu1 %v12866_v40  ;;  %v12803_v40 = vld [vmem:[%s19489_s4 + $0x2c] ss:$16 sps:$4 sm:$0xff]  }
 0x4aa   :  { %3133 = vmatpush1.bf16.msra.mxu1 %v12864_v41  ;;  %v12801_v41 = vld [vmem:[%s19489_s4 + $0x28] ss:$16 sps:$4 sm:$0xff]  }
 0x4ab   :  { %3134 = vmatprep.subr.bf16.mxu1 %v12872_v47  ;;  %v12809_v47 = vld [vmem:[%s19489_s4 + $0x4c] ss:$16 sps:$4 sm:$0xff]  }
 0x4ae   :  { %3135 = vmatpush1.bf16.msra.mxu1 %v12870_v50  ;;  %v12807_v50 = vld [vmem:[%s19489_s4 + $0x48] ss:$16 sps:$4 sm:$0xff]  }
 0x4af   :  { %3136 = vmatprep.subr.bf16.mxu1 %v12878_v51  ;;  %v12813_v51 = vld [vmem:[%s19489_s4 + $0x68] ss:$16 sps:$4 sm:$0xff]  }
 0x4b2   :  { %3137 = vmatpush1.bf16.msra.mxu1 %v12876_v52  ;;  %v12821_v52 = vld [vmem:[%s19489_s4 + $0x8c] ss:$16 sps:$4 sm:$0xff]  }
 0x52a   :  { %v2208_v53 = vpop.f32.mrb[16].mxu0  ;;  %v2249_v54 = vpop.f32.mrb[16].mxu1 }
 0x52b   :  { %v2209_v55 = vadd.f32 %v2208_v53, %v15612_v59  ;;  %v2210_v57 = vpop.f32.mrb[17].mxu0  ;;  %v2251_v61 = vpop.f32.mrb[17].mxu1  ;;  %v2250_v13 = vadd.f32 %v2249_v54, %v15615_v60  ;;  %v12819_v53 = vld [vmem:[%s19489_s4 + $0x88] ss:$16 sps:$4 sm:$0xff]   ;;  %v12827_v54 = vld [vmem:[%s19489_s4 + $0xac] ss:$16 sps:$4 sm:$0xff]  }
 0x52c   :  { %v2211_v63 = vadd.f32 %v2210_v57, %v15618_v62  ;;  %v2212_v4 = vpop.f32.mrb[18].mxu0  ;;  %v2253_v6 = vpop.f32.mrb[18].mxu1  ;;  %v2252_v15 = vadd.f32 %v2251_v61, %v15624_v18  ;;  %v12833_v57 = vld [vmem:[%s19489_s4 + $0xcc] ss:$16 sps:$4 sm:$0xff]   ;;  %v12831_v61 = vld [vmem:[%s19489_s4 + $0xc8] ss:$16 sps:$4 sm:$0xff]  }
 0x52d   :  { %v10710_v7 = vmul.f32 -1.442695, %v2209_v55  ;;  %v2213_v8 = vpop.f32.mrb[19].mxu0  ;;  %v2254_v9 = vpop.f32.mrb[19].mxu1  ;;  %v10712_v25 = vmul.f32 -1.442695, %v2250_v13 }
 0x52e   :  { %v10711_v10 = vmul.f32 -1.442695, %v2211_v63  ;;  %v12825_v55 = vld [vmem:[%s19489_s4 + $0xa8] ss:$16 sps:$4 sm:$0xff]   ;;  %v12839_v63 = vld [vmem:[%s19489_s4 + $0xec] ss:$16 sps:$4 sm:$0xff]  }
 0x52f   :  { %14128 = vpow2.f32 %v10710_v7  ;;  %v12837_v4 = vld [vmem:[%s19489_s4 + $0xe8] ss:$16 sps:$4 sm:$0xff]   ;;  %v12845_v6 = vld [vmem:[%s19489_s4 + $0x10c] ss:$16 sps:$4 sm:$0xff]   ;;  %v16734_v18 = vld [vmem:[%s19491_s6 + $0x5c4] ss:$16 sps:$4 sm:$0xff]  }
 0x530   :  { %14130 = vpow2.f32 %v10711_v10  ;;  %v12843_v7 = vld [vmem:[%s19489_s4 + $0x108] ss:$16 sps:$4 sm:$0xff]   ;;  %v12851_v8 = vld [vmem:[%s19489_s4 + $0x12c] ss:$16 sps:$4 sm:$0xff]   ;;  %v16746_v62 = vld [vmem:[%s19491_s6 + $0x5c0] ss:$16 sps:$4 sm:$0xff]  }
 0x531   :  { %14132 = vtanh.f32 %v2252_v15  ;;  %v12849_v9 = vld [vmem:[%s19489_s4 + $0x128] ss:$16 sps:$4 sm:$0xff]   ;;  %v12857_v10 = vld [vmem:[%s19489_s4 + $0x14c] ss:$16 sps:$4 sm:$0xff]   ;;  %19752 = vst [vmem:[#allocation38_spill] sm:$0xff] %v16746_v62 }
 0x532   :  { %14134 = vpow2.f32 %v10712_v25  ;;  %v12855_v13 = vld [vmem:[%s19489_s4 + $0x148] ss:$16 sps:$4 sm:$0xff]   ;;  %v12863_v15 = vld [vmem:[%s19489_s4 + $0x16c] ss:$16 sps:$4 sm:$0xff]  }
 0x533   :  { %v12861_v25 = vld [vmem:[%s19489_s4 + $0x168] ss:$16 sps:$4 sm:$0xff]   ;;  %v16739_v60 = vld [vmem:[%s19491_s6 + $0x5cc] ss:$16 sps:$4 sm:$0xff]  }
 0x534   :  { %v16751_v59 = vld [vmem:[%s19491_s6 + $0x5c8] ss:$16 sps:$4 sm:$0xff]  }
 0x535   :  { %19753 = vst [vmem:[#allocation39_spill] sm:$0xff] %v16751_v59 }
 0x539   :  { %v14129_v46 = vpop.eup %14128 }
 0x53a   :  { %v2265_v16 = vadd.f32 1.0, %v14129_v46  ;;  %v14131_v17 = vpop.eup %14130  ;;  %v12869_v46 = vld [vmem:[%s19489_s4 + $0x18c] ss:$16 sps:$4 sm:$0xff]  }
 0x53b   :  { %v2266_v20 = vadd.f32 1.0, %v14131_v17  ;;  %v14133_v22 = vpop.eup %14132  ;;  %v12875_v17 = vld [vmem:[%s19489_s4 + $0x1ac] ss:$16 sps:$4 sm:$0xff]  }
 0x53c   :  { %14136 = vrcp.f32 %v2265_v16  ;;  %v14135_v23 = vpop.eup %14134  ;;  %v12867_v16 = vld [vmem:[%s19489_s4 + $0x188] ss:$16 sps:$4 sm:$0xff]  }
 0x53d   :  { %14138 = vrcp.f32 %v2266_v20  ;;  %v2267_v32 = vadd.f32 1.0, %v14135_v23  ;;  %v12873_v20 = vld [vmem:[%s19489_s4 + $0x1a8] ss:$16 sps:$4 sm:$0xff]  }
 0x53e   :  { %v12879_v23 = vld [vmem:[%s19489_s4 + $0x1c8] ss:$16 sps:$4 sm:$0xff]  }
 0x53f   :  { %14140 = vrcp.f32 %v2267_v32  ;;  %v12885_v32 = vld [vmem:[%s19489_s4 + $0x1e8] ss:$16 sps:$4 sm:$0xff]  }
 0x546   :  { %v14137_v49 = vpop.eup %14136 }
 0x547   :  { %v2276_v0 = vmul.f32 %v14137_v49, %v14133_v22  ;;  %v14139_v42 = vpop.eup %14138  ;;  %v12881_v22 = vld [vmem:[%s19489_s4 + $0x1cc] ss:$16 sps:$4 sm:$0xff]   ;;  %v12884_v49 = vld [vmem:[%s19489_s4 + $0x1e4] ss:$16 sps:$4 sm:$0xff]  }
 0x548   :  { %v2275_v3 = vmul.f32 0.0, %v14139_v42  ;;  %v12882_v42 = vld [vmem:[%s19489_s4 + $0x1e0] ss:$16 sps:$4 sm:$0xff]   ;;  %3138 = vmatprep.subr.bf16.mxu1 %v12884_v49  ;;  %v12945_v49 = vld [vmem:[%s19491_s6 + $0x128] ss:$16 sps:$4 sm:$0xff]  }
 0x549   :  { %v14141_v31 = vpop.eup %14140  ;;  %3139 = vmatpush1.bf16.msra.mxu1 %v12882_v42  ;;  %v12953_v42 = vld [vmem:[%s19491_s6 + $0x14c] ss:$16 sps:$4 sm:$0xff]  }
 0x54a   :  { %v12089_v19 = vpop.f32.mrb[20].mxu0  ;;  %v12111_v43 = vpop.f32.mrb[20].mxu1  ;;  %v15860_v28 = vadd.f32 %v2276_v0, %v2275_v3  ;;  %v12887_v0 = vld [vmem:[%s19489_s4 + $0x1ec] ss:$16 sps:$4 sm:$0xff]   ;;  %v12890_v3 = vld [vmem:[%s19491_s6 + $0x4] ss:$16 sps:$4 sm:$0xff]  }
 0x54b   :  { %v12090_v44 = vpop.f32.mrb[21].mxu0  ;;  %v12112_v56 = vpop.f32.mrb[21].mxu1  ;;  %3599 = vmatprep.subr.bf16.mxu1 %v12890_v3  ;;  %v12951_v3 = vld [vmem:[%s19491_s6 + $0x148] ss:$16 sps:$4 sm:$0xff]  }
 0x54c   :  { %19721 = vst [vmem:[#allocation22_spill] sm:$0xff] %v15860_v28  ;;  %v12091_v48 = vadd.f32 %v12090_v44, %v12089_v19  ;;  %v12113_v27 = vadd.f32 %v12112_v56, %v12111_v43  ;;  %v12092_v33 = vpop.f32.mrb[22].mxu0  ;;  %v12114_v21 = vpop.f32.mrb[22].mxu1  ;;  %14142 = vtanh.f32 %v15860_v28  ;;  %v12893_v19 = vld [vmem:[%s19491_s6 + $0xc] ss:$16 sps:$4 sm:$0xff]  }
 0x54d   :  { %v12093_v2 = vpop.f32.mrb[23].mxu0  ;;  %v12115_v5 = vpop.f32.mrb[23].mxu1  ;;  %v16710_v28 = vld [vmem:[%s19491_s6 + $0x5a4] ss:$16 sps:$4 sm:$0xff]  }
 0x54e   :  { %v2636_v29 = vadd.f32 %v12091_v48, %v10313_v45  ;;  %v14384_v48 = vld [vmem:[%s19492_s3] sm:$0x3]  ;;  %v12891_v5 = vld [vmem:[%s19491_s6 + $0x8] ss:$16 sps:$4 sm:$0xff]   ;;  %19746 = vst [vmem:[#allocation3_spill] sm:$0xff] %v16710_v28 }
 0x54f   :  { %v12888_v2 = vld [vmem:[%s19491_s6] ss:$16 sps:$4 sm:$0xff]  }
 0x550   :  { %v15866_v30 = vadd.f32 %v12113_v27, %v2636_v29  ;;  %v12896_v29 = vld [vmem:[%s19491_s6 + $0x24] ss:$16 sps:$4 sm:$0xff]  }
 0x556   :  { %v14143_v34 = vpop.eup %14142 }
 0x557   :  { %v2279_v35 = vmul.f32 %v14143_v34, %v14141_v31  ;;  %v12894_v31 = vld [vmem:[%s19491_s6 + $0x20] ss:$16 sps:$4 sm:$0xff]   ;;  %v12897_v34 = vld [vmem:[%s19491_s6 + $0x28] ss:$16 sps:$4 sm:$0xff]  }
 0x559   :  { %v15871_v37 = vpack.c.bf16 %v2279_v35, %v2279_v35  ;;  %v12902_v35 = vld [vmem:[%s19491_s6 + $0x44] ss:$16 sps:$4 sm:$0xff]  }
 0x55b   :  { %12302 = vmatmul.mubr.bf16.vlgmr.msra.gmra.mrb[24].mxu0 %v15871_v37 }
 0x55c   :  { %3181 = vmatprep.mubr.bf16.mxu0 %v19720_v12  ;;  %3150 = vmatpush1.bf16.msra.mxu0 %v12795_v36  ;;  %v12815_v12 = vld [vmem:[%s19489_s4 + $0x6c] ss:$16 sps:$4 sm:$0xff]   ;;  %v12900_v36 = vld [vmem:[%s19491_s6 + $0x40] ss:$16 sps:$4 sm:$0xff]  }
 0x55d   :  { %3151 = vmatprep.subr.bf16.mxu0 %v12803_v40  ;;  %v12903_v40 = vld [vmem:[%s19491_s6 + $0x48] ss:$16 sps:$4 sm:$0xff]  }
 0x560   :  { %3152 = vmatpush1.bf16.msra.mxu0 %v12801_v41  ;;  %v12908_v41 = vld [vmem:[%s19491_s6 + $0x64] ss:$16 sps:$4 sm:$0xff]  }
 0x561   :  { %3153 = vmatprep.subr.bf16.mxu0 %v12809_v47  ;;  %v12911_v47 = vld [vmem:[%s19491_s6 + $0x6c] ss:$16 sps:$4 sm:$0xff]  }
 0x564   :  { %3154 = vmatpush1.bf16.msra.mxu0 %v12807_v50  ;;  %v12906_v50 = vld [vmem:[%s19491_s6 + $0x60] ss:$16 sps:$4 sm:$0xff]  }
 0x565   :  { %3155 = vmatprep.subr.bf16.mxu0 %v12815_v12  ;;  %v12909_v12 = vld [vmem:[%s19491_s6 + $0x68] ss:$16 sps:$4 sm:$0xff]  }
 0x568   :  { %3156 = vmatpush1.bf16.msra.mxu0 %v12813_v51  ;;  %v12914_v51 = vld [vmem:[%s19491_s6 + $0x84] ss:$16 sps:$4 sm:$0xff]  }
 0x569   :  { %3157 = vmatprep.subr.bf16.mxu0 %v12821_v52  ;;  %v12917_v52 = vld [vmem:[%s19491_s6 + $0x8c] ss:$16 sps:$4 sm:$0xff]  }
 0x56c   :  { %3158 = vmatpush1.bf16.msra.mxu0 %v12819_v53  ;;  %v12912_v53 = vld [vmem:[%s19491_s6 + $0x80] ss:$16 sps:$4 sm:$0xff]  }
 0x56d   :  { %3159 = vmatprep.subr.bf16.mxu0 %v12827_v54  ;;  %v12915_v54 = vld [vmem:[%s19491_s6 + $0x88] ss:$16 sps:$4 sm:$0xff]  }
 0x570   :  { %3160 = vmatpush1.bf16.msra.mxu0 %v12825_v55  ;;  %v12920_v55 = vld [vmem:[%s19491_s6 + $0xa4] ss:$16 sps:$4 sm:$0xff]  }
 0x571   :  { %3161 = vmatprep.subr.bf16.mxu0 %v12833_v57  ;;  %v12923_v57 = vld [vmem:[%s19491_s6 + $0xac] ss:$16 sps:$4 sm:$0xff]  }
 0x574   :  { %3162 = vmatpush1.bf16.msra.mxu0 %v12831_v61  ;;  %v12918_v61 = vld [vmem:[%s19491_s6 + $0xa0] ss:$16 sps:$4 sm:$0xff]  }
 0x575   :  { %3163 = vmatprep.subr.bf16.mxu0 %v12839_v63  ;;  %v12921_v63 = vld [vmem:[%s19491_s6 + $0xa8] ss:$16 sps:$4 sm:$0xff]  }
 0x578   :  { %3164 = vmatpush1.bf16.msra.mxu0 %v12837_v4  ;;  %v12926_v4 = vld [vmem:[%s19491_s6 + $0xc4] ss:$16 sps:$4 sm:$0xff]  }
 0x579   :  { %3165 = vmatprep.subr.bf16.mxu0 %v12845_v6  ;;  %v12929_v6 = vld [vmem:[%s19491_s6 + $0xcc] ss:$16 sps:$4 sm:$0xff]  }
 0x57c   :  { %3166 = vmatpush1.bf16.msra.mxu0 %v12843_v7  ;;  %v12924_v7 = vld [vmem:[%s19491_s6 + $0xc0] ss:$16 sps:$4 sm:$0xff]  }
 0x57d   :  { %3167 = vmatprep.subr.bf16.mxu0 %v12851_v8  ;;  %v12927_v8 = vld [vmem:[%s19491_s6 + $0xc8] ss:$16 sps:$4 sm:$0xff]  }
 0x580   :  { %3168 = vmatpush1.bf16.msra.mxu0 %v12849_v9  ;;  %v12932_v9 = vld [vmem:[%s19491_s6 + $0xe4] ss:$16 sps:$4 sm:$0xff]  }
 0x581   :  { %3169 = vmatprep.subr.bf16.mxu0 %v12857_v10  ;;  %v12935_v10 = vld [vmem:[%s19491_s6 + $0xec] ss:$16 sps:$4 sm:$0xff]  }
 0x584   :  { %3170 = vmatpush1.bf16.msra.mxu0 %v12855_v13  ;;  %v12930_v13 = vld [vmem:[%s19491_s6 + $0xe0] ss:$16 sps:$4 sm:$0xff]  }
 0x585   :  { %3171 = vmatprep.subr.bf16.mxu0 %v12863_v15  ;;  %v12933_v15 = vld [vmem:[%s19491_s6 + $0xe8] ss:$16 sps:$4 sm:$0xff]  }
 0x588   :  { %3172 = vmatpush1.bf16.msra.mxu0 %v12861_v25  ;;  %v12938_v25 = vld [vmem:[%s19491_s6 + $0x104] ss:$16 sps:$4 sm:$0xff]  }
 0x589   :  { %3173 = vmatprep.subr.bf16.mxu0 %v12869_v46  ;;  %v12941_v46 = vld [vmem:[%s19491_s6 + $0x10c] ss:$16 sps:$4 sm:$0xff]  }
 0x58c   :  { %3174 = vmatpush1.bf16.msra.mxu0 %v12867_v16  ;;  %v12936_v16 = vld [vmem:[%s19491_s6 + $0x100] ss:$16 sps:$4 sm:$0xff]  }
 0x58d   :  { %3175 = vmatprep.subr.bf16.mxu0 %v12875_v17  ;;  %v12939_v17 = vld [vmem:[%s19491_s6 + $0x108] ss:$16 sps:$4 sm:$0xff]  }
 0x590   :  { %3176 = vmatpush1.bf16.msra.mxu0 %v12873_v20  ;;  %v12944_v20 = vld [vmem:[%s19491_s6 + $0x124] ss:$16 sps:$4 sm:$0xff]  }
 0x591   :  { %3177 = vmatprep.subr.bf16.mxu0 %v12881_v22  ;;  %v12947_v22 = vld [vmem:[%s19491_s6 + $0x12c] ss:$16 sps:$4 sm:$0xff]  }
 0x594   :  { %3178 = vmatpush1.bf16.msra.mxu0 %v12879_v23  ;;  %v12942_v23 = vld [vmem:[%s19491_s6 + $0x120] ss:$16 sps:$4 sm:$0xff]  }
 0x595   :  { %3179 = vmatprep.subr.bf16.mxu0 %v12887_v0  ;;  %v12950_v0 = vld [vmem:[%s19491_s6 + $0x144] ss:$16 sps:$4 sm:$0xff]  }
 0x598   :  { %3180 = vmatpush1.bf16.msra.mxu0 %v12885_v32  ;;  %v12948_v32 = vld [vmem:[%s19491_s6 + $0x140] ss:$16 sps:$4 sm:$0xff]  }
 0x599   :  { %3640 = vmatprep.subr.bf16.mxu0 %v12893_v19  ;;  %v12956_v19 = vld [vmem:[%s19491_s6 + $0x164] ss:$16 sps:$4 sm:$0xff]  }
 0x62e   :  { %v2715_v43 = vpop.f32.mrb[24].mxu0 }
 0x62f   :  { %v2716_v45 = vadd.f32 %v2715_v43, %v15866_v30  ;;  %v12303_v44 = vpop.f32.mrb[25].mxu0  ;;  %v12899_v30 = vld [vmem:[%s19491_s6 + $0x2c] ss:$16 sps:$4 sm:$0xff]  }
 0x630   :  { %v2718_v56 = vpop.f32.mrb[26].mxu0  ;;  %v12959_v43 = vld [vmem:[%s19491_s6 + $0x16c] ss:$16 sps:$4 sm:$0xff]   ;;  %v12957_v44 = vld [vmem:[%s19491_s6 + $0x168] ss:$16 sps:$4 sm:$0xff]  }
 0x631   :  { %v15981_v27 = vadd.f32 %v14384_v48, %v2716_v45  ;;  %v12304_v33 = vpop.f32.mrb[27].mxu0  ;;  %v12954_v45 = vld [vmem:[%s19491_s6 + $0x160] ss:$16 sps:$4 sm:$0xff]   ;;  %v12962_v56 = vld [vmem:[%s19491_s6 + $0x184] ss:$16 sps:$4 sm:$0xff]  }
 0x632   :  { %v12965_v48 = vld [vmem:[%s19491_s6 + $0x18c] ss:$16 sps:$4 sm:$0xff]   ;;  %v12960_v33 = vld [vmem:[%s19491_s6 + $0x180] ss:$16 sps:$4 sm:$0xff]  }
 0x633   :  { %19722 = vst [vmem:[#allocation23_spill] sm:$0xff] %v15981_v27  ;;  %2722 = vst [vmem:[%s19499_s10] sm:$0x3] %v15981_v27  ;;  %v2723_v21 = vpack.c.bf16 %v15981_v27, %v15981_v27  ;;  %v16703_v27 = vld [vmem:[%s19491_s6 + $0x588] ss:$16 sps:$4 sm:$0xff]  }
 0x634   :  { %19745 = vst [vmem:[#allocation2_spill] sm:$0xff] %v16703_v27 }
 0x635   :  { %3141 = vmatmul.mubr.bf16.vlgmr.msra.gmra.mrb[24].mxu1 %v2723_v21  ;;  %3182 = vmatmul.mubr.bf16.vlgmr.msra.gmra.mrb[28].mxu0 %v2723_v21  ;;  %v12963_v21 = vld [vmem:[%s19491_s6 + $0x188] ss:$16 sps:$4 sm:$0xff]  }
 0x636   :  { %3631 = vmatprep.mubr.bf16.mxu1 %v19719_v11  ;;  %3672 = vmatprep.mubr.bf16.mxu0 %v19719_v11  ;;  %v12905_v11 = vld [vmem:[%s19491_s6 + $0x4c] ss:$16 sps:$4 sm:$0xff]  }
 0x637   :  { %3600 = vmatpush1.bf16.msra.mxu1 %v12888_v2  ;;  %3641 = vmatpush1.bf16.msra.mxu0 %v12891_v5  ;;  %v12966_v2 = vld [vmem:[%s19491_s6 + $0x1a0] ss:$16 sps:$4 sm:$0xff]   ;;  %v12968_v5 = vld [vmem:[%s19491_s6 + $0x1a4] ss:$16 sps:$4 sm:$0xff]  }
 0x638   :  { %3601 = vmatprep.subr.bf16.mxu1 %v12896_v29  ;;  %3642 = vmatprep.subr.bf16.mxu0 %v12899_v30  ;;  %v12969_v29 = vld [vmem:[%s19491_s6 + $0x1a8] ss:$16 sps:$4 sm:$0xff]   ;;  %v12971_v30 = vld [vmem:[%s19491_s6 + $0x1ac] ss:$16 sps:$4 sm:$0xff]  }
 0x63b   :  { %3602 = vmatpush1.bf16.msra.mxu1 %v12894_v31  ;;  %3643 = vmatpush1.bf16.msra.mxu0 %v12897_v34  ;;  %v12974_v31 = vld [vmem:[%s19491_s6 + $0x1c4] ss:$16 sps:$4 sm:$0xff]   ;;  %v12977_v34 = vld [vmem:[%s19491_s6 + $0x1cc] ss:$16 sps:$4 sm:$0xff]  }
 0x63c   :  { %3603 = vmatprep.subr.bf16.mxu1 %v12902_v35  ;;  %3644 = vmatprep.subr.bf16.mxu0 %v12905_v11  ;;  %v12972_v35 = vld [vmem:[%s19491_s6 + $0x1c0] ss:$16 sps:$4 sm:$0xff]   ;;  %v12975_v11 = vld [vmem:[%s19491_s6 + $0x1c8] ss:$16 sps:$4 sm:$0xff]  }
 0x63f   :  { %3604 = vmatpush1.bf16.msra.mxu1 %v12900_v36  ;;  %3645 = vmatpush1.bf16.msra.mxu0 %v12903_v40  ;;  %v12980_v36 = vld [vmem:[%s19491_s6 + $0x1e4] ss:$16 sps:$4 sm:$0xff]   ;;  %v12983_v40 = vld [vmem:[%s19491_s6 + $0x1ec] ss:$16 sps:$4 sm:$0xff]  }
 0x640   :  { %3605 = vmatprep.subr.bf16.mxu1 %v12908_v41  ;;  %3646 = vmatprep.subr.bf16.mxu0 %v12911_v47  ;;  %v12978_v41 = vld [vmem:[%s19491_s6 + $0x1e0] ss:$16 sps:$4 sm:$0xff]   ;;  %v12981_v47 = vld [vmem:[%s19491_s6 + $0x1e8] ss:$16 sps:$4 sm:$0xff]  }
 0x643   :  { %3606 = vmatpush1.bf16.msra.mxu1 %v12906_v50  ;;  %3647 = vmatpush1.bf16.msra.mxu0 %v12909_v12  ;;  %v12986_v50 = vld [vmem:[%s19491_s6 + $0x204] ss:$16 sps:$4 sm:$0xff]   ;;  %v12989_v12 = vld [vmem:[%s19491_s6 + $0x20c] ss:$16 sps:$4 sm:$0xff]  }
 0x644   :  { %3607 = vmatprep.subr.bf16.mxu1 %v12914_v51  ;;  %3648 = vmatprep.subr.bf16.mxu0 %v12917_v52 }
 0x647   :  { %3608 = vmatpush1.bf16.msra.mxu1 %v12912_v53  ;;  %3649 = vmatpush1.bf16.msra.mxu0 %v12915_v54  ;;  %v19723_v53 = vld [vmem:[#allocation4_spill] sm:$0xff] }
 0x648   :  { %3609 = vmatprep.subr.bf16.mxu1 %v12920_v55  ;;  %3650 = vmatprep.subr.bf16.mxu0 %v12923_v57 }
 0x64b   :  { %3610 = vmatpush1.bf16.msra.mxu1 %v12918_v61  ;;  %3651 = vmatpush1.bf16.msra.mxu0 %v12921_v63  ;;  %v19724_v61 = vld [vmem:[#allocation5_spill] sm:$0xff] }
 0x64c   :  { %3611 = vmatprep.subr.bf16.mxu1 %v12926_v4  ;;  %3652 = vmatprep.subr.bf16.mxu0 %v12929_v6 }
 0x64f   :  { %3612 = vmatpush1.bf16.msra.mxu1 %v12924_v7  ;;  %3653 = vmatpush1.bf16.msra.mxu0 %v12927_v8 }
 0x650   :  { %3613 = vmatprep.subr.bf16.mxu1 %v12932_v9  ;;  %3654 = vmatprep.subr.bf16.mxu0 %v12935_v10 }
 0x653   :  { %3614 = vmatpush1.bf16.msra.mxu1 %v12930_v13  ;;  %3655 = vmatpush1.bf16.msra.mxu0 %v12933_v15  ;;  %v19725_v13 = vld [vmem:[#allocation6_spill] sm:$0xff] }
 0x654   :  { %3615 = vmatprep.subr.bf16.mxu1 %v12938_v25  ;;  %3656 = vmatprep.subr.bf16.mxu0 %v12941_v46  ;;  %v19726_v25 = vld [vmem:[#allocation8_spill] sm:$0xff] }
 0x657   :  { %3616 = vmatpush1.bf16.msra.mxu1 %v12936_v16  ;;  %3657 = vmatpush1.bf16.msra.mxu0 %v12939_v17 }
 0x658   :  { %3617 = vmatprep.subr.bf16.mxu1 %v12944_v20  ;;  %3658 = vmatprep.subr.bf16.mxu0 %v12947_v22 }
 0x65b   :  { %3618 = vmatpush1.bf16.msra.mxu1 %v12942_v23  ;;  %3659 = vmatpush1.bf16.msra.mxu0 %v12945_v49 }
 0x65c   :  { %3619 = vmatprep.subr.bf16.mxu1 %v12950_v0  ;;  %3660 = vmatprep.subr.bf16.mxu0 %v12953_v42 }
 0x65f   :  { %3620 = vmatpush1.bf16.msra.mxu1 %v12948_v32  ;;  %3661 = vmatpush1.bf16.msra.mxu0 %v12951_v3 }
 0x660   :  { %3621 = vmatprep.subr.bf16.mxu1 %v12956_v19  ;;  %3662 = vmatprep.subr.bf16.mxu0 %v12959_v43  ;;  %v19727_v43 = vld [vmem:[#allocation9_spill] sm:$0xff] }
 0x661   :  { %19750 = vst [vmem:[#allocation9_spill] sm:$0xff] %v16734_v18 }
 0x663   :  { %3622 = vmatpush1.bf16.msra.mxu1 %v12954_v45  ;;  %3663 = vmatpush1.bf16.msra.mxu0 %v12957_v44 }
 0x664   :  { %3623 = vmatprep.subr.bf16.mxu1 %v12962_v56  ;;  %3664 = vmatprep.subr.bf16.mxu0 %v12965_v48 }
 0x667   :  { %3624 = vmatpush1.bf16.msra.mxu1 %v12960_v33  ;;  %3665 = vmatpush1.bf16.msra.mxu0 %v12963_v21 }
 0x668   :  { %3625 = vmatprep.subr.bf16.mxu1 %v12968_v5  ;;  %3666 = vmatprep.subr.bf16.mxu0 %v12971_v30  ;;  %v12987_v5 = vld [vmem:[%s19491_s6 + $0x208] ss:$16 sps:$4 sm:$0xff]   ;;  %v12995_v30 = vld [vmem:[%s19491_s6 + $0x22c] ss:$16 sps:$4 sm:$0xff]  }
 0x66b   :  { %3626 = vmatpush1.bf16.msra.mxu1 %v12966_v2  ;;  %3667 = vmatpush1.bf16.msra.mxu0 %v12969_v29  ;;  %v12984_v2 = vld [vmem:[%s19491_s6 + $0x200] ss:$16 sps:$4 sm:$0xff]   ;;  %v12992_v29 = vld [vmem:[%s19491_s6 + $0x224] ss:$16 sps:$4 sm:$0xff]  }
 0x66c   :  { %3627 = vmatprep.subr.bf16.mxu1 %v12974_v31  ;;  %3668 = vmatprep.subr.bf16.mxu0 %v12977_v34  ;;  %v12990_v31 = vld [vmem:[%s19491_s6 + $0x220] ss:$16 sps:$4 sm:$0xff]   ;;  %v12993_v34 = vld [vmem:[%s19491_s6 + $0x228] ss:$16 sps:$4 sm:$0xff]  }
 0x66f   :  { %3628 = vmatpush1.bf16.msra.mxu1 %v12972_v35  ;;  %3669 = vmatpush1.bf16.msra.mxu0 %v12975_v11  ;;  %v12998_v35 = vld [vmem:[%s19491_s6 + $0x244] ss:$16 sps:$4 sm:$0xff]   ;;  %v12996_v11 = vld [vmem:[%s19491_s6 + $0x240] ss:$16 sps:$4 sm:$0xff]  }
 0x670   :  { %3629 = vmatprep.subr.bf16.mxu1 %v12980_v36  ;;  %3670 = vmatprep.subr.bf16.mxu0 %v12983_v40  ;;  %v12999_v36 = vld [vmem:[%s19491_s6 + $0x248] ss:$16 sps:$4 sm:$0xff]   ;;  %v13004_v40 = vld [vmem:[%s19491_s6 + $0x264] ss:$16 sps:$4 sm:$0xff]  }
 0x673   :  { %3630 = vmatpush1.bf16.msra.mxu1 %v12978_v41  ;;  %3671 = vmatpush1.bf16.msra.mxu0 %v12981_v47  ;;  %v13007_v41 = vld [vmem:[%s19491_s6 + $0x26c] ss:$16 sps:$4 sm:$0xff]   ;;  %v13002_v47 = vld [vmem:[%s19491_s6 + $0x260] ss:$16 sps:$4 sm:$0xff]  }
 0x674   :  { %4096 = vmatprep.subr.bf16.mxu1 %v12986_v50  ;;  %4137 = vmatprep.subr.bf16.mxu0 %v12989_v12  ;;  %v13005_v50 = vld [vmem:[%s19491_s6 + $0x268] ss:$16 sps:$4 sm:$0xff]   ;;  %v13010_v12 = vld [vmem:[%s19491_s6 + $0x284] ss:$16 sps:$4 sm:$0xff]  }
 0x708   :  { %v3142_v51 = vpop.f32.mrb[24].mxu1  ;;  %v3183_v52 = vpop.f32.mrb[28].mxu0 }
 0x709   :  { %v3143_v54 = vadd.f32 %v3142_v51, %v19723_v53  ;;  %v3144_v55 = vpop.f32.mrb[25].mxu1  ;;  %v3185_v57 = vpop.f32.mrb[29].mxu0  ;;  %v3184_v15 = vadd.f32 %v3183_v52, %v19725_v13  ;;  %v13013_v51 = vld [vmem:[%s19491_s6 + $0x28c] ss:$16 sps:$4 sm:$0xff]   ;;  %v13008_v52 = vld [vmem:[%s19491_s6 + $0x280] ss:$16 sps:$4 sm:$0xff]  }
 0x70a   :  { %v3145_v63 = vadd.f32 %v3144_v55, %v19724_v61  ;;  %v3146_v4 = vpop.f32.mrb[26].mxu1  ;;  %v3187_v6 = vpop.f32.mrb[30].mxu0  ;;  %v3186_v46 = vadd.f32 %v3185_v57, %v19726_v25  ;;  %v13016_v55 = vld [vmem:[%s19491_s6 + $0x2a4] ss:$16 sps:$4 sm:$0xff]   ;;  %v13019_v57 = vld [vmem:[%s19491_s6 + $0x2ac] ss:$16 sps:$4 sm:$0xff]  }
 0x70b   :  { %v10817_v7 = vmul.f32 -1.442695, %v3143_v54  ;;  %v3147_v8 = vpop.f32.mrb[27].mxu1  ;;  %v3188_v9 = vpop.f32.mrb[31].mxu0  ;;  %v10819_v16 = vmul.f32 -1.442695, %v3184_v15 }
 0x70c   :  { %v10818_v10 = vmul.f32 -1.442695, %v3145_v63  ;;  %v13011_v54 = vld [vmem:[%s19491_s6 + $0x288] ss:$16 sps:$4 sm:$0xff]   ;;  %v13014_v63 = vld [vmem:[%s19491_s6 + $0x2a0] ss:$16 sps:$4 sm:$0xff]  }
 0x70d   :  { %14144 = vpow2.f32 %v10817_v7  ;;  %v13017_v4 = vld [vmem:[%s19491_s6 + $0x2a8] ss:$16 sps:$4 sm:$0xff]   ;;  %v13022_v6 = vld [vmem:[%s19491_s6 + $0x2c4] ss:$16 sps:$4 sm:$0xff]   ;;  %v13025_v7 = vld [vmem:[%s19491_s6 + $0x2cc] ss:$16 sps:$4 sm:$0xff]  }
 0x70e   :  { %14146 = vpow2.f32 %v10818_v10  ;;  %v13020_v8 = vld [vmem:[%s19491_s6 + $0x2c0] ss:$16 sps:$4 sm:$0xff]   ;;  %v13023_v9 = vld [vmem:[%s19491_s6 + $0x2c8] ss:$16 sps:$4 sm:$0xff]   ;;  %v13028_v10 = vld [vmem:[%s19491_s6 + $0x2e4] ss:$16 sps:$4 sm:$0xff]  }
 0x70f   :  { %14148 = vtanh.f32 %v3186_v46  ;;  %v13031_v15 = vld [vmem:[%s19491_s6 + $0x2ec] ss:$16 sps:$4 sm:$0xff]   ;;  %v13026_v46 = vld [vmem:[%s19491_s6 + $0x2e0] ss:$16 sps:$4 sm:$0xff]   ;;  %v16679_v25 = vld [vmem:[%s19491_s6 + $0x568] ss:$16 sps:$4 sm:$0xff]  }
 0x710   :  { %14150 = vpow2.f32 %v10819_v16  ;;  %v13029_v16 = vld [vmem:[%s19491_s6 + $0x2e8] ss:$16 sps:$4 sm:$0xff]   ;;  %19741 = vst [vmem:[#allocation32_spill] sm:$0xff] %v16679_v25  ;;  %v16688_v13 = vld [vmem:[%s19491_s6 + $0x584] ss:$16 sps:$4 sm:$0xff]  }
 0x711   :  { %19742 = vst [vmem:[#allocation33_spill] sm:$0xff] %v16688_v13  ;;  %v16693_v61 = vld [vmem:[%s19491_s6 + $0x58c] ss:$16 sps:$4 sm:$0xff]   ;;  %v16698_v53 = vld [vmem:[%s19491_s6 + $0x580] ss:$16 sps:$4 sm:$0xff]  }
 0x712   :  { %19743 = vst [vmem:[#allocation34_spill] sm:$0xff] %v16693_v61  ;;  %19744 = vst [vmem:[#allocation35_spill] sm:$0xff] %v16698_v53 }
 0x717   :  { %v14145_v17 = vpop.eup %14144 }
 0x718   :  { %v3199_v20 = vadd.f32 1.0, %v14145_v17  ;;  %v14147_v22 = vpop.eup %14146  ;;  %v13034_v17 = vld [vmem:[%s19491_s6 + $0x304] ss:$16 sps:$4 sm:$0xff]  }
 0x719   :  { %v3200_v23 = vadd.f32 1.0, %v14147_v22  ;;  %v14149_v49 = vpop.eup %14148  ;;  %v13032_v22 = vld [vmem:[%s19491_s6 + $0x300] ss:$16 sps:$4 sm:$0xff]  }
 0x71a   :  { %14152 = vrcp.f32 %v3199_v20  ;;  %v14151_v0 = vpop.eup %14150  ;;  %v13037_v20 = vld [vmem:[%s19491_s6 + $0x30c] ss:$16 sps:$4 sm:$0xff]  }
 0x71b   :  { %14154 = vrcp.f32 %v3200_v23  ;;  %v3201_v19 = vadd.f32 1.0, %v14151_v0  ;;  %v13035_v23 = vld [vmem:[%s19491_s6 + $0x308] ss:$16 sps:$4 sm:$0xff]   ;;  %v13043_v0 = vld [vmem:[%s19491_s6 + $0x32c] ss:$16 sps:$4 sm:$0xff]  }
 0x71d   :  { %14156 = vrcp.f32 %v3201_v19  ;;  %v13049_v19 = vld [vmem:[%s19491_s6 + $0x34c] ss:$16 sps:$4 sm:$0xff]  }
 0x724   :  { %v14153_v42 = vpop.eup %14152 }
 0x725   :  { %v3210_v32 = vmul.f32 %v14153_v42, %v14149_v49  ;;  %v14155_v3 = vpop.eup %14154  ;;  %v13040_v49 = vld [vmem:[%s19491_s6 + $0x324] ss:$16 sps:$4 sm:$0xff]   ;;  %v13038_v42 = vld [vmem:[%s19491_s6 + $0x320] ss:$16 sps:$4 sm:$0xff]  }
 0x726   :  { %v3209_v45 = vmul.f32 %v14155_v3, %v19727_v43  ;;  %v13046_v3 = vld [vmem:[%s19491_s6 + $0x344] ss:$16 sps:$4 sm:$0xff]   ;;  %v13044_v43 = vld [vmem:[%s19491_s6 + $0x340] ss:$16 sps:$4 sm:$0xff]  }
 0x727   :  { %v14157_v56 = vpop.eup %14156 }
 0x728   :  { %v16188_v44 = vadd.f32 %v3210_v32, %v3209_v45  ;;  %v13041_v32 = vld [vmem:[%s19491_s6 + $0x328] ss:$16 sps:$4 sm:$0xff]  }
 0x729   :  { %v13047_v45 = vld [vmem:[%s19491_s6 + $0x348] ss:$16 sps:$4 sm:$0xff]  }
 0x72a   :  { %19728 = vst [vmem:[#allocation24_spill] sm:$0xff] %v16188_v44  ;;  %14158 = vtanh.f32 %v16188_v44  ;;  %v16674_v44 = vld [vmem:[%s19491_s6 + $0x560] ss:$16 sps:$4 sm:$0xff]  }
 0x72b   :  { %19740 = vst [vmem:[#allocation31_spill] sm:$0xff] %v16674_v44 }
 0x734   :  { %v14159_v48 = vpop.eup %14158 }
 0x735   :  { %v3213_v33 = vmul.f32 %v14159_v48, %v14157_v56  ;;  %v13052_v56 = vld [vmem:[%s19491_s6 + $0x364] ss:$16 sps:$4 sm:$0xff]   ;;  %v13055_v48 = vld [vmem:[%s19491_s6 + $0x36c] ss:$16 sps:$4 sm:$0xff]  }
 0x737   :  { %v16191_v21 = vpack.c.bf16 %v3213_v33, %v3213_v33  ;;  %v13050_v33 = vld [vmem:[%s19491_s6 + $0x360] ss:$16 sps:$4 sm:$0xff]  }
 0x739   :  { %19729 = vst [vmem:[#allocation25_spill] sm:$0xff] %v16191_v21  ;;  %3632 = vmatmul.mubr.bf16.vlgmr.msra.gmra.mrb[28].mxu1 %v16191_v21  ;;  %3673 = vmatmul.mubr.bf16.vlgmr.msra.gmra.mrb[32].mxu0 %v16191_v21  ;;  %v16715_v21 = vld [vmem:[%s19491_s6 + $0x5ac] ss:$16 sps:$4 sm:$0xff]  }
 0x73a   :  { %4128 = vmatprep.mubr.bf16.mxu1 %v15531_v1  ;;  %4169 = vmatprep.mubr.bf16.mxu0 %v15531_v1  ;;  %v13001_v1 = vld [vmem:[%s19491_s6 + $0x24c] ss:$16 sps:$4 sm:$0xff]   ;;  %19747 = vst [vmem:[#allocation7_spill] sm:$0xff] %v16715_v21 }
 0x73b   :  { %4097 = vmatpush1.bf16.msra.mxu1 %v12984_v2  ;;  %4138 = vmatpush1.bf16.msra.mxu0 %v12987_v5  ;;  %v13053_v2 = vld [vmem:[%s19491_s6 + $0x368] ss:$16 sps:$4 sm:$0xff]   ;;  %v13056_v5 = vld [vmem:[%s19491_s6 + $0x380] ss:$16 sps:$4 sm:$0xff]  }
 0x73c   :  { %4098 = vmatprep.subr.bf16.mxu1 %v12992_v29  ;;  %4139 = vmatprep.subr.bf16.mxu0 %v12995_v30  ;;  %v13058_v29 = vld [vmem:[%s19491_s6 + $0x384] ss:$16 sps:$4 sm:$0xff]   ;;  %v13059_v30 = vld [vmem:[%s19491_s6 + $0x388] ss:$16 sps:$4 sm:$0xff]  }
 0x73f   :  { %4099 = vmatpush1.bf16.msra.mxu1 %v12990_v31  ;;  %4140 = vmatpush1.bf16.msra.mxu0 %v12993_v34  ;;  %v13061_v31 = vld [vmem:[%s19491_s6 + $0x38c] ss:$16 sps:$4 sm:$0xff]   ;;  %v13064_v34 = vld [vmem:[%s19491_s6 + $0x3a4] ss:$16 sps:$4 sm:$0xff]  }
 0x740   :  { %4100 = vmatprep.subr.bf16.mxu1 %v12998_v35  ;;  %4141 = vmatprep.subr.bf16.mxu0 %v13001_v1  ;;  %v13067_v35 = vld [vmem:[%s19491_s6 + $0x3ac] ss:$16 sps:$4 sm:$0xff]   ;;  %v13062_v1 = vld [vmem:[%s19491_s6 + $0x3a0] ss:$16 sps:$4 sm:$0xff]  }
 0x743   :  { %4101 = vmatpush1.bf16.msra.mxu1 %v12996_v11  ;;  %4142 = vmatpush1.bf16.msra.mxu0 %v12999_v36  ;;  %v13065_v11 = vld [vmem:[%s19491_s6 + $0x3a8] ss:$16 sps:$4 sm:$0xff]   ;;  %v13070_v36 = vld [vmem:[%s19491_s6 + $0x3c4] ss:$16 sps:$4 sm:$0xff]  }
 0x744   :  { %4102 = vmatprep.subr.bf16.mxu1 %v13004_v40  ;;  %4143 = vmatprep.subr.bf16.mxu0 %v13007_v41  ;;  %v13073_v40 = vld [vmem:[%s19491_s6 + $0x3cc] ss:$16 sps:$4 sm:$0xff]   ;;  %v13068_v41 = vld [vmem:[%s19491_s6 + $0x3c0] ss:$16 sps:$4 sm:$0xff]  }
 0x747   :  { %4103 = vmatpush1.bf16.msra.mxu1 %v13002_v47  ;;  %4144 = vmatpush1.bf16.msra.mxu0 %v13005_v50  ;;  %v13071_v47 = vld [vmem:[%s19491_s6 + $0x3c8] ss:$16 sps:$4 sm:$0xff]   ;;  %v13076_v50 = vld [vmem:[%s19491_s6 + $0x3e4] ss:$16 sps:$4 sm:$0xff]  }
 0x748   :  { %4104 = vmatprep.subr.bf16.mxu1 %v13010_v12  ;;  %4145 = vmatprep.subr.bf16.mxu0 %v13013_v51  ;;  %v13079_v12 = vld [vmem:[%s19491_s6 + $0x3ec] ss:$16 sps:$4 sm:$0xff]   ;;  %v13074_v51 = vld [vmem:[%s19491_s6 + $0x3e0] ss:$16 sps:$4 sm:$0xff]  }
 0x74b   :  { %4105 = vmatpush1.bf16.msra.mxu1 %v13008_v52  ;;  %4146 = vmatpush1.bf16.msra.mxu0 %v13011_v54  ;;  %v13077_v52 = vld [vmem:[%s19491_s6 + $0x3e8] ss:$16 sps:$4 sm:$0xff]   ;;  %v16386_v54 = vld [vmem:[%s19491_s6 + $0x404] ss:$16 sps:$4 sm:$0xff]  }
 0x74c   :  { %4106 = vmatprep.subr.bf16.mxu1 %v13016_v55  ;;  %4147 = vmatprep.subr.bf16.mxu0 %v13019_v57  ;;  %v16391_v55 = vld [vmem:[%s19491_s6 + $0x40c] ss:$16 sps:$4 sm:$0xff]  }
 0x74f   :  { %4107 = vmatpush1.bf16.msra.mxu1 %v13014_v63  ;;  %4148 = vmatpush1.bf16.msra.mxu0 %v13017_v4  ;;  %v19730_v4 = vld [vmem:[#allocation11_spill] sm:$0xff] }
 0x750   :  { %4108 = vmatprep.subr.bf16.mxu1 %v13022_v6  ;;  %4149 = vmatprep.subr.bf16.mxu0 %v13025_v7 }
 0x753   :  { %4109 = vmatpush1.bf16.msra.mxu1 %v13020_v8  ;;  %4150 = vmatpush1.bf16.msra.mxu0 %v13023_v9  ;;  %v19731_v9 = vld [vmem:[#allocation12_spill] sm:$0xff] }
 0x754   :  { %4110 = vmatprep.subr.bf16.mxu1 %v13028_v10  ;;  %4151 = vmatprep.subr.bf16.mxu0 %v13031_v15 }
 0x757   :  { %4111 = vmatpush1.bf16.msra.mxu1 %v13026_v46  ;;  %4152 = vmatpush1.bf16.msra.mxu0 %v13029_v16 }
 0x758   :  { %4112 = vmatprep.subr.bf16.mxu1 %v13034_v17  ;;  %4153 = vmatprep.subr.bf16.mxu0 %v13037_v20 }
 0x75b   :  { %4113 = vmatpush1.bf16.msra.mxu1 %v13032_v22  ;;  %4154 = vmatpush1.bf16.msra.mxu0 %v13035_v23  ;;  %v19732_v23 = vld [vmem:[#allocation13_spill] sm:$0xff] }
 0x75c   :  { %4114 = vmatprep.subr.bf16.mxu1 %v13040_v49  ;;  %4155 = vmatprep.subr.bf16.mxu0 %v13043_v0  ;;  %v19733_v0 = vld [vmem:[#allocation14_spill] sm:$0xff] }
 0x75f   :  { %4115 = vmatpush1.bf16.msra.mxu1 %v13038_v42  ;;  %4156 = vmatpush1.bf16.msra.mxu0 %v13041_v32 }
 0x760   :  { %4116 = vmatprep.subr.bf16.mxu1 %v13046_v3  ;;  %4157 = vmatprep.subr.bf16.mxu0 %v13049_v19 }
 0x763   :  { %4117 = vmatpush1.bf16.msra.mxu1 %v13044_v43  ;;  %4158 = vmatpush1.bf16.msra.mxu0 %v13047_v45 }
 0x764   :  { %4118 = vmatprep.subr.bf16.mxu1 %v13052_v56  ;;  %4159 = vmatprep.subr.bf16.mxu0 %v13055_v48 }
 0x767   :  { %4119 = vmatpush1.bf16.msra.mxu1 %v13050_v33  ;;  %4160 = vmatpush1.bf16.msra.mxu0 %v13053_v2 }
 0x768   :  { %4120 = vmatprep.subr.bf16.mxu1 %v13058_v29  ;;  %4161 = vmatprep.subr.bf16.mxu0 %v13061_v31 }
 0x76b   :  { %4121 = vmatpush1.bf16.msra.mxu1 %v13056_v5  ;;  %4162 = vmatpush1.bf16.msra.mxu0 %v13059_v30  ;;  %v19734_v30 = vld [vmem:[#allocation15_spill] sm:$0xff] }
 0x76c   :  { %4122 = vmatprep.subr.bf16.mxu1 %v13064_v34  ;;  %4163 = vmatprep.subr.bf16.mxu0 %v13067_v35  ;;  %19751 = vst [vmem:[#allocation15_spill] sm:$0xff] %v16739_v60 }
 0x76f   :  { %4123 = vmatpush1.bf16.msra.mxu1 %v13062_v1  ;;  %4164 = vmatpush1.bf16.msra.mxu0 %v13065_v11 }
 0x770   :  { %4124 = vmatprep.subr.bf16.mxu1 %v13070_v36  ;;  %4165 = vmatprep.subr.bf16.mxu0 %v13073_v40  ;;  %v4268_v40 = vrot.slane %v15636_v26, 7  ;;  %v16422_v26 = vld [vmem:[%s19491_s6 + $0x424] ss:$16 sps:$4 sm:$0xff]  }
 0x773   :  { %4125 = vmatpush1.bf16.msra.mxu1 %v13068_v41  ;;  %4166 = vmatpush1.bf16.msra.mxu0 %v13071_v47  ;;  %v16410_v47 = vld [vmem:[%s19491_s6 + $0x400] ss:$16 sps:$4 sm:$0xff]  }
 0x774   :  { %4126 = vmatprep.subr.bf16.mxu1 %v13076_v50  ;;  %4167 = vmatprep.subr.bf16.mxu0 %v13079_v12  ;;  %v16415_v50 = vld [vmem:[%s19491_s6 + $0x408] ss:$16 sps:$4 sm:$0xff]  }
 0x777   :  { %4127 = vmatpush1.bf16.msra.mxu1 %v13074_v51  ;;  %4168 = vmatpush1.bf16.msra.mxu0 %v13077_v52  ;;  %v4271_v51 = vrot.slane %v4268_v40, 1  ;;  %v16427_v52 = vld [vmem:[%s19491_s6 + $0x42c] ss:$16 sps:$4 sm:$0xff]   ;;  %v16616_v40 = vld [vmem:[%s19491_s6 + $0x524] ss:$16 sps:$4 sm:$0xff]  }
 0x778   :  { %4594 = vmatprep.subr.bf16.mxu1 %v16386_v54  ;;  %4635 = vmatprep.subr.bf16.mxu0 %v16391_v55 }
 0x80c   :  { %v3633_v57 = vpop.f32.mrb[28].mxu1  ;;  %v3674_v63 = vpop.f32.mrb[32].mxu0 }
 0x80d   :  { %v3634_v6 = vadd.f32 %v3633_v57, %v19730_v4  ;;  %v3635_v7 = vpop.f32.mrb[29].mxu1  ;;  %v3676_v8 = vpop.f32.mrb[33].mxu0  ;;  %v3675_v49 = vadd.f32 %v3674_v63, %v19732_v23  ;;  %v16434_v57 = vld [vmem:[%s19491_s6 + $0x420] ss:$16 sps:$4 sm:$0xff]   ;;  %v16439_v63 = vld [vmem:[%s19491_s6 + $0x428] ss:$16 sps:$4 sm:$0xff]  }
 0x80e   :  { %v3636_v10 = vadd.f32 %v3635_v7, %v19731_v9  ;;  %v3637_v15 = vpop.f32.mrb[30].mxu1  ;;  %v3678_v46 = vpop.f32.mrb[34].mxu0  ;;  %v3677_v42 = vadd.f32 %v3676_v8, %v19733_v0  ;;  %v16451_v7 = vld [vmem:[%s19491_s6 + $0x44c] ss:$16 sps:$4 sm:$0xff]   ;;  %v16458_v8 = vld [vmem:[%s19491_s6 + $0x440] ss:$16 sps:$4 sm:$0xff]  }
 0x80f   :  { %v10884_v16 = vmul.f32 -1.442695, %v3634_v6  ;;  %v3638_v17 = vpop.f32.mrb[31].mxu1  ;;  %v3679_v20 = vpop.f32.mrb[35].mxu0  ;;  %v10886_v32 = vmul.f32 -1.442695, %v3675_v49 }
 0x810   :  { %v10885_v22 = vmul.f32 -1.442695, %v3636_v10  ;;  %v16446_v6 = vld [vmem:[%s19491_s6 + $0x444] ss:$16 sps:$4 sm:$0xff]   ;;  %v16463_v10 = vld [vmem:[%s19491_s6 + $0x448] ss:$16 sps:$4 sm:$0xff]  }
 0x811   :  { %14160 = vpow2.f32 %v10884_v16  ;;  %v16470_v15 = vld [vmem:[%s19491_s6 + $0x464] ss:$16 sps:$4 sm:$0xff]   ;;  %v16475_v46 = vld [vmem:[%s19491_s6 + $0x46c] ss:$16 sps:$4 sm:$0xff]   ;;  %v16482_v16 = vld [vmem:[%s19491_s6 + $0x460] ss:$16 sps:$4 sm:$0xff]  }
 0x812   :  { %14162 = vpow2.f32 %v10885_v22  ;;  %v16487_v17 = vld [vmem:[%s19491_s6 + $0x468] ss:$16 sps:$4 sm:$0xff]   ;;  %v16496_v20 = vld [vmem:[%s19491_s6 + $0x484] ss:$16 sps:$4 sm:$0xff]   ;;  %v16501_v22 = vld [vmem:[%s19491_s6 + $0x48c] ss:$16 sps:$4 sm:$0xff]  }
 0x813   :  { %14164 = vtanh.f32 %v3677_v42  ;;  %v16506_v49 = vld [vmem:[%s19491_s6 + $0x480] ss:$16 sps:$4 sm:$0xff]   ;;  %v16511_v42 = vld [vmem:[%s19491_s6 + $0x488] ss:$16 sps:$4 sm:$0xff]   ;;  %v16664_v9 = vld [vmem:[%s19491_s6 + $0x564] ss:$16 sps:$4 sm:$0xff]  }
 0x814   :  { %14166 = vpow2.f32 %v10886_v32  ;;  %v16520_v32 = vld [vmem:[%s19491_s6 + $0x4a4] ss:$16 sps:$4 sm:$0xff]   ;;  %v16650_v0 = vld [vmem:[%s19491_s6 + $0x540] ss:$16 sps:$4 sm:$0xff]   ;;  %v16655_v23 = vld [vmem:[%s19491_s6 + $0x548] ss:$16 sps:$4 sm:$0xff]  }
 0x815   :  { %19737 = vst [vmem:[#allocation28_spill] sm:$0xff] %v16655_v23  ;;  %19738 = vst [vmem:[#allocation29_spill] sm:$0xff] %v16664_v9  ;;  %v16669_v4 = vld [vmem:[%s19491_s6 + $0x56c] ss:$16 sps:$4 sm:$0xff]  }
 0x816   :  { %19739 = vst [vmem:[#allocation30_spill] sm:$0xff] %v16669_v4 }
 0x81b   :  { %v14161_v3 = vpop.eup %14160 }
 0x81c   :  { %v3690_v19 = vadd.f32 1.0, %v14161_v3  ;;  %v14163_v43 = vpop.eup %14162  ;;  %v16525_v3 = vld [vmem:[%s19491_s6 + $0x4ac] ss:$16 sps:$4 sm:$0xff]  }
 0x81d   :  { %v3691_v45 = vadd.f32 1.0, %v14163_v43  ;;  %v14165_v56 = vpop.eup %14164  ;;  %v16535_v43 = vld [vmem:[%s19491_s6 + $0x4a8] ss:$16 sps:$4 sm:$0xff]  }
 0x81e   :  { %14168 = vrcp.f32 %v3690_v19  ;;  %v14167_v48 = vpop.eup %14166  ;;  %v16530_v19 = vld [vmem:[%s19491_s6 + $0x4a0] ss:$16 sps:$4 sm:$0xff]  }
 0x81f   :  { %14170 = vrcp.f32 %v3691_v45  ;;  %v3692_v29 = vadd.f32 1.0, %v14167_v48  ;;  %v16544_v45 = vld [vmem:[%s19491_s6 + $0x4c4] ss:$16 sps:$4 sm:$0xff]   ;;  %v16554_v48 = vld [vmem:[%s19491_s6 + $0x4c0] ss:$16 sps:$4 sm:$0xff]  }
 0x821   :  { %14172 = vrcp.f32 %v3692_v29  ;;  %v16578_v29 = vld [vmem:[%s19491_s6 + $0x4e0] ss:$16 sps:$4 sm:$0xff]  }
 0x828   :  { %v14169_v33 = vpop.eup %14168 }
 0x829   :  { %v3701_v2 = vmul.f32 %v14169_v33, %v14165_v56  ;;  %v14171_v5 = vpop.eup %14170  ;;  %v16549_v56 = vld [vmem:[%s19491_s6 + $0x4cc] ss:$16 sps:$4 sm:$0xff]   ;;  %v16559_v33 = vld [vmem:[%s19491_s6 + $0x4c8] ss:$16 sps:$4 sm:$0xff]  }
 0x82a   :  { %v3700_v31 = vmul.f32 %v14171_v5, %v19734_v30  ;;  %v16573_v5 = vld [vmem:[%s19491_s6 + $0x4ec] ss:$16 sps:$4 sm:$0xff]   ;;  %v16583_v30 = vld [vmem:[%s19491_s6 + $0x4e8] ss:$16 sps:$4 sm:$0xff]  }
 0x82b   :  { %v14173_v35 = vpop.eup %14172 }
 0x82c   :  { %v16400_v34 = vadd.f32 %v3701_v2, %v3700_v31  ;;  %v16568_v2 = vld [vmem:[%s19491_s6 + $0x4e4] ss:$16 sps:$4 sm:$0xff]  }
 0x82d   :  { %v16592_v31 = vld [vmem:[%s19491_s6 + $0x504] ss:$16 sps:$4 sm:$0xff]  }
 0x82e   :  { %19735 = vst [vmem:[#allocation26_spill] sm:$0xff] %v16400_v34  ;;  %14174 = vtanh.f32 %v16400_v34  ;;  %v16645_v34 = vld [vmem:[%s19491_s6 + $0x54c] ss:$16 sps:$4 sm:$0xff]  }
 0x838   :  { %v14175_v1 = vpop.eup %14174 }
 0x839   :  { %v3704_v11 = vmul.f32 %v14175_v1, %v14173_v35  ;;  %v16597_v35 = vld [vmem:[%s19491_s6 + $0x50c] ss:$16 sps:$4 sm:$0xff]   ;;  %v16602_v1 = vld [vmem:[%s19491_s6 + $0x500] ss:$16 sps:$4 sm:$0xff]  }
 0x83b   :  { %v16403_v36 = vpack.c.bf16 %v3704_v11, %v3704_v11  ;;  %v16607_v11 = vld [vmem:[%s19491_s6 + $0x508] ss:$16 sps:$4 sm:$0xff]  }
 0x83d   :  { %19736 = vst [vmem:[#allocation27_spill] sm:$0xff] %v16403_v36  ;;  %v3707_v41 = vrot.slane %v16403_v36, 7 }
 0x83f   :  { %v3710_v12 = vsel %vm1179_vm2, %v16403_v36, %v3707_v41  ;;  %v16621_v41 = vld [vmem:[%s19491_s6 + $0x52c] ss:$16 sps:$4 sm:$0xff]   ;;  %v16722_v36 = vld [vmem:[%s19491_s6 + $0x5a0] ss:$16 sps:$4 sm:$0xff]  }
 0x840   :  { %4129 = vmatmul.mubr.bf16.vlgmr.msra.gmra.mrb[32].mxu1 %v3710_v12  ;;  %4170 = vmatmul.mubr.bf16.vlgmr.msra.gmra.mrb[36].mxu0 %v3710_v12  ;;  %v16626_v12 = vld [vmem:[%s19491_s6 + $0x520] ss:$16 sps:$4 sm:$0xff]   ;;  %19748 = vst [vmem:[#allocation16_spill] sm:$0xff] %v16722_v36 }
 0x841   :  { %4626 = vmatprep.mubr.bf16.mxu1 %v4271_v51  ;;  %4667 = vmatprep.mubr.bf16.mxu0 %v4271_v51  ;;  %v16631_v51 = vld [vmem:[%s19491_s6 + $0x528] ss:$16 sps:$4 sm:$0xff]  }
 0x842   :  { %4595 = vmatpush1.bf16.msra.mxu1 %v16410_v47  ;;  %4636 = vmatpush1.bf16.msra.mxu0 %v16415_v50 }
 0x843   :  { %4596 = vmatprep.subr.bf16.mxu1 %v16422_v26  ;;  %4637 = vmatprep.subr.bf16.mxu0 %v16427_v52 }
 0x846   :  { %4597 = vmatpush1.bf16.msra.mxu1 %v16434_v57  ;;  %4638 = vmatpush1.bf16.msra.mxu0 %v16439_v63 }
 0x847   :  { %4598 = vmatprep.subr.bf16.mxu1 %v16446_v6  ;;  %4639 = vmatprep.subr.bf16.mxu0 %v16451_v7 }
 0x84a   :  { %4599 = vmatpush1.bf16.msra.mxu1 %v16458_v8  ;;  %4640 = vmatpush1.bf16.msra.mxu0 %v16463_v10 }
 0x84b   :  { %4600 = vmatprep.subr.bf16.mxu1 %v16470_v15  ;;  %4641 = vmatprep.subr.bf16.mxu0 %v16475_v46 }
 0x84e   :  { %4601 = vmatpush1.bf16.msra.mxu1 %v16482_v16  ;;  %4642 = vmatpush1.bf16.msra.mxu0 %v16487_v17 }
 0x84f   :  { %4602 = vmatprep.subr.bf16.mxu1 %v16496_v20  ;;  %4643 = vmatprep.subr.bf16.mxu0 %v16501_v22 }
 0x852   :  { %4603 = vmatpush1.bf16.msra.mxu1 %v16506_v49  ;;  %4644 = vmatpush1.bf16.msra.mxu0 %v16511_v42 }
 0x853   :  { %4604 = vmatprep.subr.bf16.mxu1 %v16520_v32  ;;  %4645 = vmatprep.subr.bf16.mxu0 %v16525_v3 }
 0x856   :  { %4605 = vmatpush1.bf16.msra.mxu1 %v16530_v19  ;;  %4646 = vmatpush1.bf16.msra.mxu0 %v16535_v43 }
 0x857   :  { %4606 = vmatprep.subr.bf16.mxu1 %v16544_v45  ;;  %4647 = vmatprep.subr.bf16.mxu0 %v16549_v56 }
 0x85a   :  { %4607 = vmatpush1.bf16.msra.mxu1 %v16554_v48  ;;  %4648 = vmatpush1.bf16.msra.mxu0 %v16559_v33 }
 0x85b   :  { %4608 = vmatprep.subr.bf16.mxu1 %v16568_v2  ;;  %4649 = vmatprep.subr.bf16.mxu0 %v16573_v5 }
 0x85e   :  { %4609 = vmatpush1.bf16.msra.mxu1 %v16578_v29  ;;  %4650 = vmatpush1.bf16.msra.mxu0 %v16583_v30 }
 0x85f   :  { %4610 = vmatprep.subr.bf16.mxu1 %v16592_v31  ;;  %4651 = vmatprep.subr.bf16.mxu0 %v16597_v35 }
 0x862   :  { %4611 = vmatpush1.bf16.msra.mxu1 %v16602_v1  ;;  %4652 = vmatpush1.bf16.msra.mxu0 %v16607_v11 }
 0x863   :  { %4612 = vmatprep.subr.bf16.mxu1 %v16616_v40  ;;  %4653 = vmatprep.subr.bf16.mxu0 %v16621_v41 }
 0x866   :  { %4613 = vmatpush1.bf16.msra.mxu1 %v16626_v12  ;;  %4654 = vmatpush1.bf16.msra.mxu0 %v16631_v51 }
 0x867   :  { %4614 = vmatprep.subr.bf16.mxu1 %v16640_v14  ;;  %4655 = vmatprep.subr.bf16.mxu0 %v16645_v34 }
 0x86a   :  { %4615 = vmatpush1.bf16.msra.mxu1 %v16650_v0  ;;  %4656 = vmatpush1.bf16.msra.mxu0 %v16655_v23 }
 0x86b   :  { %4616 = vmatprep.subr.bf16.mxu1 %v16664_v9  ;;  %4657 = vmatprep.subr.bf16.mxu0 %v16669_v4 }
 0x86e   :  { %4617 = vmatpush1.bf16.msra.mxu1 %v16674_v44  ;;  %4658 = vmatpush1.bf16.msra.mxu0 %v16679_v25 }
 0x86f   :  { %4618 = vmatprep.subr.bf16.mxu1 %v16688_v13  ;;  %4659 = vmatprep.subr.bf16.mxu0 %v16693_v61  ;;  %v19759_v61 = vld [vmem:[#allocation37_spill] sm:$0xff] }
 0x872   :  { %4619 = vmatpush1.bf16.msra.mxu1 %v16698_v53  ;;  %4660 = vmatpush1.bf16.msra.mxu0 %v16703_v27 }
 0x873   :  { %4620 = vmatprep.subr.bf16.mxu1 %v16710_v28  ;;  %4661 = vmatprep.subr.bf16.mxu0 %v16715_v21  ;;  %v19758_v21 = vld [vmem:[#allocation36_spill] sm:$0xff] }
 0x876   :  { %4621 = vmatpush1.bf16.msra.mxu1 %v16722_v36  ;;  %4662 = vmatpush1.bf16.msra.mxu0 %v16727_v24  ;;  %v16758_v36 = vld [vmem:[%s19491_s6 + $0x5e4] ss:$16 sps:$4 sm:$0xff]   ;;  %v16763_v24 = vld [vmem:[%s19491_s6 + $0x5ec] ss:$16 sps:$4 sm:$0xff]  }
 0x877   :  { %4622 = vmatprep.subr.bf16.mxu1 %v16734_v18  ;;  %4663 = vmatprep.subr.bf16.mxu0 %v16739_v60  ;;  %19754 = vst [vmem:[#allocation40_spill] sm:$0xff] %v16758_v36  ;;  %19755 = vst [vmem:[#allocation41_spill] sm:$0xff] %v16763_v24  ;;  %v16770_v18 = vld [vmem:[%s19491_s6 + $0x5e0] ss:$16 sps:$4 sm:$0xff]   ;;  %v16775_v60 = vld [vmem:[%s19491_s6 + $0x5e8] ss:$16 sps:$4 sm:$0xff]  }
 0x878   :  { %19756 = vst [vmem:[#allocation42_spill] sm:$0xff] %v16770_v18  ;;  %19757 = vst [vmem:[#allocation43_spill] sm:$0xff] %v16775_v60 }
 0x87a   :  { %4623 = vmatpush1.bf16.msra.mxu1 %v16746_v62  ;;  %4664 = vmatpush1.bf16.msra.mxu0 %v16751_v59 }
 0x87b   :  { %4624 = vmatprep.subr.bf16.mxu1 %v16758_v36  ;;  %4665 = vmatprep.subr.bf16.mxu0 %v16763_v24 }
 0x87e   :  { %4625 = vmatpush1.bf16.msra.mxu1 %v16770_v18  ;;  %4666 = vmatpush1.bf16.msra.mxu0 %v16775_v60 }
 0x87f   :  { %4701 = vmatprep.subr.bf16.mxu1 %v16386_v54  ;;  %4742 = vmatprep.subr.bf16.mxu0 %v16391_v55 }
 0x913   :  { %v4130_v59 = vpop.f32.mrb[32].mxu1  ;;  %v4171_v62 = vpop.f32.mrb[36].mxu0 }
 0x914   :  { %v4131_v28 = vadd.f32 %v4130_v59, %v19758_v21  ;;  %v4132_v27 = vpop.f32.mrb[33].mxu1  ;;  %v4173_v53 = vpop.f32.mrb[37].mxu0  ;;  %v4172_v54 = vadd.f32 %v4171_v62, %v15521_v38 }
 0x915   :  { %v4133_v13 = vadd.f32 %v4132_v27, %v19759_v61  ;;  %v4134_v25 = vpop.f32.mrb[34].mxu1  ;;  %v4175_v36 = vpop.f32.mrb[38].mxu0  ;;  %v4174_v55 = vadd.f32 %v4173_v53, %v15524_v39 }
 0x916   :  { %v11015_v44 = vmul.f32 -1.442695, %v4131_v28  ;;  %v4135_v24 = vpop.f32.mrb[35].mxu1  ;;  %v4176_v4 = vpop.f32.mrb[39].mxu0  ;;  %v11017_v60 = vmul.f32 -1.442695, %v4172_v54 }
 0x917   :  { %v11016_v18 = vmul.f32 -1.442695, %v4133_v13 }
 0x918   :  { %14176 = vpow2.f32 %v11015_v44 }
 0x919   :  { %14178 = vpow2.f32 %v11016_v18 }
 0x91a   :  { %14180 = vtanh.f32 %v4174_v55 }
 0x91b   :  { %14182 = vpow2.f32 %v11017_v60 }
 0x922   :  { %v14177_v9 = vpop.eup %14176 }
 0x923   :  { %v4187_v23 = vadd.f32 1.0, %v14177_v9  ;;  %v14179_v59 = vpop.eup %14178 }
 0x924   :  { %v4188_v27 = vadd.f32 1.0, %v14179_v59  ;;  %v14181_v25 = vpop.eup %14180 }
 0x925   :  { %14184 = vrcp.f32 %v4187_v23  ;;  %v14183_v28 = vpop.eup %14182 }
 0x926   :  { %14186 = vrcp.f32 %v4188_v27  ;;  %v4189_v44 = vadd.f32 1.0, %v14183_v28 }
 0x928   :  { %14188 = vrcp.f32 %v4189_v44  ;;  %v19785_v44 = vld [vmem:[#allocation21_spill] sm:$0xff] }
 0x92f   :  { %v14185_v24 = vpop.eup %14184 }
 0x930   :  { %v4198_v4 = vmul.f32 %v14185_v24, %v14181_v25  ;;  %v14187_v13 = vpop.eup %14186 }
 0x931   :  { %v4197_v18 = vmul.f32 %v14187_v13, %v15528_v58  ;;  %v19760_v58 = vld [vmem:[#allocation28_spill] sm:$0xff] }
 0x932   :  { %v14189_v53 = vpop.eup %14188 }
 0x933   :  { %v16788_v62 = vadd.f32 %v4198_v4, %v4197_v18 }
 0x935   :  { %14190 = vtanh.f32 %v16788_v62 }
 0x93f   :  { %v14191_v9 = vpop.eup %14190 }
 0x940   :  { %v4201_v36 = vmul.f32 %v14191_v9, %v14189_v53 }
 0x942   :  { %v16791_v60 = vpack.c.bf16 %v4201_v36, %v4201_v36 }
 0x944   :  { %v16794_v23 = vrot.slane %v16791_v60, 1 }
 0x946   :  { %4627 = vmatmul.mubr.bf16.vlgmr.msra.gmra.mrb[36].mxu1 %v16794_v23  ;;  %4668 = vmatmul.mubr.bf16.vlgmr.msra.gmra.mrb[40].mxu0 %v16794_v23 }
 0x947   :  { %4733 = vmatprep.mubr.bf16.mxu1 %v15871_v37  ;;  %4774 = vmatprep.mubr.bf16.mxu0 %v15871_v37  ;;  %v19761_v37 = vld [vmem:[#allocation29_spill] sm:$0xff] }
 0x948   :  { %4702 = vmatpush1.bf16.msra.mxu1 %v16410_v47  ;;  %4743 = vmatpush1.bf16.msra.mxu0 %v16415_v50  ;;  %v19762_v47 = vld [vmem:[#allocation30_spill] sm:$0xff]  ;;  %v19763_v50 = vld [vmem:[#allocation31_spill] sm:$0xff] }
 0x949   :  { %4703 = vmatprep.subr.bf16.mxu1 %v16422_v26  ;;  %4744 = vmatprep.subr.bf16.mxu0 %v16427_v52  ;;  %v19764_v26 = vld [vmem:[#allocation32_spill] sm:$0xff]  ;;  %v19765_v52 = vld [vmem:[#allocation33_spill] sm:$0xff] }
 0x94c   :  { %4704 = vmatpush1.bf16.msra.mxu1 %v16434_v57  ;;  %4745 = vmatpush1.bf16.msra.mxu0 %v16439_v63  ;;  %v19766_v57 = vld [vmem:[#allocation34_spill] sm:$0xff]  ;;  %v19767_v63 = vld [vmem:[#allocation35_spill] sm:$0xff] }
 0x94d   :  { %4705 = vmatprep.subr.bf16.mxu1 %v16446_v6  ;;  %4746 = vmatprep.subr.bf16.mxu0 %v16451_v7  ;;  %v19771_v6 = vld [vmem:[#allocation16_spill] sm:$0xff]  ;;  %v19772_v7 = vld [vmem:[#allocation10_spill] sm:$0xff] }
 0x950   :  { %4706 = vmatpush1.bf16.msra.mxu1 %v16458_v8  ;;  %4747 = vmatpush1.bf16.msra.mxu0 %v16463_v10  ;;  %v19773_v8 = vld [vmem:[#allocation9_spill] sm:$0xff]  ;;  %v19774_v10 = vld [vmem:[#allocation15_spill] sm:$0xff] }
 0x951   :  { %4707 = vmatprep.subr.bf16.mxu1 %v16470_v15  ;;  %4748 = vmatprep.subr.bf16.mxu0 %v16475_v46  ;;  %v19775_v15 = vld [vmem:[#allocation38_spill] sm:$0xff]  ;;  %v19776_v46 = vld [vmem:[#allocation39_spill] sm:$0xff] }
 0x954   :  { %4708 = vmatpush1.bf16.msra.mxu1 %v16482_v16  ;;  %4749 = vmatpush1.bf16.msra.mxu0 %v16487_v17  ;;  %v19777_v16 = vld [vmem:[#allocation40_spill] sm:$0xff]  ;;  %v19778_v17 = vld [vmem:[#allocation41_spill] sm:$0xff] }
 0x955   :  { %4709 = vmatprep.subr.bf16.mxu1 %v16496_v20  ;;  %4750 = vmatprep.subr.bf16.mxu0 %v16501_v22  ;;  %v19779_v20 = vld [vmem:[#allocation42_spill] sm:$0xff]  ;;  %v19780_v22 = vld [vmem:[#allocation43_spill] sm:$0xff] }
 0x958   :  { %4710 = vmatpush1.bf16.msra.mxu1 %v16506_v49  ;;  %4751 = vmatpush1.bf16.msra.mxu0 %v16511_v42  ;;  %v13176_v49 = vld [vmem:[%s19497_s8 + $0x40] sm:$0xff]  }
 0x959   :  { %4711 = vmatprep.subr.bf16.mxu1 %v16520_v32  ;;  %4752 = vmatprep.subr.bf16.mxu0 %v16525_v3  ;;  %v13177_v42 = vld [vmem:[%s19497_s8 + $0xc0] sm:$0xff]  }
 0x95c   :  { %4712 = vmatpush1.bf16.msra.mxu1 %v16530_v19  ;;  %4753 = vmatpush1.bf16.msra.mxu0 %v16535_v43  ;;  %v19781_v19 = vld [vmem:[#allocation17_spill] sm:$0xff] }
 0x95d   :  { %4713 = vmatprep.subr.bf16.mxu1 %v16544_v45  ;;  %4754 = vmatprep.subr.bf16.mxu0 %v16549_v56 }
 0x960   :  { %4714 = vmatpush1.bf16.msra.mxu1 %v16554_v48  ;;  %4755 = vmatpush1.bf16.msra.mxu0 %v16559_v33  ;;  %v19782_v48 = vld [vmem:[#allocation19_spill] sm:$0xff] }
 0x961   :  { %4715 = vmatprep.subr.bf16.mxu1 %v16568_v2  ;;  %4756 = vmatprep.subr.bf16.mxu0 %v16573_v5 }
 0x964   :  { %4716 = vmatpush1.bf16.msra.mxu1 %v16578_v29  ;;  %4757 = vmatpush1.bf16.msra.mxu0 %v16583_v30 }
 0x965   :  { %4717 = vmatprep.subr.bf16.mxu1 %v16592_v31  ;;  %4758 = vmatprep.subr.bf16.mxu0 %v16597_v35 }
 0x968   :  { %4718 = vmatpush1.bf16.msra.mxu1 %v16602_v1  ;;  %4759 = vmatpush1.bf16.msra.mxu0 %v16607_v11  ;;  %v19783_v1 = vld [vmem:[#allocation18_spill] sm:$0xff] }
 0x969   :  { %4719 = vmatprep.subr.bf16.mxu1 %v16616_v40  ;;  %4760 = vmatprep.subr.bf16.mxu0 %v16621_v41  ;;  %v19784_v40 = vld [vmem:[#allocation20_spill] sm:$0xff] }
 0x96c   :  { %4720 = vmatpush1.bf16.msra.mxu1 %v16626_v12  ;;  %4761 = vmatpush1.bf16.msra.mxu0 %v16631_v51 }
 0x96d   :  { %4721 = vmatprep.subr.bf16.mxu1 %v16640_v14  ;;  %4762 = vmatprep.subr.bf16.mxu0 %v16645_v34  ;;  %v19768_v14 = vld [vmem:[#allocation2_spill] sm:$0xff]  ;;  %v19769_v34 = vld [vmem:[#allocation3_spill] sm:$0xff] }
 0x970   :  { %4722 = vmatpush1.bf16.msra.mxu1 %v16650_v0  ;;  %4763 = vmatpush1.bf16.msra.mxu0 %v19760_v58  ;;  %v19770_v0 = vld [vmem:[#allocation7_spill] sm:$0xff] }
 0x971   :  { %4723 = vmatprep.subr.bf16.mxu1 %v19761_v37  ;;  %4764 = vmatprep.subr.bf16.mxu0 %v19762_v47  ;;  %v13178_v37 = vld [vmem:[%s19497_s8] sm:$0xff]  }
 0x972   :  { %v13179_v47 = vld [vmem:[%s19497_s8 + $0x80] sm:$0xff]  }
 0x974   :  { %4724 = vmatpush1.bf16.msra.mxu1 %v19763_v50  ;;  %4765 = vmatpush1.bf16.msra.mxu0 %v19764_v26  ;;  %v13180_v26 = vld [vmem:[%s19497_s8 + $0x48] sm:$0xff]  }
 0x975   :  { %4725 = vmatprep.subr.bf16.mxu1 %v19765_v52  ;;  %4766 = vmatprep.subr.bf16.mxu0 %v19766_v57  ;;  %v13181_v52 = vld [vmem:[%s19497_s8 + $0xc8] sm:$0xff]  }
 0x976   :  { %v13182_v57 = vld [vmem:[%s19497_s8 + $0x8] sm:$0xff]  }
 0x978   :  { %4726 = vmatpush1.bf16.msra.mxu1 %v19767_v63  ;;  %4767 = vmatpush1.bf16.msra.mxu0 %v19768_v14  ;;  %v13183_v63 = vld [vmem:[%s19497_s8 + $0x88] sm:$0xff]   ;;  %v13184_v14 = vld [vmem:[%s19497_s8 + $0x50] sm:$0xff]  }
 0x979   :  { %4727 = vmatprep.subr.bf16.mxu1 %v19769_v34  ;;  %4768 = vmatprep.subr.bf16.mxu0 %v19770_v0  ;;  %v13185_v34 = vld [vmem:[%s19497_s8 + $0xd0] sm:$0xff]  }
 0x97a   :  { %v13186_v0 = vld [vmem:[%s19497_s8 + $0x10] sm:$0xff]  }
 0x97c   :  { %4728 = vmatpush1.bf16.msra.mxu1 %v19771_v6  ;;  %4769 = vmatpush1.bf16.msra.mxu0 %v19772_v7  ;;  %v13187_v6 = vld [vmem:[%s19497_s8 + $0x90] sm:$0xff]   ;;  %v13188_v7 = vld [vmem:[%s19497_s8 + $0x58] sm:$0xff]  }
 0x97d   :  { %4729 = vmatprep.subr.bf16.mxu1 %v19773_v8  ;;  %4770 = vmatprep.subr.bf16.mxu0 %v19774_v10  ;;  %v13189_v8 = vld [vmem:[%s19497_s8 + $0xd8] sm:$0xff]  }
 0x97e   :  { %v13190_v10 = vld [vmem:[%s19497_s8 + $0x18] sm:$0xff]  }
 0x980   :  { %4730 = vmatpush1.bf16.msra.mxu1 %v19775_v15  ;;  %4771 = vmatpush1.bf16.msra.mxu0 %v19776_v46  ;;  %v13191_v15 = vld [vmem:[%s19497_s8 + $0x98] sm:$0xff]   ;;  %v13192_v46 = vld [vmem:[%s19497_s8 + $0x60] sm:$0xff]  }
 0x981   :  { %4731 = vmatprep.subr.bf16.mxu1 %v19777_v16  ;;  %4772 = vmatprep.subr.bf16.mxu0 %v19778_v17  ;;  %v13193_v16 = vld [vmem:[%s19497_s8 + $0xe0] sm:$0xff]  }
 0x982   :  { %v13194_v17 = vld [vmem:[%s19497_s8 + $0x20] sm:$0xff]  }
 0x984   :  { %4732 = vmatpush1.bf16.msra.mxu1 %v19779_v20  ;;  %4773 = vmatpush1.bf16.msra.mxu0 %v19780_v22  ;;  %v13195_v20 = vld [vmem:[%s19497_s8 + $0xa0] sm:$0xff]   ;;  %v13196_v22 = vld [vmem:[%s19497_s8 + $0x68] sm:$0xff]  }
 0x985   :  { %12126 = vmatprep.subr.bf16.mxu1 %v13176_v49  ;;  %12148 = vmatprep.subr.bf16.mxu0 %v13177_v42  ;;  %v13197_v49 = vld [vmem:[%s19497_s8 + $0xe8] sm:$0xff]  }
 0x986   :  { %v13198_v42 = vld [vmem:[%s19497_s8 + $0x28] sm:$0xff]  }
 0xa19   :  { %v4628_v32 = vpop.f32.mrb[36].mxu1  ;;  %v4669_v3 = vpop.f32.mrb[40].mxu0 }
 0xa1a   :  { %v4629_v43 = vadd.f32 %v4628_v32, %v19781_v19  ;;  %v4630_v45 = vpop.f32.mrb[37].mxu1  ;;  %v4671_v56 = vpop.f32.mrb[41].mxu0  ;;  %v4670_v11 = vadd.f32 %v4669_v3, %v19783_v1  ;;  %v13199_v32 = vld [vmem:[%s19497_s8 + $0xa8] sm:$0xff]   ;;  %v13200_v3 = vld [vmem:[%s19497_s8 + $0x70] sm:$0xff]  }
 0xa1b   :  { %v4631_v33 = vadd.f32 %v4630_v45, %v19782_v48  ;;  %v4632_v2 = vpop.f32.mrb[38].mxu1  ;;  %v4673_v5 = vpop.f32.mrb[42].mxu0  ;;  %v4672_v41 = vadd.f32 %v4671_v56, %v19784_v40  ;;  %v13202_v45 = vld [vmem:[%s19497_s8 + $0x30] sm:$0xff]  }
 0xa1c   :  { %v11146_v29 = vmul.f32 -1.442695, %v4629_v43  ;;  %v4633_v30 = vpop.f32.mrb[39].mxu1  ;;  %v4674_v31 = vpop.f32.mrb[43].mxu0  ;;  %v11148_v12 = vmul.f32 -1.442695, %v4670_v11 }
 0xa1d   :  { %v11147_v35 = vmul.f32 -1.442695, %v4631_v33  ;;  %v13201_v43 = vld [vmem:[%s19497_s8 + $0xf0] sm:$0xff]   ;;  %v13204_v33 = vld [vmem:[%s19497_s8 + $0x78] sm:$0xff]   ;;  %v19787_v30 = vmov 0.0   ;;  %v19788_v31 = vld [vmem:[#allocation27_spill] sm:$0xff] }
 0xa1e   :  { %14192 = vpow2.f32 %v11146_v29  ;;  %v13203_v56 = vld [vmem:[%s19497_s8 + $0xb0] sm:$0xff]   ;;  %v13205_v2 = vld [vmem:[%s19497_s8 + $0xf8] sm:$0xff]   ;;  %v13208_v11 = vld [vmem:[%s19497_s8 + $0x100] sm:$0xff]  }
 0xa1f   :  { %14194 = vpow2.f32 %v11147_v35  ;;  %v13206_v5 = vld [vmem:[%s19497_s8 + $0x38] sm:$0xff]  }
 0xa20   :  { %14196 = vtanh.f32 %v4672_v41  ;;  %v13207_v29 = vld [vmem:[%s19497_s8 + $0xb8] sm:$0xff]   ;;  %v13209_v41 = vld [vmem:[%s19497_s8 + $0x108] sm:$0xff]  }
 0xa21   :  { %14198 = vpow2.f32 %v11148_v12  ;;  %v19789_v35 = vld [vmem:[#allocation25_spill] sm:$0xff] }
 0xa22   :  { %v13211_v12 = vld [vmem:[%s19497_s8 + $0x118] sm:$0xff]  }
 0xa28   :  { %v14193_v51 = vpop.eup %14192 }
 0xa29   :  { %v4685_v54 = vadd.f32 1.0, %v14193_v51  ;;  %v14195_v55 = vpop.eup %14194  ;;  %v13212_v51 = vld [vmem:[%s19497_s8 + $0x120] sm:$0xff]  }
 0xa2a   :  { %v4686_v59 = vadd.f32 1.0, %v14195_v55  ;;  %v14197_v27 = vpop.eup %14196  ;;  %v13214_v55 = vld [vmem:[%s19497_s8 + $0x130] sm:$0xff]  }
 0xa2b   :  { %14200 = vrcp.f32 %v4685_v54  ;;  %v14199_v25 = vpop.eup %14198  ;;  %v13213_v54 = vld [vmem:[%s19497_s8 + $0x128] sm:$0xff]  }
 0xa2c   :  { %14202 = vrcp.f32 %v4686_v59  ;;  %v4687_v13 = vadd.f32 1.0, %v14199_v25  ;;  %v13215_v59 = vld [vmem:[%s19497_s8 + $0x138] sm:$0xff]   ;;  %v13218_v25 = vld [vmem:[%s19489_s4 + $0x4] ss:$16 sps:$4 sm:$0xff]  }
 0xa2e   :  { %14204 = vrcp.f32 %v4687_v13  ;;  %v13230_v13 = vld [vmem:[%s19489_s4 + $0x44] ss:$16 sps:$4 sm:$0xff]  }
 0xa35   :  { %v14201_v28 = vpop.eup %14200 }
 0xa36   :  { %v4696_v24 = vmul.f32 %v14201_v28, %v14197_v27  ;;  %v14203_v4 = vpop.eup %14202  ;;  %v13216_v27 = vld [vmem:[%s19489_s4] ss:$16 sps:$4 sm:$0xff]   ;;  %v13221_v28 = vld [vmem:[%s19489_s4 + $0xc] ss:$16 sps:$4 sm:$0xff]  }
 0xa37   :  { %v4695_v18 = vmul.f32 %v14203_v4, %v19785_v44  ;;  %v13222_v4 = vld [vmem:[%s19489_s4 + $0x20] ss:$16 sps:$4 sm:$0xff]  }
 0xa38   :  { %v14205_v9 = vpop.eup %14204  ;;  %v13228_v44 = vld [vmem:[%s19489_s4 + $0x40] ss:$16 sps:$4 sm:$0xff]  }
 0xa39   :  { %v16873_v53 = vadd.f32 %v4696_v24, %v4695_v18  ;;  %v13224_v24 = vld [vmem:[%s19489_s4 + $0x24] ss:$16 sps:$4 sm:$0xff]  }
 0xa3a   :  { %v13236_v18 = vld [vmem:[%s19489_s4 + $0x64] ss:$16 sps:$4 sm:$0xff]  }
 0xa3b   :  { %19786 = vst [vmem:[#allocation36_spill] sm:$0xff] %v16873_v53  ;;  %14206 = vtanh.f32 %v16873_v53  ;;  %v17960_v53 = vld [vmem:[%s19491_s6 + $0x5ac] ss:$16 sps:$4 sm:$0xff]  }
 0xa3c   :  { %19818 = vst [vmem:[#allocation38_spill] sm:$0xff] %v17960_v53 }
 0xa45   :  { %v14207_v36 = vpop.eup %14206 }
 0xa46   :  { %v4699_v58 = vmul.f32 %v14207_v36, %v14205_v9  ;;  %v13234_v9 = vld [vmem:[%s19489_s4 + $0x60] ss:$16 sps:$4 sm:$0xff]   ;;  %v13242_v36 = vld [vmem:[%s19489_s4 + $0x84] ss:$16 sps:$4 sm:$0xff]  }
 0xa48   :  { %v16882_v50 = vpack.c.bf16 %v4699_v58, %v4699_v58  ;;  %v13240_v58 = vld [vmem:[%s19489_s4 + $0x80] ss:$16 sps:$4 sm:$0xff]  }
 0xa4a   :  { %4734 = vmatmul.mubr.bf16.vlgmr.msra.gmra.mrb[40].mxu1 %v16882_v50  ;;  %4775 = vmatmul.mubr.bf16.vlgmr.msra.gmra.mrb[44].mxu0 %v16882_v50 }
 0xa4b   :  { %12127 = vmatpush3.bf16.msra.mxu1 %v13178_v37  ;;  %12149 = vmatpush3.bf16.msra.mxu0 %v13179_v47  ;;  %v13248_v37 = vld [vmem:[%s19489_s4 + $0xa4] ss:$16 sps:$4 sm:$0xff]   ;;  %v13246_v47 = vld [vmem:[%s19489_s4 + $0xa0] ss:$16 sps:$4 sm:$0xff]  }
 0xa4c   :  { %5160 = vmatprep.mubr.bf16.mxu1 %v16791_v60  ;;  %5200 = vmatprep.mubr.bf16.mxu0 %v16882_v50 }
 0xa4d   :  { %12128 = vmatprep.subr.bf16.mxu1 %v13180_v26  ;;  %12150 = vmatprep.subr.bf16.mxu0 %v13181_v52  ;;  %v13254_v26 = vld [vmem:[%s19489_s4 + $0xc4] ss:$16 sps:$4 sm:$0xff]   ;;  %v13252_v52 = vld [vmem:[%s19489_s4 + $0xc0] ss:$16 sps:$4 sm:$0xff]  }
 0xa4f   :  { %12129 = vmatpush3.bf16.msra.mxu1 %v13182_v57  ;;  %12151 = vmatpush3.bf16.msra.mxu0 %v13183_v63  ;;  %v13260_v57 = vld [vmem:[%s19489_s4 + $0xe4] ss:$16 sps:$4 sm:$0xff]   ;;  %v13258_v63 = vld [vmem:[%s19489_s4 + $0xe0] ss:$16 sps:$4 sm:$0xff]  }
 0xa50   :  { %12130 = vmatprep.subr.bf16.mxu1 %v13184_v14  ;;  %12152 = vmatprep.subr.bf16.mxu0 %v13185_v34  ;;  %v13266_v14 = vld [vmem:[%s19489_s4 + $0x104] ss:$16 sps:$4 sm:$0xff]   ;;  %v13264_v34 = vld [vmem:[%s19489_s4 + $0x100] ss:$16 sps:$4 sm:$0xff]  }
 0xa53   :  { %12131 = vmatpush3.bf16.msra.mxu1 %v13186_v0  ;;  %12153 = vmatpush3.bf16.msra.mxu0 %v13187_v6  ;;  %v13272_v0 = vld [vmem:[%s19489_s4 + $0x124] ss:$16 sps:$4 sm:$0xff]   ;;  %v13270_v6 = vld [vmem:[%s19489_s4 + $0x120] ss:$16 sps:$4 sm:$0xff]  }
 0xa54   :  { %12132 = vmatprep.subr.bf16.mxu1 %v13188_v7  ;;  %12154 = vmatprep.subr.bf16.mxu0 %v13189_v8  ;;  %v13278_v7 = vld [vmem:[%s19489_s4 + $0x144] ss:$16 sps:$4 sm:$0xff]   ;;  %v13276_v8 = vld [vmem:[%s19489_s4 + $0x140] ss:$16 sps:$4 sm:$0xff]  }
 0xa57   :  { %12133 = vmatpush3.bf16.msra.mxu1 %v13190_v10  ;;  %12155 = vmatpush3.bf16.msra.mxu0 %v13191_v15  ;;  %v13284_v10 = vld [vmem:[%s19489_s4 + $0x164] ss:$16 sps:$4 sm:$0xff]   ;;  %v13282_v15 = vld [vmem:[%s19489_s4 + $0x160] ss:$16 sps:$4 sm:$0xff]  }
 0xa58   :  { %12134 = vmatprep.subr.bf16.mxu1 %v13192_v46  ;;  %12156 = vmatprep.subr.bf16.mxu0 %v13193_v16  ;;  %v13290_v46 = vld [vmem:[%s19489_s4 + $0x184] ss:$16 sps:$4 sm:$0xff]   ;;  %v13288_v16 = vld [vmem:[%s19489_s4 + $0x180] ss:$16 sps:$4 sm:$0xff]  }
 0xa5b   :  { %12135 = vmatpush3.bf16.msra.mxu1 %v13194_v17  ;;  %12157 = vmatpush3.bf16.msra.mxu0 %v13195_v20  ;;  %v13296_v17 = vld [vmem:[%s19489_s4 + $0x1a4] ss:$16 sps:$4 sm:$0xff]   ;;  %v13294_v20 = vld [vmem:[%s19489_s4 + $0x1a0] ss:$16 sps:$4 sm:$0xff]  }
 0xa5c   :  { %12136 = vmatprep.subr.bf16.mxu1 %v13196_v22  ;;  %12158 = vmatprep.subr.bf16.mxu0 %v13197_v49  ;;  %v13302_v22 = vld [vmem:[%s19489_s4 + $0x1c4] ss:$16 sps:$4 sm:$0xff]   ;;  %v13300_v49 = vld [vmem:[%s19489_s4 + $0x1c0] ss:$16 sps:$4 sm:$0xff]  }
 0xa5f   :  { %12137 = vmatpush3.bf16.msra.mxu1 %v13198_v42  ;;  %12159 = vmatpush3.bf16.msra.mxu0 %v13199_v32 }
 0xa60   :  { %12138 = vmatprep.subr.bf16.mxu1 %v13200_v3  ;;  %12160 = vmatprep.subr.bf16.mxu0 %v13201_v43 }
 0xa63   :  { %12139 = vmatpush3.bf16.msra.mxu1 %v13202_v45  ;;  %12161 = vmatpush3.bf16.msra.mxu0 %v13203_v56 }
 0xa64   :  { %12140 = vmatprep.subr.bf16.mxu1 %v13204_v33  ;;  %12162 = vmatprep.subr.bf16.mxu0 %v13205_v2 }
 0xa67   :  { %12141 = vmatpush3.bf16.msra.mxu1 %v13206_v5  ;;  %12163 = vmatpush3.bf16.msra.mxu0 %v13207_v29 }
 0xa68   :  { %12305 = vmatprep.subr.bf16.mxu1 %v19787_v30  ;;  %5636 = vmatprep.subr.bf16.mxu0 %v13218_v25 }
 0xa6a   :  { %5161 = vmatmul.mubr.bf16.vlgmr.msra.gmra.mrb[44].mxu1 %v19788_v31  ;;  %5201 = vmatmul.mubr.bf16.vlgmr.msra.gmra.mrb[48].mxu0 %v16794_v23  ;;  %v13210_v23 = vld [vmem:[%s19497_s8 + $0x110] sm:$0xff]  }
 0xa6b   :  { %5668 = vmatprep.mubr.bf16.mxu0 %v19789_v35  ;;  %12321 = vmatprep.mubr.msk.bf16.mxu1 %vm14390_vm3, %v19787_v30 }
 0xa6c   :  { %12306 = vmatpush3.bf16.msra.mxu1 %v13208_v11  ;;  %5637 = vmatpush1.bf16.msra.mxu0 %v13216_v27 }
 0xa6d   :  { %12307 = vmatprep.subr.bf16.mxu1 %v19787_v30  ;;  %5638 = vmatprep.subr.bf16.mxu0 %v13224_v24 }
 0xa70   :  { %12308 = vmatpush3.bf16.msra.mxu1 %v13209_v41  ;;  %5639 = vmatpush1.bf16.msra.mxu0 %v13222_v4 }
 0xa71   :  { %12309 = vmatprep.subr.bf16.mxu1 %v19787_v30  ;;  %5640 = vmatprep.subr.bf16.mxu0 %v13230_v13 }
 0xa74   :  { %12310 = vmatpush3.bf16.msra.mxu1 %v13210_v23  ;;  %5641 = vmatpush1.bf16.msra.mxu0 %v13228_v44 }
 0xa75   :  { %12311 = vmatprep.subr.bf16.mxu1 %v19787_v30  ;;  %5642 = vmatprep.subr.bf16.mxu0 %v13236_v18  ;;  %v19790_v18 = vld [vmem:[#allocation22_spill] sm:$0xff] }
 0xa78   :  { %12312 = vmatpush3.bf16.msra.mxu1 %v13211_v12  ;;  %5643 = vmatpush1.bf16.msra.mxu0 %v13234_v9 }
 0xa79   :  { %12313 = vmatprep.subr.bf16.mxu1 %v19787_v30  ;;  %5644 = vmatprep.subr.bf16.mxu0 %v13242_v36 }
 0xa7c   :  { %12314 = vmatpush3.bf16.msra.mxu1 %v13212_v51  ;;  %5645 = vmatpush1.bf16.msra.mxu0 %v13240_v58 }
 0xa7d   :  { %12315 = vmatprep.subr.bf16.mxu1 %v19787_v30  ;;  %5646 = vmatprep.subr.bf16.mxu0 %v13248_v37 }
 0xa80   :  { %12316 = vmatpush3.bf16.msra.mxu1 %v13213_v54  ;;  %5647 = vmatpush1.bf16.msra.mxu0 %v13246_v47 }
 0xa81   :  { %12317 = vmatprep.subr.bf16.mxu1 %v19787_v30  ;;  %5648 = vmatprep.subr.bf16.mxu0 %v13254_v26 }
 0xa84   :  { %12318 = vmatpush3.bf16.msra.mxu1 %v13214_v55  ;;  %5649 = vmatpush1.bf16.msra.mxu0 %v13252_v52 }
 0xa85   :  { %12319 = vmatprep.subr.bf16.mxu1 %v19787_v30  ;;  %5650 = vmatprep.subr.bf16.mxu0 %v13260_v57  ;;  %v17955_v30 = vld [vmem:[%s19491_s6 + $0x5a4] ss:$16 sps:$4 sm:$0xff]  }
 0xa86   :  { %19817 = vst [vmem:[#allocation15_spill] sm:$0xff] %v17955_v30 }
 0xa88   :  { %12320 = vmatpush3.bf16.msra.mxu1 %v13215_v59  ;;  %5651 = vmatpush1.bf16.msra.mxu0 %v13258_v63 }
 0xa89   :  { %5677 = vmatprep.subr.bf16.mxu1 %v13221_v28  ;;  %5652 = vmatprep.subr.bf16.mxu0 %v13266_v14 }
 0xa8c   :  { %5653 = vmatpush1.bf16.msra.mxu0 %v13264_v34 }
 0xa8d   :  { %5654 = vmatprep.subr.bf16.mxu0 %v13272_v0 }
 0xa90   :  { %5655 = vmatpush1.bf16.msra.mxu0 %v13270_v6  ;;  %v14385_v6 = vld [vmem:[%s19498_s9] ss:$0 sm:$0xff] }
 0xa91   :  { %5656 = vmatprep.subr.bf16.mxu0 %v13278_v7 }
 0xa94   :  { %5657 = vmatpush1.bf16.msra.mxu0 %v13276_v8 }
 0xa95   :  { %5658 = vmatprep.subr.bf16.mxu0 %v13284_v10 }
 0xa98   :  { %5659 = vmatpush1.bf16.msra.mxu0 %v13282_v15 }
 0xa99   :  { %5660 = vmatprep.subr.bf16.mxu0 %v13290_v46 }
 0xa9c   :  { %5661 = vmatpush1.bf16.msra.mxu0 %v13288_v16  ;;  %v13219_v16 = vld [vmem:[%s19489_s4 + $0x8] ss:$16 sps:$4 sm:$0xff]  }
 0xa9d   :  { %5662 = vmatprep.subr.bf16.mxu0 %v13296_v17 }
 0xaa0   :  { %5663 = vmatpush1.bf16.msra.mxu0 %v13294_v20  ;;  %v13227_v20 = vld [vmem:[%s19489_s4 + $0x2c] ss:$16 sps:$4 sm:$0xff]  }
 0xaa1   :  { %5664 = vmatprep.subr.bf16.mxu0 %v13302_v22  ;;  %v13225_v22 = vld [vmem:[%s19489_s4 + $0x28] ss:$16 sps:$4 sm:$0xff]  }
 0xaa4   :  { %5665 = vmatpush1.bf16.msra.mxu0 %v13300_v49  ;;  %v13233_v49 = vld [vmem:[%s19489_s4 + $0x4c] ss:$16 sps:$4 sm:$0xff]  }
 0xb1d   :  { %v4735_v42 = vpop.f32.mrb[40].mxu1  ;;  %v4776_v32 = vpop.f32.mrb[44].mxu0 }
 0xb1e   :  { %v4736_v3 = vadd.f32 %v4735_v42, %v19781_v19  ;;  %v4737_v43 = vpop.f32.mrb[41].mxu1  ;;  %v4778_v45 = vpop.f32.mrb[45].mxu0  ;;  %v4777_v23 = vadd.f32 %v4776_v32, %v19783_v1  ;;  %v13231_v42 = vld [vmem:[%s19489_s4 + $0x48] ss:$16 sps:$4 sm:$0xff]   ;;  %v17984_v19 = vld [vmem:[%s19491_s6 + $0x5cc] ss:$16 sps:$4 sm:$0xff]  }
 0xb1f   :  { %v4738_v56 = vadd.f32 %v4737_v43, %v19782_v48  ;;  %v4739_v33 = vpop.f32.mrb[42].mxu1  ;;  %v4780_v2 = vpop.f32.mrb[46].mxu0  ;;  %v4779_v12 = vadd.f32 %v4778_v45, %v19784_v40  ;;  %v13237_v32 = vld [vmem:[%s19489_s4 + $0x68] ss:$16 sps:$4 sm:$0xff]   ;;  %v13251_v45 = vld [vmem:[%s19489_s4 + $0xac] ss:$16 sps:$4 sm:$0xff]  }
 0xb20   :  { %v11149_v5 = vmul.f32 -1.442695, %v4736_v3  ;;  %v4740_v29 = vpop.f32.mrb[43].mxu1  ;;  %v4781_v11 = vpop.f32.mrb[47].mxu0  ;;  %v11151_v51 = vmul.f32 -1.442695, %v4777_v23 }
 0xb21   :  { %v11150_v41 = vmul.f32 -1.442695, %v4738_v56  ;;  %v13245_v3 = vld [vmem:[%s19489_s4 + $0x8c] ss:$16 sps:$4 sm:$0xff]   ;;  %v13243_v43 = vld [vmem:[%s19489_s4 + $0x88] ss:$16 sps:$4 sm:$0xff]  }
 0xb22   :  { %14208 = vpow2.f32 %v11149_v5  ;;  %v13249_v56 = vld [vmem:[%s19489_s4 + $0xa8] ss:$16 sps:$4 sm:$0xff]   ;;  %v13257_v33 = vld [vmem:[%s19489_s4 + $0xcc] ss:$16 sps:$4 sm:$0xff]   ;;  %v17967_v40 = vld [vmem:[%s19491_s6 + $0x5a0] ss:$16 sps:$4 sm:$0xff]  }
 0xb23   :  { %14210 = vpow2.f32 %v11150_v41  ;;  %v13255_v2 = vld [vmem:[%s19489_s4 + $0xc8] ss:$16 sps:$4 sm:$0xff]   ;;  %v13263_v5 = vld [vmem:[%s19489_s4 + $0xec] ss:$16 sps:$4 sm:$0xff]   ;;  %19819 = vst [vmem:[#allocation39_spill] sm:$0xff] %v17967_v40  ;;  %19822 = vst [vmem:[#allocation42_spill] sm:$0xff] %v17984_v19 }
 0xb24   :  { %14212 = vtanh.f32 %v4779_v12  ;;  %v13261_v29 = vld [vmem:[%s19489_s4 + $0xe8] ss:$16 sps:$4 sm:$0xff]   ;;  %v13269_v11 = vld [vmem:[%s19489_s4 + $0x10c] ss:$16 sps:$4 sm:$0xff]   ;;  %v17979_v48 = vld [vmem:[%s19491_s6 + $0x5c4] ss:$16 sps:$4 sm:$0xff]  }
 0xb25   :  { %14214 = vpow2.f32 %v11151_v51  ;;  %v13267_v41 = vld [vmem:[%s19489_s4 + $0x108] ss:$16 sps:$4 sm:$0xff]   ;;  %v13275_v23 = vld [vmem:[%s19489_s4 + $0x12c] ss:$16 sps:$4 sm:$0xff]   ;;  %19821 = vst [vmem:[#allocation41_spill] sm:$0xff] %v17979_v48 }
 0xb26   :  { %v13273_v12 = vld [vmem:[%s19489_s4 + $0x128] ss:$16 sps:$4 sm:$0xff]   ;;  %v13281_v51 = vld [vmem:[%s19489_s4 + $0x14c] ss:$16 sps:$4 sm:$0xff]  }
 0xb27   :  { %v17972_v1 = vld [vmem:[%s19491_s6 + $0x5a8] ss:$16 sps:$4 sm:$0xff]  }
 0xb28   :  { %19820 = vst [vmem:[#allocation40_spill] sm:$0xff] %v17972_v1 }
 0xb2c   :  { %v14209_v54 = vpop.eup %14208 }
 0xb2d   :  { %v4792_v55 = vadd.f32 1.0, %v14209_v54  ;;  %v14211_v59 = vpop.eup %14210  ;;  %v13279_v54 = vld [vmem:[%s19489_s4 + $0x148] ss:$16 sps:$4 sm:$0xff]  }
 0xb2e   :  { %v4793_v27 = vadd.f32 1.0, %v14211_v59  ;;  %v14213_v25 = vpop.eup %14212  ;;  %v13285_v59 = vld [vmem:[%s19489_s4 + $0x168] ss:$16 sps:$4 sm:$0xff]  }
 0xb2f   :  { %14216 = vrcp.f32 %v4792_v55  ;;  %v14215_v28 = vpop.eup %14214  ;;  %v13287_v55 = vld [vmem:[%s19489_s4 + $0x16c] ss:$16 sps:$4 sm:$0xff]  }
 0xb30   :  { %14218 = vrcp.f32 %v4793_v27  ;;  %v4794_v44 = vadd.f32 1.0, %v14215_v28  ;;  %v13293_v27 = vld [vmem:[%s19489_s4 + $0x18c] ss:$16 sps:$4 sm:$0xff]  }
 0xb31   :  { %v13299_v28 = vld [vmem:[%s19489_s4 + $0x1ac] ss:$16 sps:$4 sm:$0xff]  }
 0xb32   :  { %14220 = vrcp.f32 %v4794_v44  ;;  %v13308_v44 = vld [vmem:[%s19489_s4 + $0x1e4] ss:$16 sps:$4 sm:$0xff]  }
 0xb33   :  { %5666 = vmatprep.subr.bf16.mxu0 %v13308_v44  ;;  %v13371_v44 = vld [vmem:[%s19491_s6 + $0x12c] ss:$16 sps:$4 sm:$0xff]  }
 0xb39   :  { %v14217_v24 = vpop.eup %14216 }
 0xb3a   :  { %v4803_v4 = vmul.f32 %v14217_v24, %v14213_v25  ;;  %v14219_v13 = vpop.eup %14218  ;;  %v13291_v25 = vld [vmem:[%s19489_s4 + $0x188] ss:$16 sps:$4 sm:$0xff]  }
 0xb3b   :  { %v4802_v9 = vmul.f32 %v14219_v13, %v19790_v18  ;;  %v13297_v24 = vld [vmem:[%s19489_s4 + $0x1a8] ss:$16 sps:$4 sm:$0xff]   ;;  %v13311_v18 = vld [vmem:[%s19489_s4 + $0x1ec] ss:$16 sps:$4 sm:$0xff]  }
 0xb3c   :  { %v14221_v10 = vpop.eup %14220  ;;  %v13303_v13 = vld [vmem:[%s19489_s4 + $0x1c8] ss:$16 sps:$4 sm:$0xff]  }
 0xb3d   :  { %v12142_v36 = vpop.f32.mrb[44].mxu1  ;;  %v12164_v58 = vpop.f32.mrb[48].mxu0  ;;  %v17107_v37 = vadd.f32 %v4803_v4, %v4802_v9  ;;  %v13305_v4 = vld [vmem:[%s19489_s4 + $0x1cc] ss:$16 sps:$4 sm:$0xff]   ;;  %v13306_v9 = vld [vmem:[%s19489_s4 + $0x1e0] ss:$16 sps:$4 sm:$0xff]  }
 0xb3e   :  { %v12143_v47 = vpop.f32.mrb[45].mxu1  ;;  %v12165_v26 = vpop.f32.mrb[49].mxu0  ;;  %5667 = vmatpush1.bf16.msra.mxu0 %v13306_v9  ;;  %v13369_v9 = vld [vmem:[%s19491_s6 + $0x128] ss:$16 sps:$4 sm:$0xff]  }
 0xb3f   :  { %19791 = vst [vmem:[#allocation37_spill] sm:$0xff] %v17107_v37  ;;  %v12144_v52 = vadd.f32 %v12143_v47, %v12142_v36  ;;  %v12166_v57 = vadd.f32 %v12165_v26, %v12164_v58  ;;  %v12145_v63 = vpop.f32.mrb[46].mxu1  ;;  %v12167_v14 = vpop.f32.mrb[50].mxu0  ;;  %14222 = vtanh.f32 %v17107_v37  ;;  %v13309_v36 = vld [vmem:[%s19489_s4 + $0x1e8] ss:$16 sps:$4 sm:$0xff]  }
 0xb40   :  { %v12146_v34 = vpop.f32.mrb[47].mxu1  ;;  %v12168_v0 = vpop.f32.mrb[51].mxu0  ;;  %v13314_v58 = vld [vmem:[%s19491_s6 + $0x4] ss:$16 sps:$4 sm:$0xff]   ;;  %v13317_v47 = vld [vmem:[%s19491_s6 + $0xc] ss:$16 sps:$4 sm:$0xff]  }
 0xb41   :  { %v5163_v7 = vadd.f32 %v14385_v6, %v12144_v52  ;;  %6127 = vmatprep.subr.bf16.mxu0 %v13314_v58  ;;  %v19792_v14 = vld [vmem:[#allocation23_spill] sm:$0xff] }
 0xb42   :  { %v13377_v58 = vld [vmem:[%s19491_s6 + $0x14c] ss:$16 sps:$4 sm:$0xff]  }
 0xb43   :  { %v17113_v8 = vadd.f32 %v12166_v57, %v5163_v7  ;;  %v13312_v7 = vld [vmem:[%s19491_s6] ss:$16 sps:$4 sm:$0xff]   ;;  %v17938_v37 = vld [vmem:[%s19491_s6 + $0x58c] ss:$16 sps:$4 sm:$0xff]  }
 0xb44   :  { %19814 = vst [vmem:[#allocation16_spill] sm:$0xff] %v17938_v37 }
 0xb49   :  { %v14223_v15 = vpop.eup %14222 }
 0xb4a   :  { %v4806_v46 = vmul.f32 %v14223_v15, %v14221_v10  ;;  %v13320_v10 = vld [vmem:[%s19491_s6 + $0x24] ss:$16 sps:$4 sm:$0xff]   ;;  %v13323_v15 = vld [vmem:[%s19491_s6 + $0x2c] ss:$16 sps:$4 sm:$0xff]  }
 0xb4c   :  { %v17118_v17 = vpack.c.bf16 %v4806_v46, %v4806_v46  ;;  %v13318_v46 = vld [vmem:[%s19491_s6 + $0x20] ss:$16 sps:$4 sm:$0xff]  }
 0xb4e   :  { %12322 = vmatmul.mubr.bf16.vlgmr.msra.gmra.mrb[48].mxu1 %v17118_v17 }
 0xb4f   :  { %5709 = vmatprep.mubr.bf16.mxu1 %v19789_v35  ;;  %5678 = vmatpush1.bf16.msra.mxu1 %v13219_v16  ;;  %v13239_v35 = vld [vmem:[%s19489_s4 + $0x6c] ss:$16 sps:$4 sm:$0xff]   ;;  %v13321_v16 = vld [vmem:[%s19491_s6 + $0x28] ss:$16 sps:$4 sm:$0xff]  }
 0xb50   :  { %5679 = vmatprep.subr.bf16.mxu1 %v13227_v20  ;;  %v13326_v20 = vld [vmem:[%s19491_s6 + $0x44] ss:$16 sps:$4 sm:$0xff]  }
 0xb53   :  { %5680 = vmatpush1.bf16.msra.mxu1 %v13225_v22  ;;  %v13324_v22 = vld [vmem:[%s19491_s6 + $0x40] ss:$16 sps:$4 sm:$0xff]  }
 0xb54   :  { %5681 = vmatprep.subr.bf16.mxu1 %v13233_v49  ;;  %v13327_v49 = vld [vmem:[%s19491_s6 + $0x48] ss:$16 sps:$4 sm:$0xff]  }
 0xb57   :  { %5682 = vmatpush1.bf16.msra.mxu1 %v13231_v42  ;;  %v13332_v42 = vld [vmem:[%s19491_s6 + $0x64] ss:$16 sps:$4 sm:$0xff]  }
 0xb58   :  { %5683 = vmatprep.subr.bf16.mxu1 %v13239_v35  ;;  %v13335_v35 = vld [vmem:[%s19491_s6 + $0x6c] ss:$16 sps:$4 sm:$0xff]  }
 0xb5b   :  { %5684 = vmatpush1.bf16.msra.mxu1 %v13237_v32  ;;  %v13330_v32 = vld [vmem:[%s19491_s6 + $0x60] ss:$16 sps:$4 sm:$0xff]  }
 0xb5c   :  { %5685 = vmatprep.subr.bf16.mxu1 %v13245_v3  ;;  %v13333_v3 = vld [vmem:[%s19491_s6 + $0x68] ss:$16 sps:$4 sm:$0xff]  }
 0xb5f   :  { %5686 = vmatpush1.bf16.msra.mxu1 %v13243_v43  ;;  %v13338_v43 = vld [vmem:[%s19491_s6 + $0x84] ss:$16 sps:$4 sm:$0xff]  }
 0xb60   :  { %5687 = vmatprep.subr.bf16.mxu1 %v13251_v45  ;;  %v13341_v45 = vld [vmem:[%s19491_s6 + $0x8c] ss:$16 sps:$4 sm:$0xff]  }
 0xb63   :  { %5688 = vmatpush1.bf16.msra.mxu1 %v13249_v56  ;;  %v13336_v56 = vld [vmem:[%s19491_s6 + $0x80] ss:$16 sps:$4 sm:$0xff]  }
 0xb64   :  { %5689 = vmatprep.subr.bf16.mxu1 %v13257_v33  ;;  %v13339_v33 = vld [vmem:[%s19491_s6 + $0x88] ss:$16 sps:$4 sm:$0xff]  }
 0xb67   :  { %5690 = vmatpush1.bf16.msra.mxu1 %v13255_v2  ;;  %v13344_v2 = vld [vmem:[%s19491_s6 + $0xa4] ss:$16 sps:$4 sm:$0xff]  }
 0xb68   :  { %5691 = vmatprep.subr.bf16.mxu1 %v13263_v5  ;;  %v13347_v5 = vld [vmem:[%s19491_s6 + $0xac] ss:$16 sps:$4 sm:$0xff]  }
 0xb6b   :  { %5692 = vmatpush1.bf16.msra.mxu1 %v13261_v29  ;;  %v13342_v29 = vld [vmem:[%s19491_s6 + $0xa0] ss:$16 sps:$4 sm:$0xff]  }
 0xb6c   :  { %5693 = vmatprep.subr.bf16.mxu1 %v13269_v11  ;;  %v13345_v11 = vld [vmem:[%s19491_s6 + $0xa8] ss:$16 sps:$4 sm:$0xff]  }
 0xb6f   :  { %5694 = vmatpush1.bf16.msra.mxu1 %v13267_v41  ;;  %v13350_v41 = vld [vmem:[%s19491_s6 + $0xc4] ss:$16 sps:$4 sm:$0xff]  }
 0xb70   :  { %5695 = vmatprep.subr.bf16.mxu1 %v13275_v23  ;;  %v13353_v23 = vld [vmem:[%s19491_s6 + $0xcc] ss:$16 sps:$4 sm:$0xff]  }
 0xb73   :  { %5696 = vmatpush1.bf16.msra.mxu1 %v13273_v12  ;;  %v13348_v12 = vld [vmem:[%s19491_s6 + $0xc0] ss:$16 sps:$4 sm:$0xff]  }
 0xb74   :  { %5697 = vmatprep.subr.bf16.mxu1 %v13281_v51  ;;  %v13351_v51 = vld [vmem:[%s19491_s6 + $0xc8] ss:$16 sps:$4 sm:$0xff]  }
 0xb77   :  { %5698 = vmatpush1.bf16.msra.mxu1 %v13279_v54  ;;  %v13356_v54 = vld [vmem:[%s19491_s6 + $0xe4] ss:$16 sps:$4 sm:$0xff]  }
 0xb78   :  { %5699 = vmatprep.subr.bf16.mxu1 %v13287_v55  ;;  %v13359_v55 = vld [vmem:[%s19491_s6 + $0xec] ss:$16 sps:$4 sm:$0xff]  }
 0xb7b   :  { %5700 = vmatpush1.bf16.msra.mxu1 %v13285_v59  ;;  %v13354_v59 = vld [vmem:[%s19491_s6 + $0xe0] ss:$16 sps:$4 sm:$0xff]  }
 0xb7c   :  { %5701 = vmatprep.subr.bf16.mxu1 %v13293_v27  ;;  %v13357_v27 = vld [vmem:[%s19491_s6 + $0xe8] ss:$16 sps:$4 sm:$0xff]  }
 0xb7f   :  { %5702 = vmatpush1.bf16.msra.mxu1 %v13291_v25  ;;  %v13362_v25 = vld [vmem:[%s19491_s6 + $0x104] ss:$16 sps:$4 sm:$0xff]  }
 0xb80   :  { %5703 = vmatprep.subr.bf16.mxu1 %v13299_v28  ;;  %v13365_v28 = vld [vmem:[%s19491_s6 + $0x10c] ss:$16 sps:$4 sm:$0xff]  }
 0xb83   :  { %5704 = vmatpush1.bf16.msra.mxu1 %v13297_v24  ;;  %v13360_v24 = vld [vmem:[%s19491_s6 + $0x100] ss:$16 sps:$4 sm:$0xff]  }
 0xb84   :  { %5705 = vmatprep.subr.bf16.mxu1 %v13305_v4  ;;  %v13363_v4 = vld [vmem:[%s19491_s6 + $0x108] ss:$16 sps:$4 sm:$0xff]  }
 0xb87   :  { %5706 = vmatpush1.bf16.msra.mxu1 %v13303_v13  ;;  %v13368_v13 = vld [vmem:[%s19491_s6 + $0x124] ss:$16 sps:$4 sm:$0xff]  }
 0xb88   :  { %5707 = vmatprep.subr.bf16.mxu1 %v13311_v18  ;;  %v13366_v18 = vld [vmem:[%s19491_s6 + $0x120] ss:$16 sps:$4 sm:$0xff]  }
 0xb8b   :  { %5708 = vmatpush1.bf16.msra.mxu1 %v13309_v36  ;;  %v13374_v36 = vld [vmem:[%s19491_s6 + $0x144] ss:$16 sps:$4 sm:$0xff]  }
 0xb8c   :  { %6168 = vmatprep.subr.bf16.mxu1 %v13317_v47  ;;  %v13372_v47 = vld [vmem:[%s19491_s6 + $0x140] ss:$16 sps:$4 sm:$0xff]  }
 0xc21   :  { %v5242_v26 = vpop.f32.mrb[48].mxu1 }
 0xc22   :  { %v5243_v52 = vadd.f32 %v5242_v26, %v17113_v8  ;;  %v12323_v57 = vpop.f32.mrb[49].mxu1  ;;  %v13315_v8 = vld [vmem:[%s19491_s6 + $0x8] ss:$16 sps:$4 sm:$0xff]  }
 0xc23   :  { %v5245_v63 = vpop.f32.mrb[50].mxu1  ;;  %v13375_v26 = vld [vmem:[%s19491_s6 + $0x148] ss:$16 sps:$4 sm:$0xff]   ;;  %v13383_v57 = vld [vmem:[%s19491_s6 + $0x16c] ss:$16 sps:$4 sm:$0xff]  }
 0xc24   :  { %v17226_v34 = vadd.f32 %v5243_v52, %v19792_v14  ;;  %v12324_v0 = vpop.f32.mrb[51].mxu1  ;;  %v13380_v52 = vld [vmem:[%s19491_s6 + $0x164] ss:$16 sps:$4 sm:$0xff]   ;;  %v13378_v63 = vld [vmem:[%s19491_s6 + $0x160] ss:$16 sps:$4 sm:$0xff]  }
 0xc25   :  { %v13381_v14 = vld [vmem:[%s19491_s6 + $0x168] ss:$16 sps:$4 sm:$0xff]   ;;  %v13386_v0 = vld [vmem:[%s19491_s6 + $0x184] ss:$16 sps:$4 sm:$0xff]  }
 0xc26   :  { %19793 = vst [vmem:[#allocation28_spill] sm:$0xff] %v17226_v34  ;;  %11192 = vst [vmem:[%s19499_s10 + $0x2] sm:$0x3] %v17226_v34  ;;  %v5251_v6 = vpack.c.bf16 %v17226_v34, %v17226_v34  ;;  %v17933_v34 = vld [vmem:[%s19491_s6 + $0x584] ss:$16 sps:$4 sm:$0xff]  }
 0xc27   :  { %19813 = vst [vmem:[#allocation7_spill] sm:$0xff] %v17933_v34 }
 0xc28   :  { %5669 = vmatmul.mubr.bf16.vlgmr.msra.gmra.mrb[52].mxu0 %v5251_v6  ;;  %5710 = vmatmul.mubr.bf16.vlgmr.msra.gmra.mrb[52].mxu1 %v5251_v6  ;;  %v13389_v6 = vld [vmem:[%s19491_s6 + $0x18c] ss:$16 sps:$4 sm:$0xff]  }
 0xc29   :  { %6159 = vmatprep.mubr.bf16.mxu0 %v19788_v31  ;;  %6200 = vmatprep.mubr.bf16.mxu1 %v19788_v31  ;;  %v13329_v31 = vld [vmem:[%s19491_s6 + $0x4c] ss:$16 sps:$4 sm:$0xff]  }
 0xc2a   :  { %6128 = vmatpush1.bf16.msra.mxu0 %v13312_v7  ;;  %6169 = vmatpush1.bf16.msra.mxu1 %v13315_v8  ;;  %v13384_v7 = vld [vmem:[%s19491_s6 + $0x180] ss:$16 sps:$4 sm:$0xff]   ;;  %v13387_v8 = vld [vmem:[%s19491_s6 + $0x188] ss:$16 sps:$4 sm:$0xff]  }
 0xc2b   :  { %6129 = vmatprep.subr.bf16.mxu0 %v13320_v10  ;;  %6170 = vmatprep.subr.bf16.mxu1 %v13323_v15  ;;  %v13390_v10 = vld [vmem:[%s19491_s6 + $0x1a0] ss:$16 sps:$4 sm:$0xff]   ;;  %v13392_v15 = vld [vmem:[%s19491_s6 + $0x1a4] ss:$16 sps:$4 sm:$0xff]  }
 0xc2e   :  { %6130 = vmatpush1.bf16.msra.mxu0 %v13318_v46  ;;  %6171 = vmatpush1.bf16.msra.mxu1 %v13321_v16  ;;  %v13393_v46 = vld [vmem:[%s19491_s6 + $0x1a8] ss:$16 sps:$4 sm:$0xff]   ;;  %v13395_v16 = vld [vmem:[%s19491_s6 + $0x1ac] ss:$16 sps:$4 sm:$0xff]  }
 0xc2f   :  { %6131 = vmatprep.subr.bf16.mxu0 %v13326_v20  ;;  %6172 = vmatprep.subr.bf16.mxu1 %v13329_v31  ;;  %v13398_v20 = vld [vmem:[%s19491_s6 + $0x1c4] ss:$16 sps:$4 sm:$0xff]   ;;  %v13401_v31 = vld [vmem:[%s19491_s6 + $0x1cc] ss:$16 sps:$4 sm:$0xff]  }
 0xc32   :  { %6132 = vmatpush1.bf16.msra.mxu0 %v13324_v22  ;;  %6173 = vmatpush1.bf16.msra.mxu1 %v13327_v49  ;;  %v13396_v22 = vld [vmem:[%s19491_s6 + $0x1c0] ss:$16 sps:$4 sm:$0xff]   ;;  %v13399_v49 = vld [vmem:[%s19491_s6 + $0x1c8] ss:$16 sps:$4 sm:$0xff]  }
 0xc33   :  { %6133 = vmatprep.subr.bf16.mxu0 %v13332_v42  ;;  %6174 = vmatprep.subr.bf16.mxu1 %v13335_v35  ;;  %v13404_v42 = vld [vmem:[%s19491_s6 + $0x1e4] ss:$16 sps:$4 sm:$0xff]   ;;  %v13407_v35 = vld [vmem:[%s19491_s6 + $0x1ec] ss:$16 sps:$4 sm:$0xff]  }
 0xc36   :  { %6134 = vmatpush1.bf16.msra.mxu0 %v13330_v32  ;;  %6175 = vmatpush1.bf16.msra.mxu1 %v13333_v3  ;;  %v13402_v32 = vld [vmem:[%s19491_s6 + $0x1e0] ss:$16 sps:$4 sm:$0xff]   ;;  %v13405_v3 = vld [vmem:[%s19491_s6 + $0x1e8] ss:$16 sps:$4 sm:$0xff]  }
 0xc37   :  { %6135 = vmatprep.subr.bf16.mxu0 %v13338_v43  ;;  %6176 = vmatprep.subr.bf16.mxu1 %v13341_v45  ;;  %v13410_v43 = vld [vmem:[%s19491_s6 + $0x204] ss:$16 sps:$4 sm:$0xff]   ;;  %v13413_v45 = vld [vmem:[%s19491_s6 + $0x20c] ss:$16 sps:$4 sm:$0xff]  }
 0xc3a   :  { %6136 = vmatpush1.bf16.msra.mxu0 %v13336_v56  ;;  %6177 = vmatpush1.bf16.msra.mxu1 %v13339_v33 }
 0xc3b   :  { %6137 = vmatprep.subr.bf16.mxu0 %v13344_v2  ;;  %6178 = vmatprep.subr.bf16.mxu1 %v13347_v5  ;;  %v19794_v2 = vld [vmem:[#allocation4_spill] sm:$0xff] }
 0xc3e   :  { %6138 = vmatpush1.bf16.msra.mxu0 %v13342_v29  ;;  %6179 = vmatpush1.bf16.msra.mxu1 %v13345_v11 }
 0xc3f   :  { %6139 = vmatprep.subr.bf16.mxu0 %v13350_v41  ;;  %6180 = vmatprep.subr.bf16.mxu1 %v13353_v23  ;;  %v19795_v41 = vld [vmem:[#allocation5_spill] sm:$0xff] }
 0xc42   :  { %6140 = vmatpush1.bf16.msra.mxu0 %v13348_v12  ;;  %6181 = vmatpush1.bf16.msra.mxu1 %v13351_v51 }
 0xc43   :  { %6141 = vmatprep.subr.bf16.mxu0 %v13356_v54  ;;  %6182 = vmatprep.subr.bf16.mxu1 %v13359_v55 }
 0xc46   :  { %6142 = vmatpush1.bf16.msra.mxu0 %v13354_v59  ;;  %6183 = vmatpush1.bf16.msra.mxu1 %v13357_v27 }
 0xc47   :  { %6143 = vmatprep.subr.bf16.mxu0 %v13362_v25  ;;  %6184 = vmatprep.subr.bf16.mxu1 %v13365_v28  ;;  %v19796_v25 = vld [vmem:[#allocation6_spill] sm:$0xff] }
 0xc4a   :  { %6144 = vmatpush1.bf16.msra.mxu0 %v13360_v24  ;;  %6185 = vmatpush1.bf16.msra.mxu1 %v13363_v4  ;;  %v19797_v24 = vld [vmem:[#allocation8_spill] sm:$0xff] }
 0xc4b   :  { %6145 = vmatprep.subr.bf16.mxu0 %v13368_v13  ;;  %6186 = vmatprep.subr.bf16.mxu1 %v13371_v44 }
 0xc4e   :  { %6146 = vmatpush1.bf16.msra.mxu0 %v13366_v18  ;;  %6187 = vmatpush1.bf16.msra.mxu1 %v13369_v9 }
 0xc4f   :  { %6147 = vmatprep.subr.bf16.mxu0 %v13374_v36  ;;  %6188 = vmatprep.subr.bf16.mxu1 %v13377_v58 }
 0xc52   :  { %6148 = vmatpush1.bf16.msra.mxu0 %v13372_v47  ;;  %6189 = vmatpush1.bf16.msra.mxu1 %v13375_v26 }
 0xc53   :  { %6149 = vmatprep.subr.bf16.mxu0 %v13380_v52  ;;  %6190 = vmatprep.subr.bf16.mxu1 %v13383_v57 }
 0xc56   :  { %6150 = vmatpush1.bf16.msra.mxu0 %v13378_v63  ;;  %6191 = vmatpush1.bf16.msra.mxu1 %v13381_v14  ;;  %v19798_v14 = vld [vmem:[#allocation24_spill] sm:$0xff] }
 0xc57   :  { %6151 = vmatprep.subr.bf16.mxu0 %v13386_v0  ;;  %6192 = vmatprep.subr.bf16.mxu1 %v13389_v6 }
 0xc5a   :  { %6152 = vmatpush1.bf16.msra.mxu0 %v13384_v7  ;;  %6193 = vmatpush1.bf16.msra.mxu1 %v13387_v8 }
 0xc5b   :  { %6153 = vmatprep.subr.bf16.mxu0 %v13392_v15  ;;  %6194 = vmatprep.subr.bf16.mxu1 %v13395_v16  ;;  %v13411_v16 = vld [vmem:[%s19491_s6 + $0x208] ss:$16 sps:$4 sm:$0xff]  }
 0xc5e   :  { %6154 = vmatpush1.bf16.msra.mxu0 %v13390_v10  ;;  %6195 = vmatpush1.bf16.msra.mxu1 %v13393_v46  ;;  %v13408_v46 = vld [vmem:[%s19491_s6 + $0x200] ss:$16 sps:$4 sm:$0xff]  }
 0xc5f   :  { %6155 = vmatprep.subr.bf16.mxu0 %v13398_v20  ;;  %6196 = vmatprep.subr.bf16.mxu1 %v13401_v31  ;;  %v13416_v20 = vld [vmem:[%s19491_s6 + $0x224] ss:$16 sps:$4 sm:$0xff]   ;;  %v13419_v31 = vld [vmem:[%s19491_s6 + $0x22c] ss:$16 sps:$4 sm:$0xff]  }
 0xc62   :  { %6156 = vmatpush1.bf16.msra.mxu0 %v13396_v22  ;;  %6197 = vmatpush1.bf16.msra.mxu1 %v13399_v49  ;;  %v13414_v22 = vld [vmem:[%s19491_s6 + $0x220] ss:$16 sps:$4 sm:$0xff]   ;;  %v13417_v49 = vld [vmem:[%s19491_s6 + $0x228] ss:$16 sps:$4 sm:$0xff]  }
 0xc63   :  { %6157 = vmatprep.subr.bf16.mxu0 %v13404_v42  ;;  %6198 = vmatprep.subr.bf16.mxu1 %v13407_v35  ;;  %v13422_v42 = vld [vmem:[%s19491_s6 + $0x244] ss:$16 sps:$4 sm:$0xff]   ;;  %v13420_v35 = vld [vmem:[%s19491_s6 + $0x240] ss:$16 sps:$4 sm:$0xff]  }
 0xc66   :  { %6158 = vmatpush1.bf16.msra.mxu0 %v13402_v32  ;;  %6199 = vmatpush1.bf16.msra.mxu1 %v13405_v3  ;;  %v13423_v32 = vld [vmem:[%s19491_s6 + $0x248] ss:$16 sps:$4 sm:$0xff]   ;;  %v13428_v3 = vld [vmem:[%s19491_s6 + $0x264] ss:$16 sps:$4 sm:$0xff]  }
 0xc67   :  { %6624 = vmatprep.subr.bf16.mxu0 %v13410_v43  ;;  %6665 = vmatprep.subr.bf16.mxu1 %v13413_v45  ;;  %v13431_v43 = vld [vmem:[%s19491_s6 + $0x26c] ss:$16 sps:$4 sm:$0xff]   ;;  %v13426_v45 = vld [vmem:[%s19491_s6 + $0x260] ss:$16 sps:$4 sm:$0xff]  }
 0xcfb   :  { %v5670_v56 = vpop.f32.mrb[52].mxu0  ;;  %v5711_v33 = vpop.f32.mrb[52].mxu1 }
 0xcfc   :  { %v5671_v5 = vadd.f32 %v5670_v56, %v19794_v2  ;;  %v5672_v29 = vpop.f32.mrb[53].mxu0  ;;  %v5713_v11 = vpop.f32.mrb[53].mxu1  ;;  %v5712_v28 = vadd.f32 %v5711_v33, %v19796_v25  ;;  %v13429_v56 = vld [vmem:[%s19491_s6 + $0x268] ss:$16 sps:$4 sm:$0xff]   ;;  %v13434_v33 = vld [vmem:[%s19491_s6 + $0x284] ss:$16 sps:$4 sm:$0xff]  }
 0xcfd   :  { %v5673_v23 = vadd.f32 %v5672_v29, %v19795_v41  ;;  %v5674_v12 = vpop.f32.mrb[54].mxu0  ;;  %v5715_v51 = vpop.f32.mrb[54].mxu1  ;;  %v5714_v4 = vadd.f32 %v5713_v11, %v19797_v24  ;;  %v13432_v29 = vld [vmem:[%s19491_s6 + $0x280] ss:$16 sps:$4 sm:$0xff]   ;;  %v13435_v11 = vld [vmem:[%s19491_s6 + $0x288] ss:$16 sps:$4 sm:$0xff]  }
 0xcfe   :  { %v11257_v54 = vmul.f32 -1.442695, %v5671_v5  ;;  %v5675_v55 = vpop.f32.mrb[55].mxu0  ;;  %v5716_v59 = vpop.f32.mrb[55].mxu1  ;;  %v11259_v13 = vmul.f32 -1.442695, %v5712_v28 }
 0xcff   :  { %v11258_v27 = vmul.f32 -1.442695, %v5673_v23  ;;  %v13437_v5 = vld [vmem:[%s19491_s6 + $0x28c] ss:$16 sps:$4 sm:$0xff]   ;;  %v13440_v23 = vld [vmem:[%s19491_s6 + $0x2a4] ss:$16 sps:$4 sm:$0xff]  }
 0xd00   :  { %14224 = vpow2.f32 %v11257_v54  ;;  %v13443_v12 = vld [vmem:[%s19491_s6 + $0x2ac] ss:$16 sps:$4 sm:$0xff]   ;;  %v13438_v51 = vld [vmem:[%s19491_s6 + $0x2a0] ss:$16 sps:$4 sm:$0xff]   ;;  %v13441_v54 = vld [vmem:[%s19491_s6 + $0x2a8] ss:$16 sps:$4 sm:$0xff]  }
 0xd01   :  { %14226 = vpow2.f32 %v11258_v27  ;;  %v13446_v55 = vld [vmem:[%s19491_s6 + $0x2c4] ss:$16 sps:$4 sm:$0xff]   ;;  %v13449_v59 = vld [vmem:[%s19491_s6 + $0x2cc] ss:$16 sps:$4 sm:$0xff]   ;;  %v13444_v27 = vld [vmem:[%s19491_s6 + $0x2c0] ss:$16 sps:$4 sm:$0xff]  }
 0xd02   :  { %14228 = vtanh.f32 %v5714_v4  ;;  %v13447_v28 = vld [vmem:[%s19491_s6 + $0x2c8] ss:$16 sps:$4 sm:$0xff]   ;;  %v13452_v4 = vld [vmem:[%s19491_s6 + $0x2e4] ss:$16 sps:$4 sm:$0xff]   ;;  %v17914_v25 = vld [vmem:[%s19491_s6 + $0x56c] ss:$16 sps:$4 sm:$0xff]  }
 0xd03   :  { %14230 = vpow2.f32 %v11259_v13  ;;  %v13455_v13 = vld [vmem:[%s19491_s6 + $0x2ec] ss:$16 sps:$4 sm:$0xff]   ;;  %v17909_v24 = vld [vmem:[%s19491_s6 + $0x564] ss:$16 sps:$4 sm:$0xff]   ;;  %19810 = vst [vmem:[#allocation35_spill] sm:$0xff] %v17914_v25 }
 0xd04   :  { %19809 = vst [vmem:[#allocation34_spill] sm:$0xff] %v17909_v24  ;;  %v17919_v41 = vld [vmem:[%s19491_s6 + $0x560] ss:$16 sps:$4 sm:$0xff]   ;;  %v17924_v2 = vld [vmem:[%s19491_s6 + $0x568] ss:$16 sps:$4 sm:$0xff]  }
 0xd05   :  { %19811 = vst [vmem:[#allocation2_spill] sm:$0xff] %v17919_v41  ;;  %19812 = vst [vmem:[#allocation3_spill] sm:$0xff] %v17924_v2 }
 0xd0a   :  { %v14225_v44 = vpop.eup %14224 }
 0xd0b   :  { %v5727_v18 = vadd.f32 1.0, %v14225_v44  ;;  %v14227_v9 = vpop.eup %14226  ;;  %v13450_v44 = vld [vmem:[%s19491_s6 + $0x2e0] ss:$16 sps:$4 sm:$0xff]  }
 0xd0c   :  { %v5728_v36 = vadd.f32 1.0, %v14227_v9  ;;  %v14229_v58 = vpop.eup %14228  ;;  %v13458_v9 = vld [vmem:[%s19491_s6 + $0x304] ss:$16 sps:$4 sm:$0xff]  }
 0xd0d   :  { %14232 = vrcp.f32 %v5727_v18  ;;  %v14231_v47 = vpop.eup %14230  ;;  %v13453_v18 = vld [vmem:[%s19491_s6 + $0x2e8] ss:$16 sps:$4 sm:$0xff]  }
 0xd0e   :  { %14234 = vrcp.f32 %v5728_v36  ;;  %v5729_v63 = vadd.f32 1.0, %v14231_v47  ;;  %v13461_v36 = vld [vmem:[%s19491_s6 + $0x30c] ss:$16 sps:$4 sm:$0xff]   ;;  %v13459_v47 = vld [vmem:[%s19491_s6 + $0x308] ss:$16 sps:$4 sm:$0xff]  }
 0xd10   :  { %14236 = vrcp.f32 %v5729_v63  ;;  %v13465_v63 = vld [vmem:[%s19491_s6 + $0x328] ss:$16 sps:$4 sm:$0xff]  }
 0xd17   :  { %v14233_v26 = vpop.eup %14232 }
 0xd18   :  { %v5738_v52 = vmul.f32 %v14233_v26, %v14229_v58  ;;  %v14235_v57 = vpop.eup %14234  ;;  %v13456_v58 = vld [vmem:[%s19491_s6 + $0x300] ss:$16 sps:$4 sm:$0xff]   ;;  %v13464_v26 = vld [vmem:[%s19491_s6 + $0x324] ss:$16 sps:$4 sm:$0xff]  }
 0xd19   :  { %v5737_v0 = vmul.f32 %v14235_v57, %v19798_v14  ;;  %v13462_v57 = vld [vmem:[%s19491_s6 + $0x320] ss:$16 sps:$4 sm:$0xff]   ;;  %v13470_v14 = vld [vmem:[%s19491_s6 + $0x344] ss:$16 sps:$4 sm:$0xff]  }
 0xd1a   :  { %v14237_v7 = vpop.eup %14236 }
 0xd1b   :  { %v17433_v6 = vadd.f32 %v5738_v52, %v5737_v0  ;;  %v13467_v52 = vld [vmem:[%s19491_s6 + $0x32c] ss:$16 sps:$4 sm:$0xff]  }
 0xd1c   :  { %v13473_v0 = vld [vmem:[%s19491_s6 + $0x34c] ss:$16 sps:$4 sm:$0xff]  }
 0xd1d   :  { %19799 = vst [vmem:[#allocation29_spill] sm:$0xff] %v17433_v6  ;;  %14238 = vtanh.f32 %v17433_v6  ;;  %v17900_v6 = vld [vmem:[%s19491_s6 + $0x548] ss:$16 sps:$4 sm:$0xff]  }
 0xd1e   :  { %19808 = vst [vmem:[#allocation33_spill] sm:$0xff] %v17900_v6 }
 0xd27   :  { %v14239_v8 = vpop.eup %14238 }
 0xd28   :  { %v5741_v10 = vmul.f32 %v14239_v8, %v14237_v7  ;;  %v13468_v7 = vld [vmem:[%s19491_s6 + $0x340] ss:$16 sps:$4 sm:$0xff]   ;;  %v13471_v8 = vld [vmem:[%s19491_s6 + $0x348] ss:$16 sps:$4 sm:$0xff]  }
 0xd2a   :  { %v17436_v15 = vpack.c.bf16 %v5741_v10, %v5741_v10  ;;  %v13476_v10 = vld [vmem:[%s19491_s6 + $0x364] ss:$16 sps:$4 sm:$0xff]  }
 0xd2c   :  { %19800 = vst [vmem:[#allocation30_spill] sm:$0xff] %v17436_v15  ;;  %6160 = vmatmul.mubr.bf16.vlgmr.msra.gmra.mrb[56].mxu0 %v17436_v15  ;;  %6201 = vmatmul.mubr.bf16.vlgmr.msra.gmra.mrb[56].mxu1 %v17436_v15  ;;  %v17943_v15 = vld [vmem:[%s19491_s6 + $0x580] ss:$16 sps:$4 sm:$0xff]  }
 0xd2d   :  { %6656 = vmatprep.mubr.bf16.mxu0 %v16791_v60  ;;  %6697 = vmatprep.mubr.bf16.mxu1 %v16791_v60  ;;  %v13425_v60 = vld [vmem:[%s19491_s6 + $0x24c] ss:$16 sps:$4 sm:$0xff]   ;;  %19815 = vst [vmem:[#allocation10_spill] sm:$0xff] %v17943_v15 }
 0xd2e   :  { %6625 = vmatpush1.bf16.msra.mxu0 %v13408_v46  ;;  %6666 = vmatpush1.bf16.msra.mxu1 %v13411_v16  ;;  %v13479_v46 = vld [vmem:[%s19491_s6 + $0x36c] ss:$16 sps:$4 sm:$0xff]   ;;  %v13474_v16 = vld [vmem:[%s19491_s6 + $0x360] ss:$16 sps:$4 sm:$0xff]  }
 0xd2f   :  { %6626 = vmatprep.subr.bf16.mxu0 %v13416_v20  ;;  %6667 = vmatprep.subr.bf16.mxu1 %v13419_v31  ;;  %v13477_v20 = vld [vmem:[%s19491_s6 + $0x368] ss:$16 sps:$4 sm:$0xff]   ;;  %v13480_v31 = vld [vmem:[%s19491_s6 + $0x380] ss:$16 sps:$4 sm:$0xff]  }
 0xd32   :  { %6627 = vmatpush1.bf16.msra.mxu0 %v13414_v22  ;;  %6668 = vmatpush1.bf16.msra.mxu1 %v13417_v49  ;;  %v13482_v22 = vld [vmem:[%s19491_s6 + $0x384] ss:$16 sps:$4 sm:$0xff]   ;;  %v13483_v49 = vld [vmem:[%s19491_s6 + $0x388] ss:$16 sps:$4 sm:$0xff]  }
 0xd33   :  { %6628 = vmatprep.subr.bf16.mxu0 %v13422_v42  ;;  %6669 = vmatprep.subr.bf16.mxu1 %v13425_v60  ;;  %v13485_v42 = vld [vmem:[%s19491_s6 + $0x38c] ss:$16 sps:$4 sm:$0xff]   ;;  %v13488_v60 = vld [vmem:[%s19491_s6 + $0x3a4] ss:$16 sps:$4 sm:$0xff]  }
 0xd36   :  { %6629 = vmatpush1.bf16.msra.mxu0 %v13420_v35  ;;  %6670 = vmatpush1.bf16.msra.mxu1 %v13423_v32  ;;  %v13491_v35 = vld [vmem:[%s19491_s6 + $0x3ac] ss:$16 sps:$4 sm:$0xff]   ;;  %v13486_v32 = vld [vmem:[%s19491_s6 + $0x3a0] ss:$16 sps:$4 sm:$0xff]  }
 0xd37   :  { %6630 = vmatprep.subr.bf16.mxu0 %v13428_v3  ;;  %6671 = vmatprep.subr.bf16.mxu1 %v13431_v43  ;;  %v13489_v3 = vld [vmem:[%s19491_s6 + $0x3a8] ss:$16 sps:$4 sm:$0xff]   ;;  %v13494_v43 = vld [vmem:[%s19491_s6 + $0x3c4] ss:$16 sps:$4 sm:$0xff]  }
 0xd3a   :  { %6631 = vmatpush1.bf16.msra.mxu0 %v13426_v45  ;;  %6672 = vmatpush1.bf16.msra.mxu1 %v13429_v56  ;;  %v13497_v45 = vld [vmem:[%s19491_s6 + $0x3cc] ss:$16 sps:$4 sm:$0xff]   ;;  %v13492_v56 = vld [vmem:[%s19491_s6 + $0x3c0] ss:$16 sps:$4 sm:$0xff]  }
 0xd3b   :  { %6632 = vmatprep.subr.bf16.mxu0 %v13434_v33  ;;  %6673 = vmatprep.subr.bf16.mxu1 %v13437_v5  ;;  %v13495_v33 = vld [vmem:[%s19491_s6 + $0x3c8] ss:$16 sps:$4 sm:$0xff]   ;;  %v13500_v5 = vld [vmem:[%s19491_s6 + $0x3e4] ss:$16 sps:$4 sm:$0xff]  }
 0xd3e   :  { %6633 = vmatpush1.bf16.msra.mxu0 %v13432_v29  ;;  %6674 = vmatpush1.bf16.msra.mxu1 %v13435_v11  ;;  %v13503_v29 = vld [vmem:[%s19491_s6 + $0x3ec] ss:$16 sps:$4 sm:$0xff]   ;;  %v13498_v11 = vld [vmem:[%s19491_s6 + $0x3e0] ss:$16 sps:$4 sm:$0xff]  }
 0xd3f   :  { %6634 = vmatprep.subr.bf16.mxu0 %v13440_v23  ;;  %6675 = vmatprep.subr.bf16.mxu1 %v13443_v12  ;;  %v13501_v23 = vld [vmem:[%s19491_s6 + $0x3e8] ss:$16 sps:$4 sm:$0xff]   ;;  %v17631_v12 = vld [vmem:[%s19491_s6 + $0x404] ss:$16 sps:$4 sm:$0xff]  }
 0xd42   :  { %6635 = vmatpush1.bf16.msra.mxu0 %v13438_v51  ;;  %6676 = vmatpush1.bf16.msra.mxu1 %v13441_v54  ;;  %v17636_v51 = vld [vmem:[%s19491_s6 + $0x40c] ss:$16 sps:$4 sm:$0xff]  }
 0xd43   :  { %6636 = vmatprep.subr.bf16.mxu0 %v13446_v55  ;;  %6677 = vmatprep.subr.bf16.mxu1 %v13449_v59  ;;  %v19801_v59 = vld [vmem:[#allocation11_spill] sm:$0xff] }
 0xd46   :  { %6637 = vmatpush1.bf16.msra.mxu0 %v13444_v27  ;;  %6678 = vmatpush1.bf16.msra.mxu1 %v13447_v28 }
 0xd47   :  { %6638 = vmatprep.subr.bf16.mxu0 %v13452_v4  ;;  %6679 = vmatprep.subr.bf16.mxu1 %v13455_v13  ;;  %v19802_v13 = vld [vmem:[#allocation12_spill] sm:$0xff] }
 0xd4a   :  { %6639 = vmatpush1.bf16.msra.mxu0 %v13450_v44  ;;  %6680 = vmatpush1.bf16.msra.mxu1 %v13453_v18 }
 0xd4b   :  { %6640 = vmatprep.subr.bf16.mxu0 %v13458_v9  ;;  %6681 = vmatprep.subr.bf16.mxu1 %v13461_v36 }
 0xd4e   :  { %6641 = vmatpush1.bf16.msra.mxu0 %v13456_v58  ;;  %6682 = vmatpush1.bf16.msra.mxu1 %v13459_v47 }
 0xd4f   :  { %6642 = vmatprep.subr.bf16.mxu0 %v13464_v26  ;;  %6683 = vmatprep.subr.bf16.mxu1 %v13467_v52  ;;  %v19803_v52 = vld [vmem:[#allocation13_spill] sm:$0xff] }
 0xd52   :  { %6643 = vmatpush1.bf16.msra.mxu0 %v13462_v57  ;;  %6684 = vmatpush1.bf16.msra.mxu1 %v13465_v63  ;;  %v19804_v63 = vld [vmem:[#allocation14_spill] sm:$0xff] }
 0xd53   :  { %6644 = vmatprep.subr.bf16.mxu0 %v13470_v14  ;;  %6685 = vmatprep.subr.bf16.mxu1 %v13473_v0 }
 0xd56   :  { %6645 = vmatpush1.bf16.msra.mxu0 %v13468_v7  ;;  %6686 = vmatpush1.bf16.msra.mxu1 %v13471_v8 }
 0xd57   :  { %6646 = vmatprep.subr.bf16.mxu0 %v13476_v10  ;;  %6687 = vmatprep.subr.bf16.mxu1 %v13479_v46 }
 0xd5a   :  { %6647 = vmatpush1.bf16.msra.mxu0 %v13474_v16  ;;  %6688 = vmatpush1.bf16.msra.mxu1 %v13477_v20 }
 0xd5b   :  { %6648 = vmatprep.subr.bf16.mxu0 %v13482_v22  ;;  %6689 = vmatprep.subr.bf16.mxu1 %v13485_v42 }
 0xd5e   :  { %6649 = vmatpush1.bf16.msra.mxu0 %v13480_v31  ;;  %6690 = vmatpush1.bf16.msra.mxu1 %v13483_v49 }
 0xd5f   :  { %6650 = vmatprep.subr.bf16.mxu0 %v13488_v60  ;;  %6691 = vmatprep.subr.bf16.mxu1 %v13491_v35  ;;  %v19805_v60 = vld [vmem:[#allocation26_spill] sm:$0xff] }
 0xd62   :  { %6651 = vmatpush1.bf16.msra.mxu0 %v13486_v32  ;;  %6692 = vmatpush1.bf16.msra.mxu1 %v13489_v3 }
 0xd63   :  { %6652 = vmatprep.subr.bf16.mxu0 %v13494_v43  ;;  %6693 = vmatprep.subr.bf16.mxu1 %v13497_v45 }
 0xd66   :  { %6653 = vmatpush1.bf16.msra.mxu0 %v13492_v56  ;;  %6694 = vmatpush1.bf16.msra.mxu1 %v13495_v33  ;;  %v6796_v33 = vrot.slane %v16882_v50, 7  ;;  %v17667_v50 = vld [vmem:[%s19491_s6 + $0x424] ss:$16 sps:$4 sm:$0xff]  }
 0xd67   :  { %6654 = vmatprep.subr.bf16.mxu0 %v13500_v5  ;;  %6695 = vmatprep.subr.bf16.mxu1 %v13503_v29  ;;  %v17655_v29 = vld [vmem:[%s19491_s6 + $0x400] ss:$16 sps:$4 sm:$0xff]  }
 0xd6a   :  { %6655 = vmatpush1.bf16.msra.mxu0 %v13498_v11  ;;  %6696 = vmatpush1.bf16.msra.mxu1 %v13501_v23  ;;  %v17660_v11 = vld [vmem:[%s19491_s6 + $0x408] ss:$16 sps:$4 sm:$0xff]  }
 0xd6b   :  { %7122 = vmatprep.subr.bf16.mxu0 %v17631_v12  ;;  %7163 = vmatprep.subr.bf16.mxu1 %v17636_v51 }
 0xdff   :  { %v6161_v54 = vpop.f32.mrb[56].mxu0  ;;  %v6202_v55 = vpop.f32.mrb[56].mxu1 }
 0xe00   :  { %v6162_v27 = vadd.f32 %v6161_v54, %v19801_v59  ;;  %v6163_v28 = vpop.f32.mrb[57].mxu0  ;;  %v6204_v4 = vpop.f32.mrb[57].mxu1  ;;  %v6203_v57 = vadd.f32 %v6202_v55, %v19803_v52  ;;  %v6799_v54 = vrot.slane %v6796_v33, 1  ;;  %v17672_v55 = vld [vmem:[%s19491_s6 + $0x42c] ss:$16 sps:$4 sm:$0xff]  }
 0xe01   :  { %v6164_v44 = vadd.f32 %v6163_v28, %v19802_v13  ;;  %v6165_v18 = vpop.f32.mrb[58].mxu0  ;;  %v6206_v9 = vpop.f32.mrb[58].mxu1  ;;  %v6205_v14 = vadd.f32 %v6204_v4, %v19804_v63  ;;  %v17684_v28 = vld [vmem:[%s19491_s6 + $0x428] ss:$16 sps:$4 sm:$0xff]   ;;  %v17691_v4 = vld [vmem:[%s19491_s6 + $0x444] ss:$16 sps:$4 sm:$0xff]  }
 0xe02   :  { %v11324_v36 = vmul.f32 -1.442695, %v6162_v27  ;;  %v6166_v58 = vpop.f32.mrb[59].mxu0  ;;  %v6207_v47 = vpop.f32.mrb[59].mxu1  ;;  %v11326_v0 = vmul.f32 -1.442695, %v6203_v57 }
 0xe03   :  { %v11325_v26 = vmul.f32 -1.442695, %v6164_v44  ;;  %v17679_v27 = vld [vmem:[%s19491_s6 + $0x420] ss:$16 sps:$4 sm:$0xff]   ;;  %v17696_v44 = vld [vmem:[%s19491_s6 + $0x44c] ss:$16 sps:$4 sm:$0xff]  }
 0xe04   :  { %14240 = vpow2.f32 %v11324_v36  ;;  %v17703_v18 = vld [vmem:[%s19491_s6 + $0x440] ss:$16 sps:$4 sm:$0xff]   ;;  %v17708_v9 = vld [vmem:[%s19491_s6 + $0x448] ss:$16 sps:$4 sm:$0xff]   ;;  %v17715_v36 = vld [vmem:[%s19491_s6 + $0x464] ss:$16 sps:$4 sm:$0xff]  }
 0xe05   :  { %14242 = vpow2.f32 %v11325_v26  ;;  %v17720_v58 = vld [vmem:[%s19491_s6 + $0x46c] ss:$16 sps:$4 sm:$0xff]   ;;  %v17727_v47 = vld [vmem:[%s19491_s6 + $0x460] ss:$16 sps:$4 sm:$0xff]   ;;  %v17732_v26 = vld [vmem:[%s19491_s6 + $0x468] ss:$16 sps:$4 sm:$0xff]  }
 0xe06   :  { %14244 = vtanh.f32 %v6205_v14  ;;  %v17741_v57 = vld [vmem:[%s19491_s6 + $0x484] ss:$16 sps:$4 sm:$0xff]   ;;  %v17746_v14 = vld [vmem:[%s19491_s6 + $0x48c] ss:$16 sps:$4 sm:$0xff]   ;;  %v17847_v33 = vld [vmem:[%s19491_s6 + $0x500] ss:$16 sps:$4 sm:$0xff]  }
 0xe07   :  { %14246 = vpow2.f32 %v11326_v0  ;;  %v17751_v0 = vld [vmem:[%s19491_s6 + $0x480] ss:$16 sps:$4 sm:$0xff]   ;;  %v17876_v63 = vld [vmem:[%s19491_s6 + $0x528] ss:$16 sps:$4 sm:$0xff]   ;;  %v17885_v52 = vld [vmem:[%s19491_s6 + $0x544] ss:$16 sps:$4 sm:$0xff]  }
 0xe08   :  { %v17890_v13 = vld [vmem:[%s19491_s6 + $0x54c] ss:$16 sps:$4 sm:$0xff]   ;;  %v17895_v59 = vld [vmem:[%s19491_s6 + $0x540] ss:$16 sps:$4 sm:$0xff]  }
 0xe0e   :  { %v14241_v7 = vpop.eup %14240 }
 0xe0f   :  { %v6218_v8 = vadd.f32 1.0, %v14241_v7  ;;  %v14243_v10 = vpop.eup %14242  ;;  %v17756_v7 = vld [vmem:[%s19491_s6 + $0x488] ss:$16 sps:$4 sm:$0xff]  }
 0xe10   :  { %v6219_v46 = vadd.f32 1.0, %v14243_v10  ;;  %v14245_v16 = vpop.eup %14244  ;;  %v17770_v10 = vld [vmem:[%s19491_s6 + $0x4ac] ss:$16 sps:$4 sm:$0xff]  }
 0xe11   :  { %14248 = vrcp.f32 %v6218_v8  ;;  %v14247_v20 = vpop.eup %14246  ;;  %v17765_v8 = vld [vmem:[%s19491_s6 + $0x4a4] ss:$16 sps:$4 sm:$0xff]  }
 0xe12   :  { %14250 = vrcp.f32 %v6219_v46  ;;  %v6220_v42 = vadd.f32 1.0, %v14247_v20  ;;  %v17775_v46 = vld [vmem:[%s19491_s6 + $0x4a0] ss:$16 sps:$4 sm:$0xff]   ;;  %v17789_v20 = vld [vmem:[%s19491_s6 + $0x4c4] ss:$16 sps:$4 sm:$0xff]  }
 0xe14   :  { %14252 = vrcp.f32 %v6220_v42  ;;  %v17813_v42 = vld [vmem:[%s19491_s6 + $0x4e4] ss:$16 sps:$4 sm:$0xff]  }
 0xe1b   :  { %v14249_v31 = vpop.eup %14248 }
 0xe1c   :  { %v6229_v22 = vmul.f32 %v14249_v31, %v14245_v16  ;;  %v14251_v49 = vpop.eup %14250  ;;  %v17780_v16 = vld [vmem:[%s19491_s6 + $0x4a8] ss:$16 sps:$4 sm:$0xff]   ;;  %v17794_v31 = vld [vmem:[%s19491_s6 + $0x4cc] ss:$16 sps:$4 sm:$0xff]  }
 0xe1d   :  { %v6228_v35 = vmul.f32 %v14251_v49, %v19805_v60  ;;  %v17804_v49 = vld [vmem:[%s19491_s6 + $0x4c8] ss:$16 sps:$4 sm:$0xff]   ;;  %v17818_v60 = vld [vmem:[%s19491_s6 + $0x4ec] ss:$16 sps:$4 sm:$0xff]  }
 0xe1e   :  { %v14253_v3 = vpop.eup %14252 }
 0xe1f   :  { %v17645_v32 = vadd.f32 %v6229_v22, %v6228_v35  ;;  %v17799_v22 = vld [vmem:[%s19491_s6 + $0x4c0] ss:$16 sps:$4 sm:$0xff]  }
 0xe20   :  { %v17823_v35 = vld [vmem:[%s19491_s6 + $0x4e0] ss:$16 sps:$4 sm:$0xff]  }
 0xe21   :  { %19806 = vst [vmem:[#allocation31_spill] sm:$0xff] %v17645_v32  ;;  %14254 = vtanh.f32 %v17645_v32  ;;  %v17871_v32 = vld [vmem:[%s19491_s6 + $0x520] ss:$16 sps:$4 sm:$0xff]  }
 0xe2b   :  { %v14255_v43 = vpop.eup %14254 }
 0xe2c   :  { %v6232_v45 = vmul.f32 %v14255_v43, %v14253_v3  ;;  %v17828_v3 = vld [vmem:[%s19491_s6 + $0x4e8] ss:$16 sps:$4 sm:$0xff]   ;;  %v17837_v43 = vld [vmem:[%s19491_s6 + $0x504] ss:$16 sps:$4 sm:$0xff]  }
 0xe2e   :  { %v17648_v56 = vpack.c.bf16 %v6232_v45, %v6232_v45  ;;  %v17842_v45 = vld [vmem:[%s19491_s6 + $0x50c] ss:$16 sps:$4 sm:$0xff]  }
 0xe30   :  { %19807 = vst [vmem:[#allocation32_spill] sm:$0xff] %v17648_v56  ;;  %v6235_v5 = vrot.slane %v17648_v56, 7 }
 0xe32   :  { %v6238_v23 = vsel %vm1179_vm2, %v17648_v56, %v6235_v5  ;;  %v17852_v5 = vld [vmem:[%s19491_s6 + $0x508] ss:$16 sps:$4 sm:$0xff]  }
 0xe33   :  { %6657 = vmatmul.mubr.bf16.vlgmr.msra.gmra.mrb[60].mxu0 %v6238_v23  ;;  %6698 = vmatmul.mubr.bf16.vlgmr.msra.gmra.mrb[60].mxu1 %v6238_v23  ;;  %v17861_v23 = vld [vmem:[%s19491_s6 + $0x524] ss:$16 sps:$4 sm:$0xff]   ;;  %v17948_v56 = vld [vmem:[%s19491_s6 + $0x588] ss:$16 sps:$4 sm:$0xff]  }
 0xe34   :  { %7154 = vmatprep.mubr.bf16.mxu0 %v6799_v54  ;;  %7195 = vmatprep.mubr.bf16.mxu1 %v6799_v54  ;;  %v17866_v54 = vld [vmem:[%s19491_s6 + $0x52c] ss:$16 sps:$4 sm:$0xff]   ;;  %19816 = vst [vmem:[#allocation9_spill] sm:$0xff] %v17948_v56 }
 0xe35   :  { %7123 = vmatpush1.bf16.msra.mxu0 %v17655_v29  ;;  %7164 = vmatpush1.bf16.msra.mxu1 %v17660_v11 }
 0xe36   :  { %7124 = vmatprep.subr.bf16.mxu0 %v17667_v50  ;;  %7165 = vmatprep.subr.bf16.mxu1 %v17672_v55 }
 0xe39   :  { %7125 = vmatpush1.bf16.msra.mxu0 %v17679_v27  ;;  %7166 = vmatpush1.bf16.msra.mxu1 %v17684_v28 }
 0xe3a   :  { %7126 = vmatprep.subr.bf16.mxu0 %v17691_v4  ;;  %7167 = vmatprep.subr.bf16.mxu1 %v17696_v44 }
 0xe3d   :  { %7127 = vmatpush1.bf16.msra.mxu0 %v17703_v18  ;;  %7168 = vmatpush1.bf16.msra.mxu1 %v17708_v9 }
 0xe3e   :  { %7128 = vmatprep.subr.bf16.mxu0 %v17715_v36  ;;  %7169 = vmatprep.subr.bf16.mxu1 %v17720_v58 }
 0xe41   :  { %7129 = vmatpush1.bf16.msra.mxu0 %v17727_v47  ;;  %7170 = vmatpush1.bf16.msra.mxu1 %v17732_v26 }
 0xe42   :  { %7130 = vmatprep.subr.bf16.mxu0 %v17741_v57  ;;  %7171 = vmatprep.subr.bf16.mxu1 %v17746_v14 }
 0xe45   :  { %7131 = vmatpush1.bf16.msra.mxu0 %v17751_v0  ;;  %7172 = vmatpush1.bf16.msra.mxu1 %v17756_v7 }
 0xe46   :  { %7132 = vmatprep.subr.bf16.mxu0 %v17765_v8  ;;  %7173 = vmatprep.subr.bf16.mxu1 %v17770_v10 }
 0xe49   :  { %7133 = vmatpush1.bf16.msra.mxu0 %v17775_v46  ;;  %7174 = vmatpush1.bf16.msra.mxu1 %v17780_v16 }
 0xe4a   :  { %7134 = vmatprep.subr.bf16.mxu0 %v17789_v20  ;;  %7175 = vmatprep.subr.bf16.mxu1 %v17794_v31 }
 0xe4d   :  { %7135 = vmatpush1.bf16.msra.mxu0 %v17799_v22  ;;  %7176 = vmatpush1.bf16.msra.mxu1 %v17804_v49 }
 0xe4e   :  { %7136 = vmatprep.subr.bf16.mxu0 %v17813_v42  ;;  %7177 = vmatprep.subr.bf16.mxu1 %v17818_v60 }
 0xe51   :  { %7137 = vmatpush1.bf16.msra.mxu0 %v17823_v35  ;;  %7178 = vmatpush1.bf16.msra.mxu1 %v17828_v3 }
 0xe52   :  { %7138 = vmatprep.subr.bf16.mxu0 %v17837_v43  ;;  %7179 = vmatprep.subr.bf16.mxu1 %v17842_v45 }
 0xe55   :  { %7139 = vmatpush1.bf16.msra.mxu0 %v17847_v33  ;;  %7180 = vmatpush1.bf16.msra.mxu1 %v17852_v5 }
 0xe56   :  { %7140 = vmatprep.subr.bf16.mxu0 %v17861_v23  ;;  %7181 = vmatprep.subr.bf16.mxu1 %v17866_v54 }
 0xe59   :  { %7141 = vmatpush1.bf16.msra.mxu0 %v17871_v32  ;;  %7182 = vmatpush1.bf16.msra.mxu1 %v17876_v63 }
 0xe5a   :  { %7142 = vmatprep.subr.bf16.mxu0 %v17885_v52  ;;  %7183 = vmatprep.subr.bf16.mxu1 %v17890_v13 }
 0xe5d   :  { %7143 = vmatpush1.bf16.msra.mxu0 %v17895_v59  ;;  %7184 = vmatpush1.bf16.msra.mxu1 %v17900_v6 }
 0xe5e   :  { %7144 = vmatprep.subr.bf16.mxu0 %v17909_v24  ;;  %7185 = vmatprep.subr.bf16.mxu1 %v17914_v25 }
 0xe61   :  { %7145 = vmatpush1.bf16.msra.mxu0 %v17919_v41  ;;  %7186 = vmatpush1.bf16.msra.mxu1 %v17924_v2 }
 0xe62   :  { %7146 = vmatprep.subr.bf16.mxu0 %v17933_v34  ;;  %7187 = vmatprep.subr.bf16.mxu1 %v17938_v37 }
 0xe65   :  { %7147 = vmatpush1.bf16.msra.mxu0 %v17943_v15  ;;  %7188 = vmatpush1.bf16.msra.mxu1 %v17948_v56 }
 0xe66   :  { %7148 = vmatprep.subr.bf16.mxu0 %v17955_v30  ;;  %7189 = vmatprep.subr.bf16.mxu1 %v17960_v53  ;;  %v17991_v30 = vld [vmem:[%s19491_s6 + $0x5c0] ss:$16 sps:$4 sm:$0xff]   ;;  %v17996_v53 = vld [vmem:[%s19491_s6 + $0x5c8] ss:$16 sps:$4 sm:$0xff]  }
 0xe67   :  { %19823 = vst [vmem:[#allocation43_spill] sm:$0xff] %v17991_v30  ;;  %19824 = vst [vmem:[#allocation21_spill] sm:$0xff] %v17996_v53 }
 0xe69   :  { %7149 = vmatpush1.bf16.msra.mxu0 %v17967_v40  ;;  %7190 = vmatpush1.bf16.msra.mxu1 %v17972_v1  ;;  %v18003_v40 = vld [vmem:[%s19491_s6 + $0x5e4] ss:$16 sps:$4 sm:$0xff]   ;;  %v18008_v1 = vld [vmem:[%s19491_s6 + $0x5ec] ss:$16 sps:$4 sm:$0xff]  }
 0xe6a   :  { %7150 = vmatprep.subr.bf16.mxu0 %v17979_v48  ;;  %7191 = vmatprep.subr.bf16.mxu1 %v17984_v19  ;;  %19825 = vst [vmem:[#allocation27_spill] sm:$0xff] %v18003_v40  ;;  %19826 = vst [vmem:[#allocation25_spill] sm:$0xff] %v18008_v1  ;;  %v18015_v48 = vld [vmem:[%s19491_s6 + $0x5e0] ss:$16 sps:$4 sm:$0xff]   ;;  %v18020_v19 = vld [vmem:[%s19491_s6 + $0x5e8] ss:$16 sps:$4 sm:$0xff]  }
 0xe6b   :  { %19827 = vst [vmem:[#allocation22_spill] sm:$0xff] %v18015_v48  ;;  %19828 = vst [vmem:[#allocation23_spill] sm:$0xff] %v18020_v19 }
 0xe6d   :  { %7151 = vmatpush1.bf16.msra.mxu0 %v17991_v30  ;;  %7192 = vmatpush1.bf16.msra.mxu1 %v17996_v53 }
 0xe6e   :  { %7152 = vmatprep.subr.bf16.mxu0 %v18003_v40  ;;  %7193 = vmatprep.subr.bf16.mxu1 %v18008_v1 }
 0xe71   :  { %7153 = vmatpush1.bf16.msra.mxu0 %v18015_v48  ;;  %7194 = vmatpush1.bf16.msra.mxu1 %v18020_v19 }
 0xe72   :  { %7229 = vmatprep.subr.bf16.mxu0 %v17631_v12  ;;  %7270 = vmatprep.subr.bf16.mxu1 %v17636_v51 }
 0xf06   :  { %v6658_v53 = vpop.f32.mrb[60].mxu0  ;;  %v6699_v30 = vpop.f32.mrb[60].mxu1 }
 0xf07   :  { %v6659_v56 = vadd.f32 %v6658_v53, %v19758_v21  ;;  %v6660_v15 = vpop.f32.mrb[61].mxu0  ;;  %v6701_v37 = vpop.f32.mrb[61].mxu1  ;;  %v6700_v12 = vadd.f32 %v6699_v30, %v15521_v38 }
 0xf08   :  { %v6661_v34 = vadd.f32 %v6660_v15, %v19759_v61  ;;  %v6662_v2 = vpop.f32.mrb[62].mxu0  ;;  %v6703_v40 = vpop.f32.mrb[62].mxu1  ;;  %v6702_v51 = vadd.f32 %v6701_v37, %v15524_v39 }
 0xf09   :  { %v11455_v41 = vmul.f32 -1.442695, %v6659_v56  ;;  %v6663_v1 = vpop.f32.mrb[63].mxu0  ;;  %v6704_v25 = vpop.f32.mrb[63].mxu1  ;;  %v11457_v19 = vmul.f32 -1.442695, %v6700_v12 }
 0xf0a   :  { %v11456_v48 = vmul.f32 -1.442695, %v6661_v34 }
 0xf0b   :  { %14256 = vpow2.f32 %v11455_v41 }
 0xf0c   :  { %14258 = vpow2.f32 %v11456_v48 }
 0xf0d   :  { %14260 = vtanh.f32 %v6702_v51 }
 0xf0e   :  { %14262 = vpow2.f32 %v11457_v19 }
 0xf15   :  { %v14257_v24 = vpop.eup %14256 }
 0xf16   :  { %v6715_v6 = vadd.f32 1.0, %v14257_v24  ;;  %v14259_v53 = vpop.eup %14258 }
 0xf17   :  { %v6716_v15 = vadd.f32 1.0, %v14259_v53  ;;  %v14261_v40 = vpop.eup %14260 }
 0xf18   :  { %14264 = vrcp.f32 %v6715_v6  ;;  %v14263_v2 = vpop.eup %14262 }
 0xf19   :  { %14266 = vrcp.f32 %v6716_v15  ;;  %v6717_v41 = vadd.f32 1.0, %v14263_v2 }
 0xf1b   :  { %14268 = vrcp.f32 %v6717_v41  ;;  %v19854_v41 = vld [vmem:[#allocation36_spill] sm:$0xff] }
 0xf22   :  { %v14265_v1 = vpop.eup %14264 }
 0xf23   :  { %v6726_v25 = vmul.f32 %v14265_v1, %v14261_v40  ;;  %v14267_v34 = vpop.eup %14266 }
 0xf24   :  { %v6725_v48 = vmul.f32 %v14267_v34, %v16788_v62  ;;  %v19829_v62 = vld [vmem:[#allocation33_spill] sm:$0xff] }
 0xf25   :  { %v14269_v37 = vpop.eup %14268 }
 0xf26   :  { %v18033_v30 = vadd.f32 %v6726_v25, %v6725_v48 }
 0xf28   :  { %14270 = vtanh.f32 %v18033_v30 }
 0xf32   :  { %v14271_v24 = vpop.eup %14270 }
 0xf33   :  { %v6729_v56 = vmul.f32 %v14271_v24, %v14269_v37 }
 0xf35   :  { %v18036_v19 = vpack.c.bf16 %v6729_v56, %v6729_v56 }
 0xf37   :  { %v18039_v6 = vrot.slane %v18036_v19, 1 }
 0xf39   :  { %7155 = vmatmul.mubr.bf16.vlgmr.msra.gmra.mrb[64].mxu0 %v18039_v6  ;;  %7196 = vmatmul.mubr.bf16.vlgmr.msra.gmra.mrb[64].mxu1 %v18039_v6 }
 0xf3a   :  { %7261 = vmatprep.mubr.bf16.mxu0 %v17118_v17  ;;  %7302 = vmatprep.mubr.bf16.mxu1 %v17118_v17  ;;  %v19830_v17 = vld [vmem:[#allocation34_spill] sm:$0xff] }
 0xf3b   :  { %7230 = vmatpush1.bf16.msra.mxu0 %v17655_v29  ;;  %7271 = vmatpush1.bf16.msra.mxu1 %v17660_v11  ;;  %v19831_v29 = vld [vmem:[#allocation35_spill] sm:$0xff]  ;;  %v19832_v11 = vld [vmem:[#allocation2_spill] sm:$0xff] }
 0xf3c   :  { %7231 = vmatprep.subr.bf16.mxu0 %v17667_v50  ;;  %7272 = vmatprep.subr.bf16.mxu1 %v17672_v55  ;;  %v19833_v50 = vld [vmem:[#allocation3_spill] sm:$0xff] }
 0xf3d   :  { %v19834_v55 = vld [vmem:[#allocation7_spill] sm:$0xff] }
 0xf3f   :  { %7232 = vmatpush1.bf16.msra.mxu0 %v17679_v27  ;;  %7273 = vmatpush1.bf16.msra.mxu1 %v17684_v28  ;;  %v19840_v27 = vld [vmem:[#allocation39_spill] sm:$0xff]  ;;  %v19841_v28 = vld [vmem:[#allocation40_spill] sm:$0xff] }
 0xf40   :  { %7233 = vmatprep.subr.bf16.mxu0 %v17691_v4  ;;  %7274 = vmatprep.subr.bf16.mxu1 %v17696_v44  ;;  %v19842_v4 = vld [vmem:[#allocation41_spill] sm:$0xff]  ;;  %v19843_v44 = vld [vmem:[#allocation42_spill] sm:$0xff] }
 0xf43   :  { %7234 = vmatpush1.bf16.msra.mxu0 %v17703_v18  ;;  %7275 = vmatpush1.bf16.msra.mxu1 %v17708_v9  ;;  %v19844_v18 = vld [vmem:[#allocation43_spill] sm:$0xff]  ;;  %v19845_v9 = vld [vmem:[#allocation21_spill] sm:$0xff] }
 0xf44   :  { %7235 = vmatprep.subr.bf16.mxu0 %v17715_v36  ;;  %7276 = vmatprep.subr.bf16.mxu1 %v17720_v58  ;;  %v19846_v36 = vld [vmem:[#allocation27_spill] sm:$0xff]  ;;  %v19847_v58 = vld [vmem:[#allocation25_spill] sm:$0xff] }
 0xf47   :  { %7236 = vmatpush1.bf16.msra.mxu0 %v17727_v47  ;;  %7277 = vmatpush1.bf16.msra.mxu1 %v17732_v26  ;;  %v19848_v47 = vld [vmem:[#allocation22_spill] sm:$0xff]  ;;  %v19849_v26 = vld [vmem:[#allocation23_spill] sm:$0xff] }
 0xf48   :  { %7237 = vmatprep.subr.bf16.mxu0 %v17741_v57  ;;  %7278 = vmatprep.subr.bf16.mxu1 %v17746_v14  ;;  %v13600_v57 = vld [vmem:[%s19497_s8 + $0x40] sm:$0xff]  }
 0xf49   :  { %v13601_v14 = vld [vmem:[%s19497_s8 + $0xc0] sm:$0xff]  }
 0xf4b   :  { %7238 = vmatpush1.bf16.msra.mxu0 %v17751_v0  ;;  %7279 = vmatpush1.bf16.msra.mxu1 %v17756_v7 }
 0xf4c   :  { %7239 = vmatprep.subr.bf16.mxu0 %v17765_v8  ;;  %7280 = vmatprep.subr.bf16.mxu1 %v17770_v10  ;;  %v19850_v8 = vld [vmem:[#allocation17_spill] sm:$0xff] }
 0xf4f   :  { %7240 = vmatpush1.bf16.msra.mxu0 %v17775_v46  ;;  %7281 = vmatpush1.bf16.msra.mxu1 %v17780_v16 }
 0xf50   :  { %7241 = vmatprep.subr.bf16.mxu0 %v17789_v20  ;;  %7282 = vmatprep.subr.bf16.mxu1 %v17794_v31  ;;  %v19851_v20 = vld [vmem:[#allocation19_spill] sm:$0xff] }
 0xf53   :  { %7242 = vmatpush1.bf16.msra.mxu0 %v17799_v22  ;;  %7283 = vmatpush1.bf16.msra.mxu1 %v17804_v49 }
 0xf54   :  { %7243 = vmatprep.subr.bf16.mxu0 %v17813_v42  ;;  %7284 = vmatprep.subr.bf16.mxu1 %v17818_v60 }
 0xf57   :  { %7244 = vmatpush1.bf16.msra.mxu0 %v17823_v35  ;;  %7285 = vmatpush1.bf16.msra.mxu1 %v17828_v3 }
 0xf58   :  { %7245 = vmatprep.subr.bf16.mxu0 %v17837_v43  ;;  %7286 = vmatprep.subr.bf16.mxu1 %v17842_v45  ;;  %v19852_v43 = vld [vmem:[#allocation18_spill] sm:$0xff] }
 0xf5b   :  { %7246 = vmatpush1.bf16.msra.mxu0 %v17847_v33  ;;  %7287 = vmatpush1.bf16.msra.mxu1 %v17852_v5  ;;  %v19853_v33 = vld [vmem:[#allocation20_spill] sm:$0xff] }
 0xf5c   :  { %7247 = vmatprep.subr.bf16.mxu0 %v17861_v23  ;;  %7288 = vmatprep.subr.bf16.mxu1 %v17866_v54 }
 0xf5f   :  { %7248 = vmatpush1.bf16.msra.mxu0 %v17871_v32  ;;  %7289 = vmatpush1.bf16.msra.mxu1 %v17876_v63  ;;  %v19835_v32 = vld [vmem:[#allocation16_spill] sm:$0xff]  ;;  %v19836_v63 = vld [vmem:[#allocation10_spill] sm:$0xff] }
 0xf60   :  { %7249 = vmatprep.subr.bf16.mxu0 %v17885_v52  ;;  %7290 = vmatprep.subr.bf16.mxu1 %v17890_v13  ;;  %v19837_v52 = vld [vmem:[#allocation9_spill] sm:$0xff]  ;;  %v19838_v13 = vld [vmem:[#allocation15_spill] sm:$0xff] }
 0xf63   :  { %7250 = vmatpush1.bf16.msra.mxu0 %v17895_v59  ;;  %7291 = vmatpush1.bf16.msra.mxu1 %v19829_v62  ;;  %v19839_v59 = vld [vmem:[#allocation38_spill] sm:$0xff] }
 0xf64   :  { %7251 = vmatprep.subr.bf16.mxu0 %v19830_v17  ;;  %7292 = vmatprep.subr.bf16.mxu1 %v19831_v29  ;;  %v13602_v17 = vld [vmem:[%s19497_s8] sm:$0xff]  }
 0xf65   :  { %v13603_v29 = vld [vmem:[%s19497_s8 + $0x80] sm:$0xff]  }
 0xf67   :  { %7252 = vmatpush1.bf16.msra.mxu0 %v19832_v11  ;;  %7293 = vmatpush1.bf16.msra.mxu1 %v19833_v50  ;;  %v13604_v50 = vld [vmem:[%s19497_s8 + $0x48] sm:$0xff]  }
 0xf68   :  { %7253 = vmatprep.subr.bf16.mxu0 %v19834_v55  ;;  %7294 = vmatprep.subr.bf16.mxu1 %v19835_v32  ;;  %v13605_v55 = vld [vmem:[%s19497_s8 + $0xc8] sm:$0xff]  }
 0xf69   :  { %v13606_v32 = vld [vmem:[%s19497_s8 + $0x8] sm:$0xff]  }
 0xf6b   :  { %7254 = vmatpush1.bf16.msra.mxu0 %v19836_v63  ;;  %7295 = vmatpush1.bf16.msra.mxu1 %v19837_v52  ;;  %v13607_v63 = vld [vmem:[%s19497_s8 + $0x88] sm:$0xff]   ;;  %v13608_v52 = vld [vmem:[%s19497_s8 + $0x50] sm:$0xff]  }
 0xf6c   :  { %7255 = vmatprep.subr.bf16.mxu0 %v19838_v13  ;;  %7296 = vmatprep.subr.bf16.mxu1 %v19839_v59  ;;  %v13609_v13 = vld [vmem:[%s19497_s8 + $0xd0] sm:$0xff]  }
 0xf6d   :  { %v13610_v59 = vld [vmem:[%s19497_s8 + $0x10] sm:$0xff]  }
 0xf6f   :  { %7256 = vmatpush1.bf16.msra.mxu0 %v19840_v27  ;;  %7297 = vmatpush1.bf16.msra.mxu1 %v19841_v28  ;;  %v13611_v27 = vld [vmem:[%s19497_s8 + $0x90] sm:$0xff]   ;;  %v13612_v28 = vld [vmem:[%s19497_s8 + $0x58] sm:$0xff]  }
 0xf70   :  { %7257 = vmatprep.subr.bf16.mxu0 %v19842_v4  ;;  %7298 = vmatprep.subr.bf16.mxu1 %v19843_v44  ;;  %v13613_v4 = vld [vmem:[%s19497_s8 + $0xd8] sm:$0xff]  }
 0xf71   :  { %v13614_v44 = vld [vmem:[%s19497_s8 + $0x18] sm:$0xff]  }
 0xf73   :  { %7258 = vmatpush1.bf16.msra.mxu0 %v19844_v18  ;;  %7299 = vmatpush1.bf16.msra.mxu1 %v19845_v9  ;;  %v13615_v18 = vld [vmem:[%s19497_s8 + $0x98] sm:$0xff]   ;;  %v13616_v9 = vld [vmem:[%s19497_s8 + $0x60] sm:$0xff]  }
 0xf74   :  { %7259 = vmatprep.subr.bf16.mxu0 %v19846_v36  ;;  %7300 = vmatprep.subr.bf16.mxu1 %v19847_v58  ;;  %v13617_v36 = vld [vmem:[%s19497_s8 + $0xe0] sm:$0xff]  }
 0xf75   :  { %v13618_v58 = vld [vmem:[%s19497_s8 + $0x20] sm:$0xff]  }
 0xf77   :  { %7260 = vmatpush1.bf16.msra.mxu0 %v19848_v47  ;;  %7301 = vmatpush1.bf16.msra.mxu1 %v19849_v26  ;;  %v13619_v47 = vld [vmem:[%s19497_s8 + $0xa0] sm:$0xff]   ;;  %v13620_v26 = vld [vmem:[%s19497_s8 + $0x68] sm:$0xff]  }
 0xf78   :  { %12179 = vmatprep.subr.bf16.mxu0 %v13600_v57  ;;  %12201 = vmatprep.subr.bf16.mxu1 %v13601_v14  ;;  %v13621_v57 = vld [vmem:[%s19497_s8 + $0xe8] sm:$0xff]  }
 0xf79   :  { %v13622_v14 = vld [vmem:[%s19497_s8 + $0x28] sm:$0xff]  }
0x100c   :  { %v7156_v0 = vpop.f32.mrb[64].mxu0  ;;  %v7197_v7 = vpop.f32.mrb[64].mxu1 }
0x100d   :  { %v7157_v10 = vadd.f32 %v7156_v0, %v19850_v8  ;;  %v7158_v46 = vpop.f32.mrb[65].mxu0  ;;  %v7199_v16 = vpop.f32.mrb[65].mxu1  ;;  %v7198_v45 = vadd.f32 %v7197_v7, %v19852_v43  ;;  %v13623_v0 = vld [vmem:[%s19497_s8 + $0xa8] sm:$0xff]   ;;  %v13624_v7 = vld [vmem:[%s19497_s8 + $0x70] sm:$0xff]  }
0x100e   :  { %v7159_v31 = vadd.f32 %v7158_v46, %v19851_v20  ;;  %v7160_v22 = vpop.f32.mrb[66].mxu0  ;;  %v7201_v49 = vpop.f32.mrb[66].mxu1  ;;  %v7200_v5 = vadd.f32 %v7199_v16, %v19853_v33  ;;  %v13626_v46 = vld [vmem:[%s19497_s8 + $0x30] sm:$0xff]  }
0x100f   :  { %v11586_v42 = vmul.f32 -1.442695, %v7157_v10  ;;  %v7161_v60 = vpop.f32.mrb[67].mxu0  ;;  %v7202_v35 = vpop.f32.mrb[67].mxu1  ;;  %v11588_v23 = vmul.f32 -1.442695, %v7198_v45 }
0x1010   :  { %v11587_v3 = vmul.f32 -1.442695, %v7159_v31  ;;  %v13625_v10 = vld [vmem:[%s19497_s8 + $0xf0] sm:$0xff]   ;;  %v13628_v31 = vld [vmem:[%s19497_s8 + $0x78] sm:$0xff]   ;;  %v19856_v60 = vmov 0.0   ;;  %v13632_v45 = vld [vmem:[%s19497_s8 + $0x100] sm:$0xff]  }
0x1011   :  { %14272 = vpow2.f32 %v11586_v42  ;;  %v13627_v16 = vld [vmem:[%s19497_s8 + $0xb0] sm:$0xff]   ;;  %v13629_v22 = vld [vmem:[%s19497_s8 + $0xf8] sm:$0xff]  }
0x1012   :  { %14274 = vpow2.f32 %v11587_v3  ;;  %v13630_v49 = vld [vmem:[%s19497_s8 + $0x38] sm:$0xff]   ;;  %v19857_v35 = vld [vmem:[#allocation32_spill] sm:$0xff]  ;;  %v19858_v3 = vld [vmem:[#allocation30_spill] sm:$0xff] }
0x1013   :  { %14276 = vtanh.f32 %v7200_v5  ;;  %v13631_v42 = vld [vmem:[%s19497_s8 + $0xb8] sm:$0xff]   ;;  %v13633_v5 = vld [vmem:[%s19497_s8 + $0x108] sm:$0xff]  }
0x1014   :  { %14278 = vpow2.f32 %v11588_v23  ;;  %v13635_v23 = vld [vmem:[%s19497_s8 + $0x118] sm:$0xff]  }
0x101b   :  { %v14273_v54 = vpop.eup %14272 }
0x101c   :  { %v7213_v12 = vadd.f32 1.0, %v14273_v54  ;;  %v14275_v51 = vpop.eup %14274  ;;  %v13636_v54 = vld [vmem:[%s19497_s8 + $0x120] sm:$0xff]  }
0x101d   :  { %v7214_v53 = vadd.f32 1.0, %v14275_v51  ;;  %v14277_v15 = vpop.eup %14276  ;;  %v13638_v51 = vld [vmem:[%s19497_s8 + $0x130] sm:$0xff]  }
0x101e   :  { %14280 = vrcp.f32 %v7213_v12  ;;  %v14279_v40 = vpop.eup %14278  ;;  %v13637_v12 = vld [vmem:[%s19497_s8 + $0x128] sm:$0xff]  }
0x101f   :  { %14282 = vrcp.f32 %v7214_v53  ;;  %v7215_v34 = vadd.f32 1.0, %v14279_v40  ;;  %v13639_v53 = vld [vmem:[%s19497_s8 + $0x138] sm:$0xff]   ;;  %v13642_v40 = vld [vmem:[%s19489_s4 + $0x4] ss:$16 sps:$4 sm:$0xff]  }
0x1021   :  { %14284 = vrcp.f32 %v7215_v34  ;;  %v13654_v34 = vld [vmem:[%s19489_s4 + $0x44] ss:$16 sps:$4 sm:$0xff]  }
0x1028   :  { %v14281_v2 = vpop.eup %14280 }
0x1029   :  { %v7224_v1 = vmul.f32 %v14281_v2, %v14277_v15  ;;  %v14283_v25 = vpop.eup %14282  ;;  %v13640_v15 = vld [vmem:[%s19489_s4] ss:$16 sps:$4 sm:$0xff]   ;;  %v13645_v2 = vld [vmem:[%s19489_s4 + $0xc] ss:$16 sps:$4 sm:$0xff]  }
0x102a   :  { %v7223_v48 = vmul.f32 %v14283_v25, %v19854_v41  ;;  %v13646_v25 = vld [vmem:[%s19489_s4 + $0x20] ss:$16 sps:$4 sm:$0xff]  }
0x102b   :  { %v14285_v24 = vpop.eup %14284  ;;  %v13652_v41 = vld [vmem:[%s19489_s4 + $0x40] ss:$16 sps:$4 sm:$0xff]  }
0x102c   :  { %v18118_v37 = vadd.f32 %v7224_v1, %v7223_v48  ;;  %v13648_v1 = vld [vmem:[%s19489_s4 + $0x24] ss:$16 sps:$4 sm:$0xff]  }
0x102d   :  { %v13660_v48 = vld [vmem:[%s19489_s4 + $0x64] ss:$16 sps:$4 sm:$0xff]  }
0x102e   :  { %19855 = vst [vmem:[#allocation24_spill] sm:$0xff] %v18118_v37  ;;  %14286 = vtanh.f32 %v18118_v37  ;;  %v19195_v37 = vld [vmem:[%s19491_s6 + $0x5ac] ss:$16 sps:$4 sm:$0xff]  }
0x102f   :  { %19884 = vst [vmem:[#allocation40_spill] sm:$0xff] %v19195_v37 }
0x1038   :  { %v14287_v56 = vpop.eup %14286 }
0x1039   :  { %v7227_v62 = vmul.f32 %v14287_v56, %v14285_v24  ;;  %v13658_v24 = vld [vmem:[%s19489_s4 + $0x60] ss:$16 sps:$4 sm:$0xff]   ;;  %v13666_v56 = vld [vmem:[%s19489_s4 + $0x84] ss:$16 sps:$4 sm:$0xff]  }
0x103b   :  { %v18127_v11 = vpack.c.bf16 %v7227_v62, %v7227_v62  ;;  %v13664_v62 = vld [vmem:[%s19489_s4 + $0x80] ss:$16 sps:$4 sm:$0xff]  }
0x103d   :  { %7262 = vmatmul.mubr.bf16.vlgmr.msra.gmra.mrb[68].mxu0 %v18127_v11  ;;  %7303 = vmatmul.mubr.bf16.vlgmr.msra.gmra.mrb[68].mxu1 %v18127_v11 }
0x103e   :  { %12180 = vmatpush3.bf16.msra.mxu0 %v13602_v17  ;;  %12202 = vmatpush3.bf16.msra.mxu1 %v13603_v29  ;;  %v13672_v17 = vld [vmem:[%s19489_s4 + $0xa4] ss:$16 sps:$4 sm:$0xff]   ;;  %v13670_v29 = vld [vmem:[%s19489_s4 + $0xa0] ss:$16 sps:$4 sm:$0xff]  }
0x103f   :  { %7688 = vmatprep.mubr.bf16.mxu0 %v18036_v19  ;;  %7728 = vmatprep.mubr.bf16.mxu1 %v18127_v11 }
0x1040   :  { %12181 = vmatprep.subr.bf16.mxu0 %v13604_v50  ;;  %12203 = vmatprep.subr.bf16.mxu1 %v13605_v55  ;;  %v13678_v50 = vld [vmem:[%s19489_s4 + $0xc4] ss:$16 sps:$4 sm:$0xff]   ;;  %v13676_v55 = vld [vmem:[%s19489_s4 + $0xc0] ss:$16 sps:$4 sm:$0xff]  }
0x1042   :  { %12182 = vmatpush3.bf16.msra.mxu0 %v13606_v32  ;;  %12204 = vmatpush3.bf16.msra.mxu1 %v13607_v63  ;;  %v13684_v32 = vld [vmem:[%s19489_s4 + $0xe4] ss:$16 sps:$4 sm:$0xff]   ;;  %v13682_v63 = vld [vmem:[%s19489_s4 + $0xe0] ss:$16 sps:$4 sm:$0xff]  }
0x1043   :  { %12183 = vmatprep.subr.bf16.mxu0 %v13608_v52  ;;  %12205 = vmatprep.subr.bf16.mxu1 %v13609_v13  ;;  %v13690_v52 = vld [vmem:[%s19489_s4 + $0x104] ss:$16 sps:$4 sm:$0xff]   ;;  %v13688_v13 = vld [vmem:[%s19489_s4 + $0x100] ss:$16 sps:$4 sm:$0xff]  }
0x1046   :  { %12184 = vmatpush3.bf16.msra.mxu0 %v13610_v59  ;;  %12206 = vmatpush3.bf16.msra.mxu1 %v13611_v27  ;;  %v13696_v59 = vld [vmem:[%s19489_s4 + $0x124] ss:$16 sps:$4 sm:$0xff]   ;;  %v13694_v27 = vld [vmem:[%s19489_s4 + $0x120] ss:$16 sps:$4 sm:$0xff]  }
0x1047   :  { %12185 = vmatprep.subr.bf16.mxu0 %v13612_v28  ;;  %12207 = vmatprep.subr.bf16.mxu1 %v13613_v4  ;;  %v13702_v28 = vld [vmem:[%s19489_s4 + $0x144] ss:$16 sps:$4 sm:$0xff]   ;;  %v13700_v4 = vld [vmem:[%s19489_s4 + $0x140] ss:$16 sps:$4 sm:$0xff]  }
0x104a   :  { %12186 = vmatpush3.bf16.msra.mxu0 %v13614_v44  ;;  %12208 = vmatpush3.bf16.msra.mxu1 %v13615_v18  ;;  %v13708_v44 = vld [vmem:[%s19489_s4 + $0x164] ss:$16 sps:$4 sm:$0xff]   ;;  %v13706_v18 = vld [vmem:[%s19489_s4 + $0x160] ss:$16 sps:$4 sm:$0xff]  }
0x104b   :  { %12187 = vmatprep.subr.bf16.mxu0 %v13616_v9  ;;  %12209 = vmatprep.subr.bf16.mxu1 %v13617_v36  ;;  %v13714_v9 = vld [vmem:[%s19489_s4 + $0x184] ss:$16 sps:$4 sm:$0xff]   ;;  %v13712_v36 = vld [vmem:[%s19489_s4 + $0x180] ss:$16 sps:$4 sm:$0xff]  }
0x104e   :  { %12188 = vmatpush3.bf16.msra.mxu0 %v13618_v58  ;;  %12210 = vmatpush3.bf16.msra.mxu1 %v13619_v47  ;;  %v13720_v58 = vld [vmem:[%s19489_s4 + $0x1a4] ss:$16 sps:$4 sm:$0xff]   ;;  %v13718_v47 = vld [vmem:[%s19489_s4 + $0x1a0] ss:$16 sps:$4 sm:$0xff]  }
0x104f   :  { %12189 = vmatprep.subr.bf16.mxu0 %v13620_v26  ;;  %12211 = vmatprep.subr.bf16.mxu1 %v13621_v57  ;;  %v13726_v26 = vld [vmem:[%s19489_s4 + $0x1c4] ss:$16 sps:$4 sm:$0xff]   ;;  %v13724_v57 = vld [vmem:[%s19489_s4 + $0x1c0] ss:$16 sps:$4 sm:$0xff]  }
0x1052   :  { %12190 = vmatpush3.bf16.msra.mxu0 %v13622_v14  ;;  %12212 = vmatpush3.bf16.msra.mxu1 %v13623_v0 }
0x1053   :  { %12191 = vmatprep.subr.bf16.mxu0 %v13624_v7  ;;  %12213 = vmatprep.subr.bf16.mxu1 %v13625_v10 }
0x1056   :  { %12192 = vmatpush3.bf16.msra.mxu0 %v13626_v46  ;;  %12214 = vmatpush3.bf16.msra.mxu1 %v13627_v16 }
0x1057   :  { %12193 = vmatprep.subr.bf16.mxu0 %v13628_v31  ;;  %12215 = vmatprep.subr.bf16.mxu1 %v13629_v22 }
0x105a   :  { %12194 = vmatpush3.bf16.msra.mxu0 %v13630_v49  ;;  %12216 = vmatpush3.bf16.msra.mxu1 %v13631_v42 }
0x105b   :  { %12325 = vmatprep.subr.bf16.mxu0 %v19856_v60  ;;  %8164 = vmatprep.subr.bf16.mxu1 %v13642_v40 }
0x105d   :  { %7689 = vmatmul.mubr.bf16.vlgmr.msra.gmra.mrb[72].mxu0 %v19857_v35  ;;  %7729 = vmatmul.mubr.bf16.vlgmr.msra.gmra.mrb[72].mxu1 %v18039_v6  ;;  %v13634_v6 = vld [vmem:[%s19497_s8 + $0x110] sm:$0xff]  }
0x105e   :  { %8196 = vmatprep.mubr.bf16.mxu1 %v19858_v3  ;;  %12341 = vmatprep.mubr.msk.bf16.mxu0 %vm14390_vm3, %v19856_v60 }
0x105f   :  { %12326 = vmatpush3.bf16.msra.mxu0 %v13632_v45  ;;  %8165 = vmatpush1.bf16.msra.mxu1 %v13640_v15 }
0x1060   :  { %12327 = vmatprep.subr.bf16.mxu0 %v19856_v60  ;;  %8166 = vmatprep.subr.bf16.mxu1 %v13648_v1 }
0x1063   :  { %12328 = vmatpush3.bf16.msra.mxu0 %v13633_v5  ;;  %8167 = vmatpush1.bf16.msra.mxu1 %v13646_v25 }
0x1064   :  { %12329 = vmatprep.subr.bf16.mxu0 %v19856_v60  ;;  %8168 = vmatprep.subr.bf16.mxu1 %v13654_v34 }
0x1067   :  { %12330 = vmatpush3.bf16.msra.mxu0 %v13634_v6  ;;  %8169 = vmatpush1.bf16.msra.mxu1 %v13652_v41 }
0x1068   :  { %12331 = vmatprep.subr.bf16.mxu0 %v19856_v60  ;;  %8170 = vmatprep.subr.bf16.mxu1 %v13660_v48  ;;  %v19859_v48 = vld [vmem:[#allocation37_spill] sm:$0xff] }
0x106b   :  { %12332 = vmatpush3.bf16.msra.mxu0 %v13635_v23  ;;  %8171 = vmatpush1.bf16.msra.mxu1 %v13658_v24 }
0x106c   :  { %12333 = vmatprep.subr.bf16.mxu0 %v19856_v60  ;;  %8172 = vmatprep.subr.bf16.mxu1 %v13666_v56 }
0x106f   :  { %12334 = vmatpush3.bf16.msra.mxu0 %v13636_v54  ;;  %8173 = vmatpush1.bf16.msra.mxu1 %v13664_v62 }
0x1070   :  { %12335 = vmatprep.subr.bf16.mxu0 %v19856_v60  ;;  %8174 = vmatprep.subr.bf16.mxu1 %v13672_v17 }
0x1073   :  { %12336 = vmatpush3.bf16.msra.mxu0 %v13637_v12  ;;  %8175 = vmatpush1.bf16.msra.mxu1 %v13670_v29 }
0x1074   :  { %12337 = vmatprep.subr.bf16.mxu0 %v19856_v60  ;;  %8176 = vmatprep.subr.bf16.mxu1 %v13678_v50 }
0x1077   :  { %12338 = vmatpush3.bf16.msra.mxu0 %v13638_v51  ;;  %8177 = vmatpush1.bf16.msra.mxu1 %v13676_v55 }
0x1078   :  { %12339 = vmatprep.subr.bf16.mxu0 %v19856_v60  ;;  %8178 = vmatprep.subr.bf16.mxu1 %v13684_v32  ;;  %v19190_v60 = vld [vmem:[%s19491_s6 + $0x5a4] ss:$16 sps:$4 sm:$0xff]  }
0x1079   :  { %19883 = vst [vmem:[#allocation39_spill] sm:$0xff] %v19190_v60 }
0x107b   :  { %12340 = vmatpush3.bf16.msra.mxu0 %v13639_v53  ;;  %8179 = vmatpush1.bf16.msra.mxu1 %v13682_v63 }
0x107c   :  { %8205 = vmatprep.subr.bf16.mxu0 %v13645_v2  ;;  %8180 = vmatprep.subr.bf16.mxu1 %v13690_v52 }
0x107f   :  { %8181 = vmatpush1.bf16.msra.mxu1 %v13688_v13 }
0x1080   :  { %8182 = vmatprep.subr.bf16.mxu1 %v13696_v59 }
0x1083   :  { %8183 = vmatpush1.bf16.msra.mxu1 %v13694_v27  ;;  %v14386_v27 = vld [vmem:[%s19498_s9] ss:$0 sm:$0xff] }
0x1084   :  { %8184 = vmatprep.subr.bf16.mxu1 %v13702_v28 }
0x1087   :  { %8185 = vmatpush1.bf16.msra.mxu1 %v13700_v4 }
0x1088   :  { %8186 = vmatprep.subr.bf16.mxu1 %v13708_v44 }
0x108b   :  { %8187 = vmatpush1.bf16.msra.mxu1 %v13706_v18 }
0x108c   :  { %8188 = vmatprep.subr.bf16.mxu1 %v13714_v9 }
0x108f   :  { %8189 = vmatpush1.bf16.msra.mxu1 %v13712_v36  ;;  %v13643_v36 = vld [vmem:[%s19489_s4 + $0x8] ss:$16 sps:$4 sm:$0xff]  }
0x1090   :  { %8190 = vmatprep.subr.bf16.mxu1 %v13720_v58 }
0x1093   :  { %8191 = vmatpush1.bf16.msra.mxu1 %v13718_v47  ;;  %v13651_v47 = vld [vmem:[%s19489_s4 + $0x2c] ss:$16 sps:$4 sm:$0xff]  }
0x1094   :  { %8192 = vmatprep.subr.bf16.mxu1 %v13726_v26  ;;  %v13649_v26 = vld [vmem:[%s19489_s4 + $0x28] ss:$16 sps:$4 sm:$0xff]  }
0x1097   :  { %8193 = vmatpush1.bf16.msra.mxu1 %v13724_v57  ;;  %v13657_v57 = vld [vmem:[%s19489_s4 + $0x4c] ss:$16 sps:$4 sm:$0xff]  }
0x1110   :  { %v7263_v14 = vpop.f32.mrb[68].mxu0  ;;  %v7304_v0 = vpop.f32.mrb[68].mxu1 }
0x1111   :  { %v7264_v7 = vadd.f32 %v7263_v14, %v19850_v8  ;;  %v7265_v10 = vpop.f32.mrb[69].mxu0  ;;  %v7306_v46 = vpop.f32.mrb[69].mxu1  ;;  %v7305_v6 = vadd.f32 %v7304_v0, %v19852_v43  ;;  %v13655_v14 = vld [vmem:[%s19489_s4 + $0x48] ss:$16 sps:$4 sm:$0xff]   ;;  %v19219_v8 = vld [vmem:[%s19491_s6 + $0x5cc] ss:$16 sps:$4 sm:$0xff]  }
0x1112   :  { %v7266_v16 = vadd.f32 %v7265_v10, %v19851_v20  ;;  %v7267_v31 = vpop.f32.mrb[70].mxu0  ;;  %v7308_v22 = vpop.f32.mrb[70].mxu1  ;;  %v7307_v23 = vadd.f32 %v7306_v46, %v19853_v33  ;;  %v13661_v0 = vld [vmem:[%s19489_s4 + $0x68] ss:$16 sps:$4 sm:$0xff]   ;;  %v13675_v46 = vld [vmem:[%s19489_s4 + $0xac] ss:$16 sps:$4 sm:$0xff]  }
0x1113   :  { %v11589_v49 = vmul.f32 -1.442695, %v7264_v7  ;;  %v7268_v42 = vpop.f32.mrb[71].mxu0  ;;  %v7309_v45 = vpop.f32.mrb[71].mxu1  ;;  %v11591_v54 = vmul.f32 -1.442695, %v7305_v6 }
0x1114   :  { %v11590_v5 = vmul.f32 -1.442695, %v7266_v16  ;;  %v13669_v7 = vld [vmem:[%s19489_s4 + $0x8c] ss:$16 sps:$4 sm:$0xff]   ;;  %v13667_v10 = vld [vmem:[%s19489_s4 + $0x88] ss:$16 sps:$4 sm:$0xff]  }
0x1115   :  { %14288 = vpow2.f32 %v11589_v49  ;;  %v13673_v16 = vld [vmem:[%s19489_s4 + $0xa8] ss:$16 sps:$4 sm:$0xff]   ;;  %v13681_v31 = vld [vmem:[%s19489_s4 + $0xcc] ss:$16 sps:$4 sm:$0xff]   ;;  %v19202_v33 = vld [vmem:[%s19491_s6 + $0x5a0] ss:$16 sps:$4 sm:$0xff]  }
0x1116   :  { %14290 = vpow2.f32 %v11590_v5  ;;  %v13679_v22 = vld [vmem:[%s19489_s4 + $0xc8] ss:$16 sps:$4 sm:$0xff]   ;;  %v13687_v49 = vld [vmem:[%s19489_s4 + $0xec] ss:$16 sps:$4 sm:$0xff]   ;;  %19885 = vst [vmem:[#allocation41_spill] sm:$0xff] %v19202_v33  ;;  %19888 = vst [vmem:[#allocation21_spill] sm:$0xff] %v19219_v8 }
0x1117   :  { %14292 = vtanh.f32 %v7307_v23  ;;  %v13685_v42 = vld [vmem:[%s19489_s4 + $0xe8] ss:$16 sps:$4 sm:$0xff]   ;;  %v13693_v45 = vld [vmem:[%s19489_s4 + $0x10c] ss:$16 sps:$4 sm:$0xff]   ;;  %v19214_v20 = vld [vmem:[%s19491_s6 + $0x5c4] ss:$16 sps:$4 sm:$0xff]  }
0x1118   :  { %14294 = vpow2.f32 %v11591_v54  ;;  %v13691_v5 = vld [vmem:[%s19489_s4 + $0x108] ss:$16 sps:$4 sm:$0xff]   ;;  %v13699_v6 = vld [vmem:[%s19489_s4 + $0x12c] ss:$16 sps:$4 sm:$0xff]   ;;  %19887 = vst [vmem:[#allocation43_spill] sm:$0xff] %v19214_v20 }
0x1119   :  { %v13697_v23 = vld [vmem:[%s19489_s4 + $0x128] ss:$16 sps:$4 sm:$0xff]   ;;  %v13705_v54 = vld [vmem:[%s19489_s4 + $0x14c] ss:$16 sps:$4 sm:$0xff]  }
0x111a   :  { %v19207_v43 = vld [vmem:[%s19491_s6 + $0x5a8] ss:$16 sps:$4 sm:$0xff]  }
0x111b   :  { %19886 = vst [vmem:[#allocation42_spill] sm:$0xff] %v19207_v43 }
0x111f   :  { %v14289_v12 = vpop.eup %14288 }
0x1120   :  { %v7320_v51 = vadd.f32 1.0, %v14289_v12  ;;  %v14291_v53 = vpop.eup %14290  ;;  %v13703_v12 = vld [vmem:[%s19489_s4 + $0x148] ss:$16 sps:$4 sm:$0xff]  }
0x1121   :  { %v7321_v15 = vadd.f32 1.0, %v14291_v53  ;;  %v14293_v40 = vpop.eup %14292  ;;  %v13709_v53 = vld [vmem:[%s19489_s4 + $0x168] ss:$16 sps:$4 sm:$0xff]  }
0x1122   :  { %14296 = vrcp.f32 %v7320_v51  ;;  %v14295_v2 = vpop.eup %14294  ;;  %v13711_v51 = vld [vmem:[%s19489_s4 + $0x16c] ss:$16 sps:$4 sm:$0xff]  }
0x1123   :  { %14298 = vrcp.f32 %v7321_v15  ;;  %v7322_v41 = vadd.f32 1.0, %v14295_v2  ;;  %v13717_v15 = vld [vmem:[%s19489_s4 + $0x18c] ss:$16 sps:$4 sm:$0xff]  }
0x1124   :  { %v13723_v2 = vld [vmem:[%s19489_s4 + $0x1ac] ss:$16 sps:$4 sm:$0xff]  }
0x1125   :  { %14300 = vrcp.f32 %v7322_v41  ;;  %v13732_v41 = vld [vmem:[%s19489_s4 + $0x1e4] ss:$16 sps:$4 sm:$0xff]  }
0x1126   :  { %8194 = vmatprep.subr.bf16.mxu1 %v13732_v41  ;;  %v13795_v41 = vld [vmem:[%s19491_s6 + $0x12c] ss:$16 sps:$4 sm:$0xff]  }
0x112c   :  { %v14297_v1 = vpop.eup %14296 }
0x112d   :  { %v7331_v25 = vmul.f32 %v14297_v1, %v14293_v40  ;;  %v14299_v34 = vpop.eup %14298  ;;  %v13715_v40 = vld [vmem:[%s19489_s4 + $0x188] ss:$16 sps:$4 sm:$0xff]  }
0x112e   :  { %v7330_v24 = vmul.f32 %v14299_v34, %v19859_v48  ;;  %v13721_v1 = vld [vmem:[%s19489_s4 + $0x1a8] ss:$16 sps:$4 sm:$0xff]   ;;  %v13735_v48 = vld [vmem:[%s19489_s4 + $0x1ec] ss:$16 sps:$4 sm:$0xff]  }
0x112f   :  { %v14301_v44 = vpop.eup %14300  ;;  %v13727_v34 = vld [vmem:[%s19489_s4 + $0x1c8] ss:$16 sps:$4 sm:$0xff]  }
0x1130   :  { %v12195_v56 = vpop.f32.mrb[72].mxu0  ;;  %v12217_v62 = vpop.f32.mrb[72].mxu1  ;;  %v18352_v17 = vadd.f32 %v7331_v25, %v7330_v24  ;;  %v13729_v25 = vld [vmem:[%s19489_s4 + $0x1cc] ss:$16 sps:$4 sm:$0xff]   ;;  %v13730_v24 = vld [vmem:[%s19489_s4 + $0x1e0] ss:$16 sps:$4 sm:$0xff]  }
0x1131   :  { %v12196_v29 = vpop.f32.mrb[73].mxu0  ;;  %v12218_v50 = vpop.f32.mrb[73].mxu1  ;;  %8195 = vmatpush1.bf16.msra.mxu1 %v13730_v24  ;;  %v13793_v24 = vld [vmem:[%s19491_s6 + $0x128] ss:$16 sps:$4 sm:$0xff]  }
0x1132   :  { %19860 = vst [vmem:[#allocation26_spill] sm:$0xff] %v18352_v17  ;;  %v12197_v55 = vadd.f32 %v12196_v29, %v12195_v56  ;;  %v12219_v32 = vadd.f32 %v12218_v50, %v12217_v62  ;;  %v12198_v63 = vpop.f32.mrb[74].mxu0  ;;  %v12220_v52 = vpop.f32.mrb[74].mxu1  ;;  %14302 = vtanh.f32 %v18352_v17  ;;  %v13733_v56 = vld [vmem:[%s19489_s4 + $0x1e8] ss:$16 sps:$4 sm:$0xff]  }
0x1133   :  { %v12199_v13 = vpop.f32.mrb[75].mxu0  ;;  %v12221_v59 = vpop.f32.mrb[75].mxu1  ;;  %v13738_v62 = vld [vmem:[%s19491_s6 + $0x4] ss:$16 sps:$4 sm:$0xff]   ;;  %v13741_v29 = vld [vmem:[%s19491_s6 + $0xc] ss:$16 sps:$4 sm:$0xff]  }
0x1134   :  { %v7691_v28 = vadd.f32 %v14386_v27, %v12197_v55  ;;  %8655 = vmatprep.subr.bf16.mxu1 %v13738_v62  ;;  %v19861_v52 = vld [vmem:[#allocation28_spill] sm:$0xff]  ;;  %v13801_v62 = vld [vmem:[%s19491_s6 + $0x14c] ss:$16 sps:$4 sm:$0xff]  }
0x1135   :  { %v19178_v17 = vld [vmem:[%s19491_s6 + $0x580] ss:$16 sps:$4 sm:$0xff]  }
0x1136   :  { %v18358_v4 = vadd.f32 %v12219_v32, %v7691_v28  ;;  %v13736_v28 = vld [vmem:[%s19491_s6] ss:$16 sps:$4 sm:$0xff]   ;;  %19881 = vst [vmem:[#allocation15_spill] sm:$0xff] %v19178_v17 }
0x113c   :  { %v14303_v18 = vpop.eup %14302 }
0x113d   :  { %v7334_v9 = vmul.f32 %v14303_v18, %v14301_v44  ;;  %v13744_v44 = vld [vmem:[%s19491_s6 + $0x24] ss:$16 sps:$4 sm:$0xff]   ;;  %v13747_v18 = vld [vmem:[%s19491_s6 + $0x2c] ss:$16 sps:$4 sm:$0xff]  }
0x113f   :  { %v18363_v58 = vpack.c.bf16 %v7334_v9, %v7334_v9  ;;  %v13742_v9 = vld [vmem:[%s19491_s6 + $0x20] ss:$16 sps:$4 sm:$0xff]  }
0x1141   :  { %12342 = vmatmul.mubr.bf16.vlgmr.msra.gmra.mrb[76].mxu0 %v18363_v58 }
0x1142   :  { %8237 = vmatprep.mubr.bf16.mxu0 %v19858_v3  ;;  %8206 = vmatpush1.bf16.msra.mxu0 %v13643_v36  ;;  %v13663_v3 = vld [vmem:[%s19489_s4 + $0x6c] ss:$16 sps:$4 sm:$0xff]   ;;  %v13745_v36 = vld [vmem:[%s19491_s6 + $0x28] ss:$16 sps:$4 sm:$0xff]  }
0x1143   :  { %8207 = vmatprep.subr.bf16.mxu0 %v13651_v47  ;;  %v13750_v47 = vld [vmem:[%s19491_s6 + $0x44] ss:$16 sps:$4 sm:$0xff]  }
0x1146   :  { %8208 = vmatpush1.bf16.msra.mxu0 %v13649_v26  ;;  %v13748_v26 = vld [vmem:[%s19491_s6 + $0x40] ss:$16 sps:$4 sm:$0xff]  }
0x1147   :  { %8209 = vmatprep.subr.bf16.mxu0 %v13657_v57  ;;  %v13751_v57 = vld [vmem:[%s19491_s6 + $0x48] ss:$16 sps:$4 sm:$0xff]  }
0x114a   :  { %8210 = vmatpush1.bf16.msra.mxu0 %v13655_v14  ;;  %v13756_v14 = vld [vmem:[%s19491_s6 + $0x64] ss:$16 sps:$4 sm:$0xff]  }
0x114b   :  { %8211 = vmatprep.subr.bf16.mxu0 %v13663_v3  ;;  %v13759_v3 = vld [vmem:[%s19491_s6 + $0x6c] ss:$16 sps:$4 sm:$0xff]  }
0x114e   :  { %8212 = vmatpush1.bf16.msra.mxu0 %v13661_v0  ;;  %v13754_v0 = vld [vmem:[%s19491_s6 + $0x60] ss:$16 sps:$4 sm:$0xff]  }
0x114f   :  { %8213 = vmatprep.subr.bf16.mxu0 %v13669_v7  ;;  %v13757_v7 = vld [vmem:[%s19491_s6 + $0x68] ss:$16 sps:$4 sm:$0xff]  }
0x1152   :  { %8214 = vmatpush1.bf16.msra.mxu0 %v13667_v10  ;;  %v13762_v10 = vld [vmem:[%s19491_s6 + $0x84] ss:$16 sps:$4 sm:$0xff]  }
0x1153   :  { %8215 = vmatprep.subr.bf16.mxu0 %v13675_v46  ;;  %v13765_v46 = vld [vmem:[%s19491_s6 + $0x8c] ss:$16 sps:$4 sm:$0xff]  }
0x1156   :  { %8216 = vmatpush1.bf16.msra.mxu0 %v13673_v16  ;;  %v13760_v16 = vld [vmem:[%s19491_s6 + $0x80] ss:$16 sps:$4 sm:$0xff]  }
0x1157   :  { %8217 = vmatprep.subr.bf16.mxu0 %v13681_v31  ;;  %v13763_v31 = vld [vmem:[%s19491_s6 + $0x88] ss:$16 sps:$4 sm:$0xff]  }
0x115a   :  { %8218 = vmatpush1.bf16.msra.mxu0 %v13679_v22  ;;  %v13768_v22 = vld [vmem:[%s19491_s6 + $0xa4] ss:$16 sps:$4 sm:$0xff]  }
0x115b   :  { %8219 = vmatprep.subr.bf16.mxu0 %v13687_v49  ;;  %v13771_v49 = vld [vmem:[%s19491_s6 + $0xac] ss:$16 sps:$4 sm:$0xff]  }
0x115e   :  { %8220 = vmatpush1.bf16.msra.mxu0 %v13685_v42  ;;  %v13766_v42 = vld [vmem:[%s19491_s6 + $0xa0] ss:$16 sps:$4 sm:$0xff]  }
0x115f   :  { %8221 = vmatprep.subr.bf16.mxu0 %v13693_v45  ;;  %v13769_v45 = vld [vmem:[%s19491_s6 + $0xa8] ss:$16 sps:$4 sm:$0xff]  }
0x1162   :  { %8222 = vmatpush1.bf16.msra.mxu0 %v13691_v5  ;;  %v13774_v5 = vld [vmem:[%s19491_s6 + $0xc4] ss:$16 sps:$4 sm:$0xff]  }
0x1163   :  { %8223 = vmatprep.subr.bf16.mxu0 %v13699_v6  ;;  %v13777_v6 = vld [vmem:[%s19491_s6 + $0xcc] ss:$16 sps:$4 sm:$0xff]  }
0x1166   :  { %8224 = vmatpush1.bf16.msra.mxu0 %v13697_v23  ;;  %v13772_v23 = vld [vmem:[%s19491_s6 + $0xc0] ss:$16 sps:$4 sm:$0xff]  }
0x1167   :  { %8225 = vmatprep.subr.bf16.mxu0 %v13705_v54  ;;  %v13775_v54 = vld [vmem:[%s19491_s6 + $0xc8] ss:$16 sps:$4 sm:$0xff]  }
0x116a   :  { %8226 = vmatpush1.bf16.msra.mxu0 %v13703_v12  ;;  %v13780_v12 = vld [vmem:[%s19491_s6 + $0xe4] ss:$16 sps:$4 sm:$0xff]  }
0x116b   :  { %8227 = vmatprep.subr.bf16.mxu0 %v13711_v51  ;;  %v13783_v51 = vld [vmem:[%s19491_s6 + $0xec] ss:$16 sps:$4 sm:$0xff]  }
0x116e   :  { %8228 = vmatpush1.bf16.msra.mxu0 %v13709_v53  ;;  %v13778_v53 = vld [vmem:[%s19491_s6 + $0xe0] ss:$16 sps:$4 sm:$0xff]  }
0x116f   :  { %8229 = vmatprep.subr.bf16.mxu0 %v13717_v15  ;;  %v13781_v15 = vld [vmem:[%s19491_s6 + $0xe8] ss:$16 sps:$4 sm:$0xff]  }
0x1172   :  { %8230 = vmatpush1.bf16.msra.mxu0 %v13715_v40  ;;  %v13786_v40 = vld [vmem:[%s19491_s6 + $0x104] ss:$16 sps:$4 sm:$0xff]  }
0x1173   :  { %8231 = vmatprep.subr.bf16.mxu0 %v13723_v2  ;;  %v13789_v2 = vld [vmem:[%s19491_s6 + $0x10c] ss:$16 sps:$4 sm:$0xff]  }
0x1176   :  { %8232 = vmatpush1.bf16.msra.mxu0 %v13721_v1  ;;  %v13784_v1 = vld [vmem:[%s19491_s6 + $0x100] ss:$16 sps:$4 sm:$0xff]  }
0x1177   :  { %8233 = vmatprep.subr.bf16.mxu0 %v13729_v25  ;;  %v13787_v25 = vld [vmem:[%s19491_s6 + $0x108] ss:$16 sps:$4 sm:$0xff]  }
0x117a   :  { %8234 = vmatpush1.bf16.msra.mxu0 %v13727_v34  ;;  %v13792_v34 = vld [vmem:[%s19491_s6 + $0x124] ss:$16 sps:$4 sm:$0xff]  }
0x117b   :  { %8235 = vmatprep.subr.bf16.mxu0 %v13735_v48  ;;  %v13790_v48 = vld [vmem:[%s19491_s6 + $0x120] ss:$16 sps:$4 sm:$0xff]  }
0x117e   :  { %8236 = vmatpush1.bf16.msra.mxu0 %v13733_v56  ;;  %v13798_v56 = vld [vmem:[%s19491_s6 + $0x144] ss:$16 sps:$4 sm:$0xff]  }
0x117f   :  { %8696 = vmatprep.subr.bf16.mxu0 %v13741_v29  ;;  %v13796_v29 = vld [vmem:[%s19491_s6 + $0x140] ss:$16 sps:$4 sm:$0xff]  }
0x1214   :  { %v7770_v50 = vpop.f32.mrb[76].mxu0 }
0x1215   :  { %v7771_v55 = vadd.f32 %v7770_v50, %v18358_v4  ;;  %v12343_v32 = vpop.f32.mrb[77].mxu0  ;;  %v13739_v4 = vld [vmem:[%s19491_s6 + $0x8] ss:$16 sps:$4 sm:$0xff]  }
0x1216   :  { %v7773_v63 = vpop.f32.mrb[78].mxu0  ;;  %v13799_v50 = vld [vmem:[%s19491_s6 + $0x148] ss:$16 sps:$4 sm:$0xff]   ;;  %v13807_v32 = vld [vmem:[%s19491_s6 + $0x16c] ss:$16 sps:$4 sm:$0xff]  }
0x1217   :  { %v18471_v13 = vadd.f32 %v7771_v55, %v19861_v52  ;;  %v12344_v59 = vpop.f32.mrb[79].mxu0  ;;  %v13804_v55 = vld [vmem:[%s19491_s6 + $0x164] ss:$16 sps:$4 sm:$0xff]   ;;  %v13802_v63 = vld [vmem:[%s19491_s6 + $0x160] ss:$16 sps:$4 sm:$0xff]  }
0x1218   :  { %v13805_v52 = vld [vmem:[%s19491_s6 + $0x168] ss:$16 sps:$4 sm:$0xff]   ;;  %v13810_v59 = vld [vmem:[%s19491_s6 + $0x184] ss:$16 sps:$4 sm:$0xff]  }
0x1219   :  { %19862 = vst [vmem:[#allocation33_spill] sm:$0xff] %v18471_v13  ;;  %11632 = vst [vmem:[%s19499_s10 + $0x4] sm:$0x3] %v18471_v13  ;;  %v7779_v27 = vpack.c.bf16 %v18471_v13, %v18471_v13  ;;  %v19173_v13 = vld [vmem:[%s19491_s6 + $0x58c] ss:$16 sps:$4 sm:$0xff]  }
0x121a   :  { %19880 = vst [vmem:[#allocation9_spill] sm:$0xff] %v19173_v13 }
0x121b   :  { %8197 = vmatmul.mubr.bf16.vlgmr.msra.gmra.mrb[76].mxu1 %v7779_v27  ;;  %8238 = vmatmul.mubr.bf16.vlgmr.msra.gmra.mrb[80].mxu0 %v7779_v27  ;;  %v13813_v27 = vld [vmem:[%s19491_s6 + $0x18c] ss:$16 sps:$4 sm:$0xff]  }
0x121c   :  { %8687 = vmatprep.mubr.bf16.mxu1 %v19857_v35  ;;  %8728 = vmatprep.mubr.bf16.mxu0 %v19857_v35  ;;  %v13753_v35 = vld [vmem:[%s19491_s6 + $0x4c] ss:$16 sps:$4 sm:$0xff]  }
0x121d   :  { %8656 = vmatpush1.bf16.msra.mxu1 %v13736_v28  ;;  %8697 = vmatpush1.bf16.msra.mxu0 %v13739_v4  ;;  %v13808_v28 = vld [vmem:[%s19491_s6 + $0x180] ss:$16 sps:$4 sm:$0xff]   ;;  %v13811_v4 = vld [vmem:[%s19491_s6 + $0x188] ss:$16 sps:$4 sm:$0xff]  }
0x121e   :  { %8657 = vmatprep.subr.bf16.mxu1 %v13744_v44  ;;  %8698 = vmatprep.subr.bf16.mxu0 %v13747_v18  ;;  %v13814_v44 = vld [vmem:[%s19491_s6 + $0x1a0] ss:$16 sps:$4 sm:$0xff]   ;;  %v13816_v18 = vld [vmem:[%s19491_s6 + $0x1a4] ss:$16 sps:$4 sm:$0xff]  }
0x1221   :  { %8658 = vmatpush1.bf16.msra.mxu1 %v13742_v9  ;;  %8699 = vmatpush1.bf16.msra.mxu0 %v13745_v36  ;;  %v13817_v9 = vld [vmem:[%s19491_s6 + $0x1a8] ss:$16 sps:$4 sm:$0xff]   ;;  %v13819_v36 = vld [vmem:[%s19491_s6 + $0x1ac] ss:$16 sps:$4 sm:$0xff]  }
0x1222   :  { %8659 = vmatprep.subr.bf16.mxu1 %v13750_v47  ;;  %8700 = vmatprep.subr.bf16.mxu0 %v13753_v35  ;;  %v13822_v47 = vld [vmem:[%s19491_s6 + $0x1c4] ss:$16 sps:$4 sm:$0xff]   ;;  %v13825_v35 = vld [vmem:[%s19491_s6 + $0x1cc] ss:$16 sps:$4 sm:$0xff]  }
0x1225   :  { %8660 = vmatpush1.bf16.msra.mxu1 %v13748_v26  ;;  %8701 = vmatpush1.bf16.msra.mxu0 %v13751_v57  ;;  %v13820_v26 = vld [vmem:[%s19491_s6 + $0x1c0] ss:$16 sps:$4 sm:$0xff]   ;;  %v13823_v57 = vld [vmem:[%s19491_s6 + $0x1c8] ss:$16 sps:$4 sm:$0xff]  }
0x1226   :  { %8661 = vmatprep.subr.bf16.mxu1 %v13756_v14  ;;  %8702 = vmatprep.subr.bf16.mxu0 %v13759_v3  ;;  %v13828_v14 = vld [vmem:[%s19491_s6 + $0x1e4] ss:$16 sps:$4 sm:$0xff]   ;;  %v13831_v3 = vld [vmem:[%s19491_s6 + $0x1ec] ss:$16 sps:$4 sm:$0xff]  }
0x1229   :  { %8662 = vmatpush1.bf16.msra.mxu1 %v13754_v0  ;;  %8703 = vmatpush1.bf16.msra.mxu0 %v13757_v7  ;;  %v13826_v0 = vld [vmem:[%s19491_s6 + $0x1e0] ss:$16 sps:$4 sm:$0xff]   ;;  %v13829_v7 = vld [vmem:[%s19491_s6 + $0x1e8] ss:$16 sps:$4 sm:$0xff]  }
0x122a   :  { %8663 = vmatprep.subr.bf16.mxu1 %v13762_v10  ;;  %8704 = vmatprep.subr.bf16.mxu0 %v13765_v46  ;;  %v13834_v10 = vld [vmem:[%s19491_s6 + $0x204] ss:$16 sps:$4 sm:$0xff]   ;;  %v13837_v46 = vld [vmem:[%s19491_s6 + $0x20c] ss:$16 sps:$4 sm:$0xff]  }
0x122d   :  { %8664 = vmatpush1.bf16.msra.mxu1 %v13760_v16  ;;  %8705 = vmatpush1.bf16.msra.mxu0 %v13763_v31 }
0x122e   :  { %8665 = vmatprep.subr.bf16.mxu1 %v13768_v22  ;;  %8706 = vmatprep.subr.bf16.mxu0 %v13771_v49  ;;  %v19863_v22 = vld [vmem:[#allocation4_spill] sm:$0xff] }
0x1231   :  { %8666 = vmatpush1.bf16.msra.mxu1 %v13766_v42  ;;  %8707 = vmatpush1.bf16.msra.mxu0 %v13769_v45 }
0x1232   :  { %8667 = vmatprep.subr.bf16.mxu1 %v13774_v5  ;;  %8708 = vmatprep.subr.bf16.mxu0 %v13777_v6  ;;  %v19864_v5 = vld [vmem:[#allocation5_spill] sm:$0xff] }
0x1235   :  { %8668 = vmatpush1.bf16.msra.mxu1 %v13772_v23  ;;  %8709 = vmatpush1.bf16.msra.mxu0 %v13775_v54 }
0x1236   :  { %8669 = vmatprep.subr.bf16.mxu1 %v13780_v12  ;;  %8710 = vmatprep.subr.bf16.mxu0 %v13783_v51 }
0x1239   :  { %8670 = vmatpush1.bf16.msra.mxu1 %v13778_v53  ;;  %8711 = vmatpush1.bf16.msra.mxu0 %v13781_v15 }
0x123a   :  { %8671 = vmatprep.subr.bf16.mxu1 %v13786_v40  ;;  %8712 = vmatprep.subr.bf16.mxu0 %v13789_v2  ;;  %v19865_v40 = vld [vmem:[#allocation6_spill] sm:$0xff] }
0x123d   :  { %8672 = vmatpush1.bf16.msra.mxu1 %v13784_v1  ;;  %8713 = vmatpush1.bf16.msra.mxu0 %v13787_v25  ;;  %v19866_v1 = vld [vmem:[#allocation8_spill] sm:$0xff] }
0x123e   :  { %8673 = vmatprep.subr.bf16.mxu1 %v13792_v34  ;;  %8714 = vmatprep.subr.bf16.mxu0 %v13795_v41 }
0x1241   :  { %8674 = vmatpush1.bf16.msra.mxu1 %v13790_v48  ;;  %8715 = vmatpush1.bf16.msra.mxu0 %v13793_v24 }
0x1242   :  { %8675 = vmatprep.subr.bf16.mxu1 %v13798_v56  ;;  %8716 = vmatprep.subr.bf16.mxu0 %v13801_v62 }
0x1245   :  { %8676 = vmatpush1.bf16.msra.mxu1 %v13796_v29  ;;  %8717 = vmatpush1.bf16.msra.mxu0 %v13799_v50 }
0x1246   :  { %8677 = vmatprep.subr.bf16.mxu1 %v13804_v55  ;;  %8718 = vmatprep.subr.bf16.mxu0 %v13807_v32 }
0x1249   :  { %8678 = vmatpush1.bf16.msra.mxu1 %v13802_v63  ;;  %8719 = vmatpush1.bf16.msra.mxu0 %v13805_v52  ;;  %v19867_v52 = vld [vmem:[#allocation29_spill] sm:$0xff] }
0x124a   :  { %8679 = vmatprep.subr.bf16.mxu1 %v13810_v59  ;;  %8720 = vmatprep.subr.bf16.mxu0 %v13813_v27 }
0x124d   :  { %8680 = vmatpush1.bf16.msra.mxu1 %v13808_v28  ;;  %8721 = vmatpush1.bf16.msra.mxu0 %v13811_v4 }
0x124e   :  { %8681 = vmatprep.subr.bf16.mxu1 %v13816_v18  ;;  %8722 = vmatprep.subr.bf16.mxu0 %v13819_v36  ;;  %v13835_v36 = vld [vmem:[%s19491_s6 + $0x208] ss:$16 sps:$4 sm:$0xff]  }
0x1251   :  { %8682 = vmatpush1.bf16.msra.mxu1 %v13814_v44  ;;  %8723 = vmatpush1.bf16.msra.mxu0 %v13817_v9  ;;  %v13832_v9 = vld [vmem:[%s19491_s6 + $0x200] ss:$16 sps:$4 sm:$0xff]  }
0x1252   :  { %8683 = vmatprep.subr.bf16.mxu1 %v13822_v47  ;;  %8724 = vmatprep.subr.bf16.mxu0 %v13825_v35  ;;  %v13840_v47 = vld [vmem:[%s19491_s6 + $0x224] ss:$16 sps:$4 sm:$0xff]   ;;  %v13843_v35 = vld [vmem:[%s19491_s6 + $0x22c] ss:$16 sps:$4 sm:$0xff]  }
0x1255   :  { %8684 = vmatpush1.bf16.msra.mxu1 %v13820_v26  ;;  %8725 = vmatpush1.bf16.msra.mxu0 %v13823_v57  ;;  %v13838_v26 = vld [vmem:[%s19491_s6 + $0x220] ss:$16 sps:$4 sm:$0xff]   ;;  %v13841_v57 = vld [vmem:[%s19491_s6 + $0x228] ss:$16 sps:$4 sm:$0xff]  }
0x1256   :  { %8685 = vmatprep.subr.bf16.mxu1 %v13828_v14  ;;  %8726 = vmatprep.subr.bf16.mxu0 %v13831_v3  ;;  %v13846_v14 = vld [vmem:[%s19491_s6 + $0x244] ss:$16 sps:$4 sm:$0xff]   ;;  %v13844_v3 = vld [vmem:[%s19491_s6 + $0x240] ss:$16 sps:$4 sm:$0xff]  }
0x1259   :  { %8686 = vmatpush1.bf16.msra.mxu1 %v13826_v0  ;;  %8727 = vmatpush1.bf16.msra.mxu0 %v13829_v7  ;;  %v13847_v0 = vld [vmem:[%s19491_s6 + $0x248] ss:$16 sps:$4 sm:$0xff]   ;;  %v13852_v7 = vld [vmem:[%s19491_s6 + $0x264] ss:$16 sps:$4 sm:$0xff]  }
0x125a   :  { %9152 = vmatprep.subr.bf16.mxu1 %v13834_v10  ;;  %9193 = vmatprep.subr.bf16.mxu0 %v13837_v46  ;;  %v13855_v10 = vld [vmem:[%s19491_s6 + $0x26c] ss:$16 sps:$4 sm:$0xff]   ;;  %v13850_v46 = vld [vmem:[%s19491_s6 + $0x260] ss:$16 sps:$4 sm:$0xff]  }
0x12ee   :  { %v8198_v16 = vpop.f32.mrb[76].mxu1  ;;  %v8239_v31 = vpop.f32.mrb[80].mxu0 }
0x12ef   :  { %v8199_v49 = vadd.f32 %v8198_v16, %v19863_v22  ;;  %v8200_v42 = vpop.f32.mrb[77].mxu1  ;;  %v8241_v45 = vpop.f32.mrb[81].mxu0  ;;  %v8240_v2 = vadd.f32 %v8239_v31, %v19865_v40  ;;  %v13853_v16 = vld [vmem:[%s19491_s6 + $0x268] ss:$16 sps:$4 sm:$0xff]   ;;  %v13858_v31 = vld [vmem:[%s19491_s6 + $0x284] ss:$16 sps:$4 sm:$0xff]  }
0x12f0   :  { %v8201_v6 = vadd.f32 %v8200_v42, %v19864_v5  ;;  %v8202_v23 = vpop.f32.mrb[78].mxu1  ;;  %v8243_v54 = vpop.f32.mrb[82].mxu0  ;;  %v8242_v25 = vadd.f32 %v8241_v45, %v19866_v1  ;;  %v13861_v22 = vld [vmem:[%s19491_s6 + $0x28c] ss:$16 sps:$4 sm:$0xff]   ;;  %v13859_v42 = vld [vmem:[%s19491_s6 + $0x288] ss:$16 sps:$4 sm:$0xff]  }
0x12f1   :  { %v11697_v12 = vmul.f32 -1.442695, %v8199_v49  ;;  %v8203_v51 = vpop.f32.mrb[79].mxu1  ;;  %v8244_v53 = vpop.f32.mrb[83].mxu0  ;;  %v11699_v34 = vmul.f32 -1.442695, %v8240_v2 }
0x12f2   :  { %v11698_v15 = vmul.f32 -1.442695, %v8201_v6  ;;  %v13856_v49 = vld [vmem:[%s19491_s6 + $0x280] ss:$16 sps:$4 sm:$0xff]   ;;  %v13864_v45 = vld [vmem:[%s19491_s6 + $0x2a4] ss:$16 sps:$4 sm:$0xff]  }
0x12f3   :  { %14304 = vpow2.f32 %v11697_v12  ;;  %v13867_v5 = vld [vmem:[%s19491_s6 + $0x2ac] ss:$16 sps:$4 sm:$0xff]   ;;  %v13862_v6 = vld [vmem:[%s19491_s6 + $0x2a0] ss:$16 sps:$4 sm:$0xff]   ;;  %v13865_v23 = vld [vmem:[%s19491_s6 + $0x2a8] ss:$16 sps:$4 sm:$0xff]  }
0x12f4   :  { %14306 = vpow2.f32 %v11698_v15  ;;  %v13870_v54 = vld [vmem:[%s19491_s6 + $0x2c4] ss:$16 sps:$4 sm:$0xff]   ;;  %v13873_v12 = vld [vmem:[%s19491_s6 + $0x2cc] ss:$16 sps:$4 sm:$0xff]   ;;  %v13868_v51 = vld [vmem:[%s19491_s6 + $0x2c0] ss:$16 sps:$4 sm:$0xff]  }
0x12f5   :  { %14308 = vtanh.f32 %v8242_v25  ;;  %v13871_v53 = vld [vmem:[%s19491_s6 + $0x2c8] ss:$16 sps:$4 sm:$0xff]   ;;  %v13876_v15 = vld [vmem:[%s19491_s6 + $0x2e4] ss:$16 sps:$4 sm:$0xff]   ;;  %v13879_v40 = vld [vmem:[%s19491_s6 + $0x2ec] ss:$16 sps:$4 sm:$0xff]  }
0x12f6   :  { %14310 = vpow2.f32 %v11699_v34  ;;  %v13874_v2 = vld [vmem:[%s19491_s6 + $0x2e0] ss:$16 sps:$4 sm:$0xff]   ;;  %v13877_v1 = vld [vmem:[%s19491_s6 + $0x2e8] ss:$16 sps:$4 sm:$0xff]   ;;  %v13882_v25 = vld [vmem:[%s19491_s6 + $0x304] ss:$16 sps:$4 sm:$0xff]  }
0x12f7   :  { %v13885_v34 = vld [vmem:[%s19491_s6 + $0x30c] ss:$16 sps:$4 sm:$0xff]  }
0x12fd   :  { %v14305_v41 = vpop.eup %14304 }
0x12fe   :  { %v8255_v48 = vadd.f32 1.0, %v14305_v41  ;;  %v14307_v24 = vpop.eup %14306  ;;  %v13880_v41 = vld [vmem:[%s19491_s6 + $0x300] ss:$16 sps:$4 sm:$0xff]  }
0x12ff   :  { %v8256_v56 = vadd.f32 1.0, %v14307_v24  ;;  %v14309_v62 = vpop.eup %14308  ;;  %v13888_v24 = vld [vmem:[%s19491_s6 + $0x324] ss:$16 sps:$4 sm:$0xff]  }
0x1300   :  { %14312 = vrcp.f32 %v8255_v48  ;;  %v14311_v29 = vpop.eup %14310  ;;  %v13883_v48 = vld [vmem:[%s19491_s6 + $0x308] ss:$16 sps:$4 sm:$0xff]  }
0x1301   :  { %14314 = vrcp.f32 %v8256_v56  ;;  %v8257_v63 = vadd.f32 1.0, %v14311_v29  ;;  %v13891_v56 = vld [vmem:[%s19491_s6 + $0x32c] ss:$16 sps:$4 sm:$0xff]   ;;  %v13889_v29 = vld [vmem:[%s19491_s6 + $0x328] ss:$16 sps:$4 sm:$0xff]  }
0x1303   :  { %14316 = vrcp.f32 %v8257_v63  ;;  %v13895_v63 = vld [vmem:[%s19491_s6 + $0x348] ss:$16 sps:$4 sm:$0xff]  }
0x130a   :  { %v14313_v50 = vpop.eup %14312 }
0x130b   :  { %v8266_v55 = vmul.f32 %v14313_v50, %v14309_v62  ;;  %v14315_v32 = vpop.eup %14314  ;;  %v13886_v62 = vld [vmem:[%s19491_s6 + $0x320] ss:$16 sps:$4 sm:$0xff]   ;;  %v13894_v50 = vld [vmem:[%s19491_s6 + $0x344] ss:$16 sps:$4 sm:$0xff]  }
0x130c   :  { %v8265_v59 = vmul.f32 %v14315_v32, %v19867_v52  ;;  %v13892_v32 = vld [vmem:[%s19491_s6 + $0x340] ss:$16 sps:$4 sm:$0xff]   ;;  %v13900_v52 = vld [vmem:[%s19491_s6 + $0x364] ss:$16 sps:$4 sm:$0xff]  }
0x130d   :  { %v14317_v28 = vpop.eup %14316 }
0x130e   :  { %v8267_v27 = vadd.f32 %v8266_v55, %v8265_v59  ;;  %v13897_v55 = vld [vmem:[%s19491_s6 + $0x34c] ss:$16 sps:$4 sm:$0xff]  }
0x130f   :  { %v13903_v59 = vld [vmem:[%s19491_s6 + $0x36c] ss:$16 sps:$4 sm:$0xff]  }
0x1310   :  { %14318 = vtanh.f32 %v8267_v27  ;;  %v13898_v27 = vld [vmem:[%s19491_s6 + $0x360] ss:$16 sps:$4 sm:$0xff]  }
0x131a   :  { %v14319_v4 = vpop.eup %14318 }
0x131b   :  { %v8269_v44 = vmul.f32 %v14319_v4, %v14317_v28  ;;  %v13901_v28 = vld [vmem:[%s19491_s6 + $0x368] ss:$16 sps:$4 sm:$0xff]   ;;  %v13904_v4 = vld [vmem:[%s19491_s6 + $0x380] ss:$16 sps:$4 sm:$0xff]  }
0x131d   :  { %v8270_v18 = vpack.c.bf16 %v8269_v44, %v8269_v44  ;;  %v13906_v44 = vld [vmem:[%s19491_s6 + $0x384] ss:$16 sps:$4 sm:$0xff]  }
0x131f   :  { %8688 = vmatmul.mubr.bf16.vlgmr.msra.gmra.mrb[80].mxu1 %v8270_v18  ;;  %8729 = vmatmul.mubr.bf16.vlgmr.msra.gmra.mrb[84].mxu0 %v8270_v18  ;;  %v13907_v18 = vld [vmem:[%s19491_s6 + $0x388] ss:$16 sps:$4 sm:$0xff]  }
0x1320   :  { %9184 = vmatprep.mubr.bf16.mxu1 %v18036_v19  ;;  %9225 = vmatprep.mubr.bf16.mxu0 %v18036_v19  ;;  %v13849_v19 = vld [vmem:[%s19491_s6 + $0x24c] ss:$16 sps:$4 sm:$0xff]  }
0x1321   :  { %9153 = vmatpush1.bf16.msra.mxu1 %v13832_v9  ;;  %9194 = vmatpush1.bf16.msra.mxu0 %v13835_v36  ;;  %v13909_v9 = vld [vmem:[%s19491_s6 + $0x38c] ss:$16 sps:$4 sm:$0xff]   ;;  %v13912_v36 = vld [vmem:[%s19491_s6 + $0x3a4] ss:$16 sps:$4 sm:$0xff]  }
0x1322   :  { %9154 = vmatprep.subr.bf16.mxu1 %v13840_v47  ;;  %9195 = vmatprep.subr.bf16.mxu0 %v13843_v35  ;;  %v13915_v47 = vld [vmem:[%s19491_s6 + $0x3ac] ss:$16 sps:$4 sm:$0xff]   ;;  %v13910_v35 = vld [vmem:[%s19491_s6 + $0x3a0] ss:$16 sps:$4 sm:$0xff]  }
0x1325   :  { %9155 = vmatpush1.bf16.msra.mxu1 %v13838_v26  ;;  %9196 = vmatpush1.bf16.msra.mxu0 %v13841_v57  ;;  %v13913_v26 = vld [vmem:[%s19491_s6 + $0x3a8] ss:$16 sps:$4 sm:$0xff]   ;;  %v13918_v57 = vld [vmem:[%s19491_s6 + $0x3c4] ss:$16 sps:$4 sm:$0xff]  }
0x1326   :  { %9156 = vmatprep.subr.bf16.mxu1 %v13846_v14  ;;  %9197 = vmatprep.subr.bf16.mxu0 %v13849_v19  ;;  %v13921_v14 = vld [vmem:[%s19491_s6 + $0x3cc] ss:$16 sps:$4 sm:$0xff]   ;;  %v13916_v19 = vld [vmem:[%s19491_s6 + $0x3c0] ss:$16 sps:$4 sm:$0xff]  }
0x1329   :  { %9157 = vmatpush1.bf16.msra.mxu1 %v13844_v3  ;;  %9198 = vmatpush1.bf16.msra.mxu0 %v13847_v0  ;;  %v13919_v3 = vld [vmem:[%s19491_s6 + $0x3c8] ss:$16 sps:$4 sm:$0xff]   ;;  %v13924_v0 = vld [vmem:[%s19491_s6 + $0x3e4] ss:$16 sps:$4 sm:$0xff]  }
0x132a   :  { %9158 = vmatprep.subr.bf16.mxu1 %v13852_v7  ;;  %9199 = vmatprep.subr.bf16.mxu0 %v13855_v10  ;;  %v13927_v7 = vld [vmem:[%s19491_s6 + $0x3ec] ss:$16 sps:$4 sm:$0xff]   ;;  %v13922_v10 = vld [vmem:[%s19491_s6 + $0x3e0] ss:$16 sps:$4 sm:$0xff]  }
0x132d   :  { %9159 = vmatpush1.bf16.msra.mxu1 %v13850_v46  ;;  %9200 = vmatpush1.bf16.msra.mxu0 %v13853_v16  ;;  %v13925_v46 = vld [vmem:[%s19491_s6 + $0x3e8] ss:$16 sps:$4 sm:$0xff]   ;;  %v18869_v16 = vld [vmem:[%s19491_s6 + $0x404] ss:$16 sps:$4 sm:$0xff]  }
0x132e   :  { %9160 = vmatprep.subr.bf16.mxu1 %v13858_v31  ;;  %9201 = vmatprep.subr.bf16.mxu0 %v13861_v22  ;;  %v18874_v31 = vld [vmem:[%s19491_s6 + $0x40c] ss:$16 sps:$4 sm:$0xff]  }
0x1331   :  { %9161 = vmatpush1.bf16.msra.mxu1 %v13856_v49  ;;  %9202 = vmatpush1.bf16.msra.mxu0 %v13859_v42  ;;  %v19868_v42 = vld [vmem:[#allocation11_spill] sm:$0xff] }
0x1332   :  { %9162 = vmatprep.subr.bf16.mxu1 %v13864_v45  ;;  %9203 = vmatprep.subr.bf16.mxu0 %v13867_v5 }
0x1335   :  { %9163 = vmatpush1.bf16.msra.mxu1 %v13862_v6  ;;  %9204 = vmatpush1.bf16.msra.mxu0 %v13865_v23  ;;  %v19869_v23 = vld [vmem:[#allocation12_spill] sm:$0xff] }
0x1336   :  { %9164 = vmatprep.subr.bf16.mxu1 %v13870_v54  ;;  %9205 = vmatprep.subr.bf16.mxu0 %v13873_v12 }
0x1339   :  { %9165 = vmatpush1.bf16.msra.mxu1 %v13868_v51  ;;  %9206 = vmatpush1.bf16.msra.mxu0 %v13871_v53 }
0x133a   :  { %9166 = vmatprep.subr.bf16.mxu1 %v13876_v15  ;;  %9207 = vmatprep.subr.bf16.mxu0 %v13879_v40 }
0x133d   :  { %9167 = vmatpush1.bf16.msra.mxu1 %v13874_v2  ;;  %9208 = vmatpush1.bf16.msra.mxu0 %v13877_v1  ;;  %v19870_v1 = vld [vmem:[#allocation13_spill] sm:$0xff] }
0x133e   :  { %9168 = vmatprep.subr.bf16.mxu1 %v13882_v25  ;;  %9209 = vmatprep.subr.bf16.mxu0 %v13885_v34  ;;  %v19871_v34 = vld [vmem:[#allocation14_spill] sm:$0xff] }
0x1341   :  { %9169 = vmatpush1.bf16.msra.mxu1 %v13880_v41  ;;  %9210 = vmatpush1.bf16.msra.mxu0 %v13883_v48 }
0x1342   :  { %9170 = vmatprep.subr.bf16.mxu1 %v13888_v24  ;;  %9211 = vmatprep.subr.bf16.mxu0 %v13891_v56 }
0x1345   :  { %9171 = vmatpush1.bf16.msra.mxu1 %v13886_v62  ;;  %9212 = vmatpush1.bf16.msra.mxu0 %v13889_v29 }
0x1346   :  { %9172 = vmatprep.subr.bf16.mxu1 %v13894_v50  ;;  %9213 = vmatprep.subr.bf16.mxu0 %v13897_v55 }
0x1349   :  { %9173 = vmatpush1.bf16.msra.mxu1 %v13892_v32  ;;  %9214 = vmatpush1.bf16.msra.mxu0 %v13895_v63 }
0x134a   :  { %9174 = vmatprep.subr.bf16.mxu1 %v13900_v52  ;;  %9215 = vmatprep.subr.bf16.mxu0 %v13903_v59 }
0x134d   :  { %9175 = vmatpush1.bf16.msra.mxu1 %v13898_v27  ;;  %9216 = vmatpush1.bf16.msra.mxu0 %v13901_v28  ;;  %v19872_v27 = vld [vmem:[#allocation31_spill] sm:$0xff] }
0x134e   :  { %9176 = vmatprep.subr.bf16.mxu1 %v13906_v44  ;;  %9217 = vmatprep.subr.bf16.mxu0 %v13909_v9 }
0x1351   :  { %9177 = vmatpush1.bf16.msra.mxu1 %v13904_v4  ;;  %9218 = vmatpush1.bf16.msra.mxu0 %v13907_v18 }
0x1352   :  { %9178 = vmatprep.subr.bf16.mxu1 %v13912_v36  ;;  %9219 = vmatprep.subr.bf16.mxu0 %v13915_v47  ;;  %v9324_v47 = vrot.slane %v18127_v11, 7  ;;  %v18902_v11 = vld [vmem:[%s19491_s6 + $0x424] ss:$16 sps:$4 sm:$0xff]  }
0x1355   :  { %9179 = vmatpush1.bf16.msra.mxu1 %v13910_v35  ;;  %9220 = vmatpush1.bf16.msra.mxu0 %v13913_v26  ;;  %v18890_v26 = vld [vmem:[%s19491_s6 + $0x400] ss:$16 sps:$4 sm:$0xff]  }
0x1356   :  { %9180 = vmatprep.subr.bf16.mxu1 %v13918_v57  ;;  %9221 = vmatprep.subr.bf16.mxu0 %v13921_v14  ;;  %v18895_v57 = vld [vmem:[%s19491_s6 + $0x408] ss:$16 sps:$4 sm:$0xff]  }
0x1359   :  { %9181 = vmatpush1.bf16.msra.mxu1 %v13916_v19  ;;  %9222 = vmatpush1.bf16.msra.mxu0 %v13919_v3  ;;  %v9327_v19 = vrot.slane %v9324_v47, 1  ;;  %v18907_v3 = vld [vmem:[%s19491_s6 + $0x42c] ss:$16 sps:$4 sm:$0xff]  }
0x135a   :  { %9182 = vmatprep.subr.bf16.mxu1 %v13924_v0  ;;  %9223 = vmatprep.subr.bf16.mxu0 %v13927_v7  ;;  %v18914_v0 = vld [vmem:[%s19491_s6 + $0x420] ss:$16 sps:$4 sm:$0xff]   ;;  %v18919_v7 = vld [vmem:[%s19491_s6 + $0x428] ss:$16 sps:$4 sm:$0xff]   ;;  %v19149_v47 = vld [vmem:[%s19491_s6 + $0x56c] ss:$16 sps:$4 sm:$0xff]  }
0x135b   :  { %19876 = vst [vmem:[#allocation3_spill] sm:$0xff] %v19149_v47 }
0x135d   :  { %9183 = vmatpush1.bf16.msra.mxu1 %v13922_v10  ;;  %9224 = vmatpush1.bf16.msra.mxu0 %v13925_v46  ;;  %v18926_v10 = vld [vmem:[%s19491_s6 + $0x444] ss:$16 sps:$4 sm:$0xff]   ;;  %v18931_v46 = vld [vmem:[%s19491_s6 + $0x44c] ss:$16 sps:$4 sm:$0xff]  }
0x135e   :  { %9650 = vmatprep.subr.bf16.mxu1 %v18869_v16  ;;  %9691 = vmatprep.subr.bf16.mxu0 %v18874_v31 }
0x13f2   :  { %v8689_v22 = vpop.f32.mrb[80].mxu1  ;;  %v8730_v49 = vpop.f32.mrb[84].mxu0 }
0x13f3   :  { %v8690_v45 = vadd.f32 %v8689_v22, %v19868_v42  ;;  %v8691_v5 = vpop.f32.mrb[81].mxu1  ;;  %v8732_v6 = vpop.f32.mrb[85].mxu0  ;;  %v8731_v25 = vadd.f32 %v8730_v49, %v19870_v1  ;;  %v18938_v22 = vld [vmem:[%s19491_s6 + $0x440] ss:$16 sps:$4 sm:$0xff]   ;;  %v18943_v49 = vld [vmem:[%s19491_s6 + $0x448] ss:$16 sps:$4 sm:$0xff]  }
0x13f4   :  { %v8692_v54 = vadd.f32 %v8691_v5, %v19869_v23  ;;  %v8693_v12 = vpop.f32.mrb[82].mxu1  ;;  %v8734_v51 = vpop.f32.mrb[86].mxu0  ;;  %v8733_v41 = vadd.f32 %v8732_v6, %v19871_v34  ;;  %v18950_v42 = vld [vmem:[%s19491_s6 + $0x464] ss:$16 sps:$4 sm:$0xff]   ;;  %v18962_v5 = vld [vmem:[%s19491_s6 + $0x460] ss:$16 sps:$4 sm:$0xff]  }
0x13f5   :  { %v11764_v53 = vmul.f32 -1.442695, %v8690_v45  ;;  %v8694_v15 = vpop.f32.mrb[83].mxu1  ;;  %v8735_v40 = vpop.f32.mrb[87].mxu0  ;;  %v11766_v48 = vmul.f32 -1.442695, %v8731_v25 }
0x13f6   :  { %v11765_v2 = vmul.f32 -1.442695, %v8692_v54  ;;  %v18955_v45 = vld [vmem:[%s19491_s6 + $0x46c] ss:$16 sps:$4 sm:$0xff]   ;;  %v18967_v6 = vld [vmem:[%s19491_s6 + $0x468] ss:$16 sps:$4 sm:$0xff]  }
0x13f7   :  { %14320 = vpow2.f32 %v11764_v53  ;;  %v18976_v23 = vld [vmem:[%s19491_s6 + $0x484] ss:$16 sps:$4 sm:$0xff]   ;;  %v18981_v54 = vld [vmem:[%s19491_s6 + $0x48c] ss:$16 sps:$4 sm:$0xff]   ;;  %v18986_v12 = vld [vmem:[%s19491_s6 + $0x480] ss:$16 sps:$4 sm:$0xff]  }
0x13f8   :  { %14322 = vpow2.f32 %v11765_v2  ;;  %v18991_v51 = vld [vmem:[%s19491_s6 + $0x488] ss:$16 sps:$4 sm:$0xff]   ;;  %v19000_v53 = vld [vmem:[%s19491_s6 + $0x4a4] ss:$16 sps:$4 sm:$0xff]   ;;  %v19005_v15 = vld [vmem:[%s19491_s6 + $0x4ac] ss:$16 sps:$4 sm:$0xff]  }
0x13f9   :  { %14324 = vtanh.f32 %v8733_v41  ;;  %v19010_v40 = vld [vmem:[%s19491_s6 + $0x4a0] ss:$16 sps:$4 sm:$0xff]   ;;  %v19015_v2 = vld [vmem:[%s19491_s6 + $0x4a8] ss:$16 sps:$4 sm:$0xff]   ;;  %v19024_v1 = vld [vmem:[%s19491_s6 + $0x4c4] ss:$16 sps:$4 sm:$0xff]  }
0x13fa   :  { %14326 = vpow2.f32 %v11766_v48  ;;  %v19029_v25 = vld [vmem:[%s19491_s6 + $0x4cc] ss:$16 sps:$4 sm:$0xff]   ;;  %v19034_v34 = vld [vmem:[%s19491_s6 + $0x4c0] ss:$16 sps:$4 sm:$0xff]   ;;  %v19039_v41 = vld [vmem:[%s19491_s6 + $0x4c8] ss:$16 sps:$4 sm:$0xff]  }
0x13fb   :  { %v19048_v48 = vld [vmem:[%s19491_s6 + $0x4e4] ss:$16 sps:$4 sm:$0xff]  }
0x1401   :  { %v14321_v24 = vpop.eup %14320 }
0x1402   :  { %v8746_v56 = vadd.f32 1.0, %v14321_v24  ;;  %v14323_v62 = vpop.eup %14322  ;;  %v19053_v24 = vld [vmem:[%s19491_s6 + $0x4ec] ss:$16 sps:$4 sm:$0xff]  }
0x1403   :  { %v8747_v29 = vadd.f32 1.0, %v14323_v62  ;;  %v14325_v50 = vpop.eup %14324  ;;  %v19063_v62 = vld [vmem:[%s19491_s6 + $0x4e8] ss:$16 sps:$4 sm:$0xff]  }
0x1404   :  { %14328 = vrcp.f32 %v8746_v56  ;;  %v14327_v55 = vpop.eup %14326  ;;  %v19058_v56 = vld [vmem:[%s19491_s6 + $0x4e0] ss:$16 sps:$4 sm:$0xff]  }
0x1405   :  { %14330 = vrcp.f32 %v8747_v29  ;;  %v8748_v59 = vadd.f32 1.0, %v14327_v55  ;;  %v19072_v29 = vld [vmem:[%s19491_s6 + $0x504] ss:$16 sps:$4 sm:$0xff]   ;;  %v19082_v55 = vld [vmem:[%s19491_s6 + $0x500] ss:$16 sps:$4 sm:$0xff]  }
0x1407   :  { %14332 = vrcp.f32 %v8748_v59  ;;  %v19106_v59 = vld [vmem:[%s19491_s6 + $0x520] ss:$16 sps:$4 sm:$0xff]  }
0x140e   :  { %v14329_v32 = vpop.eup %14328 }
0x140f   :  { %v8757_v63 = vmul.f32 %v14329_v32, %v14325_v50  ;;  %v14331_v52 = vpop.eup %14330  ;;  %v19077_v50 = vld [vmem:[%s19491_s6 + $0x50c] ss:$16 sps:$4 sm:$0xff]   ;;  %v19087_v32 = vld [vmem:[%s19491_s6 + $0x508] ss:$16 sps:$4 sm:$0xff]  }
0x1410   :  { %v8756_v28 = vmul.f32 %v14331_v52, %v19872_v27  ;;  %v19101_v52 = vld [vmem:[%s19491_s6 + $0x52c] ss:$16 sps:$4 sm:$0xff]   ;;  %v19111_v27 = vld [vmem:[%s19491_s6 + $0x528] ss:$16 sps:$4 sm:$0xff]  }
0x1411   :  { %v14333_v44 = vpop.eup %14332 }
0x1412   :  { %v8758_v4 = vadd.f32 %v8757_v63, %v8756_v28  ;;  %v19096_v63 = vld [vmem:[%s19491_s6 + $0x524] ss:$16 sps:$4 sm:$0xff]  }
0x1413   :  { %v19120_v28 = vld [vmem:[%s19491_s6 + $0x544] ss:$16 sps:$4 sm:$0xff]  }
0x1414   :  { %14334 = vtanh.f32 %v8758_v4  ;;  %v19125_v4 = vld [vmem:[%s19491_s6 + $0x54c] ss:$16 sps:$4 sm:$0xff]  }
0x141e   :  { %v14335_v18 = vpop.eup %14334 }
0x141f   :  { %v8760_v9 = vmul.f32 %v14335_v18, %v14333_v44  ;;  %v19130_v44 = vld [vmem:[%s19491_s6 + $0x540] ss:$16 sps:$4 sm:$0xff]   ;;  %v19135_v18 = vld [vmem:[%s19491_s6 + $0x548] ss:$16 sps:$4 sm:$0xff]  }
0x1420   :  { %19874 = vst [vmem:[#allocation35_spill] sm:$0xff] %v19135_v18 }
0x1421   :  { %v18883_v36 = vpack.c.bf16 %v8760_v9, %v8760_v9  ;;  %v19144_v9 = vld [vmem:[%s19491_s6 + $0x564] ss:$16 sps:$4 sm:$0xff]  }
0x1422   :  { %19875 = vst [vmem:[#allocation2_spill] sm:$0xff] %v19144_v9 }
0x1423   :  { %19873 = vst [vmem:[#allocation34_spill] sm:$0xff] %v18883_v36  ;;  %v8763_v35 = vrot.slane %v18883_v36, 7 }
0x1425   :  { %v8766_v14 = vsel %vm1179_vm2, %v18883_v36, %v8763_v35  ;;  %v19154_v35 = vld [vmem:[%s19491_s6 + $0x560] ss:$16 sps:$4 sm:$0xff]   ;;  %v19183_v36 = vld [vmem:[%s19491_s6 + $0x588] ss:$16 sps:$4 sm:$0xff]  }
0x1426   :  { %9185 = vmatmul.mubr.bf16.vlgmr.msra.gmra.mrb[84].mxu1 %v8766_v14  ;;  %9226 = vmatmul.mubr.bf16.vlgmr.msra.gmra.mrb[88].mxu0 %v8766_v14  ;;  %19877 = vst [vmem:[#allocation7_spill] sm:$0xff] %v19154_v35  ;;  %v19159_v14 = vld [vmem:[%s19491_s6 + $0x568] ss:$16 sps:$4 sm:$0xff]   ;;  %19882 = vst [vmem:[#allocation38_spill] sm:$0xff] %v19183_v36 }
0x1427   :  { %9682 = vmatprep.mubr.bf16.mxu1 %v9327_v19  ;;  %9723 = vmatprep.mubr.bf16.mxu0 %v9327_v19  ;;  %19878 = vst [vmem:[#allocation16_spill] sm:$0xff] %v19159_v14  ;;  %v19168_v19 = vld [vmem:[%s19491_s6 + $0x584] ss:$16 sps:$4 sm:$0xff]  }
0x1428   :  { %9651 = vmatpush1.bf16.msra.mxu1 %v18890_v26  ;;  %9692 = vmatpush1.bf16.msra.mxu0 %v18895_v57  ;;  %19879 = vst [vmem:[#allocation10_spill] sm:$0xff] %v19168_v19 }
0x1429   :  { %9652 = vmatprep.subr.bf16.mxu1 %v18902_v11  ;;  %9693 = vmatprep.subr.bf16.mxu0 %v18907_v3 }
0x142c   :  { %9653 = vmatpush1.bf16.msra.mxu1 %v18914_v0  ;;  %9694 = vmatpush1.bf16.msra.mxu0 %v18919_v7 }
0x142d   :  { %9654 = vmatprep.subr.bf16.mxu1 %v18926_v10  ;;  %9695 = vmatprep.subr.bf16.mxu0 %v18931_v46 }
0x1430   :  { %9655 = vmatpush1.bf16.msra.mxu1 %v18938_v22  ;;  %9696 = vmatpush1.bf16.msra.mxu0 %v18943_v49 }
0x1431   :  { %9656 = vmatprep.subr.bf16.mxu1 %v18950_v42  ;;  %9697 = vmatprep.subr.bf16.mxu0 %v18955_v45 }
0x1434   :  { %9657 = vmatpush1.bf16.msra.mxu1 %v18962_v5  ;;  %9698 = vmatpush1.bf16.msra.mxu0 %v18967_v6 }
0x1435   :  { %9658 = vmatprep.subr.bf16.mxu1 %v18976_v23  ;;  %9699 = vmatprep.subr.bf16.mxu0 %v18981_v54 }
0x1438   :  { %9659 = vmatpush1.bf16.msra.mxu1 %v18986_v12  ;;  %9700 = vmatpush1.bf16.msra.mxu0 %v18991_v51 }
0x1439   :  { %9660 = vmatprep.subr.bf16.mxu1 %v19000_v53  ;;  %9701 = vmatprep.subr.bf16.mxu0 %v19005_v15 }
0x143c   :  { %9661 = vmatpush1.bf16.msra.mxu1 %v19010_v40  ;;  %9702 = vmatpush1.bf16.msra.mxu0 %v19015_v2 }
0x143d   :  { %9662 = vmatprep.subr.bf16.mxu1 %v19024_v1  ;;  %9703 = vmatprep.subr.bf16.mxu0 %v19029_v25 }
0x1440   :  { %9663 = vmatpush1.bf16.msra.mxu1 %v19034_v34  ;;  %9704 = vmatpush1.bf16.msra.mxu0 %v19039_v41 }
0x1441   :  { %9664 = vmatprep.subr.bf16.mxu1 %v19048_v48  ;;  %9705 = vmatprep.subr.bf16.mxu0 %v19053_v24 }
0x1444   :  { %9665 = vmatpush1.bf16.msra.mxu1 %v19058_v56  ;;  %9706 = vmatpush1.bf16.msra.mxu0 %v19063_v62 }
0x1445   :  { %9666 = vmatprep.subr.bf16.mxu1 %v19072_v29  ;;  %9707 = vmatprep.subr.bf16.mxu0 %v19077_v50 }
0x1448   :  { %9667 = vmatpush1.bf16.msra.mxu1 %v19082_v55  ;;  %9708 = vmatpush1.bf16.msra.mxu0 %v19087_v32 }
0x1449   :  { %9668 = vmatprep.subr.bf16.mxu1 %v19096_v63  ;;  %9709 = vmatprep.subr.bf16.mxu0 %v19101_v52 }
0x144c   :  { %9669 = vmatpush1.bf16.msra.mxu1 %v19106_v59  ;;  %9710 = vmatpush1.bf16.msra.mxu0 %v19111_v27 }
0x144d   :  { %9670 = vmatprep.subr.bf16.mxu1 %v19120_v28  ;;  %9711 = vmatprep.subr.bf16.mxu0 %v19125_v4 }
0x1450   :  { %9671 = vmatpush1.bf16.msra.mxu1 %v19130_v44  ;;  %9712 = vmatpush1.bf16.msra.mxu0 %v19135_v18 }
0x1451   :  { %9672 = vmatprep.subr.bf16.mxu1 %v19144_v9  ;;  %9713 = vmatprep.subr.bf16.mxu0 %v19149_v47 }
0x1454   :  { %9673 = vmatpush1.bf16.msra.mxu1 %v19154_v35  ;;  %9714 = vmatpush1.bf16.msra.mxu0 %v19159_v14 }
0x1455   :  { %9674 = vmatprep.subr.bf16.mxu1 %v19168_v19  ;;  %9715 = vmatprep.subr.bf16.mxu0 %v19173_v13 }
0x1458   :  { %9675 = vmatpush1.bf16.msra.mxu1 %v19178_v17  ;;  %9716 = vmatpush1.bf16.msra.mxu0 %v19183_v36 }
0x1459   :  { %9676 = vmatprep.subr.bf16.mxu1 %v19190_v60  ;;  %9717 = vmatprep.subr.bf16.mxu0 %v19195_v37  ;;  %v19226_v60 = vld [vmem:[%s19491_s6 + $0x5c0] ss:$16 sps:$4 sm:$0xff]   ;;  %v19231_v37 = vld [vmem:[%s19491_s6 + $0x5c8] ss:$16 sps:$4 sm:$0xff]  }
0x145a   :  { %19889 = vst [vmem:[#allocation27_spill] sm:$0xff] %v19226_v60  ;;  %19890 = vst [vmem:[#allocation25_spill] sm:$0xff] %v19231_v37 }
0x145c   :  { %9677 = vmatpush1.bf16.msra.mxu1 %v19202_v33  ;;  %9718 = vmatpush1.bf16.msra.mxu0 %v19207_v43  ;;  %v19238_v33 = vld [vmem:[%s19491_s6 + $0x5e4] ss:$16 sps:$4 sm:$0xff]   ;;  %v19243_v43 = vld [vmem:[%s19491_s6 + $0x5ec] ss:$16 sps:$4 sm:$0xff]  }
0x145d   :  { %9678 = vmatprep.subr.bf16.mxu1 %v19214_v20  ;;  %9719 = vmatprep.subr.bf16.mxu0 %v19219_v8  ;;  %19891 = vst [vmem:[#allocation22_spill] sm:$0xff] %v19238_v33  ;;  %19892 = vst [vmem:[#allocation23_spill] sm:$0xff] %v19243_v43  ;;  %v19250_v20 = vld [vmem:[%s19491_s6 + $0x5e0] ss:$16 sps:$4 sm:$0xff]   ;;  %v19255_v8 = vld [vmem:[%s19491_s6 + $0x5e8] ss:$16 sps:$4 sm:$0xff]  }
0x145e   :  { %19893 = vst [vmem:[#allocation36_spill] sm:$0xff] %v19250_v20  ;;  %19894 = vst [vmem:[#allocation32_spill] sm:$0xff] %v19255_v8 }
0x1460   :  { %9679 = vmatpush1.bf16.msra.mxu1 %v19226_v60  ;;  %9720 = vmatpush1.bf16.msra.mxu0 %v19231_v37 }
0x1461   :  { %9680 = vmatprep.subr.bf16.mxu1 %v19238_v33  ;;  %9721 = vmatprep.subr.bf16.mxu0 %v19243_v43 }
0x1464   :  { %9681 = vmatpush1.bf16.msra.mxu1 %v19250_v20  ;;  %9722 = vmatpush1.bf16.msra.mxu0 %v19255_v8 }
0x1465   :  { %9757 = vmatprep.subr.bf16.mxu1 %v18869_v16  ;;  %9798 = vmatprep.subr.bf16.mxu0 %v18874_v31 }
0x14f9   :  { %v9186_v37 = vpop.f32.mrb[84].mxu1  ;;  %v9227_v60 = vpop.f32.mrb[88].mxu0 }
0x14fa   :  { %v9187_v36 = vadd.f32 %v9186_v37, %v19758_v21  ;;  %v9188_v17 = vpop.f32.mrb[85].mxu1  ;;  %v9229_v13 = vpop.f32.mrb[89].mxu0  ;;  %v9228_v16 = vadd.f32 %v9227_v60, %v15521_v38 }
0x14fb   :  { %v9189_v19 = vadd.f32 %v9188_v17, %v19759_v61  ;;  %v9190_v14 = vpop.f32.mrb[86].mxu1  ;;  %v9231_v33 = vpop.f32.mrb[90].mxu0  ;;  %v9230_v31 = vadd.f32 %v9229_v13, %v15524_v39 }
0x14fc   :  { %v11895_v35 = vmul.f32 -1.442695, %v9187_v36  ;;  %v9191_v43 = vpop.f32.mrb[87].mxu1  ;;  %v9232_v47 = vpop.f32.mrb[91].mxu0  ;;  %v11897_v8 = vmul.f32 -1.442695, %v9228_v16 }
0x14fd   :  { %v11896_v20 = vmul.f32 -1.442695, %v9189_v19 }
0x14fe   :  { %14336 = vpow2.f32 %v11895_v35 }
0x14ff   :  { %14338 = vpow2.f32 %v11896_v20 }
0x1500   :  { %14340 = vtanh.f32 %v9230_v31 }
0x1501   :  { %14342 = vpow2.f32 %v11897_v8 }
0x1508   :  { %v14337_v9 = vpop.eup %14336 }
0x1509   :  { %v9243_v18 = vadd.f32 1.0, %v14337_v9  ;;  %v14339_v21 = vpop.eup %14338 }
0x150a   :  { %v9244_v61 = vadd.f32 1.0, %v14339_v21  ;;  %v14341_v33 = vpop.eup %14340 }
0x150b   :  { %14344 = vrcp.f32 %v9243_v18  ;;  %v14343_v37 = vpop.eup %14342 }
0x150c   :  { %14346 = vrcp.f32 %v9244_v61  ;;  %v9245_v47 = vadd.f32 1.0, %v14343_v37  ;;  %v19920_v37 = vld [vmem:[#allocation24_spill] sm:$0xff] }
0x150e   :  { %14348 = vrcp.f32 %v9245_v47 }
0x1515   :  { %v14345_v43 = vpop.eup %14344 }
0x1516   :  { %v9254_v17 = vmul.f32 %v14345_v43, %v14341_v33  ;;  %v14347_v36 = vpop.eup %14346 }
0x1517   :  { %v9253_v20 = vmul.f32 %v14347_v36, %v18033_v30  ;;  %v19895_v30 = vld [vmem:[#allocation35_spill] sm:$0xff] }
0x1518   :  { %v14349_v39 = vpop.eup %14348 }
0x1519   :  { %v9255_v38 = vadd.f32 %v9254_v17, %v9253_v20 }
0x151b   :  { %14350 = vtanh.f32 %v9255_v38  ;;  %v14026_v38 = vld [vmem:[%s19497_s8] sm:$0xff]  }
0x1525   :  { %v14351_v60 = vpop.eup %14350 }
0x1526   :  { %v9257_v13 = vmul.f32 %v14351_v60, %v14349_v39  ;;  %v14027_v39 = vld [vmem:[%s19497_s8 + $0x80] sm:$0xff]  }
0x1528   :  { %v19268_v9 = vpack.c.bf16 %v9257_v13, %v9257_v13  ;;  %v14028_v13 = vld [vmem:[%s19497_s8 + $0x48] sm:$0xff]  }
0x152a   :  { %v19271_v8 = vrot.slane %v19268_v9, 1 }
0x152c   :  { %9683 = vmatmul.mubr.bf16.vlgmr.msra.gmra.mrb[88].mxu1 %v19271_v8  ;;  %9724 = vmatmul.mubr.bf16.vlgmr.msra.gmra.mrb[92].mxu0 %v19271_v8 }
0x152d   :  { %9789 = vmatprep.mubr.bf16.mxu1 %v18363_v58  ;;  %9830 = vmatprep.mubr.bf16.mxu0 %v18363_v58  ;;  %v19896_v58 = vld [vmem:[#allocation2_spill] sm:$0xff] }
0x152e   :  { %9758 = vmatpush1.bf16.msra.mxu1 %v18890_v26  ;;  %9799 = vmatpush1.bf16.msra.mxu0 %v18895_v57  ;;  %v19897_v26 = vld [vmem:[#allocation3_spill] sm:$0xff] }
0x152f   :  { %9759 = vmatprep.subr.bf16.mxu1 %v18902_v11  ;;  %9800 = vmatprep.subr.bf16.mxu0 %v18907_v3  ;;  %v19898_v57 = vld [vmem:[#allocation7_spill] sm:$0xff]  ;;  %v19899_v11 = vld [vmem:[#allocation16_spill] sm:$0xff]  ;;  %v19900_v3 = vld [vmem:[#allocation10_spill] sm:$0xff] }
0x1532   :  { %9760 = vmatpush1.bf16.msra.mxu1 %v18914_v0  ;;  %9801 = vmatpush1.bf16.msra.mxu0 %v18919_v7  ;;  %v19901_v0 = vld [vmem:[#allocation9_spill] sm:$0xff]  ;;  %v19902_v7 = vld [vmem:[#allocation15_spill] sm:$0xff] }
0x1533   :  { %9761 = vmatprep.subr.bf16.mxu1 %v18926_v10  ;;  %9802 = vmatprep.subr.bf16.mxu0 %v18931_v46  ;;  %v19903_v10 = vld [vmem:[#allocation38_spill] sm:$0xff]  ;;  %v19904_v46 = vld [vmem:[#allocation39_spill] sm:$0xff] }
0x1536   :  { %9762 = vmatpush1.bf16.msra.mxu1 %v18938_v22  ;;  %9803 = vmatpush1.bf16.msra.mxu0 %v18943_v49  ;;  %v19905_v22 = vld [vmem:[#allocation40_spill] sm:$0xff]  ;;  %v19906_v49 = vld [vmem:[#allocation41_spill] sm:$0xff] }
0x1537   :  { %9763 = vmatprep.subr.bf16.mxu1 %v18950_v42  ;;  %9804 = vmatprep.subr.bf16.mxu0 %v18955_v45  ;;  %v19907_v42 = vld [vmem:[#allocation42_spill] sm:$0xff]  ;;  %v19908_v45 = vld [vmem:[#allocation43_spill] sm:$0xff] }
0x153a   :  { %9764 = vmatpush1.bf16.msra.mxu1 %v18962_v5  ;;  %9805 = vmatpush1.bf16.msra.mxu0 %v18967_v6  ;;  %v19909_v5 = vld [vmem:[#allocation21_spill] sm:$0xff]  ;;  %v19910_v6 = vld [vmem:[#allocation27_spill] sm:$0xff] }
0x153b   :  { %9765 = vmatprep.subr.bf16.mxu1 %v18976_v23  ;;  %9806 = vmatprep.subr.bf16.mxu0 %v18981_v54  ;;  %v19911_v23 = vld [vmem:[#allocation25_spill] sm:$0xff]  ;;  %v19912_v54 = vld [vmem:[#allocation22_spill] sm:$0xff] }
0x153e   :  { %9766 = vmatpush1.bf16.msra.mxu1 %v18986_v12  ;;  %9807 = vmatpush1.bf16.msra.mxu0 %v18991_v51  ;;  %v19913_v12 = vld [vmem:[#allocation23_spill] sm:$0xff]  ;;  %v19914_v51 = vld [vmem:[#allocation36_spill] sm:$0xff] }
0x153f   :  { %9767 = vmatprep.subr.bf16.mxu1 %v19000_v53  ;;  %9808 = vmatprep.subr.bf16.mxu0 %v19005_v15  ;;  %v19915_v53 = vld [vmem:[#allocation32_spill] sm:$0xff]  ;;  %v14024_v15 = vld [vmem:[%s19497_s8 + $0x40] sm:$0xff]  }
0x1542   :  { %9768 = vmatpush1.bf16.msra.mxu1 %v19010_v40  ;;  %9809 = vmatpush1.bf16.msra.mxu0 %v19015_v2  ;;  %v14025_v40 = vld [vmem:[%s19497_s8 + $0xc0] sm:$0xff]  }
0x1543   :  { %9769 = vmatprep.subr.bf16.mxu1 %v19024_v1  ;;  %9810 = vmatprep.subr.bf16.mxu0 %v19029_v25  ;;  %v19916_v25 = vld [vmem:[#allocation17_spill] sm:$0xff] }
0x1546   :  { %9770 = vmatpush1.bf16.msra.mxu1 %v19034_v34  ;;  %9811 = vmatpush1.bf16.msra.mxu0 %v19039_v41 }
0x1547   :  { %9771 = vmatprep.subr.bf16.mxu1 %v19048_v48  ;;  %9812 = vmatprep.subr.bf16.mxu0 %v19053_v24  ;;  %v19917_v24 = vld [vmem:[#allocation19_spill] sm:$0xff] }
0x154a   :  { %9772 = vmatpush1.bf16.msra.mxu1 %v19058_v56  ;;  %9813 = vmatpush1.bf16.msra.mxu0 %v19063_v62 }
0x154b   :  { %9773 = vmatprep.subr.bf16.mxu1 %v19072_v29  ;;  %9814 = vmatprep.subr.bf16.mxu0 %v19077_v50 }
0x154e   :  { %9774 = vmatpush1.bf16.msra.mxu1 %v19082_v55  ;;  %9815 = vmatpush1.bf16.msra.mxu0 %v19087_v32 }
0x154f   :  { %9775 = vmatprep.subr.bf16.mxu1 %v19096_v63  ;;  %9816 = vmatprep.subr.bf16.mxu0 %v19101_v52  ;;  %v19918_v52 = vld [vmem:[#allocation18_spill] sm:$0xff] }
0x1552   :  { %9776 = vmatpush1.bf16.msra.mxu1 %v19106_v59  ;;  %9817 = vmatpush1.bf16.msra.mxu0 %v19111_v27  ;;  %v19919_v27 = vld [vmem:[#allocation20_spill] sm:$0xff] }
0x1553   :  { %9777 = vmatprep.subr.bf16.mxu1 %v19120_v28  ;;  %9818 = vmatprep.subr.bf16.mxu0 %v19125_v4 }
0x1556   :  { %9778 = vmatpush1.bf16.msra.mxu1 %v19130_v44  ;;  %9819 = vmatpush1.bf16.msra.mxu0 %v19895_v30  ;;  %v14029_v30 = vld [vmem:[%s19497_s8 + $0xc8] sm:$0xff]  }
0x1557   :  { %9779 = vmatprep.subr.bf16.mxu1 %v19896_v58  ;;  %9820 = vmatprep.subr.bf16.mxu0 %v19897_v26  ;;  %v14030_v58 = vld [vmem:[%s19497_s8 + $0x8] sm:$0xff]  }
0x1558   :  { %v14031_v26 = vld [vmem:[%s19497_s8 + $0x88] sm:$0xff]  }
0x155a   :  { %9780 = vmatpush1.bf16.msra.mxu1 %v19898_v57  ;;  %9821 = vmatpush1.bf16.msra.mxu0 %v19899_v11  ;;  %v14032_v57 = vld [vmem:[%s19497_s8 + $0x50] sm:$0xff]  }
0x155b   :  { %9781 = vmatprep.subr.bf16.mxu1 %v19900_v3  ;;  %9822 = vmatprep.subr.bf16.mxu0 %v19901_v0  ;;  %v14033_v11 = vld [vmem:[%s19497_s8 + $0xd0] sm:$0xff]   ;;  %v14036_v0 = vld [vmem:[%s19497_s8 + $0x58] sm:$0xff]  }
0x155c   :  { %v14034_v3 = vld [vmem:[%s19497_s8 + $0x10] sm:$0xff]  }
0x155e   :  { %9782 = vmatpush1.bf16.msra.mxu1 %v19902_v7  ;;  %9823 = vmatpush1.bf16.msra.mxu0 %v19903_v10  ;;  %v14037_v7 = vld [vmem:[%s19497_s8 + $0xd8] sm:$0xff]  }
0x155f   :  { %9783 = vmatprep.subr.bf16.mxu1 %v19904_v46  ;;  %9824 = vmatprep.subr.bf16.mxu0 %v19905_v22  ;;  %v14038_v10 = vld [vmem:[%s19497_s8 + $0x18] sm:$0xff]   ;;  %v14040_v22 = vld [vmem:[%s19497_s8 + $0x60] sm:$0xff]  }
0x1560   :  { %v14039_v46 = vld [vmem:[%s19497_s8 + $0x98] sm:$0xff]  }
0x1562   :  { %9784 = vmatpush1.bf16.msra.mxu1 %v19906_v49  ;;  %9825 = vmatpush1.bf16.msra.mxu0 %v19907_v42  ;;  %v14041_v49 = vld [vmem:[%s19497_s8 + $0xe0] sm:$0xff]  }
0x1563   :  { %9785 = vmatprep.subr.bf16.mxu1 %v19908_v45  ;;  %9826 = vmatprep.subr.bf16.mxu0 %v19909_v5  ;;  %v14042_v42 = vld [vmem:[%s19497_s8 + $0x20] sm:$0xff]   ;;  %v14044_v5 = vld [vmem:[%s19497_s8 + $0x68] sm:$0xff]  }
0x1564   :  { %v14043_v45 = vld [vmem:[%s19497_s8 + $0xa0] sm:$0xff]  }
0x1566   :  { %9786 = vmatpush1.bf16.msra.mxu1 %v19910_v6  ;;  %9827 = vmatpush1.bf16.msra.mxu0 %v19911_v23  ;;  %v14045_v6 = vld [vmem:[%s19497_s8 + $0xe8] sm:$0xff]  }
0x1567   :  { %9787 = vmatprep.subr.bf16.mxu1 %v19912_v54  ;;  %9828 = vmatprep.subr.bf16.mxu0 %v19913_v12  ;;  %v14046_v23 = vld [vmem:[%s19497_s8 + $0x28] sm:$0xff]   ;;  %v14048_v12 = vld [vmem:[%s19497_s8 + $0x70] sm:$0xff]  }
0x1568   :  { %v14047_v54 = vld [vmem:[%s19497_s8 + $0xa8] sm:$0xff]  }
0x156a   :  { %9788 = vmatpush1.bf16.msra.mxu1 %v19914_v51  ;;  %9829 = vmatpush1.bf16.msra.mxu0 %v19915_v53  ;;  %v14049_v51 = vld [vmem:[%s19497_s8 + $0xf0] sm:$0xff]  }
0x156b   :  { %12232 = vmatprep.subr.bf16.mxu1 %v14024_v15  ;;  %12254 = vmatprep.subr.bf16.mxu0 %v14025_v40  ;;  %v14050_v53 = vld [vmem:[%s19497_s8 + $0x30] sm:$0xff]   ;;  %v14052_v40 = vld [vmem:[%s19497_s8 + $0x78] sm:$0xff]  }
0x156c   :  { %v14051_v15 = vld [vmem:[%s19497_s8 + $0xb0] sm:$0xff]  }
0x15ff   :  { %v9684_v2 = vpop.f32.mrb[88].mxu1  ;;  %v9725_v1 = vpop.f32.mrb[92].mxu0 }
0x1600   :  { %v9685_v34 = vadd.f32 %v9684_v2, %v19916_v25  ;;  %v9686_v41 = vpop.f32.mrb[89].mxu1  ;;  %v9727_v48 = vpop.f32.mrb[93].mxu0  ;;  %v9726_v59 = vadd.f32 %v9725_v1, %v19918_v52  ;;  %v14053_v2 = vld [vmem:[%s19497_s8 + $0xf8] sm:$0xff]  }
0x1601   :  { %v9687_v56 = vadd.f32 %v9686_v41, %v19917_v24  ;;  %v9688_v62 = vpop.f32.mrb[90].mxu1  ;;  %v9729_v29 = vpop.f32.mrb[94].mxu0  ;;  %v9728_v28 = vadd.f32 %v9727_v48, %v19919_v27  ;;  %v14054_v1 = vld [vmem:[%s19497_s8 + $0x38] sm:$0xff]   ;;  %v19921_v41 = vmov 0.0   ;;  %v19922_v48 = vld [vmem:[#allocation34_spill] sm:$0xff] }
0x1602   :  { %v12026_v50 = vmul.f32 -1.442695, %v9685_v34  ;;  %v9689_v55 = vpop.f32.mrb[91].mxu1  ;;  %v9730_v32 = vpop.f32.mrb[95].mxu0  ;;  %v12028_v4 = vmul.f32 -1.442695, %v9726_v59 }
0x1603   :  { %v12027_v63 = vmul.f32 -1.442695, %v9687_v56  ;;  %v14055_v34 = vld [vmem:[%s19497_s8 + $0xb8] sm:$0xff]   ;;  %v14056_v56 = vld [vmem:[%s19497_s8 + $0x100] sm:$0xff]   ;;  %v14057_v62 = vld [vmem:[%s19497_s8 + $0x108] sm:$0xff]  }
0x1604   :  { %14352 = vpow2.f32 %v12026_v50  ;;  %v14059_v29 = vld [vmem:[%s19497_s8 + $0x118] sm:$0xff]   ;;  %v14060_v50 = vld [vmem:[%s19497_s8 + $0x120] sm:$0xff]   ;;  %v14061_v55 = vld [vmem:[%s19497_s8 + $0x128] sm:$0xff]  }
0x1605   :  { %14354 = vpow2.f32 %v12027_v63  ;;  %v14062_v32 = vld [vmem:[%s19497_s8 + $0x130] sm:$0xff]   ;;  %v14063_v63 = vld [vmem:[%s19497_s8 + $0x138] sm:$0xff]  }
0x1606   :  { %14356 = vtanh.f32 %v9728_v28 }
0x1607   :  { %14358 = vpow2.f32 %v12028_v4 }
0x160e   :  { %v14353_v44 = vpop.eup %14352 }
0x160f   :  { %v9741_v18 = vadd.f32 1.0, %v14353_v44  ;;  %v14355_v35 = vpop.eup %14354 }
0x1610   :  { %v9742_v14 = vadd.f32 1.0, %v14355_v35  ;;  %v14357_v19 = vpop.eup %14356 }
0x1611   :  { %14360 = vrcp.f32 %v9741_v18  ;;  %v14359_v16 = vpop.eup %14358 }
0x1612   :  { %14362 = vrcp.f32 %v9742_v14  ;;  %v9743_v33 = vadd.f32 1.0, %v14359_v16 }
0x1614   :  { %14364 = vrcp.f32 %v9743_v33 }
0x161b   :  { %v14361_v31 = vpop.eup %14360 }
0x161c   :  { %v9752_v21 = vmul.f32 %v14361_v31, %v14357_v19  ;;  %v14363_v61 = vpop.eup %14362 }
0x161d   :  { %v9751_v43 = vmul.f32 %v14363_v61, %v19920_v37 }
0x161e   :  { %v14365_v36 = vpop.eup %14364 }
0x161f   :  { %v9753_v17 = vadd.f32 %v9752_v21, %v9751_v43 }
0x1621   :  { %14366 = vtanh.f32 %v9753_v17 }
0x162b   :  { %v14367_v47 = vpop.eup %14366 }
0x162c   :  { %v9755_v20 = vmul.f32 %v14367_v47, %v14365_v36 }
0x162e   :  { %v9756_v60 = vpack.c.bf16 %v9755_v20, %v9755_v20 }
0x1630   :  { %9790 = vmatmul.mubr.bf16.vlgmr.msra.gmra.mrb[92].mxu1 %v9756_v60  ;;  %9831 = vmatmul.mubr.bf16.vlgmr.msra.gmra.mrb[96].mxu0 %v9756_v60 }
0x1631   :  { %12233 = vmatpush3.bf16.msra.mxu1 %v14026_v38  ;;  %12255 = vmatpush3.bf16.msra.mxu0 %v14027_v39 }
0x1632   :  { %10216 = vmatprep.mubr.bf16.mxu1 %v19268_v9  ;;  %10256 = vmatprep.mubr.bf16.mxu0 %v9756_v60  ;;  %v14035_v9 = vld [vmem:[%s19497_s8 + $0x90] sm:$0xff]  }
0x1633   :  { %12234 = vmatprep.subr.bf16.mxu1 %v14028_v13  ;;  %12256 = vmatprep.subr.bf16.mxu0 %v14029_v30  ;;  %v19923_v30 = vld [vmem:[#allocation26_spill] sm:$0xff] }
0x1635   :  { %12235 = vmatpush3.bf16.msra.mxu1 %v14030_v58  ;;  %12257 = vmatpush3.bf16.msra.mxu0 %v14031_v26 }
0x1636   :  { %12236 = vmatprep.subr.bf16.mxu1 %v14032_v57  ;;  %12258 = vmatprep.subr.bf16.mxu0 %v14033_v11 }
0x1639   :  { %12237 = vmatpush3.bf16.msra.mxu1 %v14034_v3  ;;  %12259 = vmatpush3.bf16.msra.mxu0 %v14035_v9 }
0x163a   :  { %12238 = vmatprep.subr.bf16.mxu1 %v14036_v0  ;;  %12260 = vmatprep.subr.bf16.mxu0 %v14037_v7 }
0x163d   :  { %12239 = vmatpush3.bf16.msra.mxu1 %v14038_v10  ;;  %12261 = vmatpush3.bf16.msra.mxu0 %v14039_v46 }
0x163e   :  { %12240 = vmatprep.subr.bf16.mxu1 %v14040_v22  ;;  %12262 = vmatprep.subr.bf16.mxu0 %v14041_v49  ;;  %v14387_v22 = vld [vmem:[%s19498_s9] ss:$0 sm:$0xff] }
0x1641   :  { %12241 = vmatpush3.bf16.msra.mxu1 %v14042_v42  ;;  %12263 = vmatpush3.bf16.msra.mxu0 %v14043_v45 }
0x1642   :  { %12242 = vmatprep.subr.bf16.mxu1 %v14044_v5  ;;  %12264 = vmatprep.subr.bf16.mxu0 %v14045_v6 }
0x1645   :  { %12243 = vmatpush3.bf16.msra.mxu1 %v14046_v23  ;;  %12265 = vmatpush3.bf16.msra.mxu0 %v14047_v54 }
0x1646   :  { %12244 = vmatprep.subr.bf16.mxu1 %v14048_v12  ;;  %12266 = vmatprep.subr.bf16.mxu0 %v14049_v51 }
0x1649   :  { %12245 = vmatpush3.bf16.msra.mxu1 %v14050_v53  ;;  %12267 = vmatpush3.bf16.msra.mxu0 %v14051_v15  ;;  %v19924_v15 = vld [vmem:[#allocation33_spill] sm:$0xff] }
0x164a   :  { %12246 = vmatprep.subr.bf16.mxu1 %v14052_v40  ;;  %12268 = vmatprep.subr.bf16.mxu0 %v14053_v2 }
0x164d   :  { %12247 = vmatpush3.bf16.msra.mxu1 %v14054_v1  ;;  %12269 = vmatpush3.bf16.msra.mxu0 %v14055_v34 }
0x164e   :  { %12345 = vmatprep.subr.bf16.mxu1 %v19921_v41 }
0x1650   :  { %10217 = vmatmul.mubr.bf16.vlgmr.msra.gmra.mrb[96].mxu1 %v19922_v48  ;;  %10257 = vmatmul.mubr.bf16.vlgmr.msra.gmra.mrb[100].mxu0 %v19271_v8  ;;  %v14058_v8 = vld [vmem:[%s19497_s8 + $0x110] sm:$0xff]  }
0x1651   :  { %12361 = vmatprep.mubr.msk.bf16.mxu1 %vm14390_vm3, %v19921_v41  ;;  %12346 = vmatpush3.bf16.msra.mxu1 %v14056_v56 }
0x1652   :  { %12347 = vmatprep.subr.bf16.mxu1 %v19921_v41 }
0x1655   :  { %12348 = vmatpush3.bf16.msra.mxu1 %v14057_v62 }
0x1656   :  { %12349 = vmatprep.subr.bf16.mxu1 %v19921_v41 }
0x1659   :  { %12350 = vmatpush3.bf16.msra.mxu1 %v14058_v8 }
0x165a   :  { %12351 = vmatprep.subr.bf16.mxu1 %v19921_v41 }
0x165d   :  { %12352 = vmatpush3.bf16.msra.mxu1 %v14059_v29 }
0x165e   :  { %12353 = vmatprep.subr.bf16.mxu1 %v19921_v41 }
0x1661   :  { %12354 = vmatpush3.bf16.msra.mxu1 %v14060_v50 }
0x1662   :  { %12355 = vmatprep.subr.bf16.mxu1 %v19921_v41 }
0x1665   :  { %12356 = vmatpush3.bf16.msra.mxu1 %v14061_v55 }
0x1666   :  { %12357 = vmatprep.subr.bf16.mxu1 %v19921_v41 }
0x1669   :  { %12358 = vmatpush3.bf16.msra.mxu1 %v14062_v32 }
0x166a   :  { %12359 = vmatprep.subr.bf16.mxu1 %v19921_v41 }
0x166d   :  { %12360 = vmatpush3.bf16.msra.mxu1 %v14063_v63 }
0x1703   :  { %v9791_v59 = vpop.f32.mrb[92].mxu1  ;;  %v9832_v28 = vpop.f32.mrb[96].mxu0 }
0x1704   :  { %v9792_v4 = vadd.f32 %v9791_v59, %v19916_v25  ;;  %v9793_v44 = vpop.f32.mrb[93].mxu1  ;;  %v9834_v18 = vpop.f32.mrb[97].mxu0  ;;  %v9833_v33 = vadd.f32 %v9832_v28, %v19918_v52 }
0x1705   :  { %v9794_v35 = vadd.f32 %v9793_v44, %v19917_v24  ;;  %v9795_v14 = vpop.f32.mrb[94].mxu1  ;;  %v9836_v19 = vpop.f32.mrb[98].mxu0  ;;  %v9835_v37 = vadd.f32 %v9834_v18, %v19919_v27 }
0x1706   :  { %v12029_v16 = vmul.f32 -1.442695, %v9792_v4  ;;  %v9796_v31 = vpop.f32.mrb[95].mxu1  ;;  %v9837_v21 = vpop.f32.mrb[99].mxu0  ;;  %v12031_v43 = vmul.f32 -1.442695, %v9833_v33 }
0x1707   :  { %v12030_v61 = vmul.f32 -1.442695, %v9794_v35 }
0x1708   :  { %14368 = vpow2.f32 %v12029_v16 }
0x1709   :  { %14370 = vpow2.f32 %v12030_v61 }
0x170a   :  { %14372 = vtanh.f32 %v9835_v37 }
0x170b   :  { %14374 = vpow2.f32 %v12031_v43 }
0x1712   :  { %v14369_v17 = vpop.eup %14368 }
0x1713   :  { %v9848_v36 = vadd.f32 1.0, %v14369_v17  ;;  %v14371_v25 = vpop.eup %14370 }
0x1714   :  { %v9849_v24 = vadd.f32 1.0, %v14371_v25  ;;  %v14373_v47 = vpop.eup %14372 }
0x1715   :  { %14376 = vrcp.f32 %v9848_v36  ;;  %v14375_v20 = vpop.eup %14374 }
0x1716   :  { %14378 = vrcp.f32 %v9849_v24  ;;  %v9850_v13 = vadd.f32 1.0, %v14375_v20 }
0x1718   :  { %14380 = vrcp.f32 %v9850_v13 }
0x171f   :  { %v14377_v38 = vpop.eup %14376 }
0x1720   :  { %v9859_v39 = vmul.f32 %v14377_v38, %v14373_v47  ;;  %v14379_v60 = vpop.eup %14378 }
0x1721   :  { %v9858_v58 = vmul.f32 %v14379_v60, %v19923_v30 }
0x1722   :  { %v14381_v45 = vpop.eup %14380 }
0x1723   :  { %v12248_v52 = vpop.f32.mrb[96].mxu1  ;;  %v12270_v26 = vpop.f32.mrb[100].mxu0  ;;  %v9860_v27 = vadd.f32 %v9859_v39, %v9858_v58 }
0x1724   :  { %v12249_v57 = vpop.f32.mrb[97].mxu1  ;;  %v12271_v11 = vpop.f32.mrb[101].mxu0 }
0x1725   :  { %v12250_v3 = vadd.f32 %v12249_v57, %v12248_v52  ;;  %v12272_v9 = vadd.f32 %v12271_v11, %v12270_v26  ;;  %v12251_v0 = vpop.f32.mrb[98].mxu1  ;;  %v12273_v7 = vpop.f32.mrb[102].mxu0  ;;  %14382 = vtanh.f32 %v9860_v27 }
0x1726   :  { %v12252_v10 = vpop.f32.mrb[99].mxu1  ;;  %v12274_v46 = vpop.f32.mrb[103].mxu0 }
0x1727   :  { %v10219_v49 = vadd.f32 %v14387_v22, %v12250_v3 }
0x1729   :  { %v10259_v42 = vadd.f32 %v12272_v9, %v10219_v49 }
0x172f   :  { %v14383_v5 = vpop.eup %14382 }
0x1730   :  { %v9862_v6 = vmul.f32 %v14383_v5, %v14381_v45 }
0x1732   :  { %v9863_v23 = vpack.c.bf16 %v9862_v6, %v9862_v6 }
0x1734   :  { %12362 = vmatmul.mubr.bf16.vlgmr.msra.gmra.mrb[100].mxu1 %v9863_v23 }
0x1807   :  { %v10298_v54 = vpop.f32.mrb[100].mxu1 }
0x1808   :  { %v10299_v12 = vadd.f32 %v10298_v54, %v10259_v42  ;;  %v12363_v51 = vpop.f32.mrb[101].mxu1 }
0x1809   :  { %v10301_v53 = vpop.f32.mrb[102].mxu1 }
0x180a   :  { %v10304_v40 = vadd.f32 %v10299_v12, %v19924_v15  ;;  %v12364_v2 = vpop.f32.mrb[103].mxu1 }
0x180c   :  { %12072 = vst [vmem:[%s19499_s10 + $0x6] sm:$0x3] %v10304_v40 }

</bundles_post_ra>
